<compile_context>
chip_gen: v7x
topology: tpu7x:2x2x1
jax: 0.10.0
libtpu: 0.0.40
codegen_flags: <defaults>
</compile_context>

<pallas_src>
import numpy as np
import jax
import jax.numpy as jnp
from jax import lax
from jax.experimental import pallas as pl
from jax.experimental.pallas import tpu as pltpu


# ----------------------------- generation-aware tiling -----------------------------

def _hw():
    """Best-effort hardware query: physical VMEM bytes + #TensorCores sharing the grid."""
    vmem_bytes = 64 * 1024 * 1024          # conservative default (v7x has the smallest VMEM)
    try:
        info = pltpu.get_tpu_info()
        v = getattr(info, "vmem_capacity_bytes", None)
        if v:
            vmem_bytes = int(v)
    except Exception:
        pass
    n_tc = 1
    try:
        kind = (getattr(jax.devices()[0], "device_kind", "") or "").lower()
        if ("v4" in kind) or ("v5p" in kind) or ("7" in kind):
            n_tc = 2                       # megacore / dual-TC chips: keep an even tile count
    except Exception:
        pass
    return vmem_bytes, n_tc


def _tile_vmem_bytes(tb, L, H, nin):
    """Rough per-tile VMEM footprint of the fused kernel (f32)."""
    f32 = 4
    dbuf = 2 * (3 * L + nin * L + H) * tb * f32    # double-buffered input/output tiles
    scratch = 2 * H * L * tb * f32                 # y_walk VMEM scratch (single copy)
    live = 64 * H * tb * f32                       # hoisted lane-broadcasts + gate temporaries
    return dbuf + scratch + live


def _batch_tiling(B, L, H, nin, n_tc, budget_bytes):
    """Largest lane tile (multiple of 128) that fits the VMEM budget; pad the batch to a
    multiple of n_tc tiles (even tile count only needed on dual-TensorCore chips)."""
    per_core = -(-B // n_tc)
    per_core = ((per_core + 127) // 128) * 128
    tb = 128
    for cand in (1024, 512, 256):
        if cand <= per_core and _tile_vmem_bytes(cand, L, H, nin) <= budget_bytes:
            tb = cand
            break
    per = n_tc * tb
    b_pad = ((B + per - 1) // per) * per
    return b_pad, tb


# ----------------------------- fused Pallas kernel -----------------------------
# Layout: features on sublanes, batch on the 128-lane axis.
#   u_ref   : (L, 3, TB)    rows = [sin, cos, deg]
#   xg_ref  : (L, nin, TB)  gathered node features
#   wwalk   : (6H, 5)       [w_sin_f | w_cos_f | w_sin_b | w_cos_b | folded_bias], rows
#                           gate-major & direction-interleaved: [r_f,r_b,z_f,z_b,n_f,n_b]
#   whhw    : (6H, 2H)      block-diagonal fwd (+) bwd hidden weights (same row order)
#   bnw     : (2H, 1)       n-gate b_hh of both directions [fwd; bwd]
#   wx      : (3H, nin)     main-GRU W_ih block for x
#   wy      : (3H, 2H)      main-GRU W_ih block for [y_fwd | y_bwd]
#   wmain   : (3H, 2)       [w_degree | folded_bias]
#   whhm    : (3H, H)       main-GRU W_hh
#   bnm     : (H, 1)        main-GRU n-gate b_hh
#   out     : (H, TB)       final hidden state
#   y_sc    : VMEM (L, 2H, TB) walk outputs, kept on-chip
# Gate slices below assume H % 8 == 0 (true for typical nout); otherwise the sublane
# slices at H / 2H offsets still lower correctly, just with relayout copies.

def _rum_fused_kernel(u_ref, xg_ref, wwalk_ref, whhw_ref, bnw_ref,
                      wx_ref, wy_ref, wmain_ref, whhm_ref, bnm_ref,
                      out_ref, y_sc):
    L = u_ref.shape[0]
    H, TB = out_ref.shape
    G3, G6 = 3 * H, 6 * H

    # weights & lane-broadcasts hoisted once per tile (JAX does not CSE broadcasts in loops)
    whh_w = whhw_ref[...]                                   # (6H, 2H)
    whh_m = whhm_ref[...]                                   # (3H, H)
    wx = wx_ref[...]                                        # (3H, nin)
    wy = wy_ref[...]                                        # (3H, 2H)
    wwalk = wwalk_ref[...]                                  # (6H, 5)
    wsf = jnp.broadcast_to(wwalk[:, 0:1], (G6, TB))
    wcf = jnp.broadcast_to(wwalk[:, 1:2], (G6, TB))
    wsb = jnp.broadcast_to(wwalk[:, 2:3], (G6, TB))
    wcb = jnp.broadcast_to(wwalk[:, 3:4], (G6, TB))
    bw = jnp.broadcast_to(wwalk[:, 4:5], (G6, TB))
    bnw = jnp.broadcast_to(bnw_ref[...], (2 * H, TB))
    wmain = wmain_ref[...]                                  # (3H, 2)
    wdg = jnp.broadcast_to(wmain[:, 0:1], (G3, TB))
    bm = jnp.broadcast_to(wmain[:, 1:2], (G3, TB))
    bnm = jnp.broadcast_to(bnm_ref[...], (H, TB))

    # ---- phase 1: fused bidirectional walk GRU (h0 = 0 for both directions) ----
    h2 = jnp.zeros((2 * H, TB), jnp.float32)                # [h_fwd ; h_bwd]
    for t in range(L):                                      # fully unrolled (L is small & static)
        rt = L - 1 - t                                      # backward direction time index
        u_t = u_ref[t]                                      # (3, TB)
        u_r = u_ref[rt]
        gi = (wsf * u_t[0:1] + wcf * u_t[1:2]
              + wsb * u_r[0:1] + wcb * u_r[1:2] + bw)       # (6H, TB) input projection in-kernel
        gh = jnp.dot(whh_w, h2, preferred_element_type=jnp.float32)   # one MXU dot for both dirs
        r = jax.nn.sigmoid(gi[0:2 * H] + gh[0:2 * H])
        z = jax.nn.sigmoid(gi[2 * H:4 * H] + gh[2 * H:4 * H])
        n = jnp.tanh(gi[4 * H:6 * H] + r * (gh[4 * H:6 * H] + bnw))
        h2 = n + z * (h2 - n)                               # == (1 - z) * n + z * h
        y_sc[t, 0:H, :] = h2[0:H]                           # forward output at position t
        y_sc[rt, H:2 * H, :] = h2[H:2 * H]                  # backward output at its position
    h = 0.5 * (h2[0:H] + h2[H:2 * H])                       # h.mean(0) over the two directions

    # ---- phase 2: main GRU over [x | y_walk | degree]; only the final state leaves ----
    for t in range(L):
        gi = (jnp.dot(wx, xg_ref[t], preferred_element_type=jnp.float32)
              + jnp.dot(wy, y_sc[t], preferred_element_type=jnp.float32)
              + wdg * u_ref[t][2:3] + bm)                   # (3H, TB)
        gh = jnp.dot(whh_m, h, preferred_element_type=jnp.float32)
        r = jax.nn.sigmoid(gi[0:H] + gh[0:H])
        z = jax.nn.sigmoid(gi[H:2 * H] + gh[H:2 * H])
        n = jnp.tanh(gi[2 * H:3 * H] + r * (gh[2 * H:3 * H] + bnm))
        h = n + z * (h - n)
    out_ref[...] = h


def pallas_rum_fused(u_lb, xg_lb, wwalk, whhw, bnw, wx, wy, wmain, whhm, bnm,
                     tile_b, vmem_limit):
    L, _, Bp = u_lb.shape
    nin = xg_lb.shape[1]
    H = bnm.shape[0]
    G3, G6 = 3 * H, 6 * H

    def lane(shape):
        return pl.BlockSpec(shape, lambda i, _s=shape: (0,) * (len(_s) - 1) + (i,))

    def const(shape):
        return pl.BlockSpec(shape, lambda i, _s=shape: (0,) * len(_s))

    return pl.pallas_call(
        _rum_fused_kernel,
        out_shape=jax.ShapeDtypeStruct((H, Bp), jnp.float32),
        grid_spec=pltpu.PrefetchScalarGridSpec(
            num_scalar_prefetch=0,
            grid=(Bp // tile_b,),
            in_specs=[lane((L, 3, tile_b)),       # u (sin/cos/deg)
                      lane((L, nin, tile_b)),     # gathered x
                      const((G6, 5)),             # walk projection columns + bias
                      const((G6, 2 * H)),         # walk hidden weights (block-diag)
                      const((2 * H, 1)),          # walk n-gate b_hh
                      const((G3, nin)),           # main W_x
                      const((G3, 2 * H)),         # main W_y (fwd|bwd)
                      const((G3, 2)),             # main [w_degree | bias]
                      const((G3, H)),             # main W_hh
                      const((H, 1))],             # main n-gate b_hh
            out_specs=lane((H, tile_b)),
            scratch_shapes=[pltpu.VMEM((L, 2 * H, tile_b), jnp.float32)],
        ),
        compiler_params=pltpu.CompilerParams(
            dimension_semantics=("parallel",),
            vmem_limit_bytes=int(vmem_limit)),
    )(u_lb, xg_lb, wwalk, whhw, bnw, wx, wy, wmain, whhm, bnm)


# ----------------------------- shared glue (anonymise / gather / degrees) -----------------------------

def _preprocess(x, walks, dst_degrees):
    S, E, L = walks.shape
    # anonymise_walks: index of first occurrence of each node within its walk
    eq = walks[..., :, None] == walks[..., None, :]
    uniq = jnp.argmax(eq, axis=-1)                                   # (S,E,L)
    walks_f = jnp.flip(walks, axis=-1)
    uniq_f = jnp.flip(uniq, axis=-1).astype(jnp.float32) / float(L) * (2.0 * np.pi)
    u_sin, u_cos = jnp.sin(uniq_f), jnp.cos(uniq_f)                  # (S,E,L)
    xg = x[walks_f]                                                  # (S,E,L,nin)
    deg = dst_degrees[walks_f].astype(jnp.float32)
    deg = deg / jnp.maximum(jnp.max(deg), 1e-6)                      # guard degenerate graphs
    return u_sin, u_cos, xg, deg


def _fold_bias(bih, bhh, H):
    """b_ih folded for all gates + b_hh folded for r,z; n-gate b_hh kept separate."""
    folded = bih + jnp.concatenate([bhh[:2 * H], jnp.zeros((H,), jnp.float32)])
    return folded, bhh[2 * H:]


def _interleave_dirs(a_f, a_b):
    """(3H, ...) x2 with gate-major rows [r;z;n] -> (6H, ...) rows [r_f,r_b,z_f,z_b,n_f,n_b]."""
    H = a_f.shape[0] // 3
    stacked = jnp.stack([a_f.reshape(3, H, -1), a_b.reshape(3, H, -1)], axis=1)
    return stacked.reshape(6 * H, -1)


# ----------------------------- Pallas forward path -----------------------------

def rum_layer_forward_pallas(params, x, walks, dst_degrees):
    """Eval-mode RUMLayer.forward (degrees=True, directed=False, e=None, activation=Identity)."""
    S, E, L = walks.shape
    H = params["nout"]
    nin = x.shape[-1]
    B = S * E

    vmem_bytes, n_tc = _hw()
    vmem_limit = int(min(max(vmem_bytes * 3 // 4, 32 << 20), 100 << 20))
    Bp, tile_b = _batch_tiling(B, L, H, nin, n_tc, budget_bytes=int(vmem_limit * 0.45))
    pad = Bp - B

    u_sin, u_cos, xg, deg = _preprocess(x, walks, dst_degrees)

    # flatten (S,E) -> batch, pad to the lane tiling, put batch on the last (lane) axis
    u = jnp.stack([u_sin.reshape(B, L), u_cos.reshape(B, L), deg.reshape(B, L)], axis=0)
    u_lb = jnp.pad(u, ((0, 0), (0, pad), (0, 0))).transpose(2, 0, 1)          # (L, 3, Bp)
    xg_lb = jnp.pad(xg.reshape(B, L, nin), ((0, pad), (0, 0), (0, 0))).transpose(1, 2, 0)  # (L,nin,Bp)

    # ---- rnn_walk weights: merged forward/backward, gate-major & direction-interleaved ----
    pf, pb = params["rnn_walk_fwd"], params["rnn_walk_bwd"]
    bias_f, bn_f = _fold_bias(pf["bih"], pf["bhh"], H)
    bias_b, bn_b = _fold_bias(pb["bih"], pb["bhh"], H)
    z3 = jnp.zeros((3 * H,), jnp.float32)
    wwalk_cols = jnp.concatenate([_interleave_dirs(pf["wih"][:, 0], z3),      # sin (fwd rows)
                                  _interleave_dirs(pf["wih"][:, 1], z3),      # cos (fwd rows)
                                  _interleave_dirs(z3, pb["wih"][:, 0]),      # sin (bwd rows)
                                  _interleave_dirs(z3, pb["wih"][:, 1]),      # cos (bwd rows)
                                  _interleave_dirs(bias_f, bias_b)], axis=1)  # (6H, 5)
    zhh = jnp.zeros_like(pf["whh"])
    whhw = _interleave_dirs(jnp.concatenate([pf["whh"], zhh], axis=1),
                            jnp.concatenate([zhh, pb["whh"]], axis=1))        # (6H, 2H) block-diag
    bnw = jnp.concatenate([bn_f, bn_b]).reshape(2 * H, 1)

    # ---- main GRU weights: W_ih split so no [x | y_walk | deg] concat is ever materialised ----
    pr = params["rnn"]
    w_x = pr["wih"][:, :nin]                                                  # (3H, nin)
    w_y = pr["wih"][:, nin:nin + 2 * H]                                       # (3H, 2H)
    w_dg = pr["wih"][:, nin + 2 * H:nin + 2 * H + 1]                          # (3H, 1)
    bias_m, bn_m = _fold_bias(pr["bih"], pr["bhh"], H)
    wmain_cols = jnp.concatenate([w_dg, bias_m.reshape(3 * H, 1)], axis=1)    # (3H, 2)
    bnm = bn_m.reshape(H, 1)

    h_final = pallas_rum_fused(u_lb, xg_lb, wwalk_cols, whhw, bnw,
                               w_x, w_y, wmain_cols, pr["whh"], bnm,
                               tile_b, vmem_limit)                            # (H, Bp)

    # TODO(synk): training-mode branch (Dropout mask + SelfSupervise BCE-with-logits on a random
    # subsample of the walk sequence) is not executed; eval-mode semantics -> identity / 0.0.
    self_supervise_loss = 0.0

    # activation = Identity; mean over the (num_layers=1) hidden axis; eval dropout = identity
    out = h_final[:, :B].T.reshape(S, E, H)
    return out, self_supervise_loss


# ----------------------------- pure-JAX reference path (for validation) -----------------------------

def _gru_scan(x_tm, h0, wih, whh, bih, bhh):
    H = h0.shape[-1]

    def step(h, xt):
        gi = xt @ wih.T + bih
        gh = h @ whh.T + bhh
        r = jax.nn.sigmoid(gi[:, :H] + gh[:, :H])
        z = jax.nn.sigmoid(gi[:, H:2 * H] + gh[:, H:2 * H])
        n = jnp.tanh(gi[:, 2 * H:] + r * gh[:, 2 * H:])
        hn = (1.0 - z) * n + z * h
        return hn, hn

    hN, ys = lax.scan(step, h0, x_tm)
    return ys, hN


def rum_layer_forward_ref(params, x, walks, dst_degrees):
    S, E, L = walks.shape
    H = params["nout"]
    nin = x.shape[-1]
    B = S * E
    u_sin, u_cos, xg, deg = _preprocess(x, walks, dst_degrees)

    u_tm = jnp.stack([u_sin, u_cos], axis=-1).reshape(B, L, 2).transpose(1, 0, 2)  # (L,B,2)
    h0 = jnp.zeros((B, H), jnp.float32)
    pf, pb = params["rnn_walk_fwd"], params["rnn_walk_bwd"]
    y_f, h_f = _gru_scan(u_tm, h0, pf["wih"], pf["whh"], pf["bih"], pf["bhh"])
    y_br, h_b = _gru_scan(jnp.flip(u_tm, 0), h0, pb["wih"], pb["whh"], pb["bih"], pb["bhh"])
    y_b = jnp.flip(y_br, 0)
    y_walk = jnp.concatenate([y_f, y_b], axis=-1)                         # (L,B,2H)
    h_mean = 0.5 * (h_f + h_b)

    xg_tm = xg.reshape(B, L, nin).transpose(1, 0, 2)                      # (L,B,nin)
    deg_tm = deg.reshape(B, L).transpose(1, 0)[..., None]                 # (L,B,1)
    x_cat = jnp.concatenate([xg_tm, y_walk, deg_tm], axis=-1)
    pr = params["rnn"]
    _ys, hN = _gru_scan(x_cat, h_mean, pr["wih"], pr["whh"], pr["bih"], pr["bhh"])
    return hN.reshape(S, E, H), 0.0


# ----------------------------- walker stand-in & init -----------------------------

def uniform_random_walks(key, edge_index, num_nodes, num_samples, length):
    """Stand-in for walker.uniform_random_walk: uniform walks over the undirected graph
    (+ self-loops so walks never stall).  Returns (S, E, L) int32."""
    src, dst = edge_index[0], edge_index[1]
    E = src.shape[0]
    adj = jnp.zeros((num_nodes, num_nodes), jnp.float32)
    adj = adj.at[src, dst].set(1.0)
    adj = adj.at[dst, src].set(1.0)
    adj = adj + jnp.eye(num_nodes, dtype=jnp.float32)
    logits = jnp.where(adj > 0, 0.0, -jnp.inf)
    start = jnp.broadcast_to(src[None, :], (num_samples, E))

    def step(cur, k):
        nxt = jax.random.categorical(k, logits[cur], axis=-1)
        return nxt, nxt

    keys = jax.random.split(key, length - 1)
    _, rest = lax.scan(step, start, keys)                 # (L-1, S, E)
    walks = jnp.concatenate([start[None], rest], axis=0)  # (L, S, E)
    return jnp.moveaxis(walks, 0, -1).astype(jnp.int32)   # (S, E, L)


def init_gru_dir(key, in_size, hidden):
    """PyTorch nn.GRU parameter orientation: weight (3H, In)/(3H, H), bias (3H,), gate order r|z|n."""
    k = 1.0 / np.sqrt(hidden)
    ks = jax.random.split(key, 4)
    return dict(
        wih=jax.random.uniform(ks[0], (3 * hidden, in_size), jnp.float32, -k, k),
        whh=jax.random.uniform(ks[1], (3 * hidden, hidden), jnp.float32, -k, k),
        bih=jax.random.uniform(ks[2], (3 * hidden,), jnp.float32, -k, k),
        bhh=jax.random.uniform(ks[3], (3 * hidden,), jnp.float32, -k, k),
    )


if __name__ == "__main__":
    key = jax.random.PRNGKey(0)
    N, E, S, L = 8, 16, 4, 8          # nodes, edges, num_samples, walk length
    nin, nout, n_orig = 8, 16, 4      # RUMLayer(nin, nout, original_features=n_orig, ...)

    k_graph, k_x, k_y0, k_walk, k_p = jax.random.split(key, 5)
    edge_index = jax.random.randint(k_graph, (2, E), 0, N, dtype=jnp.int32)
    x = jax.random.normal(k_x, (N, nin), jnp.float32)
    y0 = (jax.random.uniform(k_y0, (N, n_orig)) > 0.5).astype(jnp.float32)  # unused in eval mode

    walks = uniform_random_walks(k_walk, edge_index, N, S, L)               # (S, E, L)
    # walker.dst_degrees stand-in: node degree on the (undirected + self-loop) walk graph
    dst_degrees = (jnp.zeros((N,), jnp.float32)
                   .at[edge_index[0]].add(1.0)
                   .at[edge_index[1]].add(1.0) + 1.0)

    kp = jax.random.split(k_p, 4)
    params = {
        "nout": nout,
        "rnn_walk_fwd": init_gru_dir(kp[0], 2, nout),
        "rnn_walk_bwd": init_gru_dir(kp[1], 2, nout),
        "rnn": init_gru_dir(kp[2], nin + 2 * nout + 1, nout),
        # SelfSupervise fc (nin -> original_features); only used in training mode
        "ss_fc_w": jax.random.normal(kp[3], (n_orig, nin), jnp.float32) * 0.1,
    }

    out, loss = rum_layer_forward_pallas(params, x, walks, dst_degrees)
    out = jax.block_until_ready(out)
    assert out.shape == (S, E, nout)

    # validate the Pallas path against a plain lax.scan reference of the same forward
    out_ref, _ = rum_layer_forward_ref(params, x, walks, dst_degrees)
    np.testing.assert_allclose(np.asarray(out), np.asarray(out_ref), atol=2e-3, rtol=2e-3)

    print("KERNEL_OK")
</pallas_src>

<mosaic_0001>
module attributes {stable_mosaic.version = 11 : i64} {
  func.func @_rum_fused_kernel(%arg0: i32, %arg1: memref<8x3x128xf32, #tpu.memory_space<vmem>>, %arg2: memref<8x8x128xf32, #tpu.memory_space<vmem>>, %arg3: memref<96x5xf32, #tpu.memory_space<vmem>>, %arg4: memref<96x32xf32, #tpu.memory_space<vmem>>, %arg5: memref<32x1xf32, #tpu.memory_space<vmem>>, %arg6: memref<48x8xf32, #tpu.memory_space<vmem>>, %arg7: memref<48x32xf32, #tpu.memory_space<vmem>>, %arg8: memref<48x2xf32, #tpu.memory_space<vmem>>, %arg9: memref<48x16xf32, #tpu.memory_space<vmem>>, %arg10: memref<16x1xf32, #tpu.memory_space<vmem>>, %arg11: memref<16x128xf32, #tpu.memory_space<vmem>>, %arg12: memref<8x32x128xf32, #tpu.memory_space<vmem>>) attributes {dimension_semantics = [#tpu.dimension_semantics<parallel>], iteration_bounds = array<i64: 1>, scalar_prefetch = 0 : i64, scratch_operands = 1 : i64, tpu.core_type = #tpu.core_type<tc>, window_params = [{transform_indices = @transform_0, window_bounds = array<i64: 8, 3, 128>}, {transform_indices = @transform_1, window_bounds = array<i64: 8, 8, 128>}, {pipeline_mode = #tpu.pipeline_mode<synchronous>, transform_indices = @transform_2, window_bounds = array<i64: 96, 5>}, {pipeline_mode = #tpu.pipeline_mode<synchronous>, transform_indices = @transform_3, window_bounds = array<i64: 96, 32>}, {pipeline_mode = #tpu.pipeline_mode<synchronous>, transform_indices = @transform_4, window_bounds = array<i64: 32, 1>}, {pipeline_mode = #tpu.pipeline_mode<synchronous>, transform_indices = @transform_5, window_bounds = array<i64: 48, 8>}, {pipeline_mode = #tpu.pipeline_mode<synchronous>, transform_indices = @transform_6, window_bounds = array<i64: 48, 32>}, {pipeline_mode = #tpu.pipeline_mode<synchronous>, transform_indices = @transform_7, window_bounds = array<i64: 48, 2>}, {pipeline_mode = #tpu.pipeline_mode<synchronous>, transform_indices = @transform_8, window_bounds = array<i64: 48, 16>}, {pipeline_mode = #tpu.pipeline_mode<synchronous>, transform_indices = @transform_9, window_bounds = array<i64: 16, 1>}, {transform_indices = @transform_10, window_bounds = array<i64: 16, 128>}]} {
    %c0 = arith.constant 0 : index
    %c0_0 = arith.constant 0 : index
    %0 = vector.load %arg4[%c0, %c0_0] : memref<96x32xf32, #tpu.memory_space<vmem>>, vector<96x32xf32>
    %c0_1 = arith.constant 0 : index
    %c0_2 = arith.constant 0 : index
    %1 = vector.load %arg9[%c0_1, %c0_2] : memref<48x16xf32, #tpu.memory_space<vmem>>, vector<48x16xf32>
    %c0_3 = arith.constant 0 : index
    %c0_4 = arith.constant 0 : index
    %2 = vector.load %arg6[%c0_3, %c0_4] : memref<48x8xf32, #tpu.memory_space<vmem>>, vector<48x8xf32>
    %c0_5 = arith.constant 0 : index
    %c0_6 = arith.constant 0 : index
    %3 = vector.load %arg7[%c0_5, %c0_6] : memref<48x32xf32, #tpu.memory_space<vmem>>, vector<48x32xf32>
    %c0_7 = arith.constant 0 : index
    %c0_8 = arith.constant 0 : index
    %4 = vector.load %arg3[%c0_7, %c0_8] : memref<96x5xf32, #tpu.memory_space<vmem>>, vector<96x5xf32>
    %5 = vector.extract_strided_slice %4 {offsets = [0, 0], sizes = [96, 1], strides = [1, 1]} : vector<96x5xf32> to vector<96x1xf32>
    %6 = vector.shape_cast %5 : vector<96x1xf32> to vector<96x1xf32>
    %7 = vector.broadcast %6 : vector<96x1xf32> to vector<96x128xf32>
    %8 = vector.extract_strided_slice %4 {offsets = [0, 1], sizes = [96, 1], strides = [1, 1]} : vector<96x5xf32> to vector<96x1xf32>
    %9 = vector.shape_cast %8 : vector<96x1xf32> to vector<96x1xf32>
    %10 = vector.broadcast %9 : vector<96x1xf32> to vector<96x128xf32>
    %11 = vector.extract_strided_slice %4 {offsets = [0, 2], sizes = [96, 1], strides = [1, 1]} : vector<96x5xf32> to vector<96x1xf32>
    %12 = vector.shape_cast %11 : vector<96x1xf32> to vector<96x1xf32>
    %13 = vector.broadcast %12 : vector<96x1xf32> to vector<96x128xf32>
    %14 = vector.extract_strided_slice %4 {offsets = [0, 3], sizes = [96, 1], strides = [1, 1]} : vector<96x5xf32> to vector<96x1xf32>
    %15 = vector.shape_cast %14 : vector<96x1xf32> to vector<96x1xf32>
    %16 = vector.broadcast %15 : vector<96x1xf32> to vector<96x128xf32>
    %17 = vector.extract_strided_slice %4 {offsets = [0, 4], sizes = [96, 1], strides = [1, 1]} : vector<96x5xf32> to vector<96x1xf32>
    %18 = vector.shape_cast %17 : vector<96x1xf32> to vector<96x1xf32>
    %19 = vector.broadcast %18 : vector<96x1xf32> to vector<96x128xf32>
    %c0_9 = arith.constant 0 : index
    %c0_10 = arith.constant 0 : index
    %20 = vector.load %arg5[%c0_9, %c0_10] : memref<32x1xf32, #tpu.memory_space<vmem>>, vector<32x1xf32>
    %21 = vector.shape_cast %20 : vector<32x1xf32> to vector<32x1xf32>
    %22 = vector.broadcast %21 : vector<32x1xf32> to vector<32x128xf32>
    %c0_11 = arith.constant 0 : index
    %c0_12 = arith.constant 0 : index
    %23 = vector.load %arg8[%c0_11, %c0_12] : memref<48x2xf32, #tpu.memory_space<vmem>>, vector<48x2xf32>
    %24 = vector.extract_strided_slice %23 {offsets = [0, 0], sizes = [48, 1], strides = [1, 1]} : vector<48x2xf32> to vector<48x1xf32>
    %25 = vector.shape_cast %24 : vector<48x1xf32> to vector<48x1xf32>
    %26 = vector.broadcast %25 : vector<48x1xf32> to vector<48x128xf32>
    %27 = vector.extract_strided_slice %23 {offsets = [0, 1], sizes = [48, 1], strides = [1, 1]} : vector<48x2xf32> to vector<48x1xf32>
    %28 = vector.shape_cast %27 : vector<48x1xf32> to vector<48x1xf32>
    %29 = vector.broadcast %28 : vector<48x1xf32> to vector<48x128xf32>
    %c0_13 = arith.constant 0 : index
    %c0_14 = arith.constant 0 : index
    %30 = vector.load %arg10[%c0_13, %c0_14] : memref<16x1xf32, #tpu.memory_space<vmem>>, vector<16x1xf32>
    %31 = vector.shape_cast %30 : vector<16x1xf32> to vector<16x1xf32>
    %32 = vector.broadcast %31 : vector<16x1xf32> to vector<16x128xf32>
    %cst = arith.constant 0.000000e+00 : f32
    %33 = vector.broadcast %cst : f32 to vector<32x128xf32>
    %c0_15 = arith.constant 0 : index
    %c0_16 = arith.constant 0 : index
    %c0_17 = arith.constant 0 : index
    %34 = vector.load %arg1[%c0_15, %c0_16, %c0_17] : memref<8x3x128xf32, #tpu.memory_space<vmem>>, vector<1x3x128xf32>
    %35 = vector.shape_cast %34 : vector<1x3x128xf32> to vector<3x128xf32>
    %c7 = arith.constant 7 : index
    %c0_18 = arith.constant 0 : index
    %c0_19 = arith.constant 0 : index
    %36 = vector.load %arg1[%c7, %c0_18, %c0_19] : memref<8x3x128xf32, #tpu.memory_space<vmem>>, vector<1x3x128xf32>
    %37 = vector.shape_cast %36 : vector<1x3x128xf32> to vector<3x128xf32>
    %38 = vector.extract_strided_slice %35 {offsets = [0, 0], sizes = [1, 128], strides = [1, 1]} : vector<3x128xf32> to vector<1x128xf32>
    %39 = vector.broadcast %38 : vector<1x128xf32> to vector<96x128xf32>
    %40 = arith.mulf %7, %39 : vector<96x128xf32>
    %41 = vector.extract_strided_slice %35 {offsets = [1, 0], sizes = [1, 128], strides = [1, 1]} : vector<3x128xf32> to vector<1x128xf32>
    %42 = vector.broadcast %41 : vector<1x128xf32> to vector<96x128xf32>
    %43 = arith.mulf %10, %42 : vector<96x128xf32>
    %44 = arith.addf %40, %43 : vector<96x128xf32>
    %45 = vector.extract_strided_slice %37 {offsets = [0, 0], sizes = [1, 128], strides = [1, 1]} : vector<3x128xf32> to vector<1x128xf32>
    %46 = vector.broadcast %45 : vector<1x128xf32> to vector<96x128xf32>
    %47 = arith.mulf %13, %46 : vector<96x128xf32>
    %48 = arith.addf %44, %47 : vector<96x128xf32>
    %49 = vector.extract_strided_slice %37 {offsets = [1, 0], sizes = [1, 128], strides = [1, 1]} : vector<3x128xf32> to vector<1x128xf32>
    %50 = vector.broadcast %49 : vector<1x128xf32> to vector<96x128xf32>
    %51 = arith.mulf %16, %50 : vector<96x128xf32>
    %52 = arith.addf %48, %51 : vector<96x128xf32>
    %53 = arith.addf %52, %19 : vector<96x128xf32>
    %cst_20 = arith.constant dense<0.000000e+00> : vector<96x128xf32>
    %54 = tpu.matmul %0, %33, %cst_20 {dimension_numbers = #tpu.dot_dimension_numbers<[1], [0], [0], [1], [0, 0, 1, 1], [], []>} : vector<96x32xf32>, vector<32x128xf32>, vector<96x128xf32> -> vector<96x128xf32>
    %55 = vector.extract_strided_slice %53 {offsets = [0, 0], sizes = [32, 128], strides = [1, 1]} : vector<96x128xf32> to vector<32x128xf32>
    %56 = vector.extract_strided_slice %54 {offsets = [0, 0], sizes = [32, 128], strides = [1, 1]} : vector<96x128xf32> to vector<32x128xf32>
    %57 = arith.addf %55, %56 : vector<32x128xf32>
    %58 = arith.negf %57 : vector<32x128xf32>
    %59 = math.exp %58 : vector<32x128xf32>
    %cst_21 = arith.constant 1.000000e+00 : f32
    %60 = vector.broadcast %cst_21 : f32 to vector<32x128xf32>
    %61 = arith.addf %60, %59 : vector<32x128xf32>
    %62 = arith.divf %60, %61 : vector<32x128xf32>
    %63 = vector.extract_strided_slice %53 {offsets = [32, 0], sizes = [32, 128], strides = [1, 1]} : vector<96x128xf32> to vector<32x128xf32>
    %64 = vector.extract_strided_slice %54 {offsets = [32, 0], sizes = [32, 128], strides = [1, 1]} : vector<96x128xf32> to vector<32x128xf32>
    %65 = arith.addf %63, %64 : vector<32x128xf32>
    %66 = arith.negf %65 : vector<32x128xf32>
    %67 = math.exp %66 : vector<32x128xf32>
    %cst_22 = arith.constant 1.000000e+00 : f32
    %68 = vector.broadcast %cst_22 : f32 to vector<32x128xf32>
    %69 = arith.addf %68, %67 : vector<32x128xf32>
    %70 = arith.divf %68, %69 : vector<32x128xf32>
    %71 = vector.extract_strided_slice %53 {offsets = [64, 0], sizes = [32, 128], strides = [1, 1]} : vector<96x128xf32> to vector<32x128xf32>
    %72 = vector.extract_strided_slice %54 {offsets = [64, 0], sizes = [32, 128], strides = [1, 1]} : vector<96x128xf32> to vector<32x128xf32>
    %73 = arith.addf %72, %22 : vector<32x128xf32>
    %74 = arith.mulf %62, %73 : vector<32x128xf32>
    %75 = arith.addf %71, %74 : vector<32x128xf32>
    %76 = math.tanh %75 : vector<32x128xf32>
    %77 = arith.subf %33, %76 : vector<32x128xf32>
    %78 = arith.mulf %70, %77 : vector<32x128xf32>
    %79 = arith.addf %76, %78 : vector<32x128xf32>
    %80 = vector.extract_strided_slice %79 {offsets = [0, 0], sizes = [16, 128], strides = [1, 1]} : vector<32x128xf32> to vector<16x128xf32>
    %c0_23 = arith.constant 0 : index
    %c0_24 = arith.constant 0 : index
    %c0_25 = arith.constant 0 : index
    %81 = vector.load %arg12[%c0_23, %c0_24, %c0_25] : memref<8x32x128xf32, #tpu.memory_space<vmem>>, vector<1x16x128xf32>
    %82 = vector.shape_cast %81 : vector<1x16x128xf32> to vector<16x128xf32>
    %83 = vector.shape_cast %80 : vector<16x128xf32> to vector<1x16x128xf32>
    tpu.vector_store %arg12[%c0_23, %c0_24, %c0_25], %83 {strides = array<i32>} : memref<8x32x128xf32, #tpu.memory_space<vmem>>, vector<1x16x128xf32>,
    %84 = vector.extract_strided_slice %79 {offsets = [16, 0], sizes = [16, 128], strides = [1, 1]} : vector<32x128xf32> to vector<16x128xf32>
    %c7_26 = arith.constant 7 : index
    %c16 = arith.constant 16 : index
    %c0_27 = arith.constant 0 : index
    %85 = vector.load %arg12[%c7_26, %c16, %c0_27] : memref<8x32x128xf32, #tpu.memory_space<vmem>>, vector<1x16x128xf32>
    %86 = vector.shape_cast %85 : vector<1x16x128xf32> to vector<16x128xf32>
    %87 = vector.shape_cast %84 : vector<16x128xf32> to vector<1x16x128xf32>
    tpu.vector_store %arg12[%c7_26, %c16, %c0_27], %87 {strides = array<i32>} : memref<8x32x128xf32, #tpu.memory_space<vmem>>, vector<1x16x128xf32>,
    %c1 = arith.constant 1 : index
    %c0_28 = arith.constant 0 : index
    %c0_29 = arith.constant 0 : index
    %88 = vector.load %arg1[%c1, %c0_28, %c0_29] : memref<8x3x128xf32, #tpu.memory_space<vmem>>, vector<1x3x128xf32>
    %89 = vector.shape_cast %88 : vector<1x3x128xf32> to vector<3x128xf32>
    %c6 = arith.constant 6 : index
    %c0_30 = arith.constant 0 : index
    %c0_31 = arith.constant 0 : index
    %90 = vector.load %arg1[%c6, %c0_30, %c0_31] : memref<8x3x128xf32, #tpu.memory_space<vmem>>, vector<1x3x128xf32>
    %91 = vector.shape_cast %90 : vector<1x3x128xf32> to vector<3x128xf32>
    %92 = vector.extract_strided_slice %89 {offsets = [0, 0], sizes = [1, 128], strides = [1, 1]} : vector<3x128xf32> to vector<1x128xf32>
    %93 = vector.broadcast %92 : vector<1x128xf32> to vector<96x128xf32>
    %94 = arith.mulf %7, %93 : vector<96x128xf32>
    %95 = vector.extract_strided_slice %89 {offsets = [1, 0], sizes = [1, 128], strides = [1, 1]} : vector<3x128xf32> to vector<1x128xf32>
    %96 = vector.broadcast %95 : vector<1x128xf32> to vector<96x128xf32>
    %97 = arith.mulf %10, %96 : vector<96x128xf32>
    %98 = arith.addf %94, %97 : vector<96x128xf32>
    %99 = vector.extract_strided_slice %91 {offsets = [0, 0], sizes = [1, 128], strides = [1, 1]} : vector<3x128xf32> to vector<1x128xf32>
    %100 = vector.broadcast %99 : vector<1x128xf32> to vector<96x128xf32>
    %101 = arith.mulf %13, %100 : vector<96x128xf32>
    %102 = arith.addf %98, %101 : vector<96x128xf32>
    %103 = vector.extract_strided_slice %91 {offsets = [1, 0], sizes = [1, 128], strides = [1, 1]} : vector<3x128xf32> to vector<1x128xf32>
    %104 = vector.broadcast %103 : vector<1x128xf32> to vector<96x128xf32>
    %105 = arith.mulf %16, %104 : vector<96x128xf32>
    %106 = arith.addf %102, %105 : vector<96x128xf32>
    %107 = arith.addf %106, %19 : vector<96x128xf32>
    %cst_32 = arith.constant dense<0.000000e+00> : vector<96x128xf32>
    %108 = tpu.matmul %0, %79, %cst_32 {dimension_numbers = #tpu.dot_dimension_numbers<[1], [0], [0], [1], [0, 0, 1, 1], [], []>} : vector<96x32xf32>, vector<32x128xf32>, vector<96x128xf32> -> vector<96x128xf32>
    %109 = vector.extract_strided_slice %107 {offsets = [0, 0], sizes = [32, 128], strides = [1, 1]} : vector<96x128xf32> to vector<32x128xf32>
    %110 = vector.extract_strided_slice %108 {offsets = [0, 0], sizes = [32, 128], strides = [1, 1]} : vector<96x128xf32> to vector<32x128xf32>
    %111 = arith.addf %109, %110 : vector<32x128xf32>
    %112 = arith.negf %111 : vector<32x128xf32>
    %113 = math.exp %112 : vector<32x128xf32>
    %cst_33 = arith.constant 1.000000e+00 : f32
    %114 = vector.broadcast %cst_33 : f32 to vector<32x128xf32>
    %115 = arith.addf %114, %113 : vector<32x128xf32>
    %116 = arith.divf %114, %115 : vector<32x128xf32>
    %117 = vector.extract_strided_slice %107 {offsets = [32, 0], sizes = [32, 128], strides = [1, 1]} : vector<96x128xf32> to vector<32x128xf32>
    %118 = vector.extract_strided_slice %108 {offsets = [32, 0], sizes = [32, 128], strides = [1, 1]} : vector<96x128xf32> to vector<32x128xf32>
    %119 = arith.addf %117, %118 : vector<32x128xf32>
    %120 = arith.negf %119 : vector<32x128xf32>
    %121 = math.exp %120 : vector<32x128xf32>
    %cst_34 = arith.constant 1.000000e+00 : f32
    %122 = vector.broadcast %cst_34 : f32 to vector<32x128xf32>
    %123 = arith.addf %122, %121 : vector<32x128xf32>
    %124 = arith.divf %122, %123 : vector<32x128xf32>
    %125 = vector.extract_strided_slice %107 {offsets = [64, 0], sizes = [32, 128], strides = [1, 1]} : vector<96x128xf32> to vector<32x128xf32>
    %126 = vector.extract_strided_slice %108 {offsets = [64, 0], sizes = [32, 128], strides = [1, 1]} : vector<96x128xf32> to vector<32x128xf32>
    %127 = arith.addf %126, %22 : vector<32x128xf32>
    %128 = arith.mulf %116, %127 : vector<32x128xf32>
    %129 = arith.addf %125, %128 : vector<32x128xf32>
    %130 = math.tanh %129 : vector<32x128xf32>
    %131 = arith.subf %79, %130 : vector<32x128xf32>
    %132 = arith.mulf %124, %131 : vector<32x128xf32>
    %133 = arith.addf %130, %132 : vector<32x128xf32>
    %134 = vector.extract_strided_slice %133 {offsets = [0, 0], sizes = [16, 128], strides = [1, 1]} : vector<32x128xf32> to vector<16x128xf32>
    %c1_35 = arith.constant 1 : index
    %c0_36 = arith.constant 0 : index
    %c0_37 = arith.constant 0 : index
    %135 = vector.load %arg12[%c1_35, %c0_36, %c0_37] : memref<8x32x128xf32, #tpu.memory_space<vmem>>, vector<1x16x128xf32>
    %136 = vector.shape_cast %135 : vector<1x16x128xf32> to vector<16x128xf32>
    %137 = vector.shape_cast %134 : vector<16x128xf32> to vector<1x16x128xf32>
    tpu.vector_store %arg12[%c1_35, %c0_36, %c0_37], %137 {strides = array<i32>} : memref<8x32x128xf32, #tpu.memory_space<vmem>>, vector<1x16x128xf32>,
    %138 = vector.extract_strided_slice %133 {offsets = [16, 0], sizes = [16, 128], strides = [1, 1]} : vector<32x128xf32> to vector<16x128xf32>
    %c6_38 = arith.constant 6 : index
    %c16_39 = arith.constant 16 : index
    %c0_40 = arith.constant 0 : index
    %139 = vector.load %arg12[%c6_38, %c16_39, %c0_40] : memref<8x32x128xf32, #tpu.memory_space<vmem>>, vector<1x16x128xf32>
    %140 = vector.shape_cast %139 : vector<1x16x128xf32> to vector<16x128xf32>
    %141 = vector.shape_cast %138 : vector<16x128xf32> to vector<1x16x128xf32>
    tpu.vector_store %arg12[%c6_38, %c16_39, %c0_40], %141 {strides = array<i32>} : memref<8x32x128xf32, #tpu.memory_space<vmem>>, vector<1x16x128xf32>,
    %c2 = arith.constant 2 : index
    %c0_41 = arith.constant 0 : index
    %c0_42 = arith.constant 0 : index
    %142 = vector.load %arg1[%c2, %c0_41, %c0_42] : memref<8x3x128xf32, #tpu.memory_space<vmem>>, vector<1x3x128xf32>
    %143 = vector.shape_cast %142 : vector<1x3x128xf32> to vector<3x128xf32>
    %c5 = arith.constant 5 : index
    %c0_43 = arith.constant 0 : index
    %c0_44 = arith.constant 0 : index
    %144 = vector.load %arg1[%c5, %c0_43, %c0_44] : memref<8x3x128xf32, #tpu.memory_space<vmem>>, vector<1x3x128xf32>
    %145 = vector.shape_cast %144 : vector<1x3x128xf32> to vector<3x128xf32>
    %146 = vector.extract_strided_slice %143 {offsets = [0, 0], sizes = [1, 128], strides = [1, 1]} : vector<3x128xf32> to vector<1x128xf32>
    %147 = vector.broadcast %146 : vector<1x128xf32> to vector<96x128xf32>
    %148 = arith.mulf %7, %147 : vector<96x128xf32>
    %149 = vector.extract_strided_slice %143 {offsets = [1, 0], sizes = [1, 128], strides = [1, 1]} : vector<3x128xf32> to vector<1x128xf32>
    %150 = vector.broadcast %149 : vector<1x128xf32> to vector<96x128xf32>
    %151 = arith.mulf %10, %150 : vector<96x128xf32>
    %152 = arith.addf %148, %151 : vector<96x128xf32>
    %153 = vector.extract_strided_slice %145 {offsets = [0, 0], sizes = [1, 128], strides = [1, 1]} : vector<3x128xf32> to vector<1x128xf32>
    %154 = vector.broadcast %153 : vector<1x128xf32> to vector<96x128xf32>
    %155 = arith.mulf %13, %154 : vector<96x128xf32>
    %156 = arith.addf %152, %155 : vector<96x128xf32>
    %157 = vector.extract_strided_slice %145 {offsets = [1, 0], sizes = [1, 128], strides = [1, 1]} : vector<3x128xf32> to vector<1x128xf32>
    %158 = vector.broadcast %157 : vector<1x128xf32> to vector<96x128xf32>
    %159 = arith.mulf %16, %158 : vector<96x128xf32>
    %160 = arith.addf %156, %159 : vector<96x128xf32>
    %161 = arith.addf %160, %19 : vector<96x128xf32>
    %cst_45 = arith.constant dense<0.000000e+00> : vector<96x128xf32>
    %162 = tpu.matmul %0, %133, %cst_45 {dimension_numbers = #tpu.dot_dimension_numbers<[1], [0], [0], [1], [0, 0, 1, 1], [], []>} : vector<96x32xf32>, vector<32x128xf32>, vector<96x128xf32> -> vector<96x128xf32>
    %163 = vector.extract_strided_slice %161 {offsets = [0, 0], sizes = [32, 128], strides = [1, 1]} : vector<96x128xf32> to vector<32x128xf32>
    %164 = vector.extract_strided_slice %162 {offsets = [0, 0], sizes = [32, 128], strides = [1, 1]} : vector<96x128xf32> to vector<32x128xf32>
    %165 = arith.addf %163, %164 : vector<32x128xf32>
    %166 = arith.negf %165 : vector<32x128xf32>
    %167 = math.exp %166 : vector<32x128xf32>
    %cst_46 = arith.constant 1.000000e+00 : f32
    %168 = vector.broadcast %cst_46 : f32 to vector<32x128xf32>
    %169 = arith.addf %168, %167 : vector<32x128xf32>
    %170 = arith.divf %168, %169 : vector<32x128xf32>
    %171 = vector.extract_strided_slice %161 {offsets = [32, 0], sizes = [32, 128], strides = [1, 1]} : vector<96x128xf32> to vector<32x128xf32>
    %172 = vector.extract_strided_slice %162 {offsets = [32, 0], sizes = [32, 128], strides = [1, 1]} : vector<96x128xf32> to vector<32x128xf32>
    %173 = arith.addf %171, %172 : vector<32x128xf32>
    %174 = arith.negf %173 : vector<32x128xf32>
    %175 = math.exp %174 : vector<32x128xf32>
    %cst_47 = arith.constant 1.000000e+00 : f32
    %176 = vector.broadcast %cst_47 : f32 to vector<32x128xf32>
    %177 = arith.addf %176, %175 : vector<32x128xf32>
    %178 = arith.divf %176, %177 : vector<32x128xf32>
    %179 = vector.extract_strided_slice %161 {offsets = [64, 0], sizes = [32, 128], strides = [1, 1]} : vector<96x128xf32> to vector<32x128xf32>
    %180 = vector.extract_strided_slice %162 {offsets = [64, 0], sizes = [32, 128], strides = [1, 1]} : vector<96x128xf32> to vector<32x128xf32>
    %181 = arith.addf %180, %22 : vector<32x128xf32>
    %182 = arith.mulf %170, %181 : vector<32x128xf32>
    %183 = arith.addf %179, %182 : vector<32x128xf32>
    %184 = math.tanh %183 : vector<32x128xf32>
    %185 = arith.subf %133, %184 : vector<32x128xf32>
    %186 = arith.mulf %178, %185 : vector<32x128xf32>
    %187 = arith.addf %184, %186 : vector<32x128xf32>
    %188 = vector.extract_strided_slice %187 {offsets = [0, 0], sizes = [16, 128], strides = [1, 1]} : vector<32x128xf32> to vector<16x128xf32>
    %c2_48 = arith.constant 2 : index
    %c0_49 = arith.constant 0 : index
    %c0_50 = arith.constant 0 : index
    %189 = vector.load %arg12[%c2_48, %c0_49, %c0_50] : memref<8x32x128xf32, #tpu.memory_space<vmem>>, vector<1x16x128xf32>
    %190 = vector.shape_cast %189 : vector<1x16x128xf32> to vector<16x128xf32>
    %191 = vector.shape_cast %188 : vector<16x128xf32> to vector<1x16x128xf32>
    tpu.vector_store %arg12[%c2_48, %c0_49, %c0_50], %191 {strides = array<i32>} : memref<8x32x128xf32, #tpu.memory_space<vmem>>, vector<1x16x128xf32>,
    %192 = vector.extract_strided_slice %187 {offsets = [16, 0], sizes = [16, 128], strides = [1, 1]} : vector<32x128xf32> to vector<16x128xf32>
    %c5_51 = arith.constant 5 : index
    %c16_52 = arith.constant 16 : index
    %c0_53 = arith.constant 0 : index
    %193 = vector.load %arg12[%c5_51, %c16_52, %c0_53] : memref<8x32x128xf32, #tpu.memory_space<vmem>>, vector<1x16x128xf32>
    %194 = vector.shape_cast %193 : vector<1x16x128xf32> to vector<16x128xf32>
    %195 = vector.shape_cast %192 : vector<16x128xf32> to vector<1x16x128xf32>
    tpu.vector_store %arg12[%c5_51, %c16_52, %c0_53], %195 {strides = array<i32>} : memref<8x32x128xf32, #tpu.memory_space<vmem>>, vector<1x16x128xf32>,
    %c3 = arith.constant 3 : index
    %c0_54 = arith.constant 0 : index
    %c0_55 = arith.constant 0 : index
    %196 = vector.load %arg1[%c3, %c0_54, %c0_55] : memref<8x3x128xf32, #tpu.memory_space<vmem>>, vector<1x3x128xf32>
    %197 = vector.shape_cast %196 : vector<1x3x128xf32> to vector<3x128xf32>
    %c4 = arith.constant 4 : index
    %c0_56 = arith.constant 0 : index
    %c0_57 = arith.constant 0 : index
    %198 = vector.load %arg1[%c4, %c0_56, %c0_57] : memref<8x3x128xf32, #tpu.memory_space<vmem>>, vector<1x3x128xf32>
    %199 = vector.shape_cast %198 : vector<1x3x128xf32> to vector<3x128xf32>
    %200 = vector.extract_strided_slice %197 {offsets = [0, 0], sizes = [1, 128], strides = [1, 1]} : vector<3x128xf32> to vector<1x128xf32>
    %201 = vector.broadcast %200 : vector<1x128xf32> to vector<96x128xf32>
    %202 = arith.mulf %7, %201 : vector<96x128xf32>
    %203 = vector.extract_strided_slice %197 {offsets = [1, 0], sizes = [1, 128], strides = [1, 1]} : vector<3x128xf32> to vector<1x128xf32>
    %204 = vector.broadcast %203 : vector<1x128xf32> to vector<96x128xf32>
    %205 = arith.mulf %10, %204 : vector<96x128xf32>
    %206 = arith.addf %202, %205 : vector<96x128xf32>
    %207 = vector.extract_strided_slice %199 {offsets = [0, 0], sizes = [1, 128], strides = [1, 1]} : vector<3x128xf32> to vector<1x128xf32>
    %208 = vector.broadcast %207 : vector<1x128xf32> to vector<96x128xf32>
    %209 = arith.mulf %13, %208 : vector<96x128xf32>
    %210 = arith.addf %206, %209 : vector<96x128xf32>
    %211 = vector.extract_strided_slice %199 {offsets = [1, 0], sizes = [1, 128], strides = [1, 1]} : vector<3x128xf32> to vector<1x128xf32>
    %212 = vector.broadcast %211 : vector<1x128xf32> to vector<96x128xf32>
    %213 = arith.mulf %16, %212 : vector<96x128xf32>
    %214 = arith.addf %210, %213 : vector<96x128xf32>
    %215 = arith.addf %214, %19 : vector<96x128xf32>
    %cst_58 = arith.constant dense<0.000000e+00> : vector<96x128xf32>
    %216 = tpu.matmul %0, %187, %cst_58 {dimension_numbers = #tpu.dot_dimension_numbers<[1], [0], [0], [1], [0, 0, 1, 1], [], []>} : vector<96x32xf32>, vector<32x128xf32>, vector<96x128xf32> -> vector<96x128xf32>
    %217 = vector.extract_strided_slice %215 {offsets = [0, 0], sizes = [32, 128], strides = [1, 1]} : vector<96x128xf32> to vector<32x128xf32>
    %218 = vector.extract_strided_slice %216 {offsets = [0, 0], sizes = [32, 128], strides = [1, 1]} : vector<96x128xf32> to vector<32x128xf32>
    %219 = arith.addf %217, %218 : vector<32x128xf32>
    %220 = arith.negf %219 : vector<32x128xf32>
    %221 = math.exp %220 : vector<32x128xf32>
    %cst_59 = arith.constant 1.000000e+00 : f32
    %222 = vector.broadcast %cst_59 : f32 to vector<32x128xf32>
    %223 = arith.addf %222, %221 : vector<32x128xf32>
    %224 = arith.divf %222, %223 : vector<32x128xf32>
    %225 = vector.extract_strided_slice %215 {offsets = [32, 0], sizes = [32, 128], strides = [1, 1]} : vector<96x128xf32> to vector<32x128xf32>
    %226 = vector.extract_strided_slice %216 {offsets = [32, 0], sizes = [32, 128], strides = [1, 1]} : vector<96x128xf32> to vector<32x128xf32>
    %227 = arith.addf %225, %226 : vector<32x128xf32>
    %228 = arith.negf %227 : vector<32x128xf32>
    %229 = math.exp %228 : vector<32x128xf32>
    %cst_60 = arith.constant 1.000000e+00 : f32
    %230 = vector.broadcast %cst_60 : f32 to vector<32x128xf32>
    %231 = arith.addf %230, %229 : vector<32x128xf32>
    %232 = arith.divf %230, %231 : vector<32x128xf32>
    %233 = vector.extract_strided_slice %215 {offsets = [64, 0], sizes = [32, 128], strides = [1, 1]} : vector<96x128xf32> to vector<32x128xf32>
    %234 = vector.extract_strided_slice %216 {offsets = [64, 0], sizes = [32, 128], strides = [1, 1]} : vector<96x128xf32> to vector<32x128xf32>
    %235 = arith.addf %234, %22 : vector<32x128xf32>
    %236 = arith.mulf %224, %235 : vector<32x128xf32>
    %237 = arith.addf %233, %236 : vector<32x128xf32>
    %238 = math.tanh %237 : vector<32x128xf32>
    %239 = arith.subf %187, %238 : vector<32x128xf32>
    %240 = arith.mulf %232, %239 : vector<32x128xf32>
    %241 = arith.addf %238, %240 : vector<32x128xf32>
    %242 = vector.extract_strided_slice %241 {offsets = [0, 0], sizes = [16, 128], strides = [1, 1]} : vector<32x128xf32> to vector<16x128xf32>
    %c3_61 = arith.constant 3 : index
    %c0_62 = arith.constant 0 : index
    %c0_63 = arith.constant 0 : index
    %243 = vector.load %arg12[%c3_61, %c0_62, %c0_63] : memref<8x32x128xf32, #tpu.memory_space<vmem>>, vector<1x16x128xf32>
    %244 = vector.shape_cast %243 : vector<1x16x128xf32> to vector<16x128xf32>
    %245 = vector.shape_cast %242 : vector<16x128xf32> to vector<1x16x128xf32>
    tpu.vector_store %arg12[%c3_61, %c0_62, %c0_63], %245 {strides = array<i32>} : memref<8x32x128xf32, #tpu.memory_space<vmem>>, vector<1x16x128xf32>,
    %246 = vector.extract_strided_slice %241 {offsets = [16, 0], sizes = [16, 128], strides = [1, 1]} : vector<32x128xf32> to vector<16x128xf32>
    %c4_64 = arith.constant 4 : index
    %c16_65 = arith.constant 16 : index
    %c0_66 = arith.constant 0 : index
    %247 = vector.load %arg12[%c4_64, %c16_65, %c0_66] : memref<8x32x128xf32, #tpu.memory_space<vmem>>, vector<1x16x128xf32>
    %248 = vector.shape_cast %247 : vector<1x16x128xf32> to vector<16x128xf32>
    %249 = vector.shape_cast %246 : vector<16x128xf32> to vector<1x16x128xf32>
    tpu.vector_store %arg12[%c4_64, %c16_65, %c0_66], %249 {strides = array<i32>} : memref<8x32x128xf32, #tpu.memory_space<vmem>>, vector<1x16x128xf32>,
    %c4_67 = arith.constant 4 : index
    %c0_68 = arith.constant 0 : index
    %c0_69 = arith.constant 0 : index
    %250 = vector.load %arg1[%c4_67, %c0_68, %c0_69] : memref<8x3x128xf32, #tpu.memory_space<vmem>>, vector<1x3x128xf32>
    %251 = vector.shape_cast %250 : vector<1x3x128xf32> to vector<3x128xf32>
    %c3_70 = arith.constant 3 : index
    %c0_71 = arith.constant 0 : index
    %c0_72 = arith.constant 0 : index
    %252 = vector.load %arg1[%c3_70, %c0_71, %c0_72] : memref<8x3x128xf32, #tpu.memory_space<vmem>>, vector<1x3x128xf32>
    %253 = vector.shape_cast %252 : vector<1x3x128xf32> to vector<3x128xf32>
    %254 = vector.extract_strided_slice %251 {offsets = [0, 0], sizes = [1, 128], strides = [1, 1]} : vector<3x128xf32> to vector<1x128xf32>
    %255 = vector.broadcast %254 : vector<1x128xf32> to vector<96x128xf32>
    %256 = arith.mulf %7, %255 : vector<96x128xf32>
    %257 = vector.extract_strided_slice %251 {offsets = [1, 0], sizes = [1, 128], strides = [1, 1]} : vector<3x128xf32> to vector<1x128xf32>
    %258 = vector.broadcast %257 : vector<1x128xf32> to vector<96x128xf32>
    %259 = arith.mulf %10, %258 : vector<96x128xf32>
    %260 = arith.addf %256, %259 : vector<96x128xf32>
    %261 = vector.extract_strided_slice %253 {offsets = [0, 0], sizes = [1, 128], strides = [1, 1]} : vector<3x128xf32> to vector<1x128xf32>
    %262 = vector.broadcast %261 : vector<1x128xf32> to vector<96x128xf32>
    %263 = arith.mulf %13, %262 : vector<96x128xf32>
    %264 = arith.addf %260, %263 : vector<96x128xf32>
    %265 = vector.extract_strided_slice %253 {offsets = [1, 0], sizes = [1, 128], strides = [1, 1]} : vector<3x128xf32> to vector<1x128xf32>
    %266 = vector.broadcast %265 : vector<1x128xf32> to vector<96x128xf32>
    %267 = arith.mulf %16, %266 : vector<96x128xf32>
    %268 = arith.addf %264, %267 : vector<96x128xf32>
    %269 = arith.addf %268, %19 : vector<96x128xf32>
    %cst_73 = arith.constant dense<0.000000e+00> : vector<96x128xf32>
    %270 = tpu.matmul %0, %241, %cst_73 {dimension_numbers = #tpu.dot_dimension_numbers<[1], [0], [0], [1], [0, 0, 1, 1], [], []>} : vector<96x32xf32>, vector<32x128xf32>, vector<96x128xf32> -> vector<96x128xf32>
    %271 = vector.extract_strided_slice %269 {offsets = [0, 0], sizes = [32, 128], strides = [1, 1]} : vector<96x128xf32> to vector<32x128xf32>
    %272 = vector.extract_strided_slice %270 {offsets = [0, 0], sizes = [32, 128], strides = [1, 1]} : vector<96x128xf32> to vector<32x128xf32>
    %273 = arith.addf %271, %272 : vector<32x128xf32>
    %274 = arith.negf %273 : vector<32x128xf32>
    %275 = math.exp %274 : vector<32x128xf32>
    %cst_74 = arith.constant 1.000000e+00 : f32
    %276 = vector.broadcast %cst_74 : f32 to vector<32x128xf32>
    %277 = arith.addf %276, %275 : vector<32x128xf32>
    %278 = arith.divf %276, %277 : vector<32x128xf32>
    %279 = vector.extract_strided_slice %269 {offsets = [32, 0], sizes = [32, 128], strides = [1, 1]} : vector<96x128xf32> to vector<32x128xf32>
    %280 = vector.extract_strided_slice %270 {offsets = [32, 0], sizes = [32, 128], strides = [1, 1]} : vector<96x128xf32> to vector<32x128xf32>
    %281 = arith.addf %279, %280 : vector<32x128xf32>
    %282 = arith.negf %281 : vector<32x128xf32>
    %283 = math.exp %282 : vector<32x128xf32>
    %cst_75 = arith.constant 1.000000e+00 : f32
    %284 = vector.broadcast %cst_75 : f32 to vector<32x128xf32>
    %285 = arith.addf %284, %283 : vector<32x128xf32>
    %286 = arith.divf %284, %285 : vector<32x128xf32>
    %287 = vector.extract_strided_slice %269 {offsets = [64, 0], sizes = [32, 128], strides = [1, 1]} : vector<96x128xf32> to vector<32x128xf32>
    %288 = vector.extract_strided_slice %270 {offsets = [64, 0], sizes = [32, 128], strides = [1, 1]} : vector<96x128xf32> to vector<32x128xf32>
    %289 = arith.addf %288, %22 : vector<32x128xf32>
    %290 = arith.mulf %278, %289 : vector<32x128xf32>
    %291 = arith.addf %287, %290 : vector<32x128xf32>
    %292 = math.tanh %291 : vector<32x128xf32>
    %293 = arith.subf %241, %292 : vector<32x128xf32>
    %294 = arith.mulf %286, %293 : vector<32x128xf32>
    %295 = arith.addf %292, %294 : vector<32x128xf32>
    %296 = vector.extract_strided_slice %295 {offsets = [0, 0], sizes = [16, 128], strides = [1, 1]} : vector<32x128xf32> to vector<16x128xf32>
    %c4_76 = arith.constant 4 : index
    %c0_77 = arith.constant 0 : index
    %c0_78 = arith.constant 0 : index
    %297 = vector.load %arg12[%c4_76, %c0_77, %c0_78] : memref<8x32x128xf32, #tpu.memory_space<vmem>>, vector<1x16x128xf32>
    %298 = vector.shape_cast %297 : vector<1x16x128xf32> to vector<16x128xf32>
    %299 = vector.shape_cast %296 : vector<16x128xf32> to vector<1x16x128xf32>
    tpu.vector_store %arg12[%c4_76, %c0_77, %c0_78], %299 {strides = array<i32>} : memref<8x32x128xf32, #tpu.memory_space<vmem>>, vector<1x16x128xf32>,
    %300 = vector.extract_strided_slice %295 {offsets = [16, 0], sizes = [16, 128], strides = [1, 1]} : vector<32x128xf32> to vector<16x128xf32>
    %c3_79 = arith.constant 3 : index
    %c16_80 = arith.constant 16 : index
    %c0_81 = arith.constant 0 : index
    %301 = vector.load %arg12[%c3_79, %c16_80, %c0_81] : memref<8x32x128xf32, #tpu.memory_space<vmem>>, vector<1x16x128xf32>
    %302 = vector.shape_cast %301 : vector<1x16x128xf32> to vector<16x128xf32>
    %303 = vector.shape_cast %300 : vector<16x128xf32> to vector<1x16x128xf32>
    tpu.vector_store %arg12[%c3_79, %c16_80, %c0_81], %303 {strides = array<i32>} : memref<8x32x128xf32, #tpu.memory_space<vmem>>, vector<1x16x128xf32>,
    %c5_82 = arith.constant 5 : index
    %c0_83 = arith.constant 0 : index
    %c0_84 = arith.constant 0 : index
    %304 = vector.load %arg1[%c5_82, %c0_83, %c0_84] : memref<8x3x128xf32, #tpu.memory_space<vmem>>, vector<1x3x128xf32>
    %305 = vector.shape_cast %304 : vector<1x3x128xf32> to vector<3x128xf32>
    %c2_85 = arith.constant 2 : index
    %c0_86 = arith.constant 0 : index
    %c0_87 = arith.constant 0 : index
    %306 = vector.load %arg1[%c2_85, %c0_86, %c0_87] : memref<8x3x128xf32, #tpu.memory_space<vmem>>, vector<1x3x128xf32>
    %307 = vector.shape_cast %306 : vector<1x3x128xf32> to vector<3x128xf32>
    %308 = vector.extract_strided_slice %305 {offsets = [0, 0], sizes = [1, 128], strides = [1, 1]} : vector<3x128xf32> to vector<1x128xf32>
    %309 = vector.broadcast %308 : vector<1x128xf32> to vector<96x128xf32>
    %310 = arith.mulf %7, %309 : vector<96x128xf32>
    %311 = vector.extract_strided_slice %305 {offsets = [1, 0], sizes = [1, 128], strides = [1, 1]} : vector<3x128xf32> to vector<1x128xf32>
    %312 = vector.broadcast %311 : vector<1x128xf32> to vector<96x128xf32>
    %313 = arith.mulf %10, %312 : vector<96x128xf32>
    %314 = arith.addf %310, %313 : vector<96x128xf32>
    %315 = vector.extract_strided_slice %307 {offsets = [0, 0], sizes = [1, 128], strides = [1, 1]} : vector<3x128xf32> to vector<1x128xf32>
    %316 = vector.broadcast %315 : vector<1x128xf32> to vector<96x128xf32>
    %317 = arith.mulf %13, %316 : vector<96x128xf32>
    %318 = arith.addf %314, %317 : vector<96x128xf32>
    %319 = vector.extract_strided_slice %307 {offsets = [1, 0], sizes = [1, 128], strides = [1, 1]} : vector<3x128xf32> to vector<1x128xf32>
    %320 = vector.broadcast %319 : vector<1x128xf32> to vector<96x128xf32>
    %321 = arith.mulf %16, %320 : vector<96x128xf32>
    %322 = arith.addf %318, %321 : vector<96x128xf32>
    %323 = arith.addf %322, %19 : vector<96x128xf32>
    %cst_88 = arith.constant dense<0.000000e+00> : vector<96x128xf32>
    %324 = tpu.matmul %0, %295, %cst_88 {dimension_numbers = #tpu.dot_dimension_numbers<[1], [0], [0], [1], [0, 0, 1, 1], [], []>} : vector<96x32xf32>, vector<32x128xf32>, vector<96x128xf32> -> vector<96x128xf32>
    %325 = vector.extract_strided_slice %323 {offsets = [0, 0], sizes = [32, 128], strides = [1, 1]} : vector<96x128xf32> to vector<32x128xf32>
    %326 = vector.extract_strided_slice %324 {offsets = [0, 0], sizes = [32, 128], strides = [1, 1]} : vector<96x128xf32> to vector<32x128xf32>
    %327 = arith.addf %325, %326 : vector<32x128xf32>
    %328 = arith.negf %327 : vector<32x128xf32>
    %329 = math.exp %328 : vector<32x128xf32>
    %cst_89 = arith.constant 1.000000e+00 : f32
    %330 = vector.broadcast %cst_89 : f32 to vector<32x128xf32>
    %331 = arith.addf %330, %329 : vector<32x128xf32>
    %332 = arith.divf %330, %331 : vector<32x128xf32>
    %333 = vector.extract_strided_slice %323 {offsets = [32, 0], sizes = [32, 128], strides = [1, 1]} : vector<96x128xf32> to vector<32x128xf32>
    %334 = vector.extract_strided_slice %324 {offsets = [32, 0], sizes = [32, 128], strides = [1, 1]} : vector<96x128xf32> to vector<32x128xf32>
    %335 = arith.addf %333, %334 : vector<32x128xf32>
    %336 = arith.negf %335 : vector<32x128xf32>
    %337 = math.exp %336 : vector<32x128xf32>
    %cst_90 = arith.constant 1.000000e+00 : f32
    %338 = vector.broadcast %cst_90 : f32 to vector<32x128xf32>
    %339 = arith.addf %338, %337 : vector<32x128xf32>
    %340 = arith.divf %338, %339 : vector<32x128xf32>
    %341 = vector.extract_strided_slice %323 {offsets = [64, 0], sizes = [32, 128], strides = [1, 1]} : vector<96x128xf32> to vector<32x128xf32>
    %342 = vector.extract_strided_slice %324 {offsets = [64, 0], sizes = [32, 128], strides = [1, 1]} : vector<96x128xf32> to vector<32x128xf32>
    %343 = arith.addf %342, %22 : vector<32x128xf32>
    %344 = arith.mulf %332, %343 : vector<32x128xf32>
    %345 = arith.addf %341, %344 : vector<32x128xf32>
    %346 = math.tanh %345 : vector<32x128xf32>
    %347 = arith.subf %295, %346 : vector<32x128xf32>
    %348 = arith.mulf %340, %347 : vector<32x128xf32>
    %349 = arith.addf %346, %348 : vector<32x128xf32>
    %350 = vector.extract_strided_slice %349 {offsets = [0, 0], sizes = [16, 128], strides = [1, 1]} : vector<32x128xf32> to vector<16x128xf32>
    %c5_91 = arith.constant 5 : index
    %c0_92 = arith.constant 0 : index
    %c0_93 = arith.constant 0 : index
    %351 = vector.load %arg12[%c5_91, %c0_92, %c0_93] : memref<8x32x128xf32, #tpu.memory_space<vmem>>, vector<1x16x128xf32>
    %352 = vector.shape_cast %351 : vector<1x16x128xf32> to vector<16x128xf32>
    %353 = vector.shape_cast %350 : vector<16x128xf32> to vector<1x16x128xf32>
    tpu.vector_store %arg12[%c5_91, %c0_92, %c0_93], %353 {strides = array<i32>} : memref<8x32x128xf32, #tpu.memory_space<vmem>>, vector<1x16x128xf32>,
    %354 = vector.extract_strided_slice %349 {offsets = [16, 0], sizes = [16, 128], strides = [1, 1]} : vector<32x128xf32> to vector<16x128xf32>
    %c2_94 = arith.constant 2 : index
    %c16_95 = arith.constant 16 : index
    %c0_96 = arith.constant 0 : index
    %355 = vector.load %arg12[%c2_94, %c16_95, %c0_96] : memref<8x32x128xf32, #tpu.memory_space<vmem>>, vector<1x16x128xf32>
    %356 = vector.shape_cast %355 : vector<1x16x128xf32> to vector<16x128xf32>
    %357 = vector.shape_cast %354 : vector<16x128xf32> to vector<1x16x128xf32>
    tpu.vector_store %arg12[%c2_94, %c16_95, %c0_96], %357 {strides = array<i32>} : memref<8x32x128xf32, #tpu.memory_space<vmem>>, vector<1x16x128xf32>,
    %c6_97 = arith.constant 6 : index
    %c0_98 = arith.constant 0 : index
    %c0_99 = arith.constant 0 : index
    %358 = vector.load %arg1[%c6_97, %c0_98, %c0_99] : memref<8x3x128xf32, #tpu.memory_space<vmem>>, vector<1x3x128xf32>
    %359 = vector.shape_cast %358 : vector<1x3x128xf32> to vector<3x128xf32>
    %c1_100 = arith.constant 1 : index
    %c0_101 = arith.constant 0 : index
    %c0_102 = arith.constant 0 : index
    %360 = vector.load %arg1[%c1_100, %c0_101, %c0_102] : memref<8x3x128xf32, #tpu.memory_space<vmem>>, vector<1x3x128xf32>
    %361 = vector.shape_cast %360 : vector<1x3x128xf32> to vector<3x128xf32>
    %362 = vector.extract_strided_slice %359 {offsets = [0, 0], sizes = [1, 128], strides = [1, 1]} : vector<3x128xf32> to vector<1x128xf32>
    %363 = vector.broadcast %362 : vector<1x128xf32> to vector<96x128xf32>
    %364 = arith.mulf %7, %363 : vector<96x128xf32>
    %365 = vector.extract_strided_slice %359 {offsets = [1, 0], sizes = [1, 128], strides = [1, 1]} : vector<3x128xf32> to vector<1x128xf32>
    %366 = vector.broadcast %365 : vector<1x128xf32> to vector<96x128xf32>
    %367 = arith.mulf %10, %366 : vector<96x128xf32>
    %368 = arith.addf %364, %367 : vector<96x128xf32>
    %369 = vector.extract_strided_slice %361 {offsets = [0, 0], sizes = [1, 128], strides = [1, 1]} : vector<3x128xf32> to vector<1x128xf32>
    %370 = vector.broadcast %369 : vector<1x128xf32> to vector<96x128xf32>
    %371 = arith.mulf %13, %370 : vector<96x128xf32>
    %372 = arith.addf %368, %371 : vector<96x128xf32>
    %373 = vector.extract_strided_slice %361 {offsets = [1, 0], sizes = [1, 128], strides = [1, 1]} : vector<3x128xf32> to vector<1x128xf32>
    %374 = vector.broadcast %373 : vector<1x128xf32> to vector<96x128xf32>
    %375 = arith.mulf %16, %374 : vector<96x128xf32>
    %376 = arith.addf %372, %375 : vector<96x128xf32>
    %377 = arith.addf %376, %19 : vector<96x128xf32>
    %cst_103 = arith.constant dense<0.000000e+00> : vector<96x128xf32>
    %378 = tpu.matmul %0, %349, %cst_103 {dimension_numbers = #tpu.dot_dimension_numbers<[1], [0], [0], [1], [0, 0, 1, 1], [], []>} : vector<96x32xf32>, vector<32x128xf32>, vector<96x128xf32> -> vector<96x128xf32>
    %379 = vector.extract_strided_slice %377 {offsets = [0, 0], sizes = [32, 128], strides = [1, 1]} : vector<96x128xf32> to vector<32x128xf32>
    %380 = vector.extract_strided_slice %378 {offsets = [0, 0], sizes = [32, 128], strides = [1, 1]} : vector<96x128xf32> to vector<32x128xf32>
    %381 = arith.addf %379, %380 : vector<32x128xf32>
    %382 = arith.negf %381 : vector<32x128xf32>
    %383 = math.exp %382 : vector<32x128xf32>
    %cst_104 = arith.constant 1.000000e+00 : f32
    %384 = vector.broadcast %cst_104 : f32 to vector<32x128xf32>
    %385 = arith.addf %384, %383 : vector<32x128xf32>
    %386 = arith.divf %384, %385 : vector<32x128xf32>
    %387 = vector.extract_strided_slice %377 {offsets = [32, 0], sizes = [32, 128], strides = [1, 1]} : vector<96x128xf32> to vector<32x128xf32>
    %388 = vector.extract_strided_slice %378 {offsets = [32, 0], sizes = [32, 128], strides = [1, 1]} : vector<96x128xf32> to vector<32x128xf32>
    %389 = arith.addf %387, %388 : vector<32x128xf32>
    %390 = arith.negf %389 : vector<32x128xf32>
    %391 = math.exp %390 : vector<32x128xf32>
    %cst_105 = arith.constant 1.000000e+00 : f32
    %392 = vector.broadcast %cst_105 : f32 to vector<32x128xf32>
    %393 = arith.addf %392, %391 : vector<32x128xf32>
    %394 = arith.divf %392, %393 : vector<32x128xf32>
    %395 = vector.extract_strided_slice %377 {offsets = [64, 0], sizes = [32, 128], strides = [1, 1]} : vector<96x128xf32> to vector<32x128xf32>
    %396 = vector.extract_strided_slice %378 {offsets = [64, 0], sizes = [32, 128], strides = [1, 1]} : vector<96x128xf32> to vector<32x128xf32>
    %397 = arith.addf %396, %22 : vector<32x128xf32>
    %398 = arith.mulf %386, %397 : vector<32x128xf32>
    %399 = arith.addf %395, %398 : vector<32x128xf32>
    %400 = math.tanh %399 : vector<32x128xf32>
    %401 = arith.subf %349, %400 : vector<32x128xf32>
    %402 = arith.mulf %394, %401 : vector<32x128xf32>
    %403 = arith.addf %400, %402 : vector<32x128xf32>
    %404 = vector.extract_strided_slice %403 {offsets = [0, 0], sizes = [16, 128], strides = [1, 1]} : vector<32x128xf32> to vector<16x128xf32>
    %c6_106 = arith.constant 6 : index
    %c0_107 = arith.constant 0 : index
    %c0_108 = arith.constant 0 : index
    %405 = vector.load %arg12[%c6_106, %c0_107, %c0_108] : memref<8x32x128xf32, #tpu.memory_space<vmem>>, vector<1x16x128xf32>
    %406 = vector.shape_cast %405 : vector<1x16x128xf32> to vector<16x128xf32>
    %407 = vector.shape_cast %404 : vector<16x128xf32> to vector<1x16x128xf32>
    tpu.vector_store %arg12[%c6_106, %c0_107, %c0_108], %407 {strides = array<i32>} : memref<8x32x128xf32, #tpu.memory_space<vmem>>, vector<1x16x128xf32>,
    %408 = vector.extract_strided_slice %403 {offsets = [16, 0], sizes = [16, 128], strides = [1, 1]} : vector<32x128xf32> to vector<16x128xf32>
    %c1_109 = arith.constant 1 : index
    %c16_110 = arith.constant 16 : index
    %c0_111 = arith.constant 0 : index
    %409 = vector.load %arg12[%c1_109, %c16_110, %c0_111] : memref<8x32x128xf32, #tpu.memory_space<vmem>>, vector<1x16x128xf32>
    %410 = vector.shape_cast %409 : vector<1x16x128xf32> to vector<16x128xf32>
    %411 = vector.shape_cast %408 : vector<16x128xf32> to vector<1x16x128xf32>
    tpu.vector_store %arg12[%c1_109, %c16_110, %c0_111], %411 {strides = array<i32>} : memref<8x32x128xf32, #tpu.memory_space<vmem>>, vector<1x16x128xf32>,
    %c7_112 = arith.constant 7 : index
    %c0_113 = arith.constant 0 : index
    %c0_114 = arith.constant 0 : index
    %412 = vector.load %arg1[%c7_112, %c0_113, %c0_114] : memref<8x3x128xf32, #tpu.memory_space<vmem>>, vector<1x3x128xf32>
    %413 = vector.shape_cast %412 : vector<1x3x128xf32> to vector<3x128xf32>
    %c0_115 = arith.constant 0 : index
    %c0_116 = arith.constant 0 : index
    %c0_117 = arith.constant 0 : index
    %414 = vector.load %arg1[%c0_115, %c0_116, %c0_117] : memref<8x3x128xf32, #tpu.memory_space<vmem>>, vector<1x3x128xf32>
    %415 = vector.shape_cast %414 : vector<1x3x128xf32> to vector<3x128xf32>
    %416 = vector.extract_strided_slice %413 {offsets = [0, 0], sizes = [1, 128], strides = [1, 1]} : vector<3x128xf32> to vector<1x128xf32>
    %417 = vector.broadcast %416 : vector<1x128xf32> to vector<96x128xf32>
    %418 = arith.mulf %7, %417 : vector<96x128xf32>
    %419 = vector.extract_strided_slice %413 {offsets = [1, 0], sizes = [1, 128], strides = [1, 1]} : vector<3x128xf32> to vector<1x128xf32>
    %420 = vector.broadcast %419 : vector<1x128xf32> to vector<96x128xf32>
    %421 = arith.mulf %10, %420 : vector<96x128xf32>
    %422 = arith.addf %418, %421 : vector<96x128xf32>
    %423 = vector.extract_strided_slice %415 {offsets = [0, 0], sizes = [1, 128], strides = [1, 1]} : vector<3x128xf32> to vector<1x128xf32>
    %424 = vector.broadcast %423 : vector<1x128xf32> to vector<96x128xf32>
    %425 = arith.mulf %13, %424 : vector<96x128xf32>
    %426 = arith.addf %422, %425 : vector<96x128xf32>
    %427 = vector.extract_strided_slice %415 {offsets = [1, 0], sizes = [1, 128], strides = [1, 1]} : vector<3x128xf32> to vector<1x128xf32>
    %428 = vector.broadcast %427 : vector<1x128xf32> to vector<96x128xf32>
    %429 = arith.mulf %16, %428 : vector<96x128xf32>
    %430 = arith.addf %426, %429 : vector<96x128xf32>
    %431 = arith.addf %430, %19 : vector<96x128xf32>
    %cst_118 = arith.constant dense<0.000000e+00> : vector<96x128xf32>
    %432 = tpu.matmul %0, %403, %cst_118 {dimension_numbers = #tpu.dot_dimension_numbers<[1], [0], [0], [1], [0, 0, 1, 1], [], []>} : vector<96x32xf32>, vector<32x128xf32>, vector<96x128xf32> -> vector<96x128xf32>
    %433 = vector.extract_strided_slice %431 {offsets = [0, 0], sizes = [32, 128], strides = [1, 1]} : vector<96x128xf32> to vector<32x128xf32>
    %434 = vector.extract_strided_slice %432 {offsets = [0, 0], sizes = [32, 128], strides = [1, 1]} : vector<96x128xf32> to vector<32x128xf32>
    %435 = arith.addf %433, %434 : vector<32x128xf32>
    %436 = arith.negf %435 : vector<32x128xf32>
    %437 = math.exp %436 : vector<32x128xf32>
    %cst_119 = arith.constant 1.000000e+00 : f32
    %438 = vector.broadcast %cst_119 : f32 to vector<32x128xf32>
    %439 = arith.addf %438, %437 : vector<32x128xf32>
    %440 = arith.divf %438, %439 : vector<32x128xf32>
    %441 = vector.extract_strided_slice %431 {offsets = [32, 0], sizes = [32, 128], strides = [1, 1]} : vector<96x128xf32> to vector<32x128xf32>
    %442 = vector.extract_strided_slice %432 {offsets = [32, 0], sizes = [32, 128], strides = [1, 1]} : vector<96x128xf32> to vector<32x128xf32>
    %443 = arith.addf %441, %442 : vector<32x128xf32>
    %444 = arith.negf %443 : vector<32x128xf32>
    %445 = math.exp %444 : vector<32x128xf32>
    %cst_120 = arith.constant 1.000000e+00 : f32
    %446 = vector.broadcast %cst_120 : f32 to vector<32x128xf32>
    %447 = arith.addf %446, %445 : vector<32x128xf32>
    %448 = arith.divf %446, %447 : vector<32x128xf32>
    %449 = vector.extract_strided_slice %431 {offsets = [64, 0], sizes = [32, 128], strides = [1, 1]} : vector<96x128xf32> to vector<32x128xf32>
    %450 = vector.extract_strided_slice %432 {offsets = [64, 0], sizes = [32, 128], strides = [1, 1]} : vector<96x128xf32> to vector<32x128xf32>
    %451 = arith.addf %450, %22 : vector<32x128xf32>
    %452 = arith.mulf %440, %451 : vector<32x128xf32>
    %453 = arith.addf %449, %452 : vector<32x128xf32>
    %454 = math.tanh %453 : vector<32x128xf32>
    %455 = arith.subf %403, %454 : vector<32x128xf32>
    %456 = arith.mulf %448, %455 : vector<32x128xf32>
    %457 = arith.addf %454, %456 : vector<32x128xf32>
    %458 = vector.extract_strided_slice %457 {offsets = [0, 0], sizes = [16, 128], strides = [1, 1]} : vector<32x128xf32> to vector<16x128xf32>
    %c7_121 = arith.constant 7 : index
    %c0_122 = arith.constant 0 : index
    %c0_123 = arith.constant 0 : index
    %459 = vector.load %arg12[%c7_121, %c0_122, %c0_123] : memref<8x32x128xf32, #tpu.memory_space<vmem>>, vector<1x16x128xf32>
    %460 = vector.shape_cast %459 : vector<1x16x128xf32> to vector<16x128xf32>
    %461 = vector.shape_cast %458 : vector<16x128xf32> to vector<1x16x128xf32>
    tpu.vector_store %arg12[%c7_121, %c0_122, %c0_123], %461 {strides = array<i32>} : memref<8x32x128xf32, #tpu.memory_space<vmem>>, vector<1x16x128xf32>,
    %462 = vector.extract_strided_slice %457 {offsets = [16, 0], sizes = [16, 128], strides = [1, 1]} : vector<32x128xf32> to vector<16x128xf32>
    %c0_124 = arith.constant 0 : index
    %c16_125 = arith.constant 16 : index
    %c0_126 = arith.constant 0 : index
    %463 = vector.load %arg12[%c0_124, %c16_125, %c0_126] : memref<8x32x128xf32, #tpu.memory_space<vmem>>, vector<1x16x128xf32>
    %464 = vector.shape_cast %463 : vector<1x16x128xf32> to vector<16x128xf32>
    %465 = vector.shape_cast %462 : vector<16x128xf32> to vector<1x16x128xf32>
    tpu.vector_store %arg12[%c0_124, %c16_125, %c0_126], %465 {strides = array<i32>} : memref<8x32x128xf32, #tpu.memory_space<vmem>>, vector<1x16x128xf32>,
    %466 = vector.extract_strided_slice %457 {offsets = [0, 0], sizes = [16, 128], strides = [1, 1]} : vector<32x128xf32> to vector<16x128xf32>
    %467 = vector.extract_strided_slice %457 {offsets = [16, 0], sizes = [16, 128], strides = [1, 1]} : vector<32x128xf32> to vector<16x128xf32>
    %468 = arith.addf %466, %467 : vector<16x128xf32>
    %cst_127 = arith.constant 5.000000e-01 : f32
    %469 = vector.broadcast %cst_127 : f32 to vector<16x128xf32>
    %470 = arith.mulf %469, %468 : vector<16x128xf32>
    %c0_128 = arith.constant 0 : index
    %c0_129 = arith.constant 0 : index
    %c0_130 = arith.constant 0 : index
    %471 = vector.load %arg2[%c0_128, %c0_129, %c0_130] : memref<8x8x128xf32, #tpu.memory_space<vmem>>, vector<1x8x128xf32>
    %472 = vector.shape_cast %471 : vector<1x8x128xf32> to vector<8x128xf32>
    %cst_131 = arith.constant dense<0.000000e+00> : vector<48x128xf32>
    %473 = tpu.matmul %2, %472, %cst_131 {dimension_numbers = #tpu.dot_dimension_numbers<[1], [0], [0], [1], [0, 0, 1, 1], [], []>} : vector<48x8xf32>, vector<8x128xf32>, vector<48x128xf32> -> vector<48x128xf32>
    %c0_132 = arith.constant 0 : index
    %c0_133 = arith.constant 0 : index
    %c0_134 = arith.constant 0 : index
    %474 = vector.load %arg12[%c0_132, %c0_133, %c0_134] : memref<8x32x128xf32, #tpu.memory_space<vmem>>, vector<1x32x128xf32>
    %475 = vector.shape_cast %474 : vector<1x32x128xf32> to vector<32x128xf32>
    %cst_135 = arith.constant dense<0.000000e+00> : vector<48x128xf32>
    %476 = tpu.matmul %3, %475, %cst_135 {dimension_numbers = #tpu.dot_dimension_numbers<[1], [0], [0], [1], [0, 0, 1, 1], [], []>} : vector<48x32xf32>, vector<32x128xf32>, vector<48x128xf32> -> vector<48x128xf32>
    %477 = arith.addf %473, %476 : vector<48x128xf32>
    %c0_136 = arith.constant 0 : index
    %c0_137 = arith.constant 0 : index
    %c0_138 = arith.constant 0 : index
    %478 = vector.load %arg1[%c0_136, %c0_137, %c0_138] : memref<8x3x128xf32, #tpu.memory_space<vmem>>, vector<1x3x128xf32>
    %479 = vector.shape_cast %478 : vector<1x3x128xf32> to vector<3x128xf32>
    %480 = vector.extract_strided_slice %479 {offsets = [2, 0], sizes = [1, 128], strides = [1, 1]} : vector<3x128xf32> to vector<1x128xf32>
    %481 = vector.broadcast %480 : vector<1x128xf32> to vector<48x128xf32>
    %482 = arith.mulf %26, %481 : vector<48x128xf32>
    %483 = arith.addf %477, %482 : vector<48x128xf32>
    %484 = arith.addf %483, %29 : vector<48x128xf32>
    %cst_139 = arith.constant dense<0.000000e+00> : vector<48x128xf32>
    %485 = tpu.matmul %1, %470, %cst_139 {dimension_numbers = #tpu.dot_dimension_numbers<[1], [0], [0], [1], [0, 0, 1, 1], [], []>} : vector<48x16xf32>, vector<16x128xf32>, vector<48x128xf32> -> vector<48x128xf32>
    %486 = vector.extract_strided_slice %484 {offsets = [0, 0], sizes = [16, 128], strides = [1, 1]} : vector<48x128xf32> to vector<16x128xf32>
    %487 = vector.extract_strided_slice %485 {offsets = [0, 0], sizes = [16, 128], strides = [1, 1]} : vector<48x128xf32> to vector<16x128xf32>
    %488 = arith.addf %486, %487 : vector<16x128xf32>
    %489 = arith.negf %488 : vector<16x128xf32>
    %490 = math.exp %489 : vector<16x128xf32>
    %cst_140 = arith.constant 1.000000e+00 : f32
    %491 = vector.broadcast %cst_140 : f32 to vector<16x128xf32>
    %492 = arith.addf %491, %490 : vector<16x128xf32>
    %493 = arith.divf %491, %492 : vector<16x128xf32>
    %494 = vector.extract_strided_slice %484 {offsets = [16, 0], sizes = [16, 128], strides = [1, 1]} : vector<48x128xf32> to vector<16x128xf32>
    %495 = vector.extract_strided_slice %485 {offsets = [16, 0], sizes = [16, 128], strides = [1, 1]} : vector<48x128xf32> to vector<16x128xf32>
    %496 = arith.addf %494, %495 : vector<16x128xf32>
    %497 = arith.negf %496 : vector<16x128xf32>
    %498 = math.exp %497 : vector<16x128xf32>
    %cst_141 = arith.constant 1.000000e+00 : f32
    %499 = vector.broadcast %cst_141 : f32 to vector<16x128xf32>
    %500 = arith.addf %499, %498 : vector<16x128xf32>
    %501 = arith.divf %499, %500 : vector<16x128xf32>
    %502 = vector.extract_strided_slice %484 {offsets = [32, 0], sizes = [16, 128], strides = [1, 1]} : vector<48x128xf32> to vector<16x128xf32>
    %503 = vector.extract_strided_slice %485 {offsets = [32, 0], sizes = [16, 128], strides = [1, 1]} : vector<48x128xf32> to vector<16x128xf32>
    %504 = arith.addf %503, %32 : vector<16x128xf32>
    %505 = arith.mulf %493, %504 : vector<16x128xf32>
    %506 = arith.addf %502, %505 : vector<16x128xf32>
    %507 = math.tanh %506 : vector<16x128xf32>
    %508 = arith.subf %470, %507 : vector<16x128xf32>
    %509 = arith.mulf %501, %508 : vector<16x128xf32>
    %510 = arith.addf %507, %509 : vector<16x128xf32>
    %c1_142 = arith.constant 1 : index
    %c0_143 = arith.constant 0 : index
    %c0_144 = arith.constant 0 : index
    %511 = vector.load %arg2[%c1_142, %c0_143, %c0_144] : memref<8x8x128xf32, #tpu.memory_space<vmem>>, vector<1x8x128xf32>
    %512 = vector.shape_cast %511 : vector<1x8x128xf32> to vector<8x128xf32>
    %cst_145 = arith.constant dense<0.000000e+00> : vector<48x128xf32>
    %513 = tpu.matmul %2, %512, %cst_145 {dimension_numbers = #tpu.dot_dimension_numbers<[1], [0], [0], [1], [0, 0, 1, 1], [], []>} : vector<48x8xf32>, vector<8x128xf32>, vector<48x128xf32> -> vector<48x128xf32>
    %c1_146 = arith.constant 1 : index
    %c0_147 = arith.constant 0 : index
    %c0_148 = arith.constant 0 : index
    %514 = vector.load %arg12[%c1_146, %c0_147, %c0_148] : memref<8x32x128xf32, #tpu.memory_space<vmem>>, vector<1x32x128xf32>
    %515 = vector.shape_cast %514 : vector<1x32x128xf32> to vector<32x128xf32>
    %cst_149 = arith.constant dense<0.000000e+00> : vector<48x128xf32>
    %516 = tpu.matmul %3, %515, %cst_149 {dimension_numbers = #tpu.dot_dimension_numbers<[1], [0], [0], [1], [0, 0, 1, 1], [], []>} : vector<48x32xf32>, vector<32x128xf32>, vector<48x128xf32> -> vector<48x128xf32>
    %517 = arith.addf %513, %516 : vector<48x128xf32>
    %c1_150 = arith.constant 1 : index
    %c0_151 = arith.constant 0 : index
    %c0_152 = arith.constant 0 : index
    %518 = vector.load %arg1[%c1_150, %c0_151, %c0_152] : memref<8x3x128xf32, #tpu.memory_space<vmem>>, vector<1x3x128xf32>
    %519 = vector.shape_cast %518 : vector<1x3x128xf32> to vector<3x128xf32>
    %520 = vector.extract_strided_slice %519 {offsets = [2, 0], sizes = [1, 128], strides = [1, 1]} : vector<3x128xf32> to vector<1x128xf32>
    %521 = vector.broadcast %520 : vector<1x128xf32> to vector<48x128xf32>
    %522 = arith.mulf %26, %521 : vector<48x128xf32>
    %523 = arith.addf %517, %522 : vector<48x128xf32>
    %524 = arith.addf %523, %29 : vector<48x128xf32>
    %cst_153 = arith.constant dense<0.000000e+00> : vector<48x128xf32>
    %525 = tpu.matmul %1, %510, %cst_153 {dimension_numbers = #tpu.dot_dimension_numbers<[1], [0], [0], [1], [0, 0, 1, 1], [], []>} : vector<48x16xf32>, vector<16x128xf32>, vector<48x128xf32> -> vector<48x128xf32>
    %526 = vector.extract_strided_slice %524 {offsets = [0, 0], sizes = [16, 128], strides = [1, 1]} : vector<48x128xf32> to vector<16x128xf32>
    %527 = vector.extract_strided_slice %525 {offsets = [0, 0], sizes = [16, 128], strides = [1, 1]} : vector<48x128xf32> to vector<16x128xf32>
    %528 = arith.addf %526, %527 : vector<16x128xf32>
    %529 = arith.negf %528 : vector<16x128xf32>
    %530 = math.exp %529 : vector<16x128xf32>
    %cst_154 = arith.constant 1.000000e+00 : f32
    %531 = vector.broadcast %cst_154 : f32 to vector<16x128xf32>
    %532 = arith.addf %531, %530 : vector<16x128xf32>
    %533 = arith.divf %531, %532 : vector<16x128xf32>
    %534 = vector.extract_strided_slice %524 {offsets = [16, 0], sizes = [16, 128], strides = [1, 1]} : vector<48x128xf32> to vector<16x128xf32>
    %535 = vector.extract_strided_slice %525 {offsets = [16, 0], sizes = [16, 128], strides = [1, 1]} : vector<48x128xf32> to vector<16x128xf32>
    %536 = arith.addf %534, %535 : vector<16x128xf32>
    %537 = arith.negf %536 : vector<16x128xf32>
    %538 = math.exp %537 : vector<16x128xf32>
    %cst_155 = arith.constant 1.000000e+00 : f32
    %539 = vector.broadcast %cst_155 : f32 to vector<16x128xf32>
    %540 = arith.addf %539, %538 : vector<16x128xf32>
    %541 = arith.divf %539, %540 : vector<16x128xf32>
    %542 = vector.extract_strided_slice %524 {offsets = [32, 0], sizes = [16, 128], strides = [1, 1]} : vector<48x128xf32> to vector<16x128xf32>
    %543 = vector.extract_strided_slice %525 {offsets = [32, 0], sizes = [16, 128], strides = [1, 1]} : vector<48x128xf32> to vector<16x128xf32>
    %544 = arith.addf %543, %32 : vector<16x128xf32>
    %545 = arith.mulf %533, %544 : vector<16x128xf32>
    %546 = arith.addf %542, %545 : vector<16x128xf32>
    %547 = math.tanh %546 : vector<16x128xf32>
    %548 = arith.subf %510, %547 : vector<16x128xf32>
    %549 = arith.mulf %541, %548 : vector<16x128xf32>
    %550 = arith.addf %547, %549 : vector<16x128xf32>
    %c2_156 = arith.constant 2 : index
    %c0_157 = arith.constant 0 : index
    %c0_158 = arith.constant 0 : index
    %551 = vector.load %arg2[%c2_156, %c0_157, %c0_158] : memref<8x8x128xf32, #tpu.memory_space<vmem>>, vector<1x8x128xf32>
    %552 = vector.shape_cast %551 : vector<1x8x128xf32> to vector<8x128xf32>
    %cst_159 = arith.constant dense<0.000000e+00> : vector<48x128xf32>
    %553 = tpu.matmul %2, %552, %cst_159 {dimension_numbers = #tpu.dot_dimension_numbers<[1], [0], [0], [1], [0, 0, 1, 1], [], []>} : vector<48x8xf32>, vector<8x128xf32>, vector<48x128xf32> -> vector<48x128xf32>
    %c2_160 = arith.constant 2 : index
    %c0_161 = arith.constant 0 : index
    %c0_162 = arith.constant 0 : index
    %554 = vector.load %arg12[%c2_160, %c0_161, %c0_162] : memref<8x32x128xf32, #tpu.memory_space<vmem>>, vector<1x32x128xf32>
    %555 = vector.shape_cast %554 : vector<1x32x128xf32> to vector<32x128xf32>
    %cst_163 = arith.constant dense<0.000000e+00> : vector<48x128xf32>
    %556 = tpu.matmul %3, %555, %cst_163 {dimension_numbers = #tpu.dot_dimension_numbers<[1], [0], [0], [1], [0, 0, 1, 1], [], []>} : vector<48x32xf32>, vector<32x128xf32>, vector<48x128xf32> -> vector<48x128xf32>
    %557 = arith.addf %553, %556 : vector<48x128xf32>
    %c2_164 = arith.constant 2 : index
    %c0_165 = arith.constant 0 : index
    %c0_166 = arith.constant 0 : index
    %558 = vector.load %arg1[%c2_164, %c0_165, %c0_166] : memref<8x3x128xf32, #tpu.memory_space<vmem>>, vector<1x3x128xf32>
    %559 = vector.shape_cast %558 : vector<1x3x128xf32> to vector<3x128xf32>
    %560 = vector.extract_strided_slice %559 {offsets = [2, 0], sizes = [1, 128], strides = [1, 1]} : vector<3x128xf32> to vector<1x128xf32>
    %561 = vector.broadcast %560 : vector<1x128xf32> to vector<48x128xf32>
    %562 = arith.mulf %26, %561 : vector<48x128xf32>
    %563 = arith.addf %557, %562 : vector<48x128xf32>
    %564 = arith.addf %563, %29 : vector<48x128xf32>
    %cst_167 = arith.constant dense<0.000000e+00> : vector<48x128xf32>
    %565 = tpu.matmul %1, %550, %cst_167 {dimension_numbers = #tpu.dot_dimension_numbers<[1], [0], [0], [1], [0, 0, 1, 1], [], []>} : vector<48x16xf32>, vector<16x128xf32>, vector<48x128xf32> -> vector<48x128xf32>
    %566 = vector.extract_strided_slice %564 {offsets = [0, 0], sizes = [16, 128], strides = [1, 1]} : vector<48x128xf32> to vector<16x128xf32>
    %567 = vector.extract_strided_slice %565 {offsets = [0, 0], sizes = [16, 128], strides = [1, 1]} : vector<48x128xf32> to vector<16x128xf32>
    %568 = arith.addf %566, %567 : vector<16x128xf32>
    %569 = arith.negf %568 : vector<16x128xf32>
    %570 = math.exp %569 : vector<16x128xf32>
    %cst_168 = arith.constant 1.000000e+00 : f32
    %571 = vector.broadcast %cst_168 : f32 to vector<16x128xf32>
    %572 = arith.addf %571, %570 : vector<16x128xf32>
    %573 = arith.divf %571, %572 : vector<16x128xf32>
    %574 = vector.extract_strided_slice %564 {offsets = [16, 0], sizes = [16, 128], strides = [1, 1]} : vector<48x128xf32> to vector<16x128xf32>
    %575 = vector.extract_strided_slice %565 {offsets = [16, 0], sizes = [16, 128], strides = [1, 1]} : vector<48x128xf32> to vector<16x128xf32>
    %576 = arith.addf %574, %575 : vector<16x128xf32>
    %577 = arith.negf %576 : vector<16x128xf32>
    %578 = math.exp %577 : vector<16x128xf32>
    %cst_169 = arith.constant 1.000000e+00 : f32
    %579 = vector.broadcast %cst_169 : f32 to vector<16x128xf32>
    %580 = arith.addf %579, %578 : vector<16x128xf32>
    %581 = arith.divf %579, %580 : vector<16x128xf32>
    %582 = vector.extract_strided_slice %564 {offsets = [32, 0], sizes = [16, 128], strides = [1, 1]} : vector<48x128xf32> to vector<16x128xf32>
    %583 = vector.extract_strided_slice %565 {offsets = [32, 0], sizes = [16, 128], strides = [1, 1]} : vector<48x128xf32> to vector<16x128xf32>
    %584 = arith.addf %583, %32 : vector<16x128xf32>
    %585 = arith.mulf %573, %584 : vector<16x128xf32>
    %586 = arith.addf %582, %585 : vector<16x128xf32>
    %587 = math.tanh %586 : vector<16x128xf32>
    %588 = arith.subf %550, %587 : vector<16x128xf32>
    %589 = arith.mulf %581, %588 : vector<16x128xf32>
    %590 = arith.addf %587, %589 : vector<16x128xf32>
    %c3_170 = arith.constant 3 : index
    %c0_171 = arith.constant 0 : index
    %c0_172 = arith.constant 0 : index
    %591 = vector.load %arg2[%c3_170, %c0_171, %c0_172] : memref<8x8x128xf32, #tpu.memory_space<vmem>>, vector<1x8x128xf32>
    %592 = vector.shape_cast %591 : vector<1x8x128xf32> to vector<8x128xf32>
    %cst_173 = arith.constant dense<0.000000e+00> : vector<48x128xf32>
    %593 = tpu.matmul %2, %592, %cst_173 {dimension_numbers = #tpu.dot_dimension_numbers<[1], [0], [0], [1], [0, 0, 1, 1], [], []>} : vector<48x8xf32>, vector<8x128xf32>, vector<48x128xf32> -> vector<48x128xf32>
    %c3_174 = arith.constant 3 : index
    %c0_175 = arith.constant 0 : index
    %c0_176 = arith.constant 0 : index
    %594 = vector.load %arg12[%c3_174, %c0_175, %c0_176] : memref<8x32x128xf32, #tpu.memory_space<vmem>>, vector<1x32x128xf32>
    %595 = vector.shape_cast %594 : vector<1x32x128xf32> to vector<32x128xf32>
    %cst_177 = arith.constant dense<0.000000e+00> : vector<48x128xf32>
    %596 = tpu.matmul %3, %595, %cst_177 {dimension_numbers = #tpu.dot_dimension_numbers<[1], [0], [0], [1], [0, 0, 1, 1], [], []>} : vector<48x32xf32>, vector<32x128xf32>, vector<48x128xf32> -> vector<48x128xf32>
    %597 = arith.addf %593, %596 : vector<48x128xf32>
    %c3_178 = arith.constant 3 : index
    %c0_179 = arith.constant 0 : index
    %c0_180 = arith.constant 0 : index
    %598 = vector.load %arg1[%c3_178, %c0_179, %c0_180] : memref<8x3x128xf32, #tpu.memory_space<vmem>>, vector<1x3x128xf32>
    %599 = vector.shape_cast %598 : vector<1x3x128xf32> to vector<3x128xf32>
    %600 = vector.extract_strided_slice %599 {offsets = [2, 0], sizes = [1, 128], strides = [1, 1]} : vector<3x128xf32> to vector<1x128xf32>
    %601 = vector.broadcast %600 : vector<1x128xf32> to vector<48x128xf32>
    %602 = arith.mulf %26, %601 : vector<48x128xf32>
    %603 = arith.addf %597, %602 : vector<48x128xf32>
    %604 = arith.addf %603, %29 : vector<48x128xf32>
    %cst_181 = arith.constant dense<0.000000e+00> : vector<48x128xf32>
    %605 = tpu.matmul %1, %590, %cst_181 {dimension_numbers = #tpu.dot_dimension_numbers<[1], [0], [0], [1], [0, 0, 1, 1], [], []>} : vector<48x16xf32>, vector<16x128xf32>, vector<48x128xf32> -> vector<48x128xf32>
    %606 = vector.extract_strided_slice %604 {offsets = [0, 0], sizes = [16, 128], strides = [1, 1]} : vector<48x128xf32> to vector<16x128xf32>
    %607 = vector.extract_strided_slice %605 {offsets = [0, 0], sizes = [16, 128], strides = [1, 1]} : vector<48x128xf32> to vector<16x128xf32>
    %608 = arith.addf %606, %607 : vector<16x128xf32>
    %609 = arith.negf %608 : vector<16x128xf32>
    %610 = math.exp %609 : vector<16x128xf32>
    %cst_182 = arith.constant 1.000000e+00 : f32
    %611 = vector.broadcast %cst_182 : f32 to vector<16x128xf32>
    %612 = arith.addf %611, %610 : vector<16x128xf32>
    %613 = arith.divf %611, %612 : vector<16x128xf32>
    %614 = vector.extract_strided_slice %604 {offsets = [16, 0], sizes = [16, 128], strides = [1, 1]} : vector<48x128xf32> to vector<16x128xf32>
    %615 = vector.extract_strided_slice %605 {offsets = [16, 0], sizes = [16, 128], strides = [1, 1]} : vector<48x128xf32> to vector<16x128xf32>
    %616 = arith.addf %614, %615 : vector<16x128xf32>
    %617 = arith.negf %616 : vector<16x128xf32>
    %618 = math.exp %617 : vector<16x128xf32>
    %cst_183 = arith.constant 1.000000e+00 : f32
    %619 = vector.broadcast %cst_183 : f32 to vector<16x128xf32>
    %620 = arith.addf %619, %618 : vector<16x128xf32>
    %621 = arith.divf %619, %620 : vector<16x128xf32>
    %622 = vector.extract_strided_slice %604 {offsets = [32, 0], sizes = [16, 128], strides = [1, 1]} : vector<48x128xf32> to vector<16x128xf32>
    %623 = vector.extract_strided_slice %605 {offsets = [32, 0], sizes = [16, 128], strides = [1, 1]} : vector<48x128xf32> to vector<16x128xf32>
    %624 = arith.addf %623, %32 : vector<16x128xf32>
    %625 = arith.mulf %613, %624 : vector<16x128xf32>
    %626 = arith.addf %622, %625 : vector<16x128xf32>
    %627 = math.tanh %626 : vector<16x128xf32>
    %628 = arith.subf %590, %627 : vector<16x128xf32>
    %629 = arith.mulf %621, %628 : vector<16x128xf32>
    %630 = arith.addf %627, %629 : vector<16x128xf32>
    %c4_184 = arith.constant 4 : index
    %c0_185 = arith.constant 0 : index
    %c0_186 = arith.constant 0 : index
    %631 = vector.load %arg2[%c4_184, %c0_185, %c0_186] : memref<8x8x128xf32, #tpu.memory_space<vmem>>, vector<1x8x128xf32>
    %632 = vector.shape_cast %631 : vector<1x8x128xf32> to vector<8x128xf32>
    %cst_187 = arith.constant dense<0.000000e+00> : vector<48x128xf32>
    %633 = tpu.matmul %2, %632, %cst_187 {dimension_numbers = #tpu.dot_dimension_numbers<[1], [0], [0], [1], [0, 0, 1, 1], [], []>} : vector<48x8xf32>, vector<8x128xf32>, vector<48x128xf32> -> vector<48x128xf32>
    %c4_188 = arith.constant 4 : index
    %c0_189 = arith.constant 0 : index
    %c0_190 = arith.constant 0 : index
    %634 = vector.load %arg12[%c4_188, %c0_189, %c0_190] : memref<8x32x128xf32, #tpu.memory_space<vmem>>, vector<1x32x128xf32>
    %635 = vector.shape_cast %634 : vector<1x32x128xf32> to vector<32x128xf32>
    %cst_191 = arith.constant dense<0.000000e+00> : vector<48x128xf32>
    %636 = tpu.matmul %3, %635, %cst_191 {dimension_numbers = #tpu.dot_dimension_numbers<[1], [0], [0], [1], [0, 0, 1, 1], [], []>} : vector<48x32xf32>, vector<32x128xf32>, vector<48x128xf32> -> vector<48x128xf32>
    %637 = arith.addf %633, %636 : vector<48x128xf32>
    %c4_192 = arith.constant 4 : index
    %c0_193 = arith.constant 0 : index
    %c0_194 = arith.constant 0 : index
    %638 = vector.load %arg1[%c4_192, %c0_193, %c0_194] : memref<8x3x128xf32, #tpu.memory_space<vmem>>, vector<1x3x128xf32>
    %639 = vector.shape_cast %638 : vector<1x3x128xf32> to vector<3x128xf32>
    %640 = vector.extract_strided_slice %639 {offsets = [2, 0], sizes = [1, 128], strides = [1, 1]} : vector<3x128xf32> to vector<1x128xf32>
    %641 = vector.broadcast %640 : vector<1x128xf32> to vector<48x128xf32>
    %642 = arith.mulf %26, %641 : vector<48x128xf32>
    %643 = arith.addf %637, %642 : vector<48x128xf32>
    %644 = arith.addf %643, %29 : vector<48x128xf32>
    %cst_195 = arith.constant dense<0.000000e+00> : vector<48x128xf32>
    %645 = tpu.matmul %1, %630, %cst_195 {dimension_numbers = #tpu.dot_dimension_numbers<[1], [0], [0], [1], [0, 0, 1, 1], [], []>} : vector<48x16xf32>, vector<16x128xf32>, vector<48x128xf32> -> vector<48x128xf32>
    %646 = vector.extract_strided_slice %644 {offsets = [0, 0], sizes = [16, 128], strides = [1, 1]} : vector<48x128xf32> to vector<16x128xf32>
    %647 = vector.extract_strided_slice %645 {offsets = [0, 0], sizes = [16, 128], strides = [1, 1]} : vector<48x128xf32> to vector<16x128xf32>
    %648 = arith.addf %646, %647 : vector<16x128xf32>
    %649 = arith.negf %648 : vector<16x128xf32>
    %650 = math.exp %649 : vector<16x128xf32>
    %cst_196 = arith.constant 1.000000e+00 : f32
    %651 = vector.broadcast %cst_196 : f32 to vector<16x128xf32>
    %652 = arith.addf %651, %650 : vector<16x128xf32>
    %653 = arith.divf %651, %652 : vector<16x128xf32>
    %654 = vector.extract_strided_slice %644 {offsets = [16, 0], sizes = [16, 128], strides = [1, 1]} : vector<48x128xf32> to vector<16x128xf32>
    %655 = vector.extract_strided_slice %645 {offsets = [16, 0], sizes = [16, 128], strides = [1, 1]} : vector<48x128xf32> to vector<16x128xf32>
    %656 = arith.addf %654, %655 : vector<16x128xf32>
    %657 = arith.negf %656 : vector<16x128xf32>
    %658 = math.exp %657 : vector<16x128xf32>
    %cst_197 = arith.constant 1.000000e+00 : f32
    %659 = vector.broadcast %cst_197 : f32 to vector<16x128xf32>
    %660 = arith.addf %659, %658 : vector<16x128xf32>
    %661 = arith.divf %659, %660 : vector<16x128xf32>
    %662 = vector.extract_strided_slice %644 {offsets = [32, 0], sizes = [16, 128], strides = [1, 1]} : vector<48x128xf32> to vector<16x128xf32>
    %663 = vector.extract_strided_slice %645 {offsets = [32, 0], sizes = [16, 128], strides = [1, 1]} : vector<48x128xf32> to vector<16x128xf32>
    %664 = arith.addf %663, %32 : vector<16x128xf32>
    %665 = arith.mulf %653, %664 : vector<16x128xf32>
    %666 = arith.addf %662, %665 : vector<16x128xf32>
    %667 = math.tanh %666 : vector<16x128xf32>
    %668 = arith.subf %630, %667 : vector<16x128xf32>
    %669 = arith.mulf %661, %668 : vector<16x128xf32>
    %670 = arith.addf %667, %669 : vector<16x128xf32>
    %c5_198 = arith.constant 5 : index
    %c0_199 = arith.constant 0 : index
    %c0_200 = arith.constant 0 : index
    %671 = vector.load %arg2[%c5_198, %c0_199, %c0_200] : memref<8x8x128xf32, #tpu.memory_space<vmem>>, vector<1x8x128xf32>
    %672 = vector.shape_cast %671 : vector<1x8x128xf32> to vector<8x128xf32>
    %cst_201 = arith.constant dense<0.000000e+00> : vector<48x128xf32>
    %673 = tpu.matmul %2, %672, %cst_201 {dimension_numbers = #tpu.dot_dimension_numbers<[1], [0], [0], [1], [0, 0, 1, 1], [], []>} : vector<48x8xf32>, vector<8x128xf32>, vector<48x128xf32> -> vector<48x128xf32>
    %c5_202 = arith.constant 5 : index
    %c0_203 = arith.constant 0 : index
    %c0_204 = arith.constant 0 : index
    %674 = vector.load %arg12[%c5_202, %c0_203, %c0_204] : memref<8x32x128xf32, #tpu.memory_space<vmem>>, vector<1x32x128xf32>
    %675 = vector.shape_cast %674 : vector<1x32x128xf32> to vector<32x128xf32>
    %cst_205 = arith.constant dense<0.000000e+00> : vector<48x128xf32>
    %676 = tpu.matmul %3, %675, %cst_205 {dimension_numbers = #tpu.dot_dimension_numbers<[1], [0], [0], [1], [0, 0, 1, 1], [], []>} : vector<48x32xf32>, vector<32x128xf32>, vector<48x128xf32> -> vector<48x128xf32>
    %677 = arith.addf %673, %676 : vector<48x128xf32>
    %c5_206 = arith.constant 5 : index
    %c0_207 = arith.constant 0 : index
    %c0_208 = arith.constant 0 : index
    %678 = vector.load %arg1[%c5_206, %c0_207, %c0_208] : memref<8x3x128xf32, #tpu.memory_space<vmem>>, vector<1x3x128xf32>
    %679 = vector.shape_cast %678 : vector<1x3x128xf32> to vector<3x128xf32>
    %680 = vector.extract_strided_slice %679 {offsets = [2, 0], sizes = [1, 128], strides = [1, 1]} : vector<3x128xf32> to vector<1x128xf32>
    %681 = vector.broadcast %680 : vector<1x128xf32> to vector<48x128xf32>
    %682 = arith.mulf %26, %681 : vector<48x128xf32>
    %683 = arith.addf %677, %682 : vector<48x128xf32>
    %684 = arith.addf %683, %29 : vector<48x128xf32>
    %cst_209 = arith.constant dense<0.000000e+00> : vector<48x128xf32>
    %685 = tpu.matmul %1, %670, %cst_209 {dimension_numbers = #tpu.dot_dimension_numbers<[1], [0], [0], [1], [0, 0, 1, 1], [], []>} : vector<48x16xf32>, vector<16x128xf32>, vector<48x128xf32> -> vector<48x128xf32>
    %686 = vector.extract_strided_slice %684 {offsets = [0, 0], sizes = [16, 128], strides = [1, 1]} : vector<48x128xf32> to vector<16x128xf32>
    %687 = vector.extract_strided_slice %685 {offsets = [0, 0], sizes = [16, 128], strides = [1, 1]} : vector<48x128xf32> to vector<16x128xf32>
    %688 = arith.addf %686, %687 : vector<16x128xf32>
    %689 = arith.negf %688 : vector<16x128xf32>
    %690 = math.exp %689 : vector<16x128xf32>
    %cst_210 = arith.constant 1.000000e+00 : f32
    %691 = vector.broadcast %cst_210 : f32 to vector<16x128xf32>
    %692 = arith.addf %691, %690 : vector<16x128xf32>
    %693 = arith.divf %691, %692 : vector<16x128xf32>
    %694 = vector.extract_strided_slice %684 {offsets = [16, 0], sizes = [16, 128], strides = [1, 1]} : vector<48x128xf32> to vector<16x128xf32>
    %695 = vector.extract_strided_slice %685 {offsets = [16, 0], sizes = [16, 128], strides = [1, 1]} : vector<48x128xf32> to vector<16x128xf32>
    %696 = arith.addf %694, %695 : vector<16x128xf32>
    %697 = arith.negf %696 : vector<16x128xf32>
    %698 = math.exp %697 : vector<16x128xf32>
    %cst_211 = arith.constant 1.000000e+00 : f32
    %699 = vector.broadcast %cst_211 : f32 to vector<16x128xf32>
    %700 = arith.addf %699, %698 : vector<16x128xf32>
    %701 = arith.divf %699, %700 : vector<16x128xf32>
    %702 = vector.extract_strided_slice %684 {offsets = [32, 0], sizes = [16, 128], strides = [1, 1]} : vector<48x128xf32> to vector<16x128xf32>
    %703 = vector.extract_strided_slice %685 {offsets = [32, 0], sizes = [16, 128], strides = [1, 1]} : vector<48x128xf32> to vector<16x128xf32>
    %704 = arith.addf %703, %32 : vector<16x128xf32>
    %705 = arith.mulf %693, %704 : vector<16x128xf32>
    %706 = arith.addf %702, %705 : vector<16x128xf32>
    %707 = math.tanh %706 : vector<16x128xf32>
    %708 = arith.subf %670, %707 : vector<16x128xf32>
    %709 = arith.mulf %701, %708 : vector<16x128xf32>
    %710 = arith.addf %707, %709 : vector<16x128xf32>
    %c6_212 = arith.constant 6 : index
    %c0_213 = arith.constant 0 : index
    %c0_214 = arith.constant 0 : index
    %711 = vector.load %arg2[%c6_212, %c0_213, %c0_214] : memref<8x8x128xf32, #tpu.memory_space<vmem>>, vector<1x8x128xf32>
    %712 = vector.shape_cast %711 : vector<1x8x128xf32> to vector<8x128xf32>
    %cst_215 = arith.constant dense<0.000000e+00> : vector<48x128xf32>
    %713 = tpu.matmul %2, %712, %cst_215 {dimension_numbers = #tpu.dot_dimension_numbers<[1], [0], [0], [1], [0, 0, 1, 1], [], []>} : vector<48x8xf32>, vector<8x128xf32>, vector<48x128xf32> -> vector<48x128xf32>
    %c6_216 = arith.constant 6 : index
    %c0_217 = arith.constant 0 : index
    %c0_218 = arith.constant 0 : index
    %714 = vector.load %arg12[%c6_216, %c0_217, %c0_218] : memref<8x32x128xf32, #tpu.memory_space<vmem>>, vector<1x32x128xf32>
    %715 = vector.shape_cast %714 : vector<1x32x128xf32> to vector<32x128xf32>
    %cst_219 = arith.constant dense<0.000000e+00> : vector<48x128xf32>
    %716 = tpu.matmul %3, %715, %cst_219 {dimension_numbers = #tpu.dot_dimension_numbers<[1], [0], [0], [1], [0, 0, 1, 1], [], []>} : vector<48x32xf32>, vector<32x128xf32>, vector<48x128xf32> -> vector<48x128xf32>
    %717 = arith.addf %713, %716 : vector<48x128xf32>
    %c6_220 = arith.constant 6 : index
    %c0_221 = arith.constant 0 : index
    %c0_222 = arith.constant 0 : index
    %718 = vector.load %arg1[%c6_220, %c0_221, %c0_222] : memref<8x3x128xf32, #tpu.memory_space<vmem>>, vector<1x3x128xf32>
    %719 = vector.shape_cast %718 : vector<1x3x128xf32> to vector<3x128xf32>
    %720 = vector.extract_strided_slice %719 {offsets = [2, 0], sizes = [1, 128], strides = [1, 1]} : vector<3x128xf32> to vector<1x128xf32>
    %721 = vector.broadcast %720 : vector<1x128xf32> to vector<48x128xf32>
    %722 = arith.mulf %26, %721 : vector<48x128xf32>
    %723 = arith.addf %717, %722 : vector<48x128xf32>
    %724 = arith.addf %723, %29 : vector<48x128xf32>
    %cst_223 = arith.constant dense<0.000000e+00> : vector<48x128xf32>
    %725 = tpu.matmul %1, %710, %cst_223 {dimension_numbers = #tpu.dot_dimension_numbers<[1], [0], [0], [1], [0, 0, 1, 1], [], []>} : vector<48x16xf32>, vector<16x128xf32>, vector<48x128xf32> -> vector<48x128xf32>
    %726 = vector.extract_strided_slice %724 {offsets = [0, 0], sizes = [16, 128], strides = [1, 1]} : vector<48x128xf32> to vector<16x128xf32>
    %727 = vector.extract_strided_slice %725 {offsets = [0, 0], sizes = [16, 128], strides = [1, 1]} : vector<48x128xf32> to vector<16x128xf32>
    %728 = arith.addf %726, %727 : vector<16x128xf32>
    %729 = arith.negf %728 : vector<16x128xf32>
    %730 = math.exp %729 : vector<16x128xf32>
    %cst_224 = arith.constant 1.000000e+00 : f32
    %731 = vector.broadcast %cst_224 : f32 to vector<16x128xf32>
    %732 = arith.addf %731, %730 : vector<16x128xf32>
    %733 = arith.divf %731, %732 : vector<16x128xf32>
    %734 = vector.extract_strided_slice %724 {offsets = [16, 0], sizes = [16, 128], strides = [1, 1]} : vector<48x128xf32> to vector<16x128xf32>
    %735 = vector.extract_strided_slice %725 {offsets = [16, 0], sizes = [16, 128], strides = [1, 1]} : vector<48x128xf32> to vector<16x128xf32>
    %736 = arith.addf %734, %735 : vector<16x128xf32>
    %737 = arith.negf %736 : vector<16x128xf32>
    %738 = math.exp %737 : vector<16x128xf32>
    %cst_225 = arith.constant 1.000000e+00 : f32
    %739 = vector.broadcast %cst_225 : f32 to vector<16x128xf32>
    %740 = arith.addf %739, %738 : vector<16x128xf32>
    %741 = arith.divf %739, %740 : vector<16x128xf32>
    %742 = vector.extract_strided_slice %724 {offsets = [32, 0], sizes = [16, 128], strides = [1, 1]} : vector<48x128xf32> to vector<16x128xf32>
    %743 = vector.extract_strided_slice %725 {offsets = [32, 0], sizes = [16, 128], strides = [1, 1]} : vector<48x128xf32> to vector<16x128xf32>
    %744 = arith.addf %743, %32 : vector<16x128xf32>
    %745 = arith.mulf %733, %744 : vector<16x128xf32>
    %746 = arith.addf %742, %745 : vector<16x128xf32>
    %747 = math.tanh %746 : vector<16x128xf32>
    %748 = arith.subf %710, %747 : vector<16x128xf32>
    %749 = arith.mulf %741, %748 : vector<16x128xf32>
    %750 = arith.addf %747, %749 : vector<16x128xf32>
    %c7_226 = arith.constant 7 : index
    %c0_227 = arith.constant 0 : index
    %c0_228 = arith.constant 0 : index
    %751 = vector.load %arg2[%c7_226, %c0_227, %c0_228] : memref<8x8x128xf32, #tpu.memory_space<vmem>>, vector<1x8x128xf32>
    %752 = vector.shape_cast %751 : vector<1x8x128xf32> to vector<8x128xf32>
    %cst_229 = arith.constant dense<0.000000e+00> : vector<48x128xf32>
    %753 = tpu.matmul %2, %752, %cst_229 {dimension_numbers = #tpu.dot_dimension_numbers<[1], [0], [0], [1], [0, 0, 1, 1], [], []>} : vector<48x8xf32>, vector<8x128xf32>, vector<48x128xf32> -> vector<48x128xf32>
    %c7_230 = arith.constant 7 : index
    %c0_231 = arith.constant 0 : index
    %c0_232 = arith.constant 0 : index
    %754 = vector.load %arg12[%c7_230, %c0_231, %c0_232] : memref<8x32x128xf32, #tpu.memory_space<vmem>>, vector<1x32x128xf32>
    %755 = vector.shape_cast %754 : vector<1x32x128xf32> to vector<32x128xf32>
    %cst_233 = arith.constant dense<0.000000e+00> : vector<48x128xf32>
    %756 = tpu.matmul %3, %755, %cst_233 {dimension_numbers = #tpu.dot_dimension_numbers<[1], [0], [0], [1], [0, 0, 1, 1], [], []>} : vector<48x32xf32>, vector<32x128xf32>, vector<48x128xf32> -> vector<48x128xf32>
    %757 = arith.addf %753, %756 : vector<48x128xf32>
    %c7_234 = arith.constant 7 : index
    %c0_235 = arith.constant 0 : index
    %c0_236 = arith.constant 0 : index
    %758 = vector.load %arg1[%c7_234, %c0_235, %c0_236] : memref<8x3x128xf32, #tpu.memory_space<vmem>>, vector<1x3x128xf32>
    %759 = vector.shape_cast %758 : vector<1x3x128xf32> to vector<3x128xf32>
    %760 = vector.extract_strided_slice %759 {offsets = [2, 0], sizes = [1, 128], strides = [1, 1]} : vector<3x128xf32> to vector<1x128xf32>
    %761 = vector.broadcast %760 : vector<1x128xf32> to vector<48x128xf32>
    %762 = arith.mulf %26, %761 : vector<48x128xf32>
    %763 = arith.addf %757, %762 : vector<48x128xf32>
    %764 = arith.addf %763, %29 : vector<48x128xf32>
    %cst_237 = arith.constant dense<0.000000e+00> : vector<48x128xf32>
    %765 = tpu.matmul %1, %750, %cst_237 {dimension_numbers = #tpu.dot_dimension_numbers<[1], [0], [0], [1], [0, 0, 1, 1], [], []>} : vector<48x16xf32>, vector<16x128xf32>, vector<48x128xf32> -> vector<48x128xf32>
    %766 = vector.extract_strided_slice %764 {offsets = [0, 0], sizes = [16, 128], strides = [1, 1]} : vector<48x128xf32> to vector<16x128xf32>
    %767 = vector.extract_strided_slice %765 {offsets = [0, 0], sizes = [16, 128], strides = [1, 1]} : vector<48x128xf32> to vector<16x128xf32>
    %768 = arith.addf %766, %767 : vector<16x128xf32>
    %769 = arith.negf %768 : vector<16x128xf32>
    %770 = math.exp %769 : vector<16x128xf32>
    %cst_238 = arith.constant 1.000000e+00 : f32
    %771 = vector.broadcast %cst_238 : f32 to vector<16x128xf32>
    %772 = arith.addf %771, %770 : vector<16x128xf32>
    %773 = arith.divf %771, %772 : vector<16x128xf32>
    %774 = vector.extract_strided_slice %764 {offsets = [16, 0], sizes = [16, 128], strides = [1, 1]} : vector<48x128xf32> to vector<16x128xf32>
    %775 = vector.extract_strided_slice %765 {offsets = [16, 0], sizes = [16, 128], strides = [1, 1]} : vector<48x128xf32> to vector<16x128xf32>
    %776 = arith.addf %774, %775 : vector<16x128xf32>
    %777 = arith.negf %776 : vector<16x128xf32>
    %778 = math.exp %777 : vector<16x128xf32>
    %cst_239 = arith.constant 1.000000e+00 : f32
    %779 = vector.broadcast %cst_239 : f32 to vector<16x128xf32>
    %780 = arith.addf %779, %778 : vector<16x128xf32>
    %781 = arith.divf %779, %780 : vector<16x128xf32>
    %782 = vector.extract_strided_slice %764 {offsets = [32, 0], sizes = [16, 128], strides = [1, 1]} : vector<48x128xf32> to vector<16x128xf32>
    %783 = vector.extract_strided_slice %765 {offsets = [32, 0], sizes = [16, 128], strides = [1, 1]} : vector<48x128xf32> to vector<16x128xf32>
    %784 = arith.addf %783, %32 : vector<16x128xf32>
    %785 = arith.mulf %773, %784 : vector<16x128xf32>
    %786 = arith.addf %782, %785 : vector<16x128xf32>
    %787 = math.tanh %786 : vector<16x128xf32>
    %788 = arith.subf %750, %787 : vector<16x128xf32>
    %789 = arith.mulf %781, %788 : vector<16x128xf32>
    %790 = arith.addf %787, %789 : vector<16x128xf32>
    %c0_240 = arith.constant 0 : index
    %c0_241 = arith.constant 0 : index
    %791 = vector.load %arg11[%c0_240, %c0_241] : memref<16x128xf32, #tpu.memory_space<vmem>>, vector<16x128xf32>
    tpu.vector_store %arg11[%c0_240, %c0_241], %790 {strides = array<i32>} : memref<16x128xf32, #tpu.memory_space<vmem>>, vector<16x128xf32>,
    return
  }
  func.func @transform_0(%arg0: i32) -> (i32, i32, i32) {
    %c0_i32 = arith.constant 0 : i32
    %c0_i32_0 = arith.constant 0 : i32
    %c0_i32_1 = arith.constant 0 : i32
    return %c0_i32, %c0_i32_0, %arg0 : i32, i32, i32
  }
  func.func @transform_1(%arg0: i32) -> (i32, i32, i32) {
    %c0_i32 = arith.constant 0 : i32
    %c0_i32_0 = arith.constant 0 : i32
    %c0_i32_1 = arith.constant 0 : i32
    return %c0_i32, %c0_i32_0, %arg0 : i32, i32, i32
  }
  func.func @transform_2(%arg0: i32) -> (i32, i32) {
    %c0_i32 = arith.constant 0 : i32
    %c0_i32_0 = arith.constant 0 : i32
    %c0_i32_1 = arith.constant 0 : i32
    return %c0_i32, %c0_i32_0 : i32, i32
  }
  func.func @transform_3(%arg0: i32) -> (i32, i32) {
    %c0_i32 = arith.constant 0 : i32
    %c0_i32_0 = arith.constant 0 : i32
    %c0_i32_1 = arith.constant 0 : i32
    return %c0_i32, %c0_i32_0 : i32, i32
  }
  func.func @transform_4(%arg0: i32) -> (i32, i32) {
    %c0_i32 = arith.constant 0 : i32
    %c0_i32_0 = arith.constant 0 : i32
    %c0_i32_1 = arith.constant 0 : i32
    return %c0_i32, %c0_i32_0 : i32, i32
  }
  func.func @transform_5(%arg0: i32) -> (i32, i32) {
    %c0_i32 = arith.constant 0 : i32
    %c0_i32_0 = arith.constant 0 : i32
    %c0_i32_1 = arith.constant 0 : i32
    return %c0_i32, %c0_i32_0 : i32, i32
  }
  func.func @transform_6(%arg0: i32) -> (i32, i32) {
    %c0_i32 = arith.constant 0 : i32
    %c0_i32_0 = arith.constant 0 : i32
    %c0_i32_1 = arith.constant 0 : i32
    return %c0_i32, %c0_i32_0 : i32, i32
  }
  func.func @transform_7(%arg0: i32) -> (i32, i32) {
    %c0_i32 = arith.constant 0 : i32
    %c0_i32_0 = arith.constant 0 : i32
    %c0_i32_1 = arith.constant 0 : i32
    return %c0_i32, %c0_i32_0 : i32, i32
  }
  func.func @transform_8(%arg0: i32) -> (i32, i32) {
    %c0_i32 = arith.constant 0 : i32
    %c0_i32_0 = arith.constant 0 : i32
    %c0_i32_1 = arith.constant 0 : i32
    return %c0_i32, %c0_i32_0 : i32, i32
  }
  func.func @transform_9(%arg0: i32) -> (i32, i32) {
    %c0_i32 = arith.constant 0 : i32
    %c0_i32_0 = arith.constant 0 : i32
    %c0_i32_1 = arith.constant 0 : i32
    return %c0_i32, %c0_i32_0 : i32, i32
  }
  func.func @transform_10(%arg0: i32) -> (i32, i32) {
    %c0_i32 = arith.constant 0 : i32
    %c0_i32_0 = arith.constant 0 : i32
    return %c0_i32, %arg0 : i32, i32
  }
}

</mosaic_0001>

<bundles_post_ra>
// kernel: tpu_custom_call.1
= control target key start
LH: loop header
LB: loop body
LE: loop exit
PB: predicated region body
PF: predicated region fallthrough
CT: control target
= control target key end

     0   :  { %v8134_v1 = vmov 0.0   ;;  %v8135_v2 = vmov 3   ;;  %vm541_vm0 = vcmask 261120   ;;  %v10929_v4 = vmov 1   ;;  %s10916_s0 = inlined_call_operand.vmem [shape: f32[8,3,128], index: 0, kind: input, shape index: {}]   ;;  %s10917_s1 = inlined_call_operand.vmem [shape: f32[8,8,128], index: 1, kind: input, shape index: {}]   ;;  %s10918_s2 = inlined_call_operand.vmem [shape: f32[96,5], index: 2, kind: input, shape index: {}]   ;;  %s10919_s3 = inlined_call_operand.vmem [shape: f32[96,32], index: 3, kind: input, shape index: {}]   ;;  %s10920_s4 = inlined_call_operand.vmem [shape: f32[32,1], index: 4, kind: input, shape index: {}]   ;;  %s10921_s5 = inlined_call_operand.vmem [shape: f32[48,8], index: 5, kind: input, shape index: {}]   ;;  %s10922_s6 = inlined_call_operand.vmem [shape: f32[48,32], index: 6, kind: input, shape index: {}]   ;;  %s10923_s7 = inlined_call_operand.vmem [shape: f32[48,2], index: 7, kind: input, shape index: {}]   ;;  %s10924_s8 = inlined_call_operand.vmem [shape: f32[48,16], index: 8, kind: input, shape index: {}]   ;;  %s10925_s9 = inlined_call_operand.vmem [shape: f32[16,1], index: 9, kind: input, shape index: {}]   ;;  %s10926_s10 = inlined_call_operand.hbm [shape: f32[16,128], index: 10, kind: output, shape index: {}]  }
   0x1   :  { %v8201_v0 = vld [vmem:[%s10918_s2] sm:$0xff]  ;;  %6707 = vmatprep.subr.mxu0 %v8134_v1  ;;  %7546 = vset.pattern.permute.xlu0 %v8135_v2  ;;  %v8213_v5 = vld [vmem:[%s10919_s3 + $0x8] sm:$0xff]  ;;  %v8220_v6 = vld [vmem:[%s10919_s3 + $0x10] sm:$0xff] }
   0x2   :  { %v8207_v3 = vld [vmem:[%s10919_s3] sm:$0xff]  ;;  %7542 = vset.pattern.permute.xlu1 %v10929_v4  ;;  %6708 = vmatpush3.msra.mxu0 %v8134_v1  ;;  %11184 = vst [vmem:[#allocation7_spill] sm:$0xff] %v8213_v5  ;;  %11185 = vst [vmem:[#allocation8_spill] sm:$0xff] %v8220_v6  ;;  %v67_v8 = vld [vmem:[%s10918_s2 + $0x8] sm:$0xff] }
   0x3   :  { %11183 = vst [vmem:[#allocation6_spill] sm:$0xff] %v8207_v3  ;;  %235 = vperm.xlu0 %7546, %v8201_v0   ;;  %139 = vperm.xlu1 %7542, %v8201_v0   ;;  %v8227_v7 = vld [vmem:[%s10918_s2 + $0x20] sm:$0xff]  ;;  %v8241_v9 = vld [vmem:[%s10919_s3 + $0x18] sm:$0xff] }
   0x4   :  { %6709 = vmatprep.mubr.msk.f32.mxu0 %vm541_vm0, %v8207_v3  ;;  %6735 = vmatprep.mubr.msk.f32.mxu1 %vm541_vm0, %v8207_v3  ;;  %11186 = vst [vmem:[#allocation9_spill] sm:$0xff] %v8241_v9  ;;  %v8247_v10 = vld [vmem:[%s10919_s3 + $0x20] sm:$0xff] }
   0x5   :  { %6710 = vmatmul.mubr.msk.f32.vlgmr.msra.gmra.mrb[0].mxu0 %vm541_vm0, %v8213_v5  ;;  %11187 = vst [vmem:[#allocation10_spill] sm:$0xff] %v8247_v10 }
   0x6   :  { %6712 = vmatprep.mubr.msk.f32.mxu0 %vm541_vm0, %v8220_v6 }
   0x7   :  { %251 = vperm.xlu0 %7546, %v8227_v7   ;;  %143 = vperm.xlu1 %7542, %v67_v8  }
   0x9   :  { %6713 = vmatmul.mubr.msk.f32.gmra.mrb[2].mxu0 %vm541_vm0, %v8241_v9 }
   0xa   :  { %15 = vsyncpa [#allocation4], 0  ;;  %6715 = vmatprep.mubr.msk.f32.mxu0 %vm541_vm0, %v8247_v10  ;;  %v8256_v11 = vld [vmem:[%s10919_s3 + $0x28] sm:$0xff]  ;;  %v8137_v12 = vmov 4   ;;  %v8138_v13 = vmov 2   ;;  %v8263_v14 = vld [vmem:[%s10919_s3 + $0x30] sm:$0xff] }
   0xb   :  { %11188 = vst [vmem:[#allocation11_spill] sm:$0xff] %v8256_v11  ;;  %7556 = vset.pattern.permute.xlu0 %v8137_v12  ;;  %7543 = vset.pattern.permute.xlu1 %v8138_v13  ;;  %11189 = vst [vmem:[#allocation12_spill] sm:$0xff] %v8263_v14  ;;  %v69_v15 = vld [vmem:[%s10918_s2 + $0x18] sm:$0xff]  ;;  %v68_v16 = vld [vmem:[%s10918_s2 + $0x10] sm:$0xff]  ;;  %v10927_v19 = vmov 0   ;;  %vm3215_vm1 = vcmask 64512  }
   0xc   :  { %283 = vperm.xlu0 %7556, %v8201_v0   ;;  %191 = vperm.xlu1 %7543, %v67_v8   ;;  %v8279_v17 = vld [vmem:[%s10919_s3 + $0x38] sm:$0xff]  ;;  %v8284_v18 = vld [vmem:[%s10919_s3 + $0x40] sm:$0xff]  ;;  %v8294_v20 = vld [vmem:[%s10919_s3 + $0x48] sm:$0xff]  ;;  %vm3352_vm2 = vcmask 130048  }
   0xd   :  { %6716 = vmatmul.mubr.msk.f32.gmra.mrb[4].mxu0 %vm541_vm0, %v8256_v11  ;;  %11190 = vst [vmem:[#allocation13_spill] sm:$0xff] %v8279_v17  ;;  %11191 = vst [vmem:[#allocation14_spill] sm:$0xff] %v8284_v18  ;;  %v8299_v21 = vld [vmem:[%s10919_s3 + $0x50] sm:$0xff]  ;;  %v8306_v22 = vld [vmem:[%s10918_s2 + $0x38] sm:$0xff] }
   0xe   :  { %6718 = vmatprep.mubr.msk.f32.mxu0 %vm541_vm0, %v8263_v14  ;;  %11192 = vst [vmem:[#allocation15_spill] sm:$0xff] %v8294_v20  ;;  %11193 = vst [vmem:[#allocation16_spill] sm:$0xff] %v8299_v21  ;;  %v8315_v23 = vld [vmem:[%s10919_s3 + $0x58] sm:$0xff]  ;;  %v71_v24 = vld [vmem:[%s10918_s2 + $0x28] sm:$0xff] }
   0xf   :  { %11194 = vst [vmem:[#allocation17_spill] sm:$0xff] %v8315_v23  ;;  %v8334_v25 = vld [vmem:[%s10918_s2 + $0x48] sm:$0xff]  ;;  %v8341_v26 = vld [vmem:[%s10918_s2 + $0x58] sm:$0xff]  ;;  %v8355_v27 = vld [vmem:[%s10918_s2 + $0x40] sm:$0xff] }
  0x10   :  { %295 = vperm.xlu0 %7556, %v69_v15   ;;  %7544 = vset.pattern.permute.xlu1 %v10927_v19  ;;  %v72_v28 = vld [vmem:[%s10918_s2 + $0x30] sm:$0xff]  ;;  %v330_v37 = vld [vmem:[%s10920_s4] sm:$0xff]  ;;  %v331_v40 = vld [vmem:[%s10920_s4 + $0x8] sm:$0xff] }
  0x11   :  { %90 = vperm.xlu1 %7544, %v68_v16   ;;  %6719 = vmatmul.mubr.msk.f32.gmra.mrb[6].mxu0 %vm541_vm0, %v8279_v17  ;;  %v76_v29 = vld [vmem:[%s10918_s2 + $0x50] sm:$0xff]  ;;  %v333_v49 = vld [vmem:[%s10920_s4 + $0x18] sm:$0xff] }
  0x12   :  { %6721 = vmatprep.mubr.msk.f32.mxu0 %vm541_vm0, %v8284_v18  ;;  %v332_v46 = vld [vmem:[%s10920_s4 + $0x10] sm:$0xff] }
  0x14   :  { %299 = vperm.xlu0 %7556, %v8227_v7  }
  0x15   :  { %7545 = vset.pattern.permute.xlu1 %v10929_v4  ;;  %6722 = vmatmul.mubr.msk.f32.gmra.mrb[8].mxu0 %vm541_vm0, %v8294_v20 }
  0x16   :  { %147 = vperm.xlu1 %7545, %v68_v16   ;;  %6724 = vmatprep.mubr.msk.f32.mxu0 %vm541_vm0, %v8299_v21 }
  0x18   :  { %311 = vperm.xlu0 %7556, %v8306_v22  }
  0x19   :  { %6725 = vmatmul.mubr.msk.f32.gmra.mrb[10].mxu0 %vm541_vm0, %v8315_v23 }
  0x1a   :  { %151 = vperm.xlu1 %7545, %v69_v15   ;;  %6761 = vmatprep.mubr.msk.f32.mxu0 %vm541_vm0, %v8207_v3  ;;  %v6018_v3 = vld [vmem:[%s10916_s0 + $0x1c] sm:$0x7] }
  0x1c   :  { %7561 = vset.pattern.permute.xlu0 %v10927_v19 }
  0x1d   :  { %80 = vperm.xlu0 %7561, %v8201_v0  }
  0x1e   :  { %7547 = vset.pattern.permute.xlu1 %v8135_v2 }
  0x1f   :  { %239 = vperm.xlu1 %7547, %v67_v8  }
  0x21   :  { %85 = vperm.xlu0 %7561, %v67_v8  }
  0x23   :  { %7548 = vset.pattern.permute.xlu1 %v8138_v13 }
  0x24   :  { %195 = vperm.xlu1 %7548, %v68_v16  }
  0x25   :  { %95 = vperm.xlu0 %7561, %v69_v15  }
  0x28   :  { %7549 = vset.pattern.permute.xlu1 %v8135_v2 }
  0x29   :  { %105 = vperm.xlu0 %7561, %v71_v24   ;;  %243 = vperm.xlu1 %7549, %v68_v16  }
  0x2d   :  { %115 = vperm.xlu0 %7561, %v8306_v22   ;;  %247 = vperm.xlu1 %7549, %v69_v15  }
  0x31   :  { %125 = vperm.xlu0 %7561, %v8334_v25   ;;  %7550 = vset.pattern.permute.xlu1 %v8137_v12 }
  0x32   :  { %287 = vperm.xlu1 %7550, %v67_v8  }
  0x35   :  { %135 = vperm.xlu0 %7561, %v8341_v26  }
  0x36   :  { %291 = vperm.xlu1 %7550, %v68_v16   ;;  %v429_v16 = vlaneseq }
  0x39   :  { %7566 = vset.pattern.permute.xlu0 %v8138_v13 }
  0x3a   :  { %187 = vperm.xlu0 %7566, %v8201_v0   ;;  %7551 = vset.pattern.permute.xlu1 %v10927_v19 }
  0x3b   :  { %100 = vperm.xlu1 %7551, %v8227_v7  }
  0x3e   :  { %199 = vperm.xlu0 %7566, %v69_v15  }
  0x3f   :  { %7552 = vset.pattern.permute.xlu1 %v10929_v4 }
  0x40   :  { %155 = vperm.xlu1 %7552, %v8227_v7  }
  0x42   :  { %203 = vperm.xlu0 %7566, %v8227_v7  }
  0x44   :  { %159 = vperm.xlu1 %7552, %v71_v24  }
  0x46   :  { %215 = vperm.xlu0 %7566, %v8306_v22  }
  0x48   :  { %7553 = vset.pattern.permute.xlu1 %v8138_v13 }
  0x49   :  { %207 = vperm.xlu1 %7553, %v71_v24  }
  0x4a   :  { %219 = vperm.xlu0 %7566, %v8355_v27  }
  0x4d   :  { %7554 = vset.pattern.permute.xlu1 %v10927_v19 }
  0x4e   :  { %110 = vperm.xlu1 %7554, %v72_v28   ;;  %231 = vperm.xlu0 %7566, %v8341_v26  }
  0x52   :  { %7555 = vset.pattern.permute.xlu1 %v10929_v4  ;;  %7570 = vset.pattern.permute.xlu0 %v8135_v2 }
  0x53   :  { %163 = vperm.xlu1 %7555, %v72_v28   ;;  %267 = vperm.xlu0 %7570, %v8355_v27  }
  0x57   :  { %167 = vperm.xlu1 %7555, %v8306_v22   ;;  %275 = vperm.xlu0 %7570, %v76_v29  }
  0x5b   :  { %7557 = vset.pattern.permute.xlu1 %v8135_v2  ;;  %7574 = vset.pattern.permute.xlu0 %v8137_v12 }
  0x5c   :  { %255 = vperm.xlu1 %7557, %v71_v24   ;;  %319 = vperm.xlu0 %7574, %v8334_v25  }
  0x60   :  { %7558 = vset.pattern.permute.xlu1 %v8138_v13  ;;  %323 = vperm.xlu0 %7574, %v76_v29  }
  0x61   :  { %211 = vperm.xlu1 %7558, %v72_v28  }
  0x64   :  { %7577 = vset.pattern.permute.xlu0 %v10927_v19 }
  0x65   :  { %7559 = vset.pattern.permute.xlu1 %v8135_v2 }
  0x66   :  { %259 = vperm.xlu1 %7559, %v72_v28  }
  0x6a   :  { %263 = vperm.xlu1 %7559, %v8306_v22  }
  0x6e   :  { %7560 = vset.pattern.permute.xlu1 %v8137_v12 }
  0x6f   :  { %303 = vperm.xlu1 %7560, %v71_v24  }
  0x73   :  { %307 = vperm.xlu1 %7560, %v72_v28  }
  0x77   :  { %7562 = vset.pattern.permute.xlu1 %v10927_v19 }
  0x78   :  { %120 = vperm.xlu1 %7562, %v8355_v27  }
  0x7c   :  { %7563 = vset.pattern.permute.xlu1 %v10929_v4 }
  0x7d   :  { %171 = vperm.xlu1 %7563, %v8355_v27  }
  0x81   :  { %175 = vperm.xlu1 %7563, %v8334_v25  }
  0x82   :  { %v8384_v30 = vpop.permute.xlu1 %139  ;;  %v8409_v38 = vpop.permute.xlu0 %235 }
  0x83   :  { %11195 = vst [vmem:[#allocation18_spill] sm:$0xff] %v8384_v30  ;;  %11202 = vst [vmem:[#allocation25_spill] sm:$0xff] %v8409_v38 }
  0x85   :  { %7564 = vset.pattern.permute.xlu1 %v8138_v13 }
  0x86   :  { %223 = vperm.xlu1 %7564, %v8334_v25   ;;  %v8388_v31 = vpop.permute.xlu1 %143  ;;  %v8417_v41 = vpop.permute.xlu0 %251 }
  0x87   :  { %11196 = vst [vmem:[#allocation19_spill] sm:$0xff] %v8388_v31  ;;  %11204 = vst [vmem:[#allocation27_spill] sm:$0xff] %v8417_v41 }
  0x8a   :  { %7565 = vset.pattern.permute.xlu1 %v10927_v19 }
  0x8b   :  { %130 = vperm.xlu1 %7565, %v76_v29   ;;  %v8391_v32 = vpop.permute.xlu1 %191  ;;  %v8425_v44 = vpop.permute.xlu0 %283 }
  0x8c   :  { %11197 = vst [vmem:[#allocation20_spill] sm:$0xff] %v8391_v32  ;;  %11207 = vst [vmem:[#allocation30_spill] sm:$0xff] %v8425_v44 }
  0x8f   :  { %7567 = vset.pattern.permute.xlu1 %v10929_v4  ;;  %v8434_v47 = vpop.permute.xlu0 %295 }
  0x90   :  { %179 = vperm.xlu1 %7567, %v76_v29   ;;  %v8394_v33 = vpop.permute.xlu1 %90  ;;  %11209 = vst [vmem:[#allocation32_spill] sm:$0xff] %v8434_v47 }
  0x91   :  { %11198 = vst [vmem:[#allocation21_spill] sm:$0xff] %v8394_v33 }
  0x93   :  { %v8442_v50 = vpop.permute.xlu0 %299 }
  0x94   :  { %183 = vperm.xlu1 %7567, %v8341_v26  }
  0x95   :  { %v8397_v34 = vpop.permute.xlu1 %147 }
  0x96   :  { %11199 = vst [vmem:[#allocation22_spill] sm:$0xff] %v8397_v34 }
  0x97   :  { %v8450_v53 = vpop.permute.xlu0 %311 }
  0x98   :  { %7568 = vset.pattern.permute.xlu1 %v8135_v2 }
  0x99   :  { %271 = vperm.xlu1 %7568, %v8334_v25   ;;  %v8401_v35 = vpop.permute.xlu1 %151 }
  0x9a   :  { %11200 = vst [vmem:[#allocation23_spill] sm:$0xff] %v8401_v35 }
  0x9c   :  { %v8455_v55 = vpop.permute.xlu0 %80 }
  0x9d   :  { %7569 = vset.pattern.permute.xlu1 %v8138_v13  ;;  %11214 = vst [vmem:[#allocation37_spill] sm:$0xff] %v8455_v55 }
  0x9e   :  { %227 = vperm.xlu1 %7569, %v76_v29   ;;  %v8404_v36 = vpop.permute.xlu1 %239 }
  0x9f   :  { %11201 = vst [vmem:[#allocation24_spill] sm:$0xff] %v8404_v36 }
  0xa0   :  { %v8459_v57 = vpop.permute.xlu0 %85 }
  0xa1   :  { %11216 = vst [vmem:[#allocation39_spill] sm:$0xff] %v8459_v57 }
  0xa2   :  { %7571 = vset.pattern.permute.xlu1 %v10927_v19 }
  0xa3   :  { %336 = vperm.xlu1 %7571, %v330_v37   ;;  %v8412_v39 = vpop.permute.xlu1 %195 }
  0xa4   :  { %11203 = vst [vmem:[#allocation26_spill] sm:$0xff] %v8412_v39  ;;  %v8463_v59 = vpop.permute.xlu0 %95 }
  0xa5   :  { %11218 = vst [vmem:[#allocation41_spill] sm:$0xff] %v8463_v59 }
  0xa7   :  { %341 = vperm.xlu1 %7571, %v331_v40  }
  0xa8   :  { %v8419_v42 = vpop.permute.xlu1 %243  ;;  %v8469_v62 = vpop.permute.xlu0 %105 }
  0xa9   :  { %11205 = vst [vmem:[#allocation28_spill] sm:$0xff] %v8419_v42  ;;  %11221 = vst [vmem:[#allocation44_spill] sm:$0xff] %v8469_v62 }
  0xab   :  { %7572 = vset.pattern.permute.xlu1 %v8135_v2 }
  0xac   :  { %279 = vperm.xlu1 %7572, %v8341_v26   ;;  %v8423_v43 = vpop.permute.xlu1 %247  ;;  %v8477_v8 = vpop.permute.xlu0 %115 }
  0xad   :  { %11206 = vst [vmem:[#allocation29_spill] sm:$0xff] %v8423_v43  ;;  %11223 = vst [vmem:[#allocation46_spill] sm:$0xff] %v8477_v8 }
  0xb0   :  { %7573 = vset.pattern.permute.xlu1 %v8137_v12  ;;  %v8485_v22 = vpop.permute.xlu0 %125 }
  0xb1   :  { %315 = vperm.xlu1 %7573, %v8355_v27   ;;  %v8429_v45 = vpop.permute.xlu1 %287  ;;  %11225 = vst [vmem:[#allocation48_spill] sm:$0xff] %v8485_v22  ;;  %v8493_v27 = vshrl.u32 %v429_v16, 7 }
  0xb2   :  { %11208 = vst [vmem:[#allocation31_spill] sm:$0xff] %v8429_v45 }
  0xb3   :  { %11226 = vst [vmem:[#allocation49_spill] sm:$0xff] %v8493_v27  ;;  %v8512_v16 = vsub.s32 0, %v8493_v27 }
  0xb4   :  { %v8501_v40 = vpop.permute.xlu0 %135 }
  0xb5   :  { %7575 = vset.pattern.permute.xlu1 %v10927_v19  ;;  %v8437_v48 = vpop.permute.xlu1 %291  ;;  %11228 = vst [vmem:[#allocation51_spill] sm:$0xff] %v8501_v40  ;;  %11231 = vst [vmem:[#allocation54_spill] sm:$0xff] %v8512_v16  ;;  %v8530_v17 = vrot.slane %v6018_v3, %v8512_v16 }
  0xb6   :  { %11210 = vst [vmem:[#allocation33_spill] sm:$0xff] %v8437_v48  ;;  %346 = vperm.xlu1 %7575, %v332_v46   ;;  %v8504_v46 = vsub.s32 1, %v8493_v27 }
  0xb8   :  { %11229 = vst [vmem:[#allocation52_spill] sm:$0xff] %v8504_v46  ;;  %v8543_v9 = vrot.slane %v6018_v3, %v8504_v46 }
  0xb9   :  { %v8527_v18 = vpop.permute.xlu0 %187 }
  0xba   :  { %351 = vperm.xlu1 %7575, %v333_v49   ;;  %v8444_v51 = vpop.permute.xlu1 %100  ;;  %v426_v49 = vld [vmem:[%s10916_s0] sm:$0x7]  ;;  %11234 = vst [vmem:[#allocation57_spill] sm:$0xff] %v8527_v18  ;;  %v477_v10 = vmul.f32 %v8530_v17, %v8527_v18  ;;  %v478_v18 = vmul.f32 %v8530_v17, %v8391_v32  ;;  %v506_v3 = vmul.f32 %v8543_v9, %v8404_v36 }
  0xbb   :  { %11211 = vst [vmem:[#allocation34_spill] sm:$0xff] %v8444_v51  ;;  %v8522_v21 = vrot.slane %v426_v49, %v8512_v16  ;;  %v8525_v20 = vrot.slane %v426_v49, %v8504_v46 }
  0xbd   :  { %v433_v27 = vmul.f32 %v8522_v21, %v8455_v55  ;;  %v449_v11 = vmul.f32 %v8525_v20, %v8384_v30  ;;  %v434_v49 = vmul.f32 %v8522_v21, %v8459_v57  ;;  %v450_v16 = vmul.f32 %v8525_v20, %v8388_v31 }
  0xbe   :  { %7576 = vset.pattern.permute.xlu1 %v8137_v12  ;;  %v505_v55 = vmul.f32 %v8543_v9, %v8409_v38  ;;  %v8560_v38 = vpop.permute.xlu0 %199 }
  0xbf   :  { %327 = vperm.xlu1 %7576, %v8341_v26   ;;  %v8448_v52 = vpop.permute.xlu1 %155  ;;  %v461_v6 = vadd.f32 %v449_v11, %v433_v27  ;;  %v462_v30 = vadd.f32 %v450_v16, %v434_v49  ;;  %11237 = vst [vmem:[#allocation60_spill] sm:$0xff] %v8560_v38 }
  0xc0   :  { %11212 = vst [vmem:[#allocation35_spill] sm:$0xff] %v8448_v52 }
  0xc1   :  { %v489_v5 = vadd.f32 %v477_v10, %v461_v6  ;;  %v490_v40 = vadd.f32 %v478_v18, %v462_v30  ;;  %v436_v30 = vmul.f32 %v8522_v21, %v8463_v59 }
  0xc3   :  { %v8452_v54 = vpop.permute.xlu1 %159  ;;  %7578 = vset.pattern.permute.xlu1 %v10927_v19  ;;  %v518_v27 = vadd.f32 %v506_v3, %v490_v40  ;;  %v8575_v40 = vpop.permute.xlu0 %203 }
  0xc4   :  { %11213 = vst [vmem:[#allocation36_spill] sm:$0xff] %v8452_v54  ;;  %11239 = vst [vmem:[#allocation62_spill] sm:$0xff] %v8575_v40 }
  0xc5   :  { %v530_v16 = vadd.f32 %v518_v27, %v8429_v45 }
  0xc8   :  { %v8457_v56 = vpop.permute.xlu1 %207 }
  0xc9   :  { %11215 = vst [vmem:[#allocation38_spill] sm:$0xff] %v8457_v56 }
  0xcd   :  { %v8461_v58 = vpop.permute.xlu1 %110 }
  0xce   :  { %11217 = vst [vmem:[#allocation40_spill] sm:$0xff] %v8461_v58 }
  0xd2   :  { %v8465_v60 = vpop.permute.xlu1 %163 }
  0xd3   :  { %11219 = vst [vmem:[#allocation42_spill] sm:$0xff] %v8465_v60 }
  0xd6   :  { %v8467_v61 = vpop.permute.xlu1 %167 }
  0xd7   :  { %11220 = vst [vmem:[#allocation43_spill] sm:$0xff] %v8467_v61 }
  0xd8   :  { %v6711_v63 = vpop.f32.mrb[0].mxu0 }
  0xd9   :  { %v644_v0 = vpop.f32.mrb[1].mxu0  ;;  %v704_v49 = vadd.f32 %v6711_v63, %v530_v16  ;;  %v454_v63 = vmul.f32 %v8525_v20, %v8452_v54  ;;  %v482_v16 = vmul.f32 %v8530_v17, %v8457_v56 }
  0xdb   :  { %v8471_v1 = vpop.permute.xlu1 %255  ;;  %v6032_v3 = vmul.f32 -1.442695, %v704_v49 }
  0xdc   :  { %11222 = vst [vmem:[#allocation45_spill] sm:$0xff] %v8471_v1  ;;  %v8473_v2 = vpop.f32.mrb[2].mxu0  ;;  %v510_v49 = vmul.f32 %v8543_v9, %v8471_v1 }
  0xdd   :  { %v8475_v7 = vpop.f32.mrb[3].mxu0 }
  0xe0   :  { %v8479_v12 = vpop.f32.mrb[4].mxu0  ;;  %v8481_v13 = vpop.permute.xlu1 %211 }
  0xe1   :  { %11224 = vst [vmem:[#allocation47_spill] sm:$0xff] %v8481_v13  ;;  %v8483_v15 = vpop.f32.mrb[5].mxu0 }
  0xe4   :  { %v8487_v24 = vpop.f32.mrb[6].mxu0 }
  0xe5   :  { %v8489_v25 = vpop.permute.xlu1 %259  ;;  %v8491_v26 = vpop.f32.mrb[7].mxu0 }
  0xe8   :  { %v8495_v28 = vpop.f32.mrb[8].mxu0 }
  0xe9   :  { %v8497_v29 = vpop.permute.xlu1 %263  ;;  %v8499_v37 = vpop.f32.mrb[9].mxu0 }
  0xea   :  { %11227 = vst [vmem:[#allocation50_spill] sm:$0xff] %v8497_v29 }
  0xec   :  { %v8509_v19 = vpop.f32.mrb[10].mxu0 }
  0xed   :  { %11230 = vst [vmem:[#allocation53_spill] sm:$0xff] %v8509_v19  ;;  %v8514_v4 = vpop.f32.mrb[11].mxu0 }
  0xee   :  { %11232 = vst [vmem:[#allocation55_spill] sm:$0xff] %v8514_v4  ;;  %v8519_v23 = vpop.permute.xlu1 %303  ;;  %v517_v4 = vadd.f32 %v505_v55, %v489_v5  ;;  %v451_v5 = vmul.f32 %v8525_v20, %v8397_v34  ;;  %v479_v55 = vmul.f32 %v8530_v17, %v8412_v39  ;;  %v437_v39 = vmul.f32 %v8522_v21, %v8444_v51 }
  0xef   :  { %11233 = vst [vmem:[#allocation56_spill] sm:$0xff] %v8519_v23 }
  0xf0   :  { %v529_v11 = vadd.f32 %v517_v4, %v8425_v44  ;;  %v435_v4 = vmul.f32 %v8522_v21, %v8394_v33  ;;  %v480_v44 = vmul.f32 %v8530_v17, %v8560_v38 }
  0xf2   :  { %v8534_v14 = vpop.permute.xlu1 %307  ;;  %v703_v10 = vadd.f32 %v644_v0, %v529_v11  ;;  %v438_v0 = vmul.f32 %v8522_v21, %v8469_v62  ;;  %v452_v11 = vmul.f32 %v8525_v20, %v8401_v35  ;;  %v463_v27 = vadd.f32 %v451_v5, %v435_v4 }
  0xf3   :  { %v453_v5 = vmul.f32 %v8525_v20, %v8448_v52 }
  0xf4   :  { %v6031_v31 = vmul.f32 -1.442695, %v703_v10  ;;  %v507_v10 = vmul.f32 %v8543_v9, %v8419_v42  ;;  %v464_v62 = vadd.f32 %v452_v11, %v436_v30  ;;  %v491_v36 = vadd.f32 %v479_v55, %v463_v27 }
  0xf5   :  { %v466_v54 = vadd.f32 %v454_v63, %v438_v0  ;;  %v508_v55 = vmul.f32 %v8543_v9, %v8423_v43  ;;  %v465_v0 = vadd.f32 %v453_v5, %v437_v39  ;;  %v481_v63 = vmul.f32 %v8530_v17, %v8575_v40 }
  0xf6   :  { %7588 = vpow2.f32 %v6031_v31  ;;  %v8589_v31 = vpop.permute.xlu0 %215  ;;  %v519_v4 = vadd.f32 %v507_v10, %v491_v36  ;;  %v492_v56 = vadd.f32 %v480_v44, %v464_v62  ;;  %v455_v39 = vmul.f32 %v8525_v20, %v8465_v60 }
  0xf7   :  { %v8549_v19 = vpop.permute.xlu1 %120  ;;  %7590 = vpow2.f32 %v6032_v3  ;;  %v494_v42 = vadd.f32 %v482_v16, %v466_v54  ;;  %v493_v10 = vadd.f32 %v481_v63, %v465_v0  ;;  %v509_v16 = vmul.f32 %v8543_v9, %v8417_v41 }
  0xf8   :  { %v531_v33 = vadd.f32 %v519_v4, %v8437_v48  ;;  %v520_v44 = vadd.f32 %v508_v55, %v492_v56  ;;  %v483_v63 = vmul.f32 %v8530_v17, %v8481_v13 }
  0xf9   :  { %v522_v3 = vadd.f32 %v510_v49, %v494_v42  ;;  %v521_v0 = vadd.f32 %v509_v16, %v493_v10 }
  0xfa   :  { %v8604_v11 = vpop.permute.xlu0 %219  ;;  %v705_v36 = vadd.f32 %v8475_v7, %v531_v33  ;;  %v532_v49 = vadd.f32 %v520_v44, %v8434_v47  ;;  %v439_v7 = vmul.f32 %v8522_v21, %v8461_v58  ;;  %v440_v44 = vmul.f32 %v8522_v21, %v8477_v8 }
  0xfb   :  { %v534_v54 = vadd.f32 %v522_v3, %v8519_v23  ;;  %v533_v16 = vadd.f32 %v521_v0, %v8442_v50 }
  0xfc   :  { %v8553_v57 = vpop.permute.xlu1 %171  ;;  %v6033_v4 = vmul.f32 -1.442695, %v705_v36  ;;  %v706_v55 = vadd.f32 %v8473_v2, %v532_v49  ;;  %v511_v2 = vmul.f32 %v8543_v9, %v8489_v25 }
  0xfd   :  { %11235 = vst [vmem:[#allocation58_spill] sm:$0xff] %v8553_v57  ;;  %v732_v33 = vadd.f32 %v8479_v12, %v534_v54  ;;  %v456_v54 = vmul.f32 %v8525_v20, %v8467_v61 }
  0xfe   :  { %v8616_v56 = vpop.permute.xlu0 %231  ;;  %7592 = vpow2.f32 %v6033_v4  ;;  %v6034_v10 = vmul.f32 -1.442695, %v706_v55  ;;  %v484_v4 = vmul.f32 %v8530_v17, %v8589_v31  ;;  %v442_v55 = vmul.f32 %v8522_v21, %v8485_v22 }
  0xff   :  { %11240 = vst [vmem:[#allocation63_spill] sm:$0xff] %v8616_v56  ;;  %v6036_v12 = vmul.f32 -1.442695, %v732_v33  ;;  %v468_v33 = vadd.f32 %v456_v54, %v440_v44 }
 0x100   :  { %v8558_v6 = vpop.permute.xlu1 %175  ;;  %v7589_v62 = vpop.eup %7588 }
 0x101   :  { %11236 = vst [vmem:[#allocation59_spill] sm:$0xff] %v8558_v6  ;;  %v7591_v5 = vpop.eup %7590  ;;  %v719_v42 = vadd.f32 1.0, %v7589_v62  ;;  %v467_v62 = vadd.f32 %v455_v39, %v439_v7  ;;  %v458_v39 = vmul.f32 %v8525_v20, %v8558_v6 }
 0x102   :  { %v720_v36 = vadd.f32 1.0, %v7591_v5  ;;  %v8632_v23 = vpop.permute.xlu0 %267 }
 0x103   :  { %7594 = vrcp.f32 %v719_v42  ;;  %v495_v49 = vadd.f32 %v483_v63, %v467_v62  ;;  %11242 = vst [vmem:[#allocation65_spill] sm:$0xff] %v8632_v23  ;;  %v731_v42 = vadd.f32 %v8483_v15, %v533_v16  ;;  %v512_v63 = vmul.f32 %v8543_v9, %v8497_v29 }
 0x104   :  { %7596 = vrcp.f32 %v720_v36  ;;  %v470_v6 = vadd.f32 %v458_v39, %v442_v55  ;;  %v457_v16 = vmul.f32 %v8525_v20, %v8553_v57  ;;  %v441_v39 = vmul.f32 %v8522_v21, %v8549_v19 }
 0x105   :  { %v8565_v18 = vpop.permute.xlu1 %223  ;;  %7598 = vpow2.f32 %v6036_v12  ;;  %v523_v7 = vadd.f32 %v511_v2, %v495_v49  ;;  %v6035_v44 = vmul.f32 -1.442695, %v731_v42  ;;  %v496_v12 = vadd.f32 %v484_v4, %v468_v33 }
 0x106   :  { %11238 = vst [vmem:[#allocation61_spill] sm:$0xff] %v8565_v18  ;;  %v486_v0 = vmul.f32 %v8530_v17, %v8565_v18  ;;  %7600 = vpow2.f32 %v6034_v10  ;;  %v8648_v62 = vpop.permute.xlu0 %275 }
 0x107   :  { %v535_v36 = vadd.f32 %v523_v7, %v8534_v14  ;;  %11244 = vst [vmem:[#allocation67_spill] sm:$0xff] %v8648_v62  ;;  %v524_v7 = vadd.f32 %v512_v63, %v496_v12  ;;  %7602 = vpow2.f32 %v6035_v44  ;;  %v513_v12 = vmul.f32 %v8543_v9, %v8632_v23 }
 0x108   :  { %v7593_v2 = vpop.eup %7592  ;;  %v498_v10 = vadd.f32 %v486_v0, %v470_v6  ;;  %v485_v6 = vmul.f32 %v8530_v17, %v8604_v11 }
 0x109   :  { %v733_v22 = vadd.f32 %v8491_v26, %v535_v36  ;;  %v721_v57 = vadd.f32 1.0, %v7593_v2  ;;  %v536_v63 = vadd.f32 %v524_v7, %v8450_v53 }
 0x10a   :  { %v8587_v45 = vpop.permute.xlu1 %130  ;;  %v8661_v4 = vpop.permute.xlu0 %319 }
 0x10b   :  { %11246 = vst [vmem:[#allocation69_spill] sm:$0xff] %v8661_v4  ;;  %v6037_v36 = vmul.f32 -1.442695, %v733_v22  ;;  %7604 = vrcp.f32 %v721_v57  ;;  %v443_v22 = vmul.f32 %v8522_v21, %v8587_v45 }
 0x10d   :  { %v7595_v18 = vpop.eup %7594  ;;  %7606 = vpow2.f32 %v6037_v36 }
 0x10f   :  { %v8598_v30 = vpop.permute.xlu1 %179 }
 0x110   :  { %v459_v2 = vmul.f32 %v8525_v20, %v8598_v30 }
 0x113   :  { %v8608_v27 = vpop.permute.xlu1 %183 }
 0x118   :  { %v8623_v3 = vpop.permute.xlu1 %271 }
 0x119   :  { %11241 = vst [vmem:[#allocation64_spill] sm:$0xff] %v8623_v3  ;;  %v514_v15 = vmul.f32 %v8543_v9, %v8623_v3  ;;  %v7597_v3 = vpop.eup %7596 }
 0x11a   :  { %v7599_v26 = vpop.eup %7598 }
 0x11b   :  { %v526_v55 = vadd.f32 %v514_v15, %v498_v10  ;;  %v7601_v44 = vpop.eup %7600 }
 0x11c   :  { %v722_v7 = vadd.f32 1.0, %v7601_v44  ;;  %v7603_v57 = vpop.eup %7602  ;;  %v11249_v44 = vld [vmem:[#allocation51_spill] sm:$0xff] }
 0x11d   :  { %v8638_v5 = vpop.permute.xlu1 %227 }
 0x11e   :  { %11243 = vst [vmem:[#allocation66_spill] sm:$0xff] %v8638_v5 }
 0x122   :  { %v8652_v54 = vpop.permute.xlu1 %336 }
 0x123   :  { %11245 = vst [vmem:[#allocation68_spill] sm:$0xff] %v8652_v54  ;;  %v759_v49 = vadd.f32 %v8499_v37, %v8652_v54  ;;  %v469_v37 = vadd.f32 %v457_v16, %v441_v39  ;;  %v734_v39 = vadd.f32 %v8487_v24, %v536_v63  ;;  %v515_v24 = vmul.f32 %v8543_v9, %v8648_v62 }
 0x124   :  { %v460_v63 = vmul.f32 %v8525_v20, %v8608_v27  ;;  %v488_v20 = vmul.f32 %v8530_v17, %v8616_v56 }
 0x125   :  { %v763_v42 = vmul.f32 %v7595_v18, %v759_v49  ;;  %v538_v18 = vadd.f32 %v526_v55, %v8661_v4  ;;  %v497_v16 = vadd.f32 %v485_v6, %v469_v37  ;;  %v748_v49 = vadd.f32 1.0, %v7599_v26 }
 0x126   :  { %v8663_v33 = vpop.permute.xlu1 %341  ;;  %v471_v55 = vadd.f32 %v459_v2, %v443_v22  ;;  %v6038_v4 = vmul.f32 -1.442695, %v734_v39  ;;  %v747_v26 = vadd.f32 1.0, %v7603_v57  ;;  %v8691_v2 = vpop.permute.xlu0 %323 }
 0x127   :  { %11247 = vst [vmem:[#allocation70_spill] sm:$0xff] %v8663_v33  ;;  %v760_v0 = vadd.f32 %v8495_v28, %v8663_v33  ;;  %11250 = vst [vmem:[#allocation51_spill] sm:$0xff] %v8691_v2 }
 0x129   :  { %v764_v15 = vmul.f32 %v7597_v3, %v760_v0  ;;  %v487_v3 = vmul.f32 %v8530_v17, %v8638_v5  ;;  %v525_v0 = vadd.f32 %v513_v12, %v497_v16  ;;  %v444_v12 = vmul.f32 %v8522_v21, %v11249_v44 }
 0x12b   :  { %v8675_v10 = vpop.permute.xlu1 %279  ;;  %v768_v28 = vadd.f32 %v764_v15, %v538_v18  ;;  %v499_v6 = vadd.f32 %v487_v3, %v471_v55  ;;  %v7605_v15 = vpop.eup %7604 }
 0x12c   :  { %11248 = vst [vmem:[#allocation71_spill] sm:$0xff] %v8675_v10  ;;  %v516_v55 = vmul.f32 %v8543_v9, %v8675_v10 }
 0x12d   :  { %7608 = vtanh.f32 %v768_v28  ;;  %v527_v18 = vadd.f32 %v515_v24, %v499_v6  ;;  %v11251_v28 = vld [vmem:[#allocation55_spill] sm:$0xff]  ;;  %v11252_v24 = vld [vmem:[#allocation53_spill] sm:$0xff] }
 0x12e   :  { %7610 = vrcp.f32 %v748_v49  ;;  %v7607_v49 = vpop.eup %7606 }
 0x12f   :  { %7612 = vrcp.f32 %v722_v7  ;;  %v749_v57 = vadd.f32 1.0, %v7607_v49 }
 0x130   :  { %v8682_v54 = vpop.permute.xlu1 %315  ;;  %7614 = vpow2.f32 %v6038_v4  ;;  %v539_v4 = vadd.f32 %v527_v18, %v8691_v2 }
 0x131   :  { %v537_v37 = vadd.f32 %v525_v0, %v8682_v54 }
 0x133   :  { %v767_v36 = vadd.f32 %v763_v42, %v537_v37  ;;  %v472_v42 = vadd.f32 %v460_v63, %v444_v12 }
 0x135   :  { %v8693_v16 = vpop.permute.xlu1 %346  ;;  %7616 = vtanh.f32 %v767_v36 }
 0x136   :  { %v761_v39 = vadd.f32 %v11251_v28, %v8693_v16  ;;  %7618 = vrcp.f32 %v747_v26  ;;  %v500_v28 = vadd.f32 %v488_v20, %v472_v42 }
 0x137   :  { %v7609_v22 = vpop.eup %7608 }
 0x138   :  { %v765_v3 = vmul.f32 %v7605_v15, %v761_v39  ;;  %v776_v7 = vsub.f32 0.0, %v7609_v22  ;;  %v7611_v21 = vpop.eup %7610  ;;  %v528_v18 = vadd.f32 %v516_v55, %v500_v28 }
 0x139   :  { %v8702_v0 = vpop.permute.xlu1 %351  ;;  %v7613_v36 = vpop.eup %7612 }
 0x13a   :  { %v769_v6 = vadd.f32 %v765_v3, %v539_v4  ;;  %v762_v37 = vadd.f32 %v11252_v24, %v8702_v0  ;;  %v780_v26 = vmul.f32 %v7611_v21, %v776_v7  ;;  %v7615_v15 = vpop.eup %7614 }
 0x13b   :  { %v750_v3 = vadd.f32 1.0, %v7615_v15  ;;  %v11260_v15 = vld [vmem:[#allocation9_spill] sm:$0xff] }
 0x13c   :  { %7620 = vtanh.f32 %v769_v6  ;;  %v766_v17 = vmul.f32 %v7613_v36, %v762_v37  ;;  %v8706_v63 = vadd.f32 %v7609_v22, %v780_v26 }
 0x13d   :  { %7622 = vrcp.f32 %v749_v57 }
 0x13e   :  { %v8708_v12 = vpop.permute.xlu1 %327 }
 0x13f   :  { %11253 = vst [vmem:[#allocation55_spill] sm:$0xff] %v8708_v12  ;;  %v7617_v9 = vpop.eup %7616  ;;  %v540_v39 = vadd.f32 %v528_v18, %v8708_v12  ;;  %v11259_v18 = vld [vmem:[#allocation8_spill] sm:$0xff] }
 0x140   :  { %v775_v49 = vsub.f32 0.0, %v7617_v9  ;;  %v7619_v4 = vpop.eup %7618 }
 0x141   :  { %v770_v2 = vadd.f32 %v766_v17, %v540_v39  ;;  %v11258_v17 = vld [vmem:[#allocation7_spill] sm:$0xff] }
 0x142   :  { %v779_v24 = vmul.f32 %v7619_v4, %v775_v49  ;;  %v11262_v39 = vld [vmem:[#allocation11_spill] sm:$0xff]  ;;  %v11263_v49 = vld [vmem:[#allocation12_spill] sm:$0xff]  ;;  %v11264_v4 = vld [vmem:[#allocation13_spill] sm:$0xff] }
 0x143   :  { %7624 = vtanh.f32 %v770_v2 }
 0x144   :  { %v8711_v7 = vadd.f32 %v7617_v9, %v779_v24  ;;  %7626 = vrcp.f32 %v750_v3  ;;  %v11261_v9 = vld [vmem:[#allocation10_spill] sm:$0xff]  ;;  %v11266_v24 = vld [vmem:[#allocation15_spill] sm:$0xff] }
 0x145   :  { %v11265_v3 = vld [vmem:[#allocation14_spill] sm:$0xff] }
 0x146   :  { %v7621_v20 = vpop.eup %7620  ;;  %v8715_v22 = vpack.c.bf16 %v8706_v63, %v8711_v7 }
 0x147   :  { %v777_v42 = vsub.f32 0.0, %v7621_v20  ;;  %v7623_v21 = vpop.eup %7622 }
 0x148   :  { %11254 = vst [vmem:[#allocation53_spill] sm:$0xff] %v8715_v22  ;;  %7238 = vmatprep.subr.bf16.mxu1 %v8715_v22 }
 0x149   :  { %7240 = vmatpush3.bf16.msra.mxu1 %v8715_v22  ;;  %v781_v55 = vmul.f32 %v7623_v21, %v777_v42  ;;  %v11268_v42 = vld [vmem:[#allocation17_spill] sm:$0xff]  ;;  %v11269_v21 = vld [vmem:[#allocation6_spill] sm:$0xff] }
 0x14b   :  { %v8719_v57 = vadd.f32 %v7621_v20, %v781_v55  ;;  %v11267_v20 = vld [vmem:[#allocation16_spill] sm:$0xff] }
 0x14c   :  { %v6039_v55 = vld [vmem:[%s10916_s0 + $0x4] sm:$0x7] }
 0x14d   :  { %11255 = vst [vmem:[#allocation72_spill] sm:$0xff] %v8719_v57  ;;  %v7625_v6 = vpop.eup %7624 }
 0x14e   :  { %v778_v37 = vsub.f32 0.0, %v7625_v6  ;;  %v7627_v2 = vpop.eup %7626 }
 0x150   :  { %v782_v26 = vmul.f32 %v7627_v2, %v778_v37  ;;  %v11270_v37 = vld [vmem:[#allocation54_spill] sm:$0xff] }
 0x151   :  { %v8760_v2 = vrot.slane %v6039_v55, %v11270_v37 }
 0x152   :  { %v8721_v36 = vadd.f32 %v7625_v6, %v782_v26  ;;  %v6040_v6 = vld [vmem:[%s10916_s0 + $0x18] sm:$0x7]  ;;  %v8763_v26 = vrot.slane %v6039_v55, %v8504_v46 }
 0x153   :  { %v803_v55 = vmul.f32 %v8760_v2, %v8463_v59 }
 0x154   :  { %11256 = vst [vmem:[#allocation73_spill] sm:$0xff] %v8721_v36  ;;  %v8725_v28 = vpack.c.bf16 %v8721_v36, %v8719_v57 }
 0x156   :  { %11257 = vst [vmem:[#allocation74_spill] sm:$0xff] %v8725_v28  ;;  %7242 = vmatprep.subr.bf16.mxu1 %v8725_v28 }
 0x157   :  { %7244 = vmatpush3.bf16.msra.mxu1 %v8725_v28  ;;  %v8781_v28 = vrot.slane %v6040_v6, %v8504_v46 }
 0x15a   :  { %6736 = vmatmul.mubr.msk.f32.vlgmr.msra.gmra.mrb[0].mxu1 %vm541_vm0, %v11258_v17  ;;  %v11271_v17 = vld [vmem:[#allocation39_spill] sm:$0xff] }
 0x15b   :  { %6738 = vmatprep.mubr.msk.f32.mxu1 %vm541_vm0, %v11259_v18  ;;  %v801_v18 = vmul.f32 %v8760_v2, %v11271_v17  ;;  %v11277_v17 = vld [vmem:[#allocation21_spill] sm:$0xff] }
 0x15e   :  { %6739 = vmatmul.mubr.msk.f32.gmra.mrb[2].mxu1 %vm541_vm0, %v11260_v15  ;;  %v8768_v15 = vrot.slane %v6040_v6, %v11270_v37  ;;  %v802_v6 = vmul.f32 %v8760_v2, %v11277_v17  ;;  %v11281_v17 = vld [vmem:[#allocation44_spill] sm:$0xff] }
 0x15f   :  { %6741 = vmatprep.mubr.msk.f32.mxu1 %vm541_vm0, %v11261_v9  ;;  %v11272_v9 = vld [vmem:[#allocation37_spill] sm:$0xff]  ;;  %v805_v36 = vmul.f32 %v8760_v2, %v11281_v17  ;;  %v11283_v17 = vld [vmem:[#allocation31_spill] sm:$0xff] }
 0x162   :  { %6742 = vmatmul.mubr.msk.f32.gmra.mrb[4].mxu1 %vm541_vm0, %v11262_v39  ;;  %v800_v39 = vmul.f32 %v8760_v2, %v11272_v9  ;;  %v818_v9 = vmul.f32 %v8763_v26, %v8397_v34 }
 0x163   :  { %6744 = vmatprep.mubr.msk.f32.mxu1 %vm541_vm0, %v11263_v49  ;;  %v11273_v49 = vld [vmem:[#allocation19_spill] sm:$0xff] }
 0x164   :  { %v830_v46 = vadd.f32 %v818_v9, %v802_v6  ;;  %v875_v6 = vmul.f32 %v8781_v28, %v8423_v43 }
 0x166   :  { %6745 = vmatmul.mubr.msk.f32.gmra.mrb[6].mxu1 %vm541_vm0, %v11264_v4  ;;  %v817_v4 = vmul.f32 %v8763_v26, %v11273_v49  ;;  %v845_v49 = vmul.f32 %v8768_v15, %v8391_v32  ;;  %v11278_v32 = vld [vmem:[#allocation26_spill] sm:$0xff] }
 0x167   :  { %6747 = vmatprep.mubr.msk.f32.mxu1 %vm541_vm0, %v11265_v3  ;;  %v11274_v3 = vld [vmem:[#allocation18_spill] sm:$0xff]  ;;  %v846_v37 = vmul.f32 %v8768_v15, %v11278_v32 }
 0x16a   :  { %6748 = vmatmul.mubr.msk.f32.gmra.mrb[8].mxu1 %vm541_vm0, %v11266_v24  ;;  %v816_v24 = vmul.f32 %v8763_v26, %v11274_v3  ;;  %v819_v3 = vmul.f32 %v8763_v26, %v8401_v35  ;;  %v804_v35 = vmul.f32 %v8760_v2, %v8444_v51 }
 0x16b   :  { %6750 = vmatprep.mubr.msk.f32.mxu1 %vm541_vm0, %v11267_v20  ;;  %v11275_v20 = vld [vmem:[#allocation57_spill] sm:$0xff] }
 0x16c   :  { %v828_v22 = vadd.f32 %v816_v24, %v800_v39  ;;  %v820_v39 = vmul.f32 %v8763_v26, %v8448_v52  ;;  %v831_v34 = vadd.f32 %v819_v3, %v803_v55 }
 0x16e   :  { %6751 = vmatmul.mubr.msk.f32.gmra.mrb[10].mxu1 %vm541_vm0, %v11268_v42  ;;  %v844_v42 = vmul.f32 %v8768_v15, %v11275_v20  ;;  %v847_v20 = vmul.f32 %v8768_v15, %v8560_v38  ;;  %v11279_v38 = vld [vmem:[#allocation24_spill] sm:$0xff]  ;;  %v832_v3 = vadd.f32 %v820_v39, %v804_v35  ;;  %v876_v39 = vmul.f32 %v8781_v28, %v8417_v41 }
 0x16f   :  { %6787 = vmatprep.mubr.msk.f32.mxu1 %vm541_vm0, %v11269_v21  ;;  %v829_v21 = vadd.f32 %v817_v4, %v801_v18  ;;  %v11276_v4 = vld [vmem:[#allocation25_spill] sm:$0xff]  ;;  %v822_v41 = vmul.f32 %v8763_v26, %v8465_v60 }
 0x170   :  { %v856_v18 = vadd.f32 %v844_v42, %v828_v22  ;;  %v872_v59 = vmul.f32 %v8781_v28, %v11276_v4  ;;  %v873_v22 = vmul.f32 %v8781_v28, %v11279_v38  ;;  %v859_v42 = vadd.f32 %v847_v20, %v831_v34  ;;  %v11280_v4 = vld [vmem:[#allocation28_spill] sm:$0xff]  ;;  %v11284_v38 = vld [vmem:[#allocation38_spill] sm:$0xff] }
 0x171   :  { %v857_v24 = vadd.f32 %v845_v49, %v829_v21  ;;  %v874_v57 = vmul.f32 %v8781_v28, %v11280_v4  ;;  %v11282_v49 = vld [vmem:[#allocation36_spill] sm:$0xff]  ;;  %v848_v21 = vmul.f32 %v8768_v15, %v8575_v40  ;;  %v807_v34 = vmul.f32 %v8760_v2, %v8477_v8 }
 0x172   :  { %v884_v52 = vadd.f32 %v872_v59, %v856_v18  ;;  %v821_v9 = vmul.f32 %v8763_v26, %v11282_v49  ;;  %v823_v20 = vmul.f32 %v8763_v26, %v8467_v61  ;;  %v858_v4 = vadd.f32 %v846_v37, %v830_v46 }
 0x173   :  { %v885_v55 = vadd.f32 %v873_v22, %v857_v24  ;;  %v887_v18 = vadd.f32 %v875_v6, %v859_v42  ;;  %v849_v35 = vmul.f32 %v8768_v15, %v11284_v38  ;;  %v11285_v22 = vld [vmem:[#allocation30_spill] sm:$0xff]  ;;  %v860_v51 = vadd.f32 %v848_v21, %v832_v3 }
 0x174   :  { %v896_v40 = vadd.f32 %v884_v52, %v11285_v22  ;;  %v886_v43 = vadd.f32 %v874_v57, %v858_v4  ;;  %v833_v49 = vadd.f32 %v821_v9, %v805_v36  ;;  %v877_v46 = vmul.f32 %v8781_v28, %v8471_v1 }
 0x175   :  { %v897_v59 = vadd.f32 %v885_v55, %v11283_v17  ;;  %v835_v37 = vadd.f32 %v823_v20, %v807_v34  ;;  %v851_v42 = vmul.f32 %v8768_v15, %v8589_v31  ;;  %v899_v52 = vadd.f32 %v887_v18, %v8434_v47 }
 0x176   :  { %v898_v6 = vadd.f32 %v886_v43, %v8437_v48  ;;  %v861_v57 = vadd.f32 %v849_v35, %v833_v49  ;;  %v879_v36 = vmul.f32 %v8781_v28, %v8497_v29  ;;  %v888_v3 = vadd.f32 %v876_v39, %v860_v51  ;;  %v11286_v35 = vld [vmem:[#allocation56_spill] sm:$0xff] }
 0x177   :  { %v806_v21 = vmul.f32 %v8760_v2, %v8461_v58 }
 0x178   :  { %v889_v34 = vadd.f32 %v877_v46, %v861_v57  ;;  %v900_v58 = vadd.f32 %v888_v3, %v8442_v50 }
 0x179   :  { %v834_v49 = vadd.f32 %v822_v41, %v806_v21 }
 0x17a   :  { %v901_v51 = vadd.f32 %v889_v34, %v11286_v35 }
 0x22d   :  { %v6737_v24 = vpop.f32.mrb[0].mxu1 }
 0x22e   :  { %v1034_v8 = vadd.f32 %v6737_v24, %v897_v59  ;;  %v974_v32 = vpop.f32.mrb[1].mxu1  ;;  %v878_v59 = vmul.f32 %v8781_v28, %v8489_v25 }
 0x22f   :  { %v1033_v55 = vadd.f32 %v974_v32, %v896_v40  ;;  %v850_v32 = vmul.f32 %v8768_v15, %v8481_v13 }
 0x230   :  { %v6054_v38 = vmul.f32 -1.442695, %v1034_v8  ;;  %v863_v8 = vadd.f32 %v851_v42, %v835_v37 }
 0x231   :  { %v6053_v4 = vmul.f32 -1.442695, %v1033_v55  ;;  %v6740_v9 = vpop.f32.mrb[2].mxu1  ;;  %v862_v13 = vadd.f32 %v850_v32, %v834_v49 }
 0x232   :  { %7628 = vpow2.f32 %v6054_v38  ;;  %v1036_v43 = vadd.f32 %v6740_v9, %v899_v52  ;;  %v984_v40 = vpop.f32.mrb[3].mxu1  ;;  %v891_v39 = vadd.f32 %v879_v36, %v863_v8 }
 0x233   :  { %7630 = vpow2.f32 %v6053_v4  ;;  %v1035_v20 = vadd.f32 %v984_v40, %v898_v6  ;;  %v890_v37 = vadd.f32 %v878_v59, %v862_v13  ;;  %v11287_v40 = vld [vmem:[#allocation58_spill] sm:$0xff] }
 0x234   :  { %v6056_v18 = vmul.f32 -1.442695, %v1036_v43  ;;  %v903_v41 = vadd.f32 %v891_v39, %v8450_v53  ;;  %v824_v3 = vmul.f32 %v8763_v26, %v11287_v40  ;;  %v11289_v39 = vld [vmem:[#allocation48_spill] sm:$0xff] }
 0x235   :  { %v6055_v24 = vmul.f32 -1.442695, %v1035_v20  ;;  %v6743_v55 = vpop.f32.mrb[4].mxu1  ;;  %v902_v57 = vadd.f32 %v890_v37, %v8534_v14  ;;  %v852_v37 = vmul.f32 %v8768_v15, %v8604_v11 }
 0x236   :  { %7632 = vpow2.f32 %v6056_v18  ;;  %v1062_v38 = vadd.f32 %v6743_v55, %v901_v51  ;;  %v994_v52 = vpop.f32.mrb[5].mxu1  ;;  %v808_v18 = vmul.f32 %v8760_v2, %v8549_v19 }
 0x237   :  { %7634 = vpow2.f32 %v6055_v24  ;;  %v1061_v46 = vadd.f32 %v994_v52, %v900_v58  ;;  %v11288_v58 = vld [vmem:[#allocation59_spill] sm:$0xff]  ;;  %v809_v24 = vmul.f32 %v8760_v2, %v11289_v39 }
 0x238   :  { %v6058_v42 = vmul.f32 -1.442695, %v1062_v38  ;;  %v825_v13 = vmul.f32 %v8763_v26, %v11288_v58  ;;  %v11290_v38 = vld [vmem:[#allocation61_spill] sm:$0xff] }
 0x239   :  { %v6746_v6 = vpop.f32.mrb[6].mxu1  ;;  %v6057_v4 = vmul.f32 -1.442695, %v1061_v46  ;;  %v853_v52 = vmul.f32 %v8768_v15, %v11290_v38  ;;  %v836_v46 = vadd.f32 %v824_v3, %v808_v18 }
 0x23a   :  { %v1064_v9 = vadd.f32 %v6746_v6, %v903_v41  ;;  %v1004_v36 = vpop.f32.mrb[7].mxu1  ;;  %7636 = vpow2.f32 %v6058_v42  ;;  %v837_v6 = vadd.f32 %v825_v13, %v809_v24  ;;  %v811_v13 = vmul.f32 %v8760_v2, %v11249_v44 }
 0x23b   :  { %v1063_v21 = vadd.f32 %v1004_v36, %v902_v57  ;;  %7638 = vpow2.f32 %v6057_v4  ;;  %v826_v4 = vmul.f32 %v8763_v26, %v8598_v30  ;;  %v11291_v36 = vld [vmem:[#allocation64_spill] sm:$0xff] }
 0x23c   :  { %v7629_v43 = vpop.eup %7628  ;;  %v6060_v8 = vmul.f32 -1.442695, %v1064_v9 }
 0x23d   :  { %v7631_v32 = vpop.eup %7630  ;;  %v1050_v34 = vadd.f32 1.0, %v7629_v43  ;;  %v6749_v20 = vpop.f32.mrb[8].mxu1  ;;  %v6059_v59 = vmul.f32 -1.442695, %v1063_v21  ;;  %v881_v21 = vmul.f32 %v8781_v28, %v11291_v36  ;;  %v827_v43 = vmul.f32 %v8763_v26, %v8608_v27 }
 0x23e   :  { %v1049_v49 = vadd.f32 1.0, %v7631_v32  ;;  %v1014_v51 = vpop.f32.mrb[9].mxu1  ;;  %v810_v32 = vmul.f32 %v8760_v2, %v8587_v45  ;;  %v883_v2 = vmul.f32 %v8781_v28, %v8675_v10 }
 0x23f   :  { %7640 = vrcp.f32 %v1050_v34  ;;  %v854_v34 = vmul.f32 %v8768_v15, %v8638_v5  ;;  %v839_v26 = vadd.f32 %v827_v43, %v811_v13  ;;  %v882_v5 = vmul.f32 %v8781_v28, %v8648_v62 }
 0x240   :  { %v7633_v55 = vpop.eup %7632  ;;  %7642 = vrcp.f32 %v1049_v49  ;;  %v864_v49 = vadd.f32 %v852_v37, %v836_v46  ;;  %v838_v18 = vadd.f32 %v826_v4, %v810_v32  ;;  %v11293_v32 = vld [vmem:[#allocation69_spill] sm:$0xff] }
 0x241   :  { %v7635_v41 = vpop.eup %7634  ;;  %v1052_v42 = vadd.f32 1.0, %v7633_v55  ;;  %7644 = vpow2.f32 %v6060_v8  ;;  %v6752_v57 = vpop.f32.mrb[10].mxu1  ;;  %v865_v8 = vadd.f32 %v853_v52, %v837_v6  ;;  %v855_v55 = vmul.f32 %v8768_v15, %v8616_v56  ;;  %v11292_v6 = vld [vmem:[#allocation68_spill] sm:$0xff] }
 0x242   :  { %v1051_v9 = vadd.f32 1.0, %v7635_v41  ;;  %7646 = vpow2.f32 %v6059_v59  ;;  %v1024_v3 = vpop.f32.mrb[11].mxu1  ;;  %v880_v59 = vmul.f32 %v8781_v28, %v8632_v23  ;;  %v1090_v52 = vadd.f32 %v6749_v20, %v8663_v33 }
 0x243   :  { %7648 = vrcp.f32 %v1052_v42  ;;  %v893_v24 = vadd.f32 %v881_v21, %v865_v8  ;;  %v866_v42 = vadd.f32 %v854_v34, %v838_v18  ;;  %v1089_v4 = vadd.f32 %v1014_v51, %v11292_v6 }
 0x244   :  { %7650 = vrcp.f32 %v1051_v9  ;;  %v7637_v41 = vpop.eup %7636  ;;  %v892_v37 = vadd.f32 %v880_v59, %v864_v49  ;;  %v867_v13 = vadd.f32 %v855_v55, %v839_v26  ;;  %v1092_v28 = vadd.f32 %v6752_v57, %v8702_v0  ;;  %v11294_v55 = vld [vmem:[#allocation51_spill] sm:$0xff] }
 0x245   :  { %v7639_v9 = vpop.eup %7638  ;;  %v1078_v43 = vadd.f32 1.0, %v7637_v41  ;;  %v905_v8 = vadd.f32 %v893_v24, %v11293_v32  ;;  %v894_v56 = vadd.f32 %v882_v5, %v866_v42  ;;  %v1091_v51 = vadd.f32 %v1024_v3, %v8693_v16 }
 0x246   :  { %v904_v18 = vadd.f32 %v892_v37, %v8682_v54  ;;  %v895_v33 = vadd.f32 %v883_v2, %v867_v13  ;;  %v1077_v49 = vadd.f32 1.0, %v7639_v9 }
 0x247   :  { %7652 = vrcp.f32 %v1078_v43 }
 0x248   :  { %v907_v24 = vadd.f32 %v895_v33, %v8708_v12 }
 0x249   :  { %v7641_v46 = vpop.eup %7640 }
 0x24a   :  { %v7643_v21 = vpop.eup %7642  ;;  %v1094_v15 = vmul.f32 %v7641_v46, %v1090_v52  ;;  %v906_v52 = vadd.f32 %v894_v56, %v11294_v55 }
 0x24b   :  { %v7645_v34 = vpop.eup %7644  ;;  %v1093_v62 = vmul.f32 %v7643_v21, %v1089_v4 }
 0x24c   :  { %v7647_v23 = vpop.eup %7646  ;;  %v1098_v20 = vadd.f32 %v1094_v15, %v905_v8  ;;  %v1080_v5 = vadd.f32 1.0, %v7645_v34  ;;  %v11295_v8 = vld [vmem:[#allocation73_spill] sm:$0xff]  ;;  %v11296_v34 = vld [vmem:[#allocation72_spill] sm:$0xff] }
 0x24d   :  { %v7649_v10 = vpop.eup %7648  ;;  %v1097_v59 = vadd.f32 %v1093_v62, %v904_v18  ;;  %v1079_v2 = vadd.f32 1.0, %v7647_v23 }
 0x24e   :  { %v7651_v41 = vpop.eup %7650  ;;  %v1096_v26 = vmul.f32 %v7649_v10, %v1092_v28  ;;  %7654 = vtanh.f32 %v1098_v20 }
 0x24f   :  { %v1095_v46 = vmul.f32 %v7651_v41, %v1091_v51  ;;  %7656 = vtanh.f32 %v1097_v59 }
 0x250   :  { %v1100_v42 = vadd.f32 %v1096_v26, %v907_v24  ;;  %7658 = vrcp.f32 %v1077_v49  ;;  %v8910_v24 = vld [vmem:[%s10919_s3 + $0x8] sm:$0xff]  ;;  %v8917_v26 = vld [vmem:[%s10919_s3 + $0x10] sm:$0xff] }
 0x251   :  { %v1099_v57 = vadd.f32 %v1095_v46, %v906_v52  ;;  %v7653_v62 = vpop.eup %7652  ;;  %11302 = vst [vmem:[#allocation12_spill] sm:$0xff] %v8910_v24  ;;  %11303 = vst [vmem:[#allocation13_spill] sm:$0xff] %v8917_v26  ;;  %v8924_v52 = vld [vmem:[%s10919_s3 + $0x18] sm:$0xff]  ;;  %v8931_v46 = vld [vmem:[%s10919_s3 + $0x20] sm:$0xff] }
 0x252   :  { %7660 = vtanh.f32 %v1100_v42  ;;  %11304 = vst [vmem:[#allocation14_spill] sm:$0xff] %v8924_v52  ;;  %11305 = vst [vmem:[#allocation15_spill] sm:$0xff] %v8931_v46  ;;  %v8945_v42 = vld [vmem:[%s10919_s3 + $0x30] sm:$0xff] }
 0x253   :  { %7662 = vtanh.f32 %v1099_v57  ;;  %11307 = vst [vmem:[#allocation17_spill] sm:$0xff] %v8945_v42  ;;  %v8959_v57 = vld [vmem:[%s10919_s3 + $0x40] sm:$0xff] }
 0x254   :  { %7664 = vrcp.f32 %v1080_v5  ;;  %v8938_v5 = vld [vmem:[%s10919_s3 + $0x28] sm:$0xff]  ;;  %11309 = vst [vmem:[#allocation56_spill] sm:$0xff] %v8959_v57 }
 0x255   :  { %7666 = vrcp.f32 %v1079_v2  ;;  %11306 = vst [vmem:[#allocation16_spill] sm:$0xff] %v8938_v5  ;;  %v8952_v2 = vld [vmem:[%s10919_s3 + $0x38] sm:$0xff] }
 0x256   :  { %11308 = vst [vmem:[#allocation6_spill] sm:$0xff] %v8952_v2 }
 0x258   :  { %v7655_v3 = vpop.eup %7654 }
 0x259   :  { %v7657_v9 = vpop.eup %7656  ;;  %v1106_v33 = vsub.f32 %v8706_v63, %v7655_v3 }
 0x25a   :  { %v7659_v10 = vpop.eup %7658  ;;  %v1105_v37 = vsub.f32 %v8711_v7, %v7657_v9 }
 0x25b   :  { %v1110_v4 = vmul.f32 %v7653_v62, %v1106_v33  ;;  %v8966_v62 = vld [vmem:[%s10919_s3 + $0x48] sm:$0xff]  ;;  %v8987_v33 = vld [vmem:[%s10919_s3] sm:$0xff] }
 0x25c   :  { %v7661_v56 = vpop.eup %7660  ;;  %v1109_v43 = vmul.f32 %v7659_v10, %v1105_v37  ;;  %11310 = vst [vmem:[#allocation58_spill] sm:$0xff] %v8966_v62  ;;  %11313 = vst [vmem:[#allocation61_spill] sm:$0xff] %v8987_v33  ;;  %v6061_v10 = vld [vmem:[%s10916_s0 + $0x8] sm:$0x7]  ;;  %v6062_v37 = vld [vmem:[%s10916_s0 + $0x14] sm:$0x7] }
 0x25d   :  { %v7663_v21 = vpop.eup %7662  ;;  %v1108_v15 = vsub.f32 %v11295_v8, %v7661_v56  ;;  %v8886_v13 = vadd.f32 %v7655_v3, %v1110_v4  ;;  %v8973_v3 = vld [vmem:[%s10919_s3 + $0x50] sm:$0xff]  ;;  %v11316_v8 = vld [vmem:[#allocation39_spill] sm:$0xff] }
 0x25e   :  { %v7665_v23 = vpop.eup %7664  ;;  %v1107_v18 = vsub.f32 %v11296_v34, %v7663_v21  ;;  %v8889_v28 = vadd.f32 %v7657_v9, %v1109_v43  ;;  %11311 = vst [vmem:[#allocation59_spill] sm:$0xff] %v8973_v3  ;;  %v8980_v9 = vld [vmem:[%s10919_s3 + $0x58] sm:$0xff]  ;;  %v11317_v34 = vld [vmem:[#allocation37_spill] sm:$0xff] }
 0x25f   :  { %v7667_v20 = vpop.eup %7666  ;;  %v1112_v49 = vmul.f32 %v7665_v23, %v1108_v15  ;;  %11312 = vst [vmem:[#allocation48_spill] sm:$0xff] %v8980_v9 }
 0x260   :  { %11297 = vst [vmem:[#allocation7_spill] sm:$0xff] %v8889_v28  ;;  %v1111_v59 = vmul.f32 %v7667_v20, %v1107_v18  ;;  %v8893_v63 = vpack.c.bf16 %v8886_v13, %v8889_v28  ;;  %v11318_v20 = vld [vmem:[#allocation19_spill] sm:$0xff] }
 0x261   :  { %v8895_v7 = vadd.f32 %v7661_v56, %v1112_v49  ;;  %v11314_v56 = vld [vmem:[#allocation54_spill] sm:$0xff] }
 0x262   :  { %11298 = vst [vmem:[#allocation8_spill] sm:$0xff] %v8893_v63  ;;  %v8897_v51 = vadd.f32 %v7663_v21, %v1111_v59  ;;  %7246 = vmatprep.subr.bf16.mxu0 %v8893_v63  ;;  %v8998_v4 = vrot.slane %v6061_v10, %v11314_v56  ;;  %v11315_v21 = vld [vmem:[#allocation52_spill] sm:$0xff]  ;;  %v9006_v23 = vrot.slane %v6062_v37, %v11314_v56  ;;  %v11319_v59 = vld [vmem:[#allocation18_spill] sm:$0xff] }
 0x263   :  { %11299 = vst [vmem:[#allocation9_spill] sm:$0xff] %v8895_v7  ;;  %7248 = vmatpush3.bf16.msra.mxu0 %v8893_v63  ;;  %v9001_v43 = vrot.slane %v6061_v10, %v11315_v21  ;;  %v11320_v63 = vld [vmem:[#allocation57_spill] sm:$0xff] }
 0x264   :  { %11300 = vst [vmem:[#allocation10_spill] sm:$0xff] %v8897_v51  ;;  %v8903_v41 = vpack.c.bf16 %v8895_v7, %v8897_v51  ;;  %v1132_v15 = vmul.f32 %v8998_v4, %v11316_v8  ;;  %v1131_v18 = vmul.f32 %v8998_v4, %v11317_v34  ;;  %v9019_v8 = vrot.slane %v6062_v37, %v11315_v21 }
 0x265   :  { %v1148_v49 = vmul.f32 %v9001_v43, %v11318_v20 }
 0x266   :  { %11301 = vst [vmem:[#allocation11_spill] sm:$0xff] %v8903_v41  ;;  %7250 = vmatprep.subr.bf16.mxu0 %v8903_v41 }
 0x267   :  { %7252 = vmatpush3.bf16.msra.mxu0 %v8903_v41  ;;  %v1147_v41 = vmul.f32 %v9001_v43, %v11319_v59  ;;  %v1160_v10 = vadd.f32 %v1148_v49, %v1132_v15  ;;  %v11326_v49 = vld [vmem:[#allocation25_spill] sm:$0xff] }
 0x269   :  { %v1159_v56 = vadd.f32 %v1147_v41, %v1131_v18  ;;  %v11328_v41 = vld [vmem:[#allocation35_spill] sm:$0xff] }
 0x26a   :  { %6762 = vmatmul.mubr.msk.f32.vlgmr.msra.gmra.mrb[12].mxu0 %vm541_vm0, %v8910_v24  ;;  %v1151_v18 = vmul.f32 %v9001_v43, %v11328_v41 }
 0x26b   :  { %6764 = vmatprep.mubr.msk.f32.mxu0 %vm541_vm0, %v8917_v26 }
 0x26e   :  { %6765 = vmatmul.mubr.msk.f32.gmra.mrb[14].mxu0 %vm541_vm0, %v8924_v52 }
 0x26f   :  { %6767 = vmatprep.mubr.msk.f32.mxu0 %vm541_vm0, %v8931_v46 }
 0x272   :  { %6768 = vmatmul.mubr.msk.f32.gmra.mrb[16].mxu0 %vm541_vm0, %v8938_v5  ;;  %v11327_v5 = vld [vmem:[#allocation21_spill] sm:$0xff] }
 0x273   :  { %6770 = vmatprep.mubr.msk.f32.mxu0 %vm541_vm0, %v8945_v42  ;;  %v11325_v42 = vld [vmem:[#allocation60_spill] sm:$0xff]  ;;  %v1133_v37 = vmul.f32 %v8998_v4, %v11327_v5 }
 0x274   :  { %v11333_v5 = vld [vmem:[#allocation44_spill] sm:$0xff] }
 0x275   :  { %v1136_v51 = vmul.f32 %v8998_v4, %v11333_v5  ;;  %v11338_v5 = vld [vmem:[#allocation38_spill] sm:$0xff] }
 0x276   :  { %6771 = vmatmul.mubr.msk.f32.gmra.mrb[18].mxu0 %vm541_vm0, %v8952_v2  ;;  %v11324_v2 = vld [vmem:[#allocation23_spill] sm:$0xff] }
 0x277   :  { %6773 = vmatprep.mubr.msk.f32.mxu0 %vm541_vm0, %v8959_v57  ;;  %v11323_v57 = vld [vmem:[#allocation20_spill] sm:$0xff]  ;;  %v1150_v59 = vmul.f32 %v9001_v43, %v11324_v2  ;;  %v11330_v2 = vld [vmem:[#allocation34_spill] sm:$0xff] }
 0x278   :  { %v1176_v20 = vmul.f32 %v9006_v23, %v11323_v57  ;;  %v11329_v57 = vld [vmem:[#allocation26_spill] sm:$0xff]  ;;  %v1135_v26 = vmul.f32 %v8998_v4, %v11330_v2  ;;  %v11336_v2 = vld [vmem:[#allocation29_spill] sm:$0xff] }
 0x279   :  { %v1177_v52 = vmul.f32 %v9006_v23, %v11329_v57  ;;  %v1206_v57 = vmul.f32 %v9019_v8, %v11336_v2 }
 0x27a   :  { %6774 = vmatmul.mubr.msk.f32.gmra.mrb[20].mxu0 %vm541_vm0, %v8966_v62  ;;  %v11322_v62 = vld [vmem:[#allocation22_spill] sm:$0xff] }
 0x27b   :  { %6776 = vmatprep.mubr.msk.f32.mxu0 %vm541_vm0, %v8973_v3  ;;  %v1149_v34 = vmul.f32 %v9001_v43, %v11322_v62  ;;  %v1188_v62 = vadd.f32 %v1176_v20, %v1160_v10  ;;  %v11334_v20 = vld [vmem:[#allocation36_spill] sm:$0xff] }
 0x27d   :  { %v1161_v46 = vadd.f32 %v1149_v34, %v1133_v37  ;;  %v1163_v34 = vadd.f32 %v1151_v18, %v1135_v26  ;;  %v1180_v26 = vmul.f32 %v9006_v23, %v11338_v5  ;;  %v11339_v18 = vld [vmem:[#allocation27_spill] sm:$0xff] }
 0x27e   :  { %6777 = vmatmul.mubr.msk.f32.gmra.mrb[22].mxu0 %vm541_vm0, %v8980_v9  ;;  %v11321_v9 = vld [vmem:[#allocation41_spill] sm:$0xff] }
 0x27f   :  { %6813 = vmatprep.mubr.msk.f32.mxu0 %vm541_vm0, %v8987_v33  ;;  %v1175_v33 = vmul.f32 %v9006_v23, %v11320_v63  ;;  %v1134_v3 = vmul.f32 %v8998_v4, %v11321_v9  ;;  %v1178_v63 = vmul.f32 %v9006_v23, %v11325_v42  ;;  %v1203_v9 = vmul.f32 %v9019_v8, %v11326_v49  ;;  %v11331_v42 = vld [vmem:[#allocation24_spill] sm:$0xff] }
 0x280   :  { %v11332_v49 = vld [vmem:[#allocation28_spill] sm:$0xff] }
 0x281   :  { %v1187_v15 = vadd.f32 %v1175_v33, %v1159_v56  ;;  %v1162_v21 = vadd.f32 %v1150_v59, %v1134_v3  ;;  %v1204_v33 = vmul.f32 %v9019_v8, %v11331_v42  ;;  %v1205_v24 = vmul.f32 %v9019_v8, %v11332_v49  ;;  %v11335_v59 = vld [vmem:[#allocation62_spill] sm:$0xff] }
 0x282   :  { %v1152_v3 = vmul.f32 %v9001_v43, %v11334_v20  ;;  %v1179_v10 = vmul.f32 %v9006_v23, %v11335_v59  ;;  %v11337_v42 = vld [vmem:[#allocation46_spill] sm:$0xff]  ;;  %v1189_v49 = vadd.f32 %v1177_v52, %v1161_v46  ;;  %v1207_v20 = vmul.f32 %v9019_v8, %v11339_v18 }
 0x283   :  { %v1190_v56 = vadd.f32 %v1178_v63, %v1162_v21  ;;  %v1215_v41 = vadd.f32 %v1203_v9, %v1187_v15  ;;  %v1216_v37 = vadd.f32 %v1204_v33, %v1188_v62  ;;  %v1138_v63 = vmul.f32 %v8998_v4, %v11337_v42 }
 0x284   :  { %v1154_v21 = vmul.f32 %v9001_v43, %v8467_v61  ;;  %v1217_v2 = vadd.f32 %v1205_v24, %v1189_v49  ;;  %v1164_v59 = vadd.f32 %v1152_v3, %v1136_v51  ;;  %v1191_v7 = vadd.f32 %v1179_v10, %v1163_v34  ;;  %v11340_v10 = vld [vmem:[#allocation40_spill] sm:$0xff] }
 0x285   :  { %v1228_v9 = vadd.f32 %v1216_v37, %v11283_v17  ;;  %v1218_v15 = vadd.f32 %v1206_v57, %v1190_v56  ;;  %v1227_v33 = vadd.f32 %v1215_v41, %v11285_v22  ;;  %v1208_v52 = vmul.f32 %v9019_v8, %v8471_v1 }
 0x286   :  { %v1166_v46 = vadd.f32 %v1154_v21, %v1138_v63  ;;  %v1182_v57 = vmul.f32 %v9006_v23, %v8589_v31  ;;  %v1229_v37 = vadd.f32 %v1217_v2, %v8437_v48  ;;  %v1153_v18 = vmul.f32 %v9001_v43, %v8465_v60  ;;  %v11341_v21 = vld [vmem:[#allocation47_spill] sm:$0xff] }
 0x287   :  { %v1230_v24 = vadd.f32 %v1218_v15, %v8434_v47  ;;  %v1192_v51 = vadd.f32 %v1180_v26, %v1164_v59  ;;  %v1210_v49 = vmul.f32 %v9019_v8, %v8497_v29  ;;  %v1219_v34 = vadd.f32 %v1207_v20, %v1191_v7 }
 0x288   :  { %v1137_v63 = vmul.f32 %v8998_v4, %v11340_v10  ;;  %v1209_v26 = vmul.f32 %v9019_v8, %v8489_v25 }
 0x289   :  { %v1231_v29 = vadd.f32 %v1219_v34, %v8442_v50  ;;  %v1155_v34 = vmul.f32 %v9001_v43, %v11287_v40 }
 0x28a   :  { %v1165_v59 = vadd.f32 %v1153_v18, %v1137_v63 }
 0x33d   :  { %v6763_v62 = vpop.f32.mrb[12].mxu0 }
 0x33e   :  { %v1365_v42 = vadd.f32 %v6763_v62, %v1228_v9  ;;  %v1305_v28 = vpop.f32.mrb[13].mxu0  ;;  %v1220_v62 = vadd.f32 %v1208_v52, %v1192_v51 }
 0x33f   :  { %v1364_v56 = vadd.f32 %v1305_v28, %v1227_v33  ;;  %v1181_v28 = vmul.f32 %v9006_v23, %v11341_v21 }
 0x340   :  { %v6076_v5 = vmul.f32 -1.442695, %v1365_v42  ;;  %v1194_v42 = vadd.f32 %v1182_v57, %v1166_v46  ;;  %v1232_v7 = vadd.f32 %v1220_v62, %v11286_v35 }
 0x341   :  { %v6075_v41 = vmul.f32 -1.442695, %v1364_v56  ;;  %v6766_v3 = vpop.f32.mrb[14].mxu0  ;;  %v1193_v21 = vadd.f32 %v1181_v28, %v1165_v59 }
 0x342   :  { %7668 = vpow2.f32 %v6076_v5  ;;  %v1367_v2 = vadd.f32 %v6766_v3, %v1230_v24  ;;  %v1315_v9 = vpop.f32.mrb[15].mxu0  ;;  %v1222_v20 = vadd.f32 %v1210_v49, %v1194_v42 }
 0x343   :  { %7670 = vpow2.f32 %v6075_v41  ;;  %v1366_v15 = vadd.f32 %v1315_v9, %v1229_v37  ;;  %v1221_v46 = vadd.f32 %v1209_v26, %v1193_v21  ;;  %v1140_v26 = vmul.f32 %v8998_v4, %v11289_v39 }
 0x344   :  { %v6078_v33 = vmul.f32 -1.442695, %v1367_v2  ;;  %v1234_v18 = vadd.f32 %v1222_v20, %v8450_v53 }
 0x345   :  { %v6077_v56 = vmul.f32 -1.442695, %v1366_v15  ;;  %v6769_v10 = vpop.f32.mrb[16].mxu0  ;;  %v1233_v51 = vadd.f32 %v1221_v46, %v8534_v14  ;;  %v1139_v15 = vmul.f32 %v8998_v4, %v8549_v19 }
 0x346   :  { %7672 = vpow2.f32 %v6078_v33  ;;  %v1393_v5 = vadd.f32 %v6769_v10, %v1232_v7  ;;  %v1325_v24 = vpop.f32.mrb[17].mxu0  ;;  %v1184_v7 = vmul.f32 %v9006_v23, %v11290_v38 }
 0x347   :  { %7674 = vpow2.f32 %v6077_v56  ;;  %v1392_v52 = vadd.f32 %v1325_v24, %v1231_v29  ;;  %v1156_v29 = vmul.f32 %v9001_v43, %v11288_v58  ;;  %v1167_v20 = vadd.f32 %v1155_v34, %v1139_v15 }
 0x348   :  { %v6080_v57 = vmul.f32 -1.442695, %v1393_v5  ;;  %v1183_v56 = vmul.f32 %v9006_v23, %v8604_v11  ;;  %v1142_v34 = vmul.f32 %v8998_v4, %v11249_v44 }
 0x349   :  { %v6772_v37 = vpop.f32.mrb[18].mxu0  ;;  %v6079_v41 = vmul.f32 -1.442695, %v1392_v52  ;;  %v1168_v52 = vadd.f32 %v1156_v29, %v1140_v26 }
 0x34a   :  { %v1395_v3 = vadd.f32 %v6772_v37, %v1234_v18  ;;  %v1335_v49 = vpop.f32.mrb[19].mxu0  ;;  %7676 = vpow2.f32 %v6080_v57  ;;  %v1157_v18 = vmul.f32 %v9001_v43, %v8598_v30  ;;  %v1212_v37 = vmul.f32 %v9019_v8, %v11291_v36 }
 0x34b   :  { %v1394_v63 = vadd.f32 %v1335_v49, %v1233_v51  ;;  %7678 = vpow2.f32 %v6079_v41  ;;  %v1158_v51 = vmul.f32 %v9001_v43, %v8608_v27  ;;  %v11342_v49 = vld [vmem:[#allocation66_spill] sm:$0xff] }
 0x34c   :  { %v7669_v2 = vpop.eup %7668  ;;  %v6082_v9 = vmul.f32 -1.442695, %v1395_v3  ;;  %v1141_v3 = vmul.f32 %v8998_v4, %v8587_v45 }
 0x34d   :  { %v7671_v28 = vpop.eup %7670  ;;  %v1381_v10 = vadd.f32 1.0, %v7669_v2  ;;  %v6775_v21 = vpop.f32.mrb[20].mxu0  ;;  %v6081_v42 = vmul.f32 -1.442695, %v1394_v63  ;;  %v1185_v63 = vmul.f32 %v9006_v23, %v11342_v49  ;;  %v1196_v2 = vadd.f32 %v1184_v7, %v1168_v52  ;;  %v11346_v7 = vld [vmem:[#allocation70_spill] sm:$0xff]  ;;  %v11347_v49 = vld [vmem:[#allocation71_spill] sm:$0xff] }
 0x34e   :  { %v1380_v62 = vadd.f32 1.0, %v7671_v28  ;;  %v1345_v59 = vpop.f32.mrb[21].mxu0  ;;  %v1195_v28 = vadd.f32 %v1183_v56, %v1167_v20  ;;  %v1169_v29 = vadd.f32 %v1157_v18, %v1141_v3  ;;  %v1170_v43 = vadd.f32 %v1158_v51, %v1142_v34 }
 0x34f   :  { %7680 = vrcp.f32 %v1381_v10  ;;  %v11343_v10 = vld [vmem:[#allocation65_spill] sm:$0xff]  ;;  %v1421_v52 = vadd.f32 %v6775_v21, %v11346_v7  ;;  %v1214_v4 = vmul.f32 %v9019_v8, %v11347_v49  ;;  %v1420_v18 = vadd.f32 %v1345_v59, %v11292_v6 }
 0x350   :  { %v7673_v33 = vpop.eup %7672  ;;  %7682 = vrcp.f32 %v1380_v62  ;;  %v1224_v62 = vadd.f32 %v1212_v37, %v1196_v2 }
 0x351   :  { %v7675_v5 = vpop.eup %7674  ;;  %v1383_v24 = vadd.f32 1.0, %v7673_v33  ;;  %7684 = vpow2.f32 %v6082_v9  ;;  %v6778_v46 = vpop.f32.mrb[22].mxu0  ;;  %v1211_v9 = vmul.f32 %v9019_v8, %v11343_v10  ;;  %v1197_v33 = vadd.f32 %v1185_v63, %v1169_v29 }
 0x352   :  { %v1382_v57 = vadd.f32 1.0, %v7675_v5  ;;  %7686 = vpow2.f32 %v6081_v42  ;;  %v1355_v41 = vpop.f32.mrb[23].mxu0  ;;  %v11344_v42 = vld [vmem:[#allocation63_spill] sm:$0xff]  ;;  %v1236_v3 = vadd.f32 %v1224_v62, %v11293_v32 }
 0x353   :  { %7688 = vrcp.f32 %v1383_v24  ;;  %v1186_v15 = vmul.f32 %v9006_v23, %v11344_v42  ;;  %v11345_v5 = vld [vmem:[#allocation67_spill] sm:$0xff]  ;;  %v1223_v56 = vadd.f32 %v1211_v9, %v1195_v28  ;;  %v1422_v59 = vadd.f32 %v1355_v41, %v8693_v16 }
 0x354   :  { %7690 = vrcp.f32 %v1382_v57  ;;  %v7677_v26 = vpop.eup %7676  ;;  %v1213_v24 = vmul.f32 %v9019_v8, %v11345_v5  ;;  %v1423_v8 = vadd.f32 %v6778_v46, %v8702_v0 }
 0x355   :  { %v7679_v57 = vpop.eup %7678  ;;  %v1409_v51 = vadd.f32 1.0, %v7677_v26  ;;  %v1198_v2 = vadd.f32 %v1186_v15, %v1170_v43  ;;  %v1235_v34 = vadd.f32 %v1223_v56, %v8682_v54  ;;  %v11348_v56 = vld [vmem:[#allocation7_spill] sm:$0xff] }
 0x356   :  { %v1225_v5 = vadd.f32 %v1213_v24, %v1197_v33  ;;  %v1408_v28 = vadd.f32 1.0, %v7679_v57 }
 0x357   :  { %v1226_v7 = vadd.f32 %v1214_v4, %v1198_v2  ;;  %7692 = vrcp.f32 %v1409_v51 }
 0x358   :  { %v1237_v15 = vadd.f32 %v1225_v5, %v11294_v55 }
 0x359   :  { %v7681_v20 = vpop.eup %7680  ;;  %v1238_v62 = vadd.f32 %v1226_v7, %v8708_v12 }
 0x35a   :  { %v7683_v37 = vpop.eup %7682  ;;  %v1425_v23 = vmul.f32 %v7681_v20, %v1421_v52 }
 0x35b   :  { %v7685_v63 = vpop.eup %7684  ;;  %v1424_v29 = vmul.f32 %v7683_v37, %v1420_v18 }
 0x35c   :  { %v7687_v42 = vpop.eup %7686  ;;  %v1429_v21 = vadd.f32 %v1425_v23, %v1236_v3  ;;  %v1411_v33 = vadd.f32 1.0, %v7685_v63  ;;  %v11349_v23 = vld [vmem:[#allocation9_spill] sm:$0xff] }
 0x35d   :  { %v7689_v49 = vpop.eup %7688  ;;  %v1428_v9 = vadd.f32 %v1424_v29, %v1235_v34  ;;  %v1410_v4 = vadd.f32 1.0, %v7687_v42  ;;  %v11350_v34 = vld [vmem:[#allocation10_spill] sm:$0xff] }
 0x35e   :  { %v7691_v26 = vpop.eup %7690  ;;  %v1427_v43 = vmul.f32 %v7689_v49, %v1423_v8  ;;  %7694 = vtanh.f32 %v1429_v21 }
 0x35f   :  { %v1426_v52 = vmul.f32 %v7691_v26, %v1422_v59  ;;  %7696 = vtanh.f32 %v1428_v9 }
 0x360   :  { %v1431_v24 = vadd.f32 %v1427_v43, %v1238_v62  ;;  %7698 = vrcp.f32 %v1408_v28  ;;  %v11355_v43 = vld [vmem:[#allocation12_spill] sm:$0xff] }
 0x361   :  { %v1430_v46 = vadd.f32 %v1426_v52, %v1237_v15  ;;  %v7693_v41 = vpop.eup %7692  ;;  %v11356_v15 = vld [vmem:[#allocation13_spill] sm:$0xff]  ;;  %v11357_v52 = vld [vmem:[#allocation14_spill] sm:$0xff] }
 0x362   :  { %7700 = vtanh.f32 %v1431_v24  ;;  %v11359_v24 = vld [vmem:[#allocation16_spill] sm:$0xff] }
 0x363   :  { %7702 = vtanh.f32 %v1430_v46  ;;  %v11361_v46 = vld [vmem:[#allocation6_spill] sm:$0xff] }
 0x364   :  { %7704 = vrcp.f32 %v1411_v33  ;;  %v11358_v33 = vld [vmem:[#allocation15_spill] sm:$0xff] }
 0x365   :  { %7706 = vrcp.f32 %v1410_v4  ;;  %v11360_v4 = vld [vmem:[#allocation17_spill] sm:$0xff] }
 0x368   :  { %v7695_v57 = vpop.eup %7694 }
 0x369   :  { %v7697_v20 = vpop.eup %7696  ;;  %v1437_v7 = vsub.f32 %v8886_v13, %v7695_v57 }
 0x36a   :  { %v7699_v49 = vpop.eup %7698  ;;  %v1436_v18 = vsub.f32 %v11348_v56, %v7697_v20  ;;  %v6083_v56 = vld [vmem:[%s10916_s0 + $0xc] sm:$0x7] }
 0x36b   :  { %v1441_v37 = vmul.f32 %v7693_v41, %v1437_v7  ;;  %v11362_v41 = vld [vmem:[#allocation56_spill] sm:$0xff] }
 0x36c   :  { %v7701_v5 = vpop.eup %7700  ;;  %v1440_v3 = vmul.f32 %v7699_v49, %v1436_v18  ;;  %v11365_v7 = vld [vmem:[#allocation48_spill] sm:$0xff]  ;;  %v11366_v49 = vld [vmem:[#allocation61_spill] sm:$0xff]  ;;  %v11367_v18 = vld [vmem:[#allocation54_spill] sm:$0xff] }
 0x36d   :  { %v7703_v51 = vpop.eup %7702  ;;  %v1439_v2 = vsub.f32 %v11349_v23, %v7701_v5  ;;  %v9124_v63 = vadd.f32 %v7695_v57, %v1441_v37  ;;  %v11363_v57 = vld [vmem:[#allocation58_spill] sm:$0xff]  ;;  %v11369_v23 = vld [vmem:[#allocation52_spill] sm:$0xff] }
 0x36e   :  { %v7705_v42 = vpop.eup %7704  ;;  %v1438_v29 = vsub.f32 %v11350_v34, %v7703_v51  ;;  %v9127_v8 = vadd.f32 %v7697_v20, %v1440_v3  ;;  %v11364_v20 = vld [vmem:[#allocation59_spill] sm:$0xff]  ;;  %v6084_v37 = vld [vmem:[%s10916_s0 + $0x10] sm:$0x7] }
 0x36f   :  { %v7707_v21 = vpop.eup %7706  ;;  %v1443_v28 = vmul.f32 %v7705_v42, %v1439_v2  ;;  %v9181_v2 = vrot.slane %v6083_v56, %v11369_v23  ;;  %v11370_v42 = vld [vmem:[#allocation19_spill] sm:$0xff] }
 0x370   :  { %v1442_v9 = vmul.f32 %v7707_v21, %v1438_v29  ;;  %v9131_v13 = vpack.c.bf16 %v9124_v63, %v9127_v8  ;;  %v9186_v29 = vrot.slane %v6084_v37, %v11367_v18  ;;  %v11371_v21 = vld [vmem:[#allocation37_spill] sm:$0xff] }
 0x371   :  { %v9133_v59 = vadd.f32 %v7701_v5, %v1443_v28  ;;  %v9173_v5 = vrot.slane %v6083_v56, %v11367_v18  ;;  %v1479_v34 = vmul.f32 %v9181_v2, %v11370_v42  ;;  %v11375_v42 = vld [vmem:[#allocation41_spill] sm:$0xff] }
 0x372   :  { %11351 = vst [vmem:[#allocation64_spill] sm:$0xff] %v9131_v13  ;;  %v9135_v26 = vadd.f32 %v7703_v51, %v1442_v9  ;;  %7254 = vmatprep.subr.bf16.mxu1 %v9131_v13  ;;  %v11368_v51 = vld [vmem:[#allocation39_spill] sm:$0xff] }
 0x373   :  { %11352 = vst [vmem:[#allocation68_spill] sm:$0xff] %v9133_v59  ;;  %7256 = vmatpush3.bf16.msra.mxu1 %v9131_v13  ;;  %v1463_v3 = vmul.f32 %v9173_v5, %v11368_v51  ;;  %v1462_v28 = vmul.f32 %v9173_v5, %v11371_v21  ;;  %v11374_v51 = vld [vmem:[#allocation20_spill] sm:$0xff]  ;;  %v1465_v18 = vmul.f32 %v9173_v5, %v11375_v42  ;;  %v11378_v21 = vld [vmem:[#allocation22_spill] sm:$0xff] }
 0x374   :  { %11353 = vst [vmem:[#allocation69_spill] sm:$0xff] %v9135_v26  ;;  %v9141_v62 = vpack.c.bf16 %v9133_v59, %v9135_v26  ;;  %v1507_v56 = vmul.f32 %v9186_v29, %v11374_v51  ;;  %v11384_v42 = vld [vmem:[#allocation34_spill] sm:$0xff]  ;;  %v11388_v26 = vld [vmem:[#allocation29_spill] sm:$0xff]  ;;  %v11389_v59 = vld [vmem:[#allocation36_spill] sm:$0xff] }
 0x375   :  { %v1491_v9 = vadd.f32 %v1479_v34, %v1463_v3  ;;  %v11377_v34 = vld [vmem:[#allocation60_spill] sm:$0xff] }
 0x376   :  { %11354 = vst [vmem:[#allocation73_spill] sm:$0xff] %v9141_v62  ;;  %7258 = vmatprep.subr.bf16.mxu1 %v9141_v62 }
 0x377   :  { %7260 = vmatpush3.bf16.msra.mxu1 %v9141_v62  ;;  %v11372_v62 = vld [vmem:[#allocation18_spill] sm:$0xff] }
 0x378   :  { %v1478_v13 = vmul.f32 %v9181_v2, %v11372_v62  ;;  %v1509_v62 = vmul.f32 %v9186_v29, %v11377_v34 }
 0x37a   :  { %6788 = vmatmul.mubr.msk.f32.vlgmr.msra.gmra.mrb[12].mxu1 %vm541_vm0, %v11355_v43  ;;  %v11386_v43 = vld [vmem:[#allocation44_spill] sm:$0xff] }
 0x37b   :  { %6790 = vmatprep.mubr.msk.f32.mxu1 %vm541_vm0, %v11356_v15 }
 0x37e   :  { %6791 = vmatmul.mubr.msk.f32.gmra.mrb[14].mxu1 %vm541_vm0, %v11357_v52 }
 0x37f   :  { %6793 = vmatprep.mubr.msk.f32.mxu1 %vm541_vm0, %v11358_v33  ;;  %v11381_v33 = vld [vmem:[#allocation24_spill] sm:$0xff] }
 0x382   :  { %6794 = vmatmul.mubr.msk.f32.gmra.mrb[16].mxu1 %vm541_vm0, %v11359_v24  ;;  %v11379_v24 = vld [vmem:[#allocation25_spill] sm:$0xff] }
 0x383   :  { %6796 = vmatprep.mubr.msk.f32.mxu1 %vm541_vm0, %v11360_v4 }
 0x386   :  { %6797 = vmatmul.mubr.msk.f32.gmra.mrb[18].mxu1 %vm541_vm0, %v11361_v46  ;;  %v11376_v46 = vld [vmem:[#allocation23_spill] sm:$0xff] }
 0x387   :  { %6799 = vmatprep.mubr.msk.f32.mxu1 %vm541_vm0, %v11362_v41  ;;  %v1519_v41 = vadd.f32 %v1507_v56, %v1491_v9  ;;  %v1481_v3 = vmul.f32 %v9181_v2, %v11376_v46  ;;  %v11382_v9 = vld [vmem:[#allocation21_spill] sm:$0xff]  ;;  %v11383_v46 = vld [vmem:[#allocation26_spill] sm:$0xff] }
 0x388   :  { %v1464_v56 = vmul.f32 %v9173_v5, %v11382_v9  ;;  %v1508_v34 = vmul.f32 %v9186_v29, %v11383_v46 }
 0x38a   :  { %6800 = vmatmul.mubr.msk.f32.gmra.mrb[20].mxu1 %vm541_vm0, %v11363_v57  ;;  %v1490_v57 = vadd.f32 %v1478_v13, %v1462_v28  ;;  %v1493_v28 = vadd.f32 %v1481_v3, %v1465_v18  ;;  %v11387_v3 = vld [vmem:[#allocation62_spill] sm:$0xff] }
 0x38b   :  { %6802 = vmatprep.mubr.msk.f32.mxu1 %vm541_vm0, %v11364_v20  ;;  %v9197_v20 = vrot.slane %v6084_v37, %v11369_v23  ;;  %v11380_v37 = vld [vmem:[#allocation35_spill] sm:$0xff]  ;;  %v1510_v9 = vmul.f32 %v9186_v29, %v11387_v3 }
 0x38c   :  { %v1482_v23 = vmul.f32 %v9181_v2, %v11380_v37 }
 0x38d   :  { %v1534_v51 = vmul.f32 %v9197_v20, %v11379_v24  ;;  %v1535_v13 = vmul.f32 %v9197_v20, %v11381_v33  ;;  %v11385_v24 = vld [vmem:[#allocation28_spill] sm:$0xff]  ;;  %v1467_v33 = vmul.f32 %v9173_v5, %v11386_v43  ;;  %v1537_v46 = vmul.f32 %v9197_v20, %v11388_v26 }
 0x38e   :  { %6803 = vmatmul.mubr.msk.f32.gmra.mrb[22].mxu1 %vm541_vm0, %v11365_v7  ;;  %v1536_v15 = vmul.f32 %v9197_v20, %v11385_v24 }
 0x38f   :  { %6839 = vmatprep.mubr.msk.f32.mxu1 %vm541_vm0, %v11366_v49  ;;  %v11373_v49 = vld [vmem:[#allocation57_spill] sm:$0xff] }
 0x390   :  { %v1506_v7 = vmul.f32 %v9186_v29, %v11373_v49  ;;  %v1480_v49 = vmul.f32 %v9181_v2, %v11378_v21  ;;  %v1466_v21 = vmul.f32 %v9173_v5, %v11384_v42  ;;  %v1483_v42 = vmul.f32 %v9181_v2, %v11389_v59 }
 0x392   :  { %v1518_v4 = vadd.f32 %v1506_v7, %v1490_v57  ;;  %v1547_v57 = vadd.f32 %v1535_v13, %v1519_v41  ;;  %v1521_v7 = vadd.f32 %v1509_v62, %v1493_v28  ;;  %v1492_v52 = vadd.f32 %v1480_v49, %v1464_v56  ;;  %v11390_v41 = vld [vmem:[#allocation46_spill] sm:$0xff]  ;;  %v11392_v28 = vld [vmem:[#allocation27_spill] sm:$0xff] }
 0x393   :  { %v1494_v18 = vadd.f32 %v1482_v23, %v1466_v21  ;;  %v1469_v62 = vmul.f32 %v9173_v5, %v11390_v41  ;;  %v1485_v49 = vmul.f32 %v9181_v2, %v8467_v61  ;;  %v11391_v23 = vld [vmem:[#allocation38_spill] sm:$0xff]  ;;  %v1538_v56 = vmul.f32 %v9197_v20, %v11392_v28 }
 0x394   :  { %v1546_v37 = vadd.f32 %v1534_v51, %v1518_v4  ;;  %v1520_v4 = vadd.f32 %v1508_v34, %v1492_v52  ;;  %v1559_v51 = vadd.f32 %v1547_v57, %v11283_v17  ;;  %v1549_v13 = vadd.f32 %v1537_v46, %v1521_v7 }
 0x395   :  { %v1511_v21 = vmul.f32 %v9186_v29, %v11391_v23  ;;  %v1522_v43 = vadd.f32 %v1510_v9, %v1494_v18  ;;  %v1513_v41 = vmul.f32 %v9186_v29, %v8589_v31  ;;  %v1495_v52 = vadd.f32 %v1483_v42, %v1467_v33  ;;  %v11393_v9 = vld [vmem:[#allocation50_spill] sm:$0xff]  ;;  %v11394_v42 = vld [vmem:[#allocation40_spill] sm:$0xff] }
 0x396   :  { %v1558_v3 = vadd.f32 %v1546_v37, %v11285_v22  ;;  %v1548_v59 = vadd.f32 %v1536_v15, %v1520_v4  ;;  %v1539_v46 = vmul.f32 %v9197_v20, %v8471_v1  ;;  %v1497_v34 = vadd.f32 %v1485_v49, %v1469_v62  ;;  %v11395_v62 = vld [vmem:[#allocation47_spill] sm:$0xff] }
 0x397   :  { %v1484_v28 = vmul.f32 %v9181_v2, %v8465_v60  ;;  %v1561_v15 = vadd.f32 %v1549_v13, %v8434_v47  ;;  %v1523_v37 = vadd.f32 %v1511_v21, %v1495_v52  ;;  %v1541_v18 = vmul.f32 %v9197_v20, %v11393_v9 }
 0x398   :  { %v1560_v7 = vadd.f32 %v1548_v59, %v8437_v48  ;;  %v1550_v33 = vadd.f32 %v1538_v56, %v1522_v43  ;;  %v1540_v52 = vmul.f32 %v9197_v20, %v8489_v25 }
 0x399   :  { %v1551_v49 = vadd.f32 %v1539_v46, %v1523_v37 }
 0x39a   :  { %v1562_v47 = vadd.f32 %v1550_v33, %v8442_v50  ;;  %v1486_v33 = vmul.f32 %v9181_v2, %v11287_v40 }
 0x39b   :  { %v1563_v43 = vadd.f32 %v1551_v49, %v11286_v35 }
 0x44d   :  { %v6789_v26 = vpop.f32.mrb[12].mxu1 }
 0x44e   :  { %v1696_v24 = vadd.f32 %v6789_v26, %v1559_v51  ;;  %v1636_v61 = vpop.f32.mrb[13].mxu1  ;;  %v1468_v51 = vmul.f32 %v9173_v5, %v11394_v42 }
 0x44f   :  { %v1695_v57 = vadd.f32 %v1636_v61, %v1558_v3  ;;  %v1512_v61 = vmul.f32 %v9186_v29, %v11395_v62 }
 0x450   :  { %v6098_v23 = vmul.f32 -1.442695, %v1696_v24  ;;  %v1525_v24 = vadd.f32 %v1513_v41, %v1497_v34  ;;  %v1496_v21 = vadd.f32 %v1484_v28, %v1468_v51 }
 0x451   :  { %v6097_v26 = vmul.f32 -1.442695, %v1695_v57  ;;  %v6792_v4 = vpop.f32.mrb[14].mxu1 }
 0x452   :  { %7708 = vpow2.f32 %v6098_v23  ;;  %v1698_v59 = vadd.f32 %v6792_v4, %v1561_v15  ;;  %v1646_v3 = vpop.f32.mrb[15].mxu1  ;;  %v1553_v56 = vadd.f32 %v1541_v18, %v1525_v24  ;;  %v1524_v62 = vadd.f32 %v1512_v61, %v1496_v21 }
 0x453   :  { %7710 = vpow2.f32 %v6097_v26  ;;  %v1697_v13 = vadd.f32 %v1646_v3, %v1560_v7  ;;  %v1470_v24 = vmul.f32 %v9173_v5, %v8549_v19  ;;  %v1471_v21 = vmul.f32 %v9173_v5, %v11289_v39 }
 0x454   :  { %v6100_v57 = vmul.f32 -1.442695, %v1698_v59  ;;  %v1552_v46 = vadd.f32 %v1540_v52, %v1524_v62  ;;  %v1565_v28 = vadd.f32 %v1553_v56, %v8450_v53  ;;  %v1514_v56 = vmul.f32 %v9186_v29, %v8604_v11 }
 0x455   :  { %v6099_v9 = vmul.f32 -1.442695, %v1697_v13  ;;  %v6795_v42 = vpop.f32.mrb[16].mxu1 }
 0x456   :  { %7712 = vpow2.f32 %v6100_v57  ;;  %v1724_v23 = vadd.f32 %v6795_v42, %v1563_v43  ;;  %v1656_v15 = vpop.f32.mrb[17].mxu1  ;;  %v1564_v37 = vadd.f32 %v1552_v46, %v8534_v14  ;;  %v1515_v57 = vmul.f32 %v9186_v29, %v11290_v38 }
 0x457   :  { %7714 = vpow2.f32 %v6099_v9  ;;  %v1723_v41 = vadd.f32 %v1656_v15, %v1562_v47  ;;  %v1487_v47 = vmul.f32 %v9181_v2, %v11288_v58  ;;  %v1498_v43 = vadd.f32 %v1486_v33, %v1470_v24 }
 0x458   :  { %v6102_v34 = vmul.f32 -1.442695, %v1724_v23  ;;  %v1473_v33 = vmul.f32 %v9173_v5, %v11249_v44 }
 0x459   :  { %v6798_v7 = vpop.f32.mrb[18].mxu1  ;;  %v6101_v26 = vmul.f32 -1.442695, %v1723_v41  ;;  %v1499_v41 = vadd.f32 %v1487_v47, %v1471_v21 }
 0x45a   :  { %v1726_v4 = vadd.f32 %v6798_v7, %v1565_v28  ;;  %v1666_v18 = vpop.f32.mrb[19].mxu1  ;;  %7716 = vpow2.f32 %v6102_v34  ;;  %v1488_v28 = vmul.f32 %v9181_v2, %v8598_v30  ;;  %v1543_v7 = vmul.f32 %v9197_v20, %v11291_v36 }
 0x45b   :  { %v1725_v51 = vadd.f32 %v1666_v18, %v1564_v37  ;;  %7718 = vpow2.f32 %v6101_v26  ;;  %v1489_v37 = vmul.f32 %v9181_v2, %v8608_v27  ;;  %v11396_v18 = vld [vmem:[#allocation66_spill] sm:$0xff] }
 0x45c   :  { %v7709_v59 = vpop.eup %7708  ;;  %v6104_v9 = vmul.f32 -1.442695, %v1726_v4  ;;  %v1472_v4 = vmul.f32 %v9173_v5, %v8587_v45 }
 0x45d   :  { %v7711_v61 = vpop.eup %7710  ;;  %v1712_v42 = vadd.f32 1.0, %v7709_v59  ;;  %v6801_v62 = vpop.f32.mrb[20].mxu1  ;;  %v6103_v49 = vmul.f32 -1.442695, %v1725_v51  ;;  %v1516_v51 = vmul.f32 %v9186_v29, %v11396_v18  ;;  %v1527_v59 = vadd.f32 %v1515_v57, %v1499_v41  ;;  %v11399_v57 = vld [vmem:[#allocation70_spill] sm:$0xff] }
 0x45e   :  { %v1711_v3 = vadd.f32 1.0, %v7711_v61  ;;  %v1676_v13 = vpop.f32.mrb[21].mxu1  ;;  %v1526_v61 = vadd.f32 %v1514_v56, %v1498_v43  ;;  %v1501_v2 = vadd.f32 %v1489_v37, %v1473_v33  ;;  %v1752_v41 = vadd.f32 %v6801_v62, %v11399_v57 }
 0x45f   :  { %7720 = vrcp.f32 %v1712_v42  ;;  %v1542_v42 = vmul.f32 %v9197_v20, %v11343_v10  ;;  %v1555_v47 = vadd.f32 %v1543_v7, %v1527_v59 }
 0x460   :  { %v7713_v52 = vpop.eup %7712  ;;  %7722 = vrcp.f32 %v1711_v3  ;;  %v11397_v3 = vld [vmem:[#allocation63_spill] sm:$0xff] }
 0x461   :  { %v7715_v23 = vpop.eup %7714  ;;  %v1714_v15 = vadd.f32 1.0, %v7713_v52  ;;  %7724 = vpow2.f32 %v6104_v9  ;;  %v6804_v46 = vpop.f32.mrb[22].mxu1  ;;  %v1500_v9 = vadd.f32 %v1488_v28, %v1472_v4  ;;  %v11398_v52 = vld [vmem:[#allocation67_spill] sm:$0xff]  ;;  %v1554_v56 = vadd.f32 %v1542_v42, %v1526_v61 }
 0x462   :  { %v1713_v34 = vadd.f32 1.0, %v7715_v23  ;;  %7726 = vpow2.f32 %v6103_v49  ;;  %v1686_v26 = vpop.f32.mrb[23].mxu1  ;;  %v1517_v49 = vmul.f32 %v9186_v29, %v11397_v3  ;;  %v1544_v23 = vmul.f32 %v9197_v20, %v11398_v52 }
 0x463   :  { %7728 = vrcp.f32 %v1714_v15  ;;  %v1528_v21 = vadd.f32 %v1516_v51, %v1500_v9  ;;  %v1751_v28 = vadd.f32 %v1676_v13, %v11292_v6  ;;  %v1567_v4 = vadd.f32 %v1555_v47, %v11293_v32 }
 0x464   :  { %7730 = vrcp.f32 %v1713_v34  ;;  %v7717_v24 = vpop.eup %7716  ;;  %v11400_v34 = vld [vmem:[#allocation71_spill] sm:$0xff]  ;;  %v1529_v59 = vadd.f32 %v1517_v49, %v1501_v2  ;;  %v1566_v33 = vadd.f32 %v1554_v56, %v8682_v54  ;;  %v1753_v13 = vadd.f32 %v1686_v26, %v8693_v16 }
 0x465   :  { %v7719_v15 = vpop.eup %7718  ;;  %v1545_v5 = vmul.f32 %v9197_v20, %v11400_v34  ;;  %v1740_v37 = vadd.f32 1.0, %v7717_v24  ;;  %v1556_v52 = vadd.f32 %v1544_v23, %v1528_v21  ;;  %v1754_v20 = vadd.f32 %v6804_v46, %v8702_v0 }
 0x466   :  { %v1739_v61 = vadd.f32 1.0, %v7719_v15 }
 0x467   :  { %v1557_v57 = vadd.f32 %v1545_v5, %v1529_v59  ;;  %7732 = vrcp.f32 %v1740_v37  ;;  %v1568_v49 = vadd.f32 %v1556_v52, %v11294_v55 }
 0x469   :  { %v7721_v43 = vpop.eup %7720  ;;  %v1569_v47 = vadd.f32 %v1557_v57, %v8708_v12 }
 0x46a   :  { %v7723_v7 = vpop.eup %7722  ;;  %v1756_v29 = vmul.f32 %v7721_v43, %v1752_v41 }
 0x46b   :  { %v7725_v51 = vpop.eup %7724  ;;  %v1755_v9 = vmul.f32 %v7723_v7, %v1751_v28 }
 0x46c   :  { %v7727_v3 = vpop.eup %7726  ;;  %v1760_v62 = vadd.f32 %v1756_v29, %v1567_v4  ;;  %v1742_v21 = vadd.f32 1.0, %v7725_v51  ;;  %v11401_v4 = vld [vmem:[#allocation68_spill] sm:$0xff]  ;;  %v11402_v51 = vld [vmem:[#allocation69_spill] sm:$0xff] }
 0x46d   :  { %v7729_v34 = vpop.eup %7728  ;;  %v1759_v42 = vadd.f32 %v1755_v9, %v1566_v33  ;;  %v1741_v5 = vadd.f32 1.0, %v7727_v3 }
 0x46e   :  { %v7731_v24 = vpop.eup %7730  ;;  %v1758_v2 = vmul.f32 %v7729_v34, %v1754_v20  ;;  %7734 = vtanh.f32 %v1760_v62 }
 0x46f   :  { %v1757_v41 = vmul.f32 %v7731_v24, %v1753_v13  ;;  %7736 = vtanh.f32 %v1759_v42  ;;  %v11408_v24 = vld [vmem:[#allocation12_spill] sm:$0xff] }
 0x470   :  { %v1762_v23 = vadd.f32 %v1758_v2, %v1569_v47  ;;  %7738 = vrcp.f32 %v1739_v61  ;;  %v11409_v47 = vld [vmem:[#allocation13_spill] sm:$0xff]  ;;  %v11410_v2 = vld [vmem:[#allocation14_spill] sm:$0xff] }
 0x471   :  { %v1761_v46 = vadd.f32 %v1757_v41, %v1568_v49  ;;  %v7733_v26 = vpop.eup %7732  ;;  %v11411_v49 = vld [vmem:[#allocation15_spill] sm:$0xff]  ;;  %v11412_v41 = vld [vmem:[#allocation16_spill] sm:$0xff] }
 0x472   :  { %7740 = vtanh.f32 %v1762_v23  ;;  %v11414_v23 = vld [vmem:[#allocation6_spill] sm:$0xff] }
 0x473   :  { %7742 = vtanh.f32 %v1761_v46  ;;  %v11416_v46 = vld [vmem:[#allocation58_spill] sm:$0xff] }
 0x474   :  { %7744 = vrcp.f32 %v1742_v21  ;;  %v11413_v21 = vld [vmem:[#allocation17_spill] sm:$0xff] }
 0x475   :  { %7746 = vrcp.f32 %v1741_v5  ;;  %v11415_v5 = vld [vmem:[#allocation56_spill] sm:$0xff] }
 0x478   :  { %v7735_v15 = vpop.eup %7734 }
 0x479   :  { %v7737_v43 = vpop.eup %7736  ;;  %v1768_v57 = vsub.f32 %v9124_v63, %v7735_v15 }
 0x47a   :  { %v7739_v34 = vpop.eup %7738  ;;  %v1767_v56 = vsub.f32 %v9127_v8, %v7737_v43 }
 0x47b   :  { %v1772_v28 = vmul.f32 %v7733_v26, %v1768_v57  ;;  %v11417_v26 = vld [vmem:[#allocation59_spill] sm:$0xff]  ;;  %v6105_v57 = vld [vmem:[%s10916_s0 + $0x10] sm:$0x7] }
 0x47c   :  { %v7741_v52 = vpop.eup %7740  ;;  %v1771_v37 = vmul.f32 %v7739_v34, %v1767_v56  ;;  %v6106_v34 = vld [vmem:[%s10916_s0 + $0xc] sm:$0x7]  ;;  %v11420_v56 = vld [vmem:[#allocation54_spill] sm:$0xff] }
 0x47d   :  { %v7743_v7 = vpop.eup %7742  ;;  %v1770_v29 = vsub.f32 %v11401_v4, %v7741_v52  ;;  %v9302_v59 = vadd.f32 %v7735_v15, %v1772_v28  ;;  %v11418_v15 = vld [vmem:[#allocation48_spill] sm:$0xff] }
 0x47e   :  { %v7745_v3 = vpop.eup %7744  ;;  %v1769_v33 = vsub.f32 %v11402_v51, %v7743_v7  ;;  %v9305_v62 = vadd.f32 %v7737_v43, %v1771_v37  ;;  %v11419_v43 = vld [vmem:[#allocation61_spill] sm:$0xff]  ;;  %v11421_v28 = vld [vmem:[#allocation52_spill] sm:$0xff]  ;;  %v11422_v37 = vld [vmem:[#allocation39_spill] sm:$0xff] }
 0x47f   :  { %v7747_v9 = vpop.eup %7746  ;;  %v1774_v20 = vmul.f32 %v7745_v3, %v1770_v29  ;;  %v9362_v29 = vrot.slane %v6106_v34, %v11420_v56  ;;  %v11423_v3 = vld [vmem:[#allocation37_spill] sm:$0xff] }
 0x480   :  { %11403 = vst [vmem:[#allocation72_spill] sm:$0xff] %v9305_v62  ;;  %v1773_v61 = vmul.f32 %v7747_v9, %v1769_v33  ;;  %v9309_v63 = vpack.c.bf16 %v9302_v59, %v9305_v62  ;;  %v11424_v33 = vld [vmem:[#allocation19_spill] sm:$0xff] }
 0x481   :  { %v9311_v8 = vadd.f32 %v7741_v52, %v1774_v20  ;;  %v9354_v52 = vrot.slane %v6105_v57, %v11420_v56  ;;  %v11425_v20 = vld [vmem:[#allocation18_spill] sm:$0xff] }
 0x482   :  { %11404 = vst [vmem:[#allocation65_spill] sm:$0xff] %v9309_v63  ;;  %v9313_v42 = vadd.f32 %v7743_v7, %v1773_v61  ;;  %7262 = vmatprep.subr.bf16.mxu0 %v9309_v63  ;;  %v9357_v7 = vrot.slane %v6105_v57, %v11421_v28 }
 0x483   :  { %11405 = vst [vmem:[#allocation7_spill] sm:$0xff] %v9311_v8  ;;  %7264 = vmatpush3.bf16.msra.mxu0 %v9309_v63  ;;  %v1792_v4 = vmul.f32 %v9354_v52, %v11422_v37  ;;  %v1791_v51 = vmul.f32 %v9354_v52, %v11423_v3 }
 0x484   :  { %11406 = vst [vmem:[#allocation9_spill] sm:$0xff] %v9313_v42  ;;  %v9319_v13 = vpack.c.bf16 %v9311_v8, %v9313_v42  ;;  %v1808_v9 = vmul.f32 %v9357_v7, %v11424_v33  ;;  %v1807_v61 = vmul.f32 %v9357_v7, %v11425_v20 }
 0x486   :  { %11407 = vst [vmem:[#allocation10_spill] sm:$0xff] %v9319_v13  ;;  %7266 = vmatprep.subr.bf16.mxu0 %v9319_v13 }
 0x487   :  { %7268 = vmatpush3.bf16.msra.mxu0 %v9319_v13  ;;  %v11431_v13 = vld [vmem:[#allocation60_spill] sm:$0xff] }
 0x488   :  { %v1838_v63 = vmul.f32 %v9362_v29, %v11431_v13  ;;  %v11437_v13 = vld [vmem:[#allocation24_spill] sm:$0xff] }
 0x48a   :  { %6814 = vmatmul.mubr.msk.f32.vlgmr.msra.gmra.mrb[24].mxu0 %vm541_vm0, %v11408_v24  ;;  %v11426_v24 = vld [vmem:[#allocation57_spill] sm:$0xff] }
 0x48b   :  { %6816 = vmatprep.mubr.msk.f32.mxu0 %vm541_vm0, %v11409_v47  ;;  %v1835_v47 = vmul.f32 %v9362_v29, %v11426_v24  ;;  %v11433_v24 = vld [vmem:[#allocation21_spill] sm:$0xff] }
 0x48e   :  { %6817 = vmatmul.mubr.msk.f32.gmra.mrb[26].mxu0 %vm541_vm0, %v11410_v2  ;;  %v1820_v2 = vadd.f32 %v1808_v9, %v1792_v4  ;;  %v11432_v9 = vld [vmem:[#allocation25_spill] sm:$0xff] }
 0x48f   :  { %6819 = vmatprep.mubr.msk.f32.mxu0 %vm541_vm0, %v11411_v49  ;;  %v11427_v49 = vld [vmem:[#allocation41_spill] sm:$0xff] }
 0x492   :  { %6820 = vmatmul.mubr.msk.f32.gmra.mrb[28].mxu0 %vm541_vm0, %v11412_v41  ;;  %v1794_v41 = vmul.f32 %v9354_v52, %v11427_v49 }
 0x493   :  { %6822 = vmatprep.mubr.msk.f32.mxu0 %vm541_vm0, %v11413_v21  ;;  %v9375_v21 = vrot.slane %v6106_v34, %v11421_v28  ;;  %v1793_v34 = vmul.f32 %v9354_v52, %v11433_v24  ;;  %v11439_v24 = vld [vmem:[#allocation44_spill] sm:$0xff] }
 0x494   :  { %v1796_v56 = vmul.f32 %v9354_v52, %v11439_v24  ;;  %v11445_v24 = vld [vmem:[#allocation38_spill] sm:$0xff] }
 0x495   :  { %v1863_v49 = vmul.f32 %v9375_v21, %v11432_v9  ;;  %v11438_v9 = vld [vmem:[#allocation28_spill] sm:$0xff] }
 0x496   :  { %6823 = vmatmul.mubr.msk.f32.gmra.mrb[30].mxu0 %vm541_vm0, %v11414_v23  ;;  %v1819_v23 = vadd.f32 %v1807_v61, %v1791_v51  ;;  %v11434_v51 = vld [vmem:[#allocation35_spill] sm:$0xff]  ;;  %v1865_v37 = vmul.f32 %v9375_v21, %v11438_v9 }
 0x497   :  { %6825 = vmatprep.mubr.msk.f32.mxu0 %vm541_vm0, %v11415_v5  ;;  %v11428_v5 = vld [vmem:[#allocation22_spill] sm:$0xff]  ;;  %v1811_v61 = vmul.f32 %v9357_v7, %v11434_v51 }
 0x498   :  { %v1847_v4 = vadd.f32 %v1835_v47, %v1819_v23  ;;  %v1864_v47 = vmul.f32 %v9375_v21, %v11437_v13  ;;  %v11443_v13 = vld [vmem:[#allocation46_spill] sm:$0xff] }
 0x49a   :  { %6826 = vmatmul.mubr.msk.f32.gmra.mrb[32].mxu0 %vm541_vm0, %v11416_v46  ;;  %v1809_v46 = vmul.f32 %v9357_v7, %v11428_v5  ;;  %v1875_v51 = vadd.f32 %v1863_v49, %v1847_v4 }
 0x49b   :  { %6828 = vmatprep.mubr.msk.f32.mxu0 %vm541_vm0, %v11417_v26  ;;  %v11429_v26 = vld [vmem:[#allocation20_spill] sm:$0xff] }
 0x49c   :  { %v1821_v3 = vadd.f32 %v1809_v46, %v1793_v34 }
 0x49e   :  { %6829 = vmatmul.mubr.msk.f32.gmra.mrb[34].mxu0 %vm541_vm0, %v11418_v15  ;;  %v1836_v15 = vmul.f32 %v9362_v29, %v11429_v26  ;;  %v11435_v26 = vld [vmem:[#allocation26_spill] sm:$0xff] }
 0x49f   :  { %6865 = vmatprep.mubr.msk.f32.mxu0 %vm541_vm0, %v11419_v43  ;;  %v11430_v43 = vld [vmem:[#allocation23_spill] sm:$0xff]  ;;  %v1837_v33 = vmul.f32 %v9362_v29, %v11435_v26 }
 0x4a0   :  { %v1810_v57 = vmul.f32 %v9357_v7, %v11430_v43  ;;  %v1848_v5 = vadd.f32 %v1836_v15, %v1820_v2  ;;  %v11436_v43 = vld [vmem:[#allocation34_spill] sm:$0xff]  ;;  %v11440_v2 = vld [vmem:[#allocation36_spill] sm:$0xff] }
 0x4a1   :  { %v1795_v28 = vmul.f32 %v9354_v52, %v11436_v43  ;;  %v11441_v15 = vld [vmem:[#allocation62_spill] sm:$0xff]  ;;  %v11442_v43 = vld [vmem:[#allocation29_spill] sm:$0xff]  ;;  %v1849_v42 = vadd.f32 %v1837_v33, %v1821_v3  ;;  %v1868_v3 = vmul.f32 %v9375_v21, %v8471_v1 }
 0x4a2   :  { %v1822_v20 = vadd.f32 %v1810_v57, %v1794_v41  ;;  %v1812_v41 = vmul.f32 %v9357_v7, %v11440_v2  ;;  %v1839_v57 = vmul.f32 %v9362_v29, %v11441_v15  ;;  %v1876_v34 = vadd.f32 %v1864_v47, %v1848_v5 }
 0x4a3   :  { %v1823_v46 = vadd.f32 %v1811_v61, %v1795_v28  ;;  %v1866_v26 = vmul.f32 %v9375_v21, %v11442_v43  ;;  %v1840_v28 = vmul.f32 %v9362_v29, %v11445_v24  ;;  %v11446_v61 = vld [vmem:[#allocation27_spill] sm:$0xff]  ;;  %v1887_v47 = vadd.f32 %v1875_v51, %v11285_v22  ;;  %v11447_v51 = vld [vmem:[#allocation32_spill] sm:$0xff] }
 0x4a4   :  { %v1850_v23 = vadd.f32 %v1838_v63, %v1822_v20  ;;  %v1798_v63 = vmul.f32 %v9354_v52, %v11443_v13  ;;  %v11444_v20 = vld [vmem:[#allocation43_spill] sm:$0xff]  ;;  %v1888_v49 = vadd.f32 %v1876_v34, %v11283_v17  ;;  %v1867_v2 = vmul.f32 %v9375_v21, %v11446_v61 }
 0x4a5   :  { %v1814_v9 = vmul.f32 %v9357_v7, %v11444_v20  ;;  %v1877_v15 = vadd.f32 %v1865_v37, %v1849_v42  ;;  %v1824_v43 = vadd.f32 %v1812_v41, %v1796_v56  ;;  %v1851_v8 = vadd.f32 %v1839_v57, %v1823_v46  ;;  %v11448_v37 = vld [vmem:[#allocation50_spill] sm:$0xff] }
 0x4a6   :  { %v1878_v4 = vadd.f32 %v1866_v26, %v1850_v23  ;;  %v1842_v26 = vmul.f32 %v9362_v29, %v8589_v31  ;;  %v1813_v61 = vmul.f32 %v9357_v7, %v8465_v60  ;;  %v1870_v41 = vmul.f32 %v9375_v21, %v11448_v37 }
 0x4a7   :  { %v1826_v33 = vadd.f32 %v1814_v9, %v1798_v63  ;;  %v1889_v34 = vadd.f32 %v1877_v15, %v8437_v48  ;;  %v1852_v56 = vadd.f32 %v1840_v28, %v1824_v43  ;;  %v11449_v9 = vld [vmem:[#allocation40_spill] sm:$0xff]  ;;  %v1869_v28 = vmul.f32 %v9375_v21, %v8489_v25 }
 0x4a8   :  { %v1890_v42 = vadd.f32 %v1878_v4, %v11447_v51  ;;  %v1797_v63 = vmul.f32 %v9354_v52, %v11449_v9 }
 0x4a9   :  { %v1880_v48 = vadd.f32 %v1868_v3, %v1852_v56 }
 0x4aa   :  { %v1825_v43 = vadd.f32 %v1813_v61, %v1797_v63 }
 0x55d   :  { %v6815_v5 = vpop.f32.mrb[24].mxu0 }
 0x55e   :  { %v2025_v13 = vadd.f32 %v6815_v5, %v1888_v49  ;;  %v1965_v62 = vpop.f32.mrb[25].mxu0  ;;  %v1879_v49 = vadd.f32 %v1867_v2, %v1851_v8  ;;  %v11450_v5 = vld [vmem:[#allocation47_spill] sm:$0xff]  ;;  %v1892_v8 = vadd.f32 %v1880_v48, %v11286_v35 }
 0x55f   :  { %v2024_v23 = vadd.f32 %v1965_v62, %v1887_v47  ;;  %v1841_v62 = vmul.f32 %v9362_v29, %v11450_v5 }
 0x560   :  { %v6120_v24 = vmul.f32 -1.442695, %v2025_v13  ;;  %v1854_v13 = vadd.f32 %v1842_v26, %v1826_v33  ;;  %v1891_v60 = vadd.f32 %v1879_v49, %v8442_v50  ;;  %v1815_v49 = vmul.f32 %v9357_v7, %v11287_v40 }
 0x561   :  { %v6119_v46 = vmul.f32 -1.442695, %v2024_v23  ;;  %v6818_v57 = vpop.f32.mrb[26].mxu0  ;;  %v1853_v5 = vadd.f32 %v1841_v62, %v1825_v43  ;;  %v1800_v43 = vmul.f32 %v9354_v52, %v11289_v39 }
 0x562   :  { %7748 = vpow2.f32 %v6120_v24  ;;  %v2027_v15 = vadd.f32 %v6818_v57, %v1890_v42  ;;  %v1975_v47 = vpop.f32.mrb[27].mxu0  ;;  %v1882_v2 = vadd.f32 %v1870_v41, %v1854_v13  ;;  %v1799_v13 = vmul.f32 %v9354_v52, %v8549_v19 }
 0x563   :  { %7750 = vpow2.f32 %v6119_v46  ;;  %v2026_v4 = vadd.f32 %v1975_v47, %v1889_v34  ;;  %v1881_v33 = vadd.f32 %v1869_v28, %v1853_v5 }
 0x564   :  { %v6122_v23 = vmul.f32 -1.442695, %v2027_v15  ;;  %v1894_v61 = vadd.f32 %v1882_v2, %v8450_v53  ;;  %v1843_v2 = vmul.f32 %v9362_v29, %v8604_v11 }
 0x565   :  { %v6121_v51 = vmul.f32 -1.442695, %v2026_v4  ;;  %v6821_v9 = vpop.f32.mrb[28].mxu0  ;;  %v1893_v56 = vadd.f32 %v1881_v33, %v8534_v14 }
 0x566   :  { %7752 = vpow2.f32 %v6122_v23  ;;  %v2053_v24 = vadd.f32 %v6821_v9, %v1892_v8  ;;  %v1985_v42 = vpop.f32.mrb[29].mxu0  ;;  %v1844_v23 = vmul.f32 %v9362_v29, %v11290_v38  ;;  %v1827_v8 = vadd.f32 %v1815_v49, %v1799_v13 }
 0x567   :  { %7754 = vpow2.f32 %v6121_v51  ;;  %v2052_v3 = vadd.f32 %v1985_v42, %v1891_v60  ;;  %v1816_v60 = vmul.f32 %v9357_v7, %v11288_v58 }
 0x568   :  { %v6124_v26 = vmul.f32 -1.442695, %v2053_v24  ;;  %v1855_v49 = vadd.f32 %v1843_v2, %v1827_v8 }
 0x569   :  { %v6824_v34 = vpop.f32.mrb[30].mxu0  ;;  %v6123_v46 = vmul.f32 -1.442695, %v2052_v3  ;;  %v1828_v3 = vadd.f32 %v1816_v60, %v1800_v43  ;;  %v11451_v60 = vld [vmem:[#allocation63_spill] sm:$0xff] }
 0x56a   :  { %v2055_v48 = vadd.f32 %v6824_v34, %v1894_v61  ;;  %v1995_v41 = vpop.f32.mrb[31].mxu0  ;;  %7756 = vpow2.f32 %v6124_v26  ;;  %v1817_v61 = vmul.f32 %v9357_v7, %v8598_v30  ;;  %v1872_v34 = vmul.f32 %v9375_v21, %v11291_v36  ;;  %v11452_v43 = vld [vmem:[#allocation67_spill] sm:$0xff] }
 0x56b   :  { %v2054_v57 = vadd.f32 %v1995_v41, %v1893_v56  ;;  %7758 = vpow2.f32 %v6123_v46  ;;  %v1818_v56 = vmul.f32 %v9357_v7, %v8608_v27  ;;  %v1845_v41 = vmul.f32 %v9362_v29, %v11396_v18 }
 0x56c   :  { %v7749_v63 = vpop.eup %7748  ;;  %v6126_v51 = vmul.f32 -1.442695, %v2055_v48  ;;  %v1801_v48 = vmul.f32 %v9354_v52, %v8587_v45 }
 0x56d   :  { %v7751_v62 = vpop.eup %7750  ;;  %v2041_v9 = vadd.f32 1.0, %v7749_v63  ;;  %v6827_v5 = vpop.f32.mrb[32].mxu0  ;;  %v6125_v47 = vmul.f32 -1.442695, %v2054_v57  ;;  %v1856_v57 = vadd.f32 %v1844_v23, %v1828_v3  ;;  %v1802_v63 = vmul.f32 %v9354_v52, %v11249_v44  ;;  %v11453_v23 = vld [vmem:[#allocation70_spill] sm:$0xff]  ;;  %v11454_v3 = vld [vmem:[#allocation71_spill] sm:$0xff] }
 0x56e   :  { %v2040_v15 = vadd.f32 1.0, %v7751_v62  ;;  %v2005_v4 = vpop.f32.mrb[33].mxu0  ;;  %v1871_v62 = vmul.f32 %v9375_v21, %v11343_v10  ;;  %v1874_v52 = vmul.f32 %v9375_v21, %v11454_v3 }
 0x56f   :  { %7760 = vrcp.f32 %v2041_v9  ;;  %v1829_v9 = vadd.f32 %v1817_v61, %v1801_v48  ;;  %v1830_v7 = vadd.f32 %v1818_v56, %v1802_v63  ;;  %v2080_v61 = vadd.f32 %v2005_v4, %v11292_v6 }
 0x570   :  { %v7753_v28 = vpop.eup %7752  ;;  %7762 = vrcp.f32 %v2040_v15  ;;  %v1846_v15 = vmul.f32 %v9362_v29, %v11451_v60  ;;  %v1883_v2 = vadd.f32 %v1871_v62, %v1855_v49 }
 0x571   :  { %v7755_v24 = vpop.eup %7754  ;;  %v2043_v42 = vadd.f32 1.0, %v7753_v28  ;;  %7764 = vpow2.f32 %v6126_v51  ;;  %v6830_v33 = vpop.f32.mrb[34].mxu0  ;;  %v1884_v51 = vadd.f32 %v1872_v34, %v1856_v57  ;;  %v1857_v13 = vadd.f32 %v1845_v41, %v1829_v9 }
 0x572   :  { %v2042_v26 = vadd.f32 1.0, %v7755_v24  ;;  %7766 = vpow2.f32 %v6125_v47  ;;  %v2015_v46 = vpop.f32.mrb[35].mxu0  ;;  %v1873_v28 = vmul.f32 %v9375_v21, %v11452_v43  ;;  %v1858_v48 = vadd.f32 %v1846_v15, %v1830_v7 }
 0x573   :  { %7768 = vrcp.f32 %v2043_v42  ;;  %v2081_v42 = vadd.f32 %v6827_v5, %v11453_v23  ;;  %v1896_v56 = vadd.f32 %v1884_v51, %v11293_v32  ;;  %v1895_v57 = vadd.f32 %v1883_v2, %v8682_v54  ;;  %v11455_v2 = vld [vmem:[#allocation72_spill] sm:$0xff] }
 0x574   :  { %7770 = vrcp.f32 %v2042_v26  ;;  %v7757_v47 = vpop.eup %7756  ;;  %v1885_v9 = vadd.f32 %v1873_v28, %v1857_v13  ;;  %v1886_v23 = vadd.f32 %v1874_v52, %v1858_v48  ;;  %v2083_v21 = vadd.f32 %v6830_v33, %v8702_v0  ;;  %v11456_v48 = vld [vmem:[#allocation7_spill] sm:$0xff] }
 0x575   :  { %v7759_v24 = vpop.eup %7758  ;;  %v2069_v34 = vadd.f32 1.0, %v7757_v47  ;;  %v2082_v4 = vadd.f32 %v2015_v46, %v8693_v16 }
 0x576   :  { %v2068_v49 = vadd.f32 1.0, %v7759_v24  ;;  %v1898_v51 = vadd.f32 %v1886_v23, %v8708_v12  ;;  %v1897_v15 = vadd.f32 %v1885_v9, %v11294_v55 }
 0x577   :  { %7772 = vrcp.f32 %v2069_v34 }
 0x579   :  { %v7761_v8 = vpop.eup %7760 }
 0x57a   :  { %v7763_v26 = vpop.eup %7762  ;;  %v2085_v29 = vmul.f32 %v7761_v8, %v2081_v42 }
 0x57b   :  { %v7765_v41 = vpop.eup %7764  ;;  %v2084_v63 = vmul.f32 %v7763_v26, %v2080_v61 }
 0x57c   :  { %v7767_v43 = vpop.eup %7766  ;;  %v2089_v5 = vadd.f32 %v2085_v29, %v1896_v56  ;;  %v2071_v13 = vadd.f32 1.0, %v7765_v41 }
 0x57d   :  { %v7769_v3 = vpop.eup %7768  ;;  %v2088_v62 = vadd.f32 %v2084_v63, %v1895_v57  ;;  %v2070_v52 = vadd.f32 1.0, %v7767_v43  ;;  %v11457_v63 = vld [vmem:[#allocation9_spill] sm:$0xff] }
 0x57e   :  { %v7771_v47 = vpop.eup %7770  ;;  %v2087_v7 = vmul.f32 %v7769_v3, %v2083_v21  ;;  %7774 = vtanh.f32 %v2089_v5 }
 0x57f   :  { %v2086_v42 = vmul.f32 %v7771_v47, %v2082_v4  ;;  %7776 = vtanh.f32 %v2088_v62 }
 0x580   :  { %v2091_v28 = vadd.f32 %v2087_v7, %v1898_v51  ;;  %7778 = vrcp.f32 %v2068_v49  ;;  %v9504_v7 = vld [vmem:[%s10919_s3 + $0x8] sm:$0xff] }
 0x581   :  { %v2090_v33 = vadd.f32 %v2086_v42, %v1897_v15  ;;  %v7773_v46 = vpop.eup %7772  ;;  %11462 = vst [vmem:[#allocation13_spill] sm:$0xff] %v9504_v7  ;;  %v9511_v15 = vld [vmem:[%s10919_s3 + $0x10] sm:$0xff]  ;;  %v9518_v42 = vld [vmem:[%s10919_s3 + $0x18] sm:$0xff] }
 0x582   :  { %7780 = vtanh.f32 %v2091_v28  ;;  %11463 = vst [vmem:[#allocation14_spill] sm:$0xff] %v9511_v15  ;;  %11464 = vst [vmem:[#allocation15_spill] sm:$0xff] %v9518_v42  ;;  %v9532_v28 = vld [vmem:[%s10919_s3 + $0x28] sm:$0xff] }
 0x583   :  { %7782 = vtanh.f32 %v2090_v33  ;;  %11466 = vst [vmem:[#allocation17_spill] sm:$0xff] %v9532_v28  ;;  %v9546_v33 = vld [vmem:[%s10919_s3 + $0x38] sm:$0xff] }
 0x584   :  { %7784 = vrcp.f32 %v2071_v13  ;;  %v9525_v13 = vld [vmem:[%s10919_s3 + $0x20] sm:$0xff]  ;;  %11468 = vst [vmem:[#allocation56_spill] sm:$0xff] %v9546_v33 }
 0x585   :  { %7786 = vrcp.f32 %v2070_v52  ;;  %11465 = vst [vmem:[#allocation16_spill] sm:$0xff] %v9525_v13  ;;  %v9539_v52 = vld [vmem:[%s10919_s3 + $0x30] sm:$0xff] }
 0x586   :  { %11467 = vst [vmem:[#allocation6_spill] sm:$0xff] %v9539_v52 }
 0x588   :  { %v7775_v24 = vpop.eup %7774 }
 0x589   :  { %v7777_v8 = vpop.eup %7776  ;;  %v2097_v23 = vsub.f32 %v9302_v59, %v7775_v24 }
 0x58a   :  { %v7779_v3 = vpop.eup %7778  ;;  %v2096_v61 = vsub.f32 %v11455_v2, %v7777_v8  ;;  %v6127_v2 = vld [vmem:[%s10916_s0 + $0x14] sm:$0x7] }
 0x58b   :  { %v2101_v34 = vmul.f32 %v7773_v46, %v2097_v23  ;;  %v9553_v46 = vld [vmem:[%s10919_s3 + $0x40] sm:$0xff]  ;;  %v9574_v23 = vld [vmem:[%s10919_s3 + $0x58] sm:$0xff] }
 0x58c   :  { %v7781_v26 = vpop.eup %7780  ;;  %v2100_v29 = vmul.f32 %v7779_v3, %v2096_v61  ;;  %11469 = vst [vmem:[#allocation58_spill] sm:$0xff] %v9553_v46  ;;  %11472 = vst [vmem:[#allocation61_spill] sm:$0xff] %v9574_v23  ;;  %v8091_v3 = vld [vmem:[%s10919_s3] sm:$0xff]  ;;  %v11473_v61 = vld [vmem:[#allocation54_spill] sm:$0xff] }
 0x58d   :  { %v7783_v56 = vpop.eup %7782  ;;  %v2099_v41 = vsub.f32 %v11456_v48, %v7781_v26  ;;  %v9480_v57 = vadd.f32 %v7775_v24, %v2101_v34  ;;  %v9560_v24 = vld [vmem:[%s10919_s3 + $0x48] sm:$0xff]  ;;  %v11475_v48 = vld [vmem:[#allocation52_spill] sm:$0xff] }
 0x58e   :  { %v7785_v43 = vpop.eup %7784  ;;  %v2098_v9 = vsub.f32 %v11457_v63, %v7783_v56  ;;  %v9483_v21 = vadd.f32 %v7777_v8, %v2100_v29  ;;  %11470 = vst [vmem:[#allocation59_spill] sm:$0xff] %v9560_v24  ;;  %v9567_v8 = vld [vmem:[%s10919_s3 + $0x50] sm:$0xff]  ;;  %v6128_v34 = vld [vmem:[%s10916_s0 + $0x8] sm:$0x7] }
 0x58f   :  { %v7787_v5 = vpop.eup %7786  ;;  %v2103_v49 = vmul.f32 %v7785_v43, %v2099_v41  ;;  %11471 = vst [vmem:[#allocation48_spill] sm:$0xff] %v9567_v8  ;;  %v9594_v41 = vrot.slane %v6127_v2, %v11475_v48  ;;  %v11476_v43 = vld [vmem:[#allocation19_spill] sm:$0xff] }
 0x590   :  { %v2102_v62 = vmul.f32 %v7787_v5, %v2098_v9  ;;  %v9487_v59 = vpack.c.bf16 %v9480_v57, %v9483_v21  ;;  %v9599_v9 = vrot.slane %v6128_v34, %v11473_v61  ;;  %v11477_v5 = vld [vmem:[#allocation37_spill] sm:$0xff] }
 0x591   :  { %v9489_v4 = vadd.f32 %v7781_v26, %v2103_v49  ;;  %v9586_v26 = vrot.slane %v6127_v2, %v11473_v61  ;;  %v2135_v63 = vmul.f32 %v9594_v41, %v11476_v43  ;;  %v9612_v43 = vrot.slane %v6128_v34, %v11475_v48  ;;  %v11487_v48 = vld [vmem:[#allocation21_spill] sm:$0xff] }
 0x592   :  { %11458 = vst [vmem:[#allocation66_spill] sm:$0xff] %v9487_v59  ;;  %v9491_v47 = vadd.f32 %v7783_v56, %v2102_v62  ;;  %7270 = vmatprep.subr.bf16.mxu1 %v9487_v59  ;;  %v11474_v56 = vld [vmem:[#allocation39_spill] sm:$0xff] }
 0x593   :  { %11459 = vst [vmem:[#allocation68_spill] sm:$0xff] %v9489_v4  ;;  %7272 = vmatpush3.bf16.msra.mxu1 %v9487_v59  ;;  %v2119_v29 = vmul.f32 %v9586_v26, %v11474_v56  ;;  %v2118_v49 = vmul.f32 %v9586_v26, %v11477_v5  ;;  %v11480_v56 = vld [vmem:[#allocation41_spill] sm:$0xff] }
 0x594   :  { %11460 = vst [vmem:[#allocation69_spill] sm:$0xff] %v9491_v47  ;;  %v9497_v51 = vpack.c.bf16 %v9489_v4, %v9491_v47  ;;  %v2121_v2 = vmul.f32 %v9586_v26, %v11480_v56  ;;  %v11494_v47 = vld [vmem:[#allocation44_spill] sm:$0xff] }
 0x595   :  { %v2147_v62 = vadd.f32 %v2135_v63, %v2119_v29  ;;  %v11483_v29 = vld [vmem:[#allocation60_spill] sm:$0xff] }
 0x596   :  { %11461 = vst [vmem:[#allocation12_spill] sm:$0xff] %v9497_v51  ;;  %7274 = vmatprep.subr.bf16.mxu1 %v9497_v51  ;;  %v2165_v63 = vmul.f32 %v9599_v9, %v11483_v29  ;;  %v11495_v4 = vld [vmem:[#allocation36_spill] sm:$0xff] }
 0x597   :  { %7276 = vmatpush3.bf16.msra.mxu1 %v9497_v51  ;;  %v11479_v51 = vld [vmem:[#allocation57_spill] sm:$0xff] }
 0x59a   :  { %6840 = vmatmul.mubr.msk.f32.vlgmr.msra.gmra.mrb[24].mxu1 %vm541_vm0, %v9504_v7  ;;  %v11493_v7 = vld [vmem:[#allocation62_spill] sm:$0xff] }
 0x59b   :  { %6842 = vmatprep.mubr.msk.f32.mxu1 %vm541_vm0, %v9511_v15  ;;  %v11490_v15 = vld [vmem:[#allocation34_spill] sm:$0xff] }
 0x59e   :  { %6843 = vmatmul.mubr.msk.f32.gmra.mrb[26].mxu1 %vm541_vm0, %v9518_v42  ;;  %v11489_v42 = vld [vmem:[#allocation26_spill] sm:$0xff] }
 0x59f   :  { %6845 = vmatprep.mubr.msk.f32.mxu1 %vm541_vm0, %v9525_v13  ;;  %v11486_v13 = vld [vmem:[#allocation35_spill] sm:$0xff]  ;;  %v2164_v29 = vmul.f32 %v9599_v9, %v11489_v42  ;;  %v2123_v42 = vmul.f32 %v9586_v26, %v11494_v47 }
 0x5a2   :  { %6846 = vmatmul.mubr.msk.f32.gmra.mrb[28].mxu1 %vm541_vm0, %v9532_v28  ;;  %v11485_v28 = vld [vmem:[#allocation25_spill] sm:$0xff] }
 0x5a3   :  { %6848 = vmatprep.mubr.msk.f32.mxu1 %vm541_vm0, %v9539_v52  ;;  %v2190_v56 = vmul.f32 %v9612_v43, %v11485_v28 }
 0x5a6   :  { %6849 = vmatmul.mubr.msk.f32.gmra.mrb[30].mxu1 %vm541_vm0, %v9546_v33 }
 0x5a7   :  { %6851 = vmatprep.mubr.msk.f32.mxu1 %vm541_vm0, %v9553_v46  ;;  %v11482_v46 = vld [vmem:[#allocation23_spill] sm:$0xff] }
 0x5a8   :  { %v2137_v5 = vmul.f32 %v9594_v41, %v11482_v46 }
 0x5aa   :  { %6852 = vmatmul.mubr.msk.f32.gmra.mrb[32].mxu1 %vm541_vm0, %v9560_v24  ;;  %v2149_v34 = vadd.f32 %v2137_v5, %v2121_v2 }
 0x5ab   :  { %6854 = vmatprep.mubr.msk.f32.mxu1 %vm541_vm0, %v9567_v8  ;;  %v11481_v8 = vld [vmem:[#allocation20_spill] sm:$0xff] }
 0x5ac   :  { %v2163_v24 = vmul.f32 %v9599_v9, %v11481_v8  ;;  %v2138_v8 = vmul.f32 %v9594_v41, %v11486_v13 }
 0x5ae   :  { %6855 = vmatmul.mubr.msk.f32.gmra.mrb[34].mxu1 %vm541_vm0, %v9574_v23  ;;  %v2162_v23 = vmul.f32 %v9599_v9, %v11479_v51  ;;  %v2175_v51 = vadd.f32 %v2163_v24, %v2147_v62  ;;  %v2122_v24 = vmul.f32 %v9586_v26, %v11490_v15  ;;  %v2139_v15 = vmul.f32 %v9594_v41, %v11495_v4 }
 0x5af   :  { %6891 = vmatprep.mubr.msk.f32.mxu1 %vm541_vm0, %v8091_v3  ;;  %v11478_v3 = vld [vmem:[#allocation18_spill] sm:$0xff] }
 0x5b0   :  { %v2134_v59 = vmul.f32 %v9594_v41, %v11478_v3  ;;  %v11484_v3 = vld [vmem:[#allocation22_spill] sm:$0xff] }
 0x5b1   :  { %v2136_v33 = vmul.f32 %v9594_v41, %v11484_v3  ;;  %v11492_v3 = vld [vmem:[#allocation28_spill] sm:$0xff] }
 0x5b2   :  { %v2146_v61 = vadd.f32 %v2134_v59, %v2118_v49  ;;  %v2120_v59 = vmul.f32 %v9586_v26, %v11487_v48  ;;  %v11488_v49 = vld [vmem:[#allocation24_spill] sm:$0xff]  ;;  %v2192_v5 = vmul.f32 %v9612_v43, %v11492_v3  ;;  %v2150_v48 = vadd.f32 %v2138_v8, %v2122_v24 }
 0x5b3   :  { %v2191_v46 = vmul.f32 %v9612_v43, %v11488_v49  ;;  %v2166_v49 = vmul.f32 %v9599_v9, %v11493_v7 }
 0x5b4   :  { %v2174_v52 = vadd.f32 %v2162_v23, %v2146_v61  ;;  %v2177_v23 = vadd.f32 %v2165_v63, %v2149_v34  ;;  %v11491_v61 = vld [vmem:[#allocation29_spill] sm:$0xff]  ;;  %v2148_v28 = vadd.f32 %v2136_v33, %v2120_v59  ;;  %v11496_v63 = vld [vmem:[#allocation46_spill] sm:$0xff]  ;;  %v2141_v33 = vmul.f32 %v9594_v41, %v11444_v20 }
 0x5b5   :  { %v2193_v62 = vmul.f32 %v9612_v43, %v11491_v61  ;;  %v2203_v2 = vadd.f32 %v2191_v46, %v2175_v51  ;;  %v2125_v34 = vmul.f32 %v9586_v26, %v11496_v63  ;;  %v11497_v46 = vld [vmem:[#allocation38_spill] sm:$0xff]  ;;  %v2195_v63 = vmul.f32 %v9612_v43, %v8471_v1 }
 0x5b6   :  { %v2202_v13 = vadd.f32 %v2190_v56, %v2174_v52  ;;  %v2176_v59 = vadd.f32 %v2164_v29, %v2148_v28  ;;  %v2167_v8 = vmul.f32 %v9599_v9, %v11497_v46  ;;  %v11498_v56 = vld [vmem:[#allocation27_spill] sm:$0xff]  ;;  %v2178_v3 = vadd.f32 %v2166_v49, %v2150_v48 }
 0x5b7   :  { %v2215_v51 = vadd.f32 %v2203_v2, %v11283_v17  ;;  %v2205_v52 = vadd.f32 %v2193_v62, %v2177_v23  ;;  %v2194_v24 = vmul.f32 %v9612_v43, %v11498_v56  ;;  %v2151_v28 = vadd.f32 %v2139_v15, %v2123_v42  ;;  %v11499_v56 = vld [vmem:[#allocation42_spill] sm:$0xff]  ;;  %v11502_v42 = vld [vmem:[#allocation40_spill] sm:$0xff] }
 0x5b8   :  { %v2214_v7 = vadd.f32 %v2202_v13, %v11285_v22  ;;  %v2204_v4 = vadd.f32 %v2192_v5, %v2176_v59  ;;  %v2153_v29 = vadd.f32 %v2141_v33, %v2125_v34  ;;  %v2169_v23 = vmul.f32 %v9599_v9, %v8589_v31  ;;  %v11500_v5 = vld [vmem:[#allocation32_spill] sm:$0xff]  ;;  %v11501_v22 = vld [vmem:[#allocation33_spill] sm:$0xff]  ;;  %v11503_v33 = vld [vmem:[#allocation47_spill] sm:$0xff] }
 0x5b9   :  { %v2197_v2 = vmul.f32 %v9612_v43, %v11448_v37  ;;  %v2140_v46 = vmul.f32 %v9594_v41, %v11499_v56  ;;  %v2217_v59 = vadd.f32 %v2205_v52, %v11500_v5  ;;  %v2179_v48 = vadd.f32 %v2167_v8, %v2151_v28 }
 0x5ba   :  { %v2216_v1 = vadd.f32 %v2204_v4, %v11501_v22  ;;  %v2206_v15 = vadd.f32 %v2194_v24, %v2178_v3  ;;  %v2124_v34 = vmul.f32 %v9586_v26, %v11502_v42  ;;  %v2181_v56 = vadd.f32 %v2169_v23, %v2153_v29 }
 0x5bb   :  { %v2207_v37 = vadd.f32 %v2195_v63, %v2179_v48  ;;  %v2196_v4 = vmul.f32 %v9612_v43, %v8489_v25 }
 0x5bc   :  { %v2152_v52 = vadd.f32 %v2140_v46, %v2124_v34  ;;  %v2209_v24 = vadd.f32 %v2197_v2, %v2181_v56  ;;  %v2218_v42 = vadd.f32 %v2206_v15, %v8442_v50  ;;  %v2143_v15 = vmul.f32 %v9594_v41, %v11288_v58 }
 0x5bd   :  { %v2219_v3 = vadd.f32 %v2207_v37, %v11286_v35 }
 0x66d   :  { %v6841_v47 = vpop.f32.mrb[24].mxu1 }
 0x66e   :  { %v2352_v61 = vadd.f32 %v6841_v47, %v2215_v51  ;;  %v2292_v20 = vpop.f32.mrb[25].mxu1 }
 0x66f   :  { %v2351_v62 = vadd.f32 %v2292_v20, %v2214_v7  ;;  %v2168_v20 = vmul.f32 %v9599_v9, %v11503_v33 }
 0x670   :  { %v6142_v13 = vmul.f32 -1.442695, %v2352_v61 }
 0x671   :  { %v6141_v47 = vmul.f32 -1.442695, %v2351_v62  ;;  %v6844_v49 = vpop.f32.mrb[26].mxu1  ;;  %v2180_v33 = vadd.f32 %v2168_v20, %v2152_v52  ;;  %v2127_v52 = vmul.f32 %v9586_v26, %v11289_v39 }
 0x672   :  { %7788 = vpow2.f32 %v6142_v13  ;;  %v2354_v7 = vadd.f32 %v6844_v49, %v2217_v59  ;;  %v2302_v51 = vpop.f32.mrb[27].mxu1 }
 0x673   :  { %7790 = vpow2.f32 %v6141_v47  ;;  %v2353_v61 = vadd.f32 %v2302_v51, %v2216_v1  ;;  %v2208_v29 = vadd.f32 %v2196_v4, %v2180_v33  ;;  %v2221_v1 = vadd.f32 %v2209_v24, %v8450_v53 }
 0x674   :  { %v6144_v8 = vmul.f32 -1.442695, %v2354_v7  ;;  %v2142_v33 = vmul.f32 %v9594_v41, %v11287_v40  ;;  %v2155_v24 = vadd.f32 %v2143_v15, %v2127_v52  ;;  %v11504_v52 = vld [vmem:[#allocation67_spill] sm:$0xff] }
 0x675   :  { %v6143_v28 = vmul.f32 -1.442695, %v2353_v61  ;;  %v6847_v62 = vpop.f32.mrb[28].mxu1  ;;  %v2220_v48 = vadd.f32 %v2208_v29, %v8534_v14 }
 0x676   :  { %7792 = vpow2.f32 %v6144_v8  ;;  %v2380_v13 = vadd.f32 %v6847_v62, %v2219_v3  ;;  %v2312_v59 = vpop.f32.mrb[29].mxu1  ;;  %v2126_v8 = vmul.f32 %v9586_v26, %v8549_v19  ;;  %v2170_v62 = vmul.f32 %v9599_v9, %v8604_v11 }
 0x677   :  { %7794 = vpow2.f32 %v6143_v28  ;;  %v2379_v63 = vadd.f32 %v2312_v59, %v2218_v42  ;;  %v2171_v28 = vmul.f32 %v9599_v9, %v11290_v38 }
 0x678   :  { %v6146_v46 = vmul.f32 -1.442695, %v2380_v13 }
 0x679   :  { %v6850_v23 = vpop.f32.mrb[30].mxu1  ;;  %v6145_v47 = vmul.f32 -1.442695, %v2379_v63  ;;  %v2154_v63 = vadd.f32 %v2142_v33, %v2126_v8  ;;  %v2173_v33 = vmul.f32 %v9599_v9, %v11451_v60  ;;  %v2200_v8 = vmul.f32 %v9612_v43, %v11504_v52 }
 0x67a   :  { %v2382_v37 = vadd.f32 %v6850_v23, %v2221_v1  ;;  %v2322_v56 = vpop.f32.mrb[31].mxu1  ;;  %7796 = vpow2.f32 %v6146_v46  ;;  %v2144_v1 = vmul.f32 %v9594_v41, %v8598_v30  ;;  %v2199_v23 = vmul.f32 %v9612_v43, %v11291_v36 }
 0x67b   :  { %v2381_v2 = vadd.f32 %v2322_v56, %v2220_v48  ;;  %7798 = vpow2.f32 %v6145_v47  ;;  %v2145_v48 = vmul.f32 %v9594_v41, %v8608_v27  ;;  %v2172_v56 = vmul.f32 %v9599_v9, %v11396_v18 }
 0x67c   :  { %v7789_v49 = vpop.eup %7788  ;;  %v6148_v7 = vmul.f32 -1.442695, %v2382_v37  ;;  %v2128_v37 = vmul.f32 %v9586_v26, %v8587_v45  ;;  %v2182_v15 = vadd.f32 %v2170_v62, %v2154_v63 }
 0x67d   :  { %v7791_v34 = vpop.eup %7790  ;;  %v2368_v20 = vadd.f32 1.0, %v7789_v49  ;;  %v6853_v42 = vpop.f32.mrb[32].mxu1  ;;  %v6147_v61 = vmul.f32 -1.442695, %v2381_v2  ;;  %v2183_v2 = vadd.f32 %v2171_v28, %v2155_v24  ;;  %v2129_v49 = vmul.f32 %v9586_v26, %v11249_v44  ;;  %v11505_v24 = vld [vmem:[#allocation70_spill] sm:$0xff] }
 0x67e   :  { %v2367_v51 = vadd.f32 1.0, %v7791_v34  ;;  %v2332_v4 = vpop.f32.mrb[33].mxu1  ;;  %v2198_v34 = vmul.f32 %v9612_v43, %v11343_v10  ;;  %v2408_v28 = vadd.f32 %v6853_v42, %v11505_v24 }
 0x67f   :  { %7800 = vrcp.f32 %v2368_v20  ;;  %v2156_v20 = vadd.f32 %v2144_v1, %v2128_v37  ;;  %v2157_v41 = vadd.f32 %v2145_v48, %v2129_v49  ;;  %v2407_v63 = vadd.f32 %v2332_v4, %v11292_v6 }
 0x680   :  { %v7793_v3 = vpop.eup %7792  ;;  %7802 = vrcp.f32 %v2367_v51 }
 0x681   :  { %v7795_v13 = vpop.eup %7794  ;;  %v2370_v59 = vadd.f32 1.0, %v7793_v3  ;;  %7804 = vpow2.f32 %v6148_v7  ;;  %v6856_v29 = vpop.f32.mrb[34].mxu1  ;;  %v2211_v7 = vadd.f32 %v2199_v23, %v2183_v2  ;;  %v2185_v48 = vadd.f32 %v2173_v33, %v2157_v41 }
 0x682   :  { %v2369_v46 = vadd.f32 1.0, %v7795_v13  ;;  %7806 = vpow2.f32 %v6147_v61  ;;  %v2342_v47 = vpop.f32.mrb[35].mxu1  ;;  %v2184_v61 = vadd.f32 %v2172_v56, %v2156_v20  ;;  %v11506_v13 = vld [vmem:[#allocation71_spill] sm:$0xff] }
 0x683   :  { %7808 = vrcp.f32 %v2370_v59  ;;  %v2201_v26 = vmul.f32 %v9612_v43, %v11506_v13  ;;  %v2210_v59 = vadd.f32 %v2198_v34, %v2182_v15  ;;  %v2223_v23 = vadd.f32 %v2211_v7, %v11293_v32 }
 0x684   :  { %7810 = vrcp.f32 %v2369_v46  ;;  %v7797_v51 = vpop.eup %7796  ;;  %v2212_v49 = vadd.f32 %v2200_v8, %v2184_v61  ;;  %v2410_v43 = vadd.f32 %v6856_v29, %v8702_v0  ;;  %v2409_v4 = vadd.f32 %v2342_v47, %v8693_v16 }
 0x685   :  { %v7799_v3 = vpop.eup %7798  ;;  %v2396_v46 = vadd.f32 1.0, %v7797_v51  ;;  %v2222_v56 = vadd.f32 %v2210_v59, %v8682_v54  ;;  %v2213_v24 = vadd.f32 %v2201_v26, %v2185_v48 }
 0x686   :  { %v2395_v15 = vadd.f32 1.0, %v7799_v3  ;;  %v2224_v33 = vadd.f32 %v2212_v49, %v11294_v55 }
 0x687   :  { %7812 = vrcp.f32 %v2396_v46  ;;  %v2225_v7 = vadd.f32 %v2213_v24, %v8708_v12 }
 0x689   :  { %v7801_v62 = vpop.eup %7800 }
 0x68a   :  { %v7803_v1 = vpop.eup %7802  ;;  %v2412_v9 = vmul.f32 %v7801_v62, %v2408_v28 }
 0x68b   :  { %v7805_v37 = vpop.eup %7804  ;;  %v2411_v2 = vmul.f32 %v7803_v1, %v2407_v63 }
 0x68c   :  { %v7807_v20 = vpop.eup %7806  ;;  %v2416_v42 = vadd.f32 %v2412_v9, %v2223_v23  ;;  %v2398_v61 = vadd.f32 1.0, %v7805_v37  ;;  %v11507_v9 = vld [vmem:[#allocation68_spill] sm:$0xff] }
 0x68d   :  { %v7809_v13 = vpop.eup %7808  ;;  %v2415_v34 = vadd.f32 %v2411_v2, %v2222_v56  ;;  %v2397_v26 = vadd.f32 1.0, %v7807_v20  ;;  %v11509_v2 = vld [vmem:[#allocation69_spill] sm:$0xff] }
 0x68e   :  { %v7811_v51 = vpop.eup %7810  ;;  %v2414_v41 = vmul.f32 %v7809_v13, %v2410_v43  ;;  %7814 = vtanh.f32 %v2416_v42 }
 0x68f   :  { %v2413_v28 = vmul.f32 %v7811_v51, %v2409_v4  ;;  %7816 = vtanh.f32 %v2415_v34  ;;  %v11515_v51 = vld [vmem:[#allocation53_spill] sm:$0xff] }
 0x690   :  { %v2418_v8 = vadd.f32 %v2414_v41, %v2225_v7  ;;  %7818 = vrcp.f32 %v2395_v15  ;;  %v11516_v7 = vld [vmem:[#allocation13_spill] sm:$0xff]  ;;  %v11517_v41 = vld [vmem:[#allocation14_spill] sm:$0xff] }
 0x691   :  { %v2417_v29 = vadd.f32 %v2413_v28, %v2224_v33  ;;  %v7813_v47 = vpop.eup %7812  ;;  %v11518_v33 = vld [vmem:[#allocation15_spill] sm:$0xff]  ;;  %v11519_v28 = vld [vmem:[#allocation16_spill] sm:$0xff] }
 0x692   :  { %7820 = vtanh.f32 %v2418_v8  ;;  %v11521_v8 = vld [vmem:[#allocation6_spill] sm:$0xff] }
 0x693   :  { %7822 = vtanh.f32 %v2417_v29  ;;  %v11523_v29 = vld [vmem:[#allocation58_spill] sm:$0xff] }
 0x694   :  { %7824 = vrcp.f32 %v2398_v61  ;;  %v11520_v61 = vld [vmem:[#allocation17_spill] sm:$0xff] }
 0x695   :  { %7826 = vrcp.f32 %v2397_v26  ;;  %v11522_v26 = vld [vmem:[#allocation56_spill] sm:$0xff] }
 0x698   :  { %v7815_v3 = vpop.eup %7814 }
 0x699   :  { %v7817_v62 = vpop.eup %7816  ;;  %v2424_v24 = vsub.f32 %v9480_v57, %v7815_v3 }
 0x69a   :  { %v7819_v13 = vpop.eup %7818  ;;  %v2423_v59 = vsub.f32 %v9483_v21, %v7817_v62 }
 0x69b   :  { %v2428_v1 = vmul.f32 %v7813_v47, %v2424_v24  ;;  %v11524_v47 = vld [vmem:[#allocation59_spill] sm:$0xff] }
 0x69c   :  { %v7821_v63 = vpop.eup %7820  ;;  %v2427_v23 = vmul.f32 %v7819_v13, %v2423_v59  ;;  %v6149_v24 = vld [vmem:[%s10916_s0 + $0x18] sm:$0x7]  ;;  %v11527_v13 = vld [vmem:[#allocation54_spill] sm:$0xff] }
 0x69d   :  { %v7823_v46 = vpop.eup %7822  ;;  %v2426_v48 = vsub.f32 %v11507_v9, %v7821_v63  ;;  %v9715_v56 = vadd.f32 %v7815_v3, %v2428_v1  ;;  %v11525_v3 = vld [vmem:[#allocation48_spill] sm:$0xff]  ;;  %v9764_v59 = vrot.slane %v6149_v24, %v11527_v13  ;;  %v11528_v1 = vld [vmem:[#allocation39_spill] sm:$0xff] }
 0x69e   :  { %v7825_v37 = vpop.eup %7824  ;;  %v2425_v49 = vsub.f32 %v11509_v2, %v7823_v46  ;;  %v9718_v42 = vadd.f32 %v7817_v62, %v2427_v23  ;;  %v11526_v62 = vld [vmem:[#allocation61_spill] sm:$0xff]  ;;  %v11529_v23 = vld [vmem:[#allocation52_spill] sm:$0xff] }
 0x69f   :  { %11508 = vst [vmem:[#allocation63_spill] sm:$0xff] %v9715_v56  ;;  %v7827_v20 = vpop.eup %7826  ;;  %v2430_v43 = vmul.f32 %v7825_v37, %v2426_v48  ;;  %v9772_v9 = vrot.slane %v6149_v24, %v11529_v23  ;;  %v11530_v48 = vld [vmem:[#allocation19_spill] sm:$0xff] }
 0x6a0   :  { %11510 = vst [vmem:[#allocation72_spill] sm:$0xff] %v9718_v42  ;;  %v2429_v15 = vmul.f32 %v7827_v20, %v2425_v49  ;;  %v9722_v57 = vpack.c.bf16 %v9715_v56, %v9718_v42  ;;  %v11531_v49 = vld [vmem:[#allocation37_spill] sm:$0xff]  ;;  %v11555_v42 = vld [vmem:[#allocation27_spill] sm:$0xff] }
 0x6a1   :  { %v9724_v21 = vadd.f32 %v7821_v63, %v2430_v43  ;;  %v6150_v63 = vld [vmem:[%s10916_s0 + $0x4] sm:$0x7]  ;;  %v2462_v37 = vmul.f32 %v9772_v9, %v11530_v48  ;;  %v2445_v20 = vmul.f32 %v9764_v59, %v11531_v49  ;;  %v11535_v48 = vld [vmem:[#allocation41_spill] sm:$0xff]  ;;  %v11538_v49 = vld [vmem:[#allocation22_spill] sm:$0xff] }
 0x6a2   :  { %11511 = vst [vmem:[#allocation7_spill] sm:$0xff] %v9722_v57  ;;  %v9726_v34 = vadd.f32 %v7823_v46, %v2429_v15  ;;  %7278 = vmatprep.subr.bf16.mxu0 %v9722_v57  ;;  %v2446_v46 = vmul.f32 %v9764_v59, %v11528_v1  ;;  %v9777_v2 = vrot.slane %v6150_v63, %v11527_v13  ;;  %v11532_v15 = vld [vmem:[#allocation18_spill] sm:$0xff]  ;;  %v11534_v1 = vld [vmem:[#allocation20_spill] sm:$0xff] }
 0x6a3   :  { %11512 = vst [vmem:[#allocation9_spill] sm:$0xff] %v9724_v21  ;;  %7280 = vmatpush3.bf16.msra.mxu0 %v9722_v57  ;;  %v11533_v57 = vld [vmem:[#allocation57_spill] sm:$0xff]  ;;  %v2448_v13 = vmul.f32 %v9764_v59, %v11535_v48  ;;  %v11544_v48 = vld [vmem:[#allocation34_spill] sm:$0xff] }
 0x6a4   :  { %11513 = vst [vmem:[#allocation32_spill] sm:$0xff] %v9726_v34  ;;  %v9732_v4 = vpack.c.bf16 %v9724_v21, %v9726_v34  ;;  %v2474_v43 = vadd.f32 %v2462_v37, %v2446_v46  ;;  %v2490_v24 = vmul.f32 %v9777_v2, %v11534_v1  ;;  %v11537_v37 = vld [vmem:[#allocation60_spill] sm:$0xff] }
 0x6a5   :  { %v11549_v34 = vld [vmem:[#allocation36_spill] sm:$0xff] }
 0x6a6   :  { %11514 = vst [vmem:[#allocation67_spill] sm:$0xff] %v9732_v4  ;;  %7282 = vmatprep.subr.bf16.mxu0 %v9732_v4 }
 0x6a7   :  { %7284 = vmatpush3.bf16.msra.mxu0 %v9732_v4  ;;  %v2489_v4 = vmul.f32 %v9777_v2, %v11533_v57  ;;  %v2463_v57 = vmul.f32 %v9772_v9, %v11538_v49  ;;  %v2449_v49 = vmul.f32 %v9764_v59, %v11544_v48  ;;  %v2466_v48 = vmul.f32 %v9772_v9, %v11549_v34 }
 0x6a8   :  { %7294 = vmatprep.subr.bf16.mxu0 %v11515_v51 }
 0x6aa   :  { %6866 = vmatmul.mubr.msk.f32.vlgmr.msra.gmra.mrb[36].mxu0 %vm541_vm0, %v11516_v7  ;;  %v11548_v7 = vld [vmem:[#allocation44_spill] sm:$0xff] }
 0x6ab   :  { %7296 = vmatpush3.bf16.msra.mxu0 %v11515_v51  ;;  %6868 = vmatprep.mubr.msk.f32.mxu0 %vm541_vm0, %v11517_v41  ;;  %v2461_v51 = vmul.f32 %v9772_v9, %v11532_v15  ;;  %v2492_v15 = vmul.f32 %v9777_v2, %v11537_v37  ;;  %v11546_v41 = vld [vmem:[#allocation28_spill] sm:$0xff] }
 0x6ae   :  { %6869 = vmatmul.mubr.msk.f32.gmra.mrb[38].mxu0 %vm541_vm0, %v11518_v33 }
 0x6af   :  { %6871 = vmatprep.mubr.msk.f32.mxu0 %vm541_vm0, %v11519_v28  ;;  %v11545_v28 = vld [vmem:[#allocation29_spill] sm:$0xff] }
 0x6b2   :  { %6872 = vmatmul.mubr.msk.f32.gmra.mrb[40].mxu0 %vm541_vm0, %v11520_v61  ;;  %v11541_v61 = vld [vmem:[#allocation24_spill] sm:$0xff] }
 0x6b3   :  { %6874 = vmatprep.mubr.msk.f32.mxu0 %vm541_vm0, %v11521_v8  ;;  %v11539_v8 = vld [vmem:[#allocation25_spill] sm:$0xff] }
 0x6b6   :  { %6875 = vmatmul.mubr.msk.f32.gmra.mrb[42].mxu0 %vm541_vm0, %v11522_v26 }
 0x6b7   :  { %6877 = vmatprep.mubr.msk.f32.mxu0 %vm541_vm0, %v11523_v29  ;;  %v11536_v29 = vld [vmem:[#allocation23_spill] sm:$0xff] }
 0x6b8   :  { %v2464_v46 = vmul.f32 %v9772_v9, %v11536_v29  ;;  %v11543_v29 = vld [vmem:[#allocation26_spill] sm:$0xff] }
 0x6b9   :  { %v2491_v37 = vmul.f32 %v9777_v2, %v11543_v29  ;;  %v2450_v29 = vmul.f32 %v9764_v59, %v11548_v7  ;;  %v11554_v7 = vld [vmem:[#allocation30_spill] sm:$0xff] }
 0x6ba   :  { %6878 = vmatmul.mubr.msk.f32.gmra.mrb[44].mxu0 %vm541_vm0, %v11524_v47  ;;  %v2502_v47 = vadd.f32 %v2490_v24, %v2474_v43  ;;  %v2476_v43 = vadd.f32 %v2464_v46, %v2448_v13  ;;  %v11547_v46 = vld [vmem:[#allocation62_spill] sm:$0xff] }
 0x6bb   :  { %6880 = vmatprep.mubr.msk.f32.mxu0 %vm541_vm0, %v11525_v3  ;;  %v2473_v3 = vadd.f32 %v2461_v51, %v2445_v20  ;;  %v11542_v51 = vld [vmem:[#allocation21_spill] sm:$0xff] }
 0x6bc   :  { %v2447_v24 = vmul.f32 %v9764_v59, %v11542_v51  ;;  %v2493_v51 = vmul.f32 %v9777_v2, %v11547_v46 }
 0x6bd   :  { %v2501_v26 = vadd.f32 %v2489_v4, %v2473_v3  ;;  %v2504_v3 = vadd.f32 %v2492_v15, %v2476_v43 }
 0x6be   :  { %6881 = vmatmul.mubr.msk.f32.gmra.mrb[46].mxu0 %vm541_vm0, %v11526_v62  ;;  %v9788_v62 = vrot.slane %v6150_v63, %v11529_v23  ;;  %v11540_v63 = vld [vmem:[#allocation35_spill] sm:$0xff]  ;;  %v2475_v33 = vadd.f32 %v2463_v57, %v2447_v24  ;;  %v11553_v24 = vld [vmem:[#allocation45_spill] sm:$0xff] }
 0x6bf   :  { %v2465_v23 = vmul.f32 %v9772_v9, %v11540_v63 }
 0x6c0   :  { %v2517_v1 = vmul.f32 %v9788_v62, %v11539_v8  ;;  %v2518_v20 = vmul.f32 %v9788_v62, %v11541_v61  ;;  %v2520_v8 = vmul.f32 %v9788_v62, %v11545_v28  ;;  %v2519_v61 = vmul.f32 %v9788_v62, %v11546_v41 }
 0x6c1   :  { %v2477_v13 = vadd.f32 %v2465_v23, %v2449_v49  ;;  %v11552_v23 = vld [vmem:[#allocation38_spill] sm:$0xff]  ;;  %v2522_v41 = vmul.f32 %v9788_v62, %v11553_v24 }
 0x6c2   :  { %v2530_v4 = vadd.f32 %v2518_v20, %v2502_v47  ;;  %v2529_v63 = vadd.f32 %v2517_v1, %v2501_v26  ;;  %v11550_v47 = vld [vmem:[#allocation46_spill] sm:$0xff]  ;;  %v11551_v20 = vld [vmem:[#allocation43_spill] sm:$0xff]  ;;  %v2503_v26 = vadd.f32 %v2491_v37, %v2475_v33  ;;  %v2532_v43 = vadd.f32 %v2520_v8, %v2504_v3 }
 0x6c3   :  { %v2452_v15 = vmul.f32 %v9764_v59, %v11550_v47  ;;  %v2468_v57 = vmul.f32 %v9772_v9, %v11551_v20  ;;  %v2494_v49 = vmul.f32 %v9777_v2, %v11552_v23  ;;  %v2505_v21 = vadd.f32 %v2493_v51, %v2477_v13  ;;  %v11556_v23 = vld [vmem:[#allocation42_spill] sm:$0xff] }
 0x6c4   :  { %v2542_v1 = vadd.f32 %v2530_v4, %v11283_v17  ;;  %v2541_v28 = vadd.f32 %v2529_v63, %v11554_v7  ;;  %v2531_v34 = vadd.f32 %v2519_v61, %v2503_v26  ;;  %v2521_v47 = vmul.f32 %v9788_v62, %v11555_v42  ;;  %v11557_v51 = vld [vmem:[#allocation50_spill] sm:$0xff] }
 0x6c5   :  { %v2478_v33 = vadd.f32 %v2466_v48, %v2450_v29  ;;  %v2480_v37 = vadd.f32 %v2468_v57, %v2452_v15  ;;  %v2496_v8 = vmul.f32 %v9777_v2, %v8589_v31  ;;  %v2467_v24 = vmul.f32 %v9772_v9, %v11556_v23  ;;  %v11558_v48 = vld [vmem:[#allocation40_spill] sm:$0xff]  ;;  %v11559_v57 = vld [vmem:[#allocation47_spill] sm:$0xff] }
 0x6c6   :  { %v2543_v3 = vadd.f32 %v2531_v34, %v11501_v22  ;;  %v2544_v61 = vadd.f32 %v2532_v43, %v11500_v5  ;;  %v2524_v13 = vmul.f32 %v9788_v62, %v11557_v51  ;;  %v2533_v29 = vadd.f32 %v2521_v47, %v2505_v21 }
 0x6c7   :  { %v2506_v63 = vadd.f32 %v2494_v49, %v2478_v33  ;;  %v2451_v15 = vmul.f32 %v9764_v59, %v11558_v48  ;;  %v2523_v33 = vmul.f32 %v9788_v62, %v8489_v25 }
 0x6c8   :  { %v2545_v22 = vadd.f32 %v2533_v29, %v8442_v50 }
 0x6c9   :  { %v2479_v49 = vadd.f32 %v2467_v24, %v2451_v15 }
 0x77d   :  { %v6867_v46 = vpop.f32.mrb[36].mxu0 }
 0x77e   :  { %v2679_v56 = vadd.f32 %v6867_v46, %v2542_v1  ;;  %v2619_v20 = vpop.f32.mrb[37].mxu0  ;;  %v2534_v1 = vadd.f32 %v2522_v41, %v2506_v63 }
 0x77f   :  { %v2678_v4 = vadd.f32 %v2619_v20, %v2541_v28  ;;  %v2495_v28 = vmul.f32 %v9777_v2, %v11559_v57 }
 0x780   :  { %v6164_v17 = vmul.f32 -1.442695, %v2679_v56  ;;  %v2508_v56 = vadd.f32 %v2496_v8, %v2480_v37  ;;  %v2546_v21 = vadd.f32 %v2534_v1, %v11286_v35  ;;  %v2470_v1 = vmul.f32 %v9772_v9, %v11288_v58 }
 0x781   :  { %v6163_v46 = vmul.f32 -1.442695, %v2678_v4  ;;  %v6870_v26 = vpop.f32.mrb[38].mxu0  ;;  %v2507_v57 = vadd.f32 %v2495_v28, %v2479_v49  ;;  %v2453_v49 = vmul.f32 %v9764_v59, %v8549_v19 }
 0x782   :  { %7828 = vpow2.f32 %v6164_v17  ;;  %v2681_v34 = vadd.f32 %v6870_v26, %v2544_v61  ;;  %v2629_v20 = vpop.f32.mrb[39].mxu0  ;;  %v2536_v47 = vadd.f32 %v2524_v13, %v2508_v56 }
 0x783   :  { %7830 = vpow2.f32 %v6163_v46  ;;  %v2680_v43 = vadd.f32 %v2629_v20, %v2543_v3  ;;  %v2535_v37 = vadd.f32 %v2523_v33, %v2507_v57 }
 0x784   :  { %v6166_v4 = vmul.f32 -1.442695, %v2681_v34  ;;  %v2548_v24 = vadd.f32 %v2536_v47, %v8450_v53  ;;  %v2497_v47 = vmul.f32 %v9777_v2, %v8604_v11 }
 0x785   :  { %v6165_v51 = vmul.f32 -1.442695, %v2680_v43  ;;  %v6873_v48 = vpop.f32.mrb[40].mxu0  ;;  %v2547_v63 = vadd.f32 %v2535_v37, %v8534_v14  ;;  %v2454_v43 = vmul.f32 %v9764_v59, %v11289_v39 }
 0x786   :  { %7832 = vpow2.f32 %v6166_v4  ;;  %v2707_v17 = vadd.f32 %v6873_v48, %v2546_v21  ;;  %v2639_v61 = vpop.f32.mrb[41].mxu0  ;;  %v2498_v4 = vmul.f32 %v9777_v2, %v11290_v38  ;;  %v2526_v21 = vmul.f32 %v9788_v62, %v11291_v36 }
 0x787   :  { %7834 = vpow2.f32 %v6165_v51  ;;  %v2706_v41 = vadd.f32 %v2639_v61, %v2545_v22  ;;  %v2469_v22 = vmul.f32 %v9772_v9, %v11287_v40 }
 0x788   :  { %v6168_v8 = vmul.f32 -1.442695, %v2707_v17 }
 0x789   :  { %v6876_v3 = vpop.f32.mrb[42].mxu0  ;;  %v6167_v46 = vmul.f32 -1.442695, %v2706_v41  ;;  %v2481_v41 = vadd.f32 %v2469_v22, %v2453_v49 }
 0x78a   :  { %v2709_v26 = vadd.f32 %v6876_v3, %v2548_v24  ;;  %v2649_v13 = vpop.f32.mrb[43].mxu0  ;;  %7836 = vpow2.f32 %v6168_v8  ;;  %v2471_v24 = vmul.f32 %v9772_v9, %v8598_v30  ;;  %v2482_v3 = vadd.f32 %v2470_v1, %v2454_v43 }
 0x78b   :  { %v2708_v15 = vadd.f32 %v2649_v13, %v2547_v63  ;;  %7838 = vpow2.f32 %v6167_v46  ;;  %v2472_v63 = vmul.f32 %v9772_v9, %v8608_v27  ;;  %v2499_v13 = vmul.f32 %v9777_v2, %v11396_v18 }
 0x78c   :  { %v7829_v34 = vpop.eup %7828  ;;  %v6170_v28 = vmul.f32 -1.442695, %v2709_v26  ;;  %v2455_v26 = vmul.f32 %v9764_v59, %v8587_v45  ;;  %v2527_v43 = vmul.f32 %v9788_v62, %v11504_v52 }
 0x78d   :  { %v7831_v20 = vpop.eup %7830  ;;  %v2695_v29 = vadd.f32 1.0, %v7829_v34  ;;  %v6879_v48 = vpop.f32.mrb[44].mxu0  ;;  %v6169_v57 = vmul.f32 -1.442695, %v2708_v15  ;;  %v2510_v15 = vadd.f32 %v2498_v4, %v2482_v3  ;;  %v2456_v34 = vmul.f32 %v9764_v59, %v11249_v44 }
 0x78e   :  { %v2694_v51 = vadd.f32 1.0, %v7831_v20  ;;  %v2659_v56 = vpop.f32.mrb[45].mxu0  ;;  %v2509_v20 = vadd.f32 %v2497_v47, %v2481_v41 }
 0x78f   :  { %7840 = vrcp.f32 %v2695_v29  ;;  %v2525_v29 = vmul.f32 %v9788_v62, %v11343_v10  ;;  %v2538_v22 = vadd.f32 %v2526_v21, %v2510_v15  ;;  %v2484_v9 = vadd.f32 %v2472_v63, %v2456_v34 }
 0x790   :  { %v7833_v33 = vpop.eup %7832  ;;  %7842 = vrcp.f32 %v2694_v51  ;;  %v2500_v51 = vmul.f32 %v9777_v2, %v11451_v60  ;;  %v2734_v41 = vadd.f32 %v2659_v56, %v11292_v6 }
 0x791   :  { %v7835_v17 = vpop.eup %7834  ;;  %v2697_v61 = vadd.f32 1.0, %v7833_v33  ;;  %7844 = vpow2.f32 %v6170_v28  ;;  %v6882_v37 = vpop.f32.mrb[46].mxu0  ;;  %v2483_v28 = vadd.f32 %v2471_v24, %v2455_v26  ;;  %v11560_v33 = vld [vmem:[#allocation70_spill] sm:$0xff] }
 0x792   :  { %v2696_v8 = vadd.f32 1.0, %v7835_v17  ;;  %7846 = vpow2.f32 %v6169_v57  ;;  %v2669_v46 = vpop.f32.mrb[47].mxu0  ;;  %v2735_v4 = vadd.f32 %v6879_v48, %v11560_v33  ;;  %v11561_v17 = vld [vmem:[#allocation71_spill] sm:$0xff]  ;;  %v2512_v3 = vadd.f32 %v2500_v51, %v2484_v9 }
 0x793   :  { %7848 = vrcp.f32 %v2697_v61  ;;  %v2511_v1 = vadd.f32 %v2499_v13, %v2483_v28  ;;  %v2528_v59 = vmul.f32 %v9788_v62, %v11561_v17  ;;  %v2537_v61 = vadd.f32 %v2525_v29, %v2509_v20 }
 0x794   :  { %7850 = vrcp.f32 %v2696_v8  ;;  %v7837_v57 = vpop.eup %7836  ;;  %v2550_v8 = vadd.f32 %v2538_v22, %v11293_v32  ;;  %v2737_v62 = vadd.f32 %v6882_v37, %v8702_v0  ;;  %v2736_v56 = vadd.f32 %v2669_v46, %v8693_v16 }
 0x795   :  { %v7839_v49 = vpop.eup %7838  ;;  %v2723_v24 = vadd.f32 1.0, %v7837_v57  ;;  %v2549_v26 = vadd.f32 %v2537_v61, %v8682_v54  ;;  %v2539_v15 = vadd.f32 %v2527_v43, %v2511_v1  ;;  %v2540_v28 = vadd.f32 %v2528_v59, %v2512_v3  ;;  %v11562_v61 = vld [vmem:[#allocation63_spill] sm:$0xff] }
 0x796   :  { %v2722_v20 = vadd.f32 1.0, %v7839_v49 }
 0x797   :  { %7852 = vrcp.f32 %v2723_v24  ;;  %v2552_v22 = vadd.f32 %v2540_v28, %v8708_v12  ;;  %v2551_v51 = vadd.f32 %v2539_v15, %v11294_v55 }
 0x799   :  { %v7841_v47 = vpop.eup %7840 }
 0x79a   :  { %v7843_v21 = vpop.eup %7842  ;;  %v2739_v2 = vmul.f32 %v7841_v47, %v2735_v4 }
 0x79b   :  { %v7845_v63 = vpop.eup %7844  ;;  %v2738_v13 = vmul.f32 %v7843_v21, %v2734_v41  ;;  %v11563_v21 = vld [vmem:[#allocation72_spill] sm:$0xff] }
 0x79c   :  { %v7847_v34 = vpop.eup %7846  ;;  %v2743_v48 = vadd.f32 %v2739_v2, %v2550_v8  ;;  %v2725_v1 = vadd.f32 1.0, %v7845_v63 }
 0x79d   :  { %v7849_v17 = vpop.eup %7848  ;;  %v2742_v29 = vadd.f32 %v2738_v13, %v2549_v26  ;;  %v2724_v59 = vadd.f32 1.0, %v7847_v34  ;;  %v11564_v26 = vld [vmem:[#allocation9_spill] sm:$0xff] }
 0x79e   :  { %v7851_v57 = vpop.eup %7850  ;;  %v2741_v9 = vmul.f32 %v7849_v17, %v2737_v62  ;;  %7854 = vtanh.f32 %v2743_v48  ;;  %v11566_v48 = vld [vmem:[#allocation32_spill] sm:$0xff] }
 0x79f   :  { %v2740_v4 = vmul.f32 %v7851_v57, %v2736_v56  ;;  %7856 = vtanh.f32 %v2742_v29 }
 0x7a0   :  { %v2745_v43 = vadd.f32 %v2741_v9, %v2552_v22  ;;  %7858 = vrcp.f32 %v2722_v20 }
 0x7a1   :  { %v2744_v37 = vadd.f32 %v2740_v4, %v2551_v51  ;;  %v7853_v46 = vpop.eup %7852  ;;  %v11571_v4 = vld [vmem:[#allocation8_spill] sm:$0xff] }
 0x7a2   :  { %7860 = vtanh.f32 %v2745_v43  ;;  %v11573_v43 = vld [vmem:[#allocation14_spill] sm:$0xff] }
 0x7a3   :  { %7862 = vtanh.f32 %v2744_v37  ;;  %v11575_v37 = vld [vmem:[#allocation16_spill] sm:$0xff] }
 0x7a4   :  { %7864 = vrcp.f32 %v2725_v1  ;;  %v11572_v1 = vld [vmem:[#allocation13_spill] sm:$0xff] }
 0x7a5   :  { %7866 = vrcp.f32 %v2724_v59  ;;  %v11574_v59 = vld [vmem:[#allocation15_spill] sm:$0xff] }
 0x7a8   :  { %v7855_v49 = vpop.eup %7854 }
 0x7a9   :  { %v7857_v47 = vpop.eup %7856  ;;  %v2751_v41 = vsub.f32 %v11562_v61, %v7855_v49  ;;  %v11579_v61 = vld [vmem:[#allocation58_spill] sm:$0xff] }
 0x7aa   :  { %v7859_v17 = vpop.eup %7858  ;;  %v2750_v24 = vsub.f32 %v11563_v21, %v7857_v47  ;;  %v11582_v21 = vld [vmem:[#allocation61_spill] sm:$0xff] }
 0x7ab   :  { %v2755_v2 = vmul.f32 %v7853_v46, %v2751_v41  ;;  %v11576_v46 = vld [vmem:[#allocation17_spill] sm:$0xff]  ;;  %v11580_v41 = vld [vmem:[#allocation59_spill] sm:$0xff] }
 0x7ac   :  { %v7861_v8 = vpop.eup %7860  ;;  %v2754_v63 = vmul.f32 %v7859_v17, %v2750_v24  ;;  %v11581_v17 = vld [vmem:[#allocation48_spill] sm:$0xff] }
 0x7ad   :  { %v7863_v3 = vpop.eup %7862  ;;  %v2753_v13 = vsub.f32 %v11564_v26, %v7861_v8  ;;  %v9893_v34 = vadd.f32 %v7855_v49, %v2755_v2  ;;  %v11577_v49 = vld [vmem:[#allocation6_spill] sm:$0xff]  ;;  %v9937_v24 = vld [vmem:[%s10922_s6] sm:$0xff]  ;;  %v9974_v26 = vld [vmem:[%s10922_s6 + $0x28] sm:$0xff] }
 0x7ae   :  { %v7865_v15 = vpop.eup %7864  ;;  %v2752_v28 = vsub.f32 %v11566_v48, %v7863_v3  ;;  %v9896_v20 = vadd.f32 %v7857_v47, %v2754_v63  ;;  %v11578_v47 = vld [vmem:[#allocation56_spill] sm:$0xff]  ;;  %11583 = vst [vmem:[#allocation42_spill] sm:$0xff] %v9937_v24  ;;  %6917 = vmatprep.mubr.msk.f32.mxu0 %vm541_vm0, %v9937_v24  ;;  %v9953_v2 = vld [vmem:[%s10922_s6 + $0x10] sm:$0xff]  ;;  %11588 = vst [vmem:[#allocation32_spill] sm:$0xff] %v9974_v26 }
 0x7af   :  { %11565 = vst [vmem:[#allocation68_spill] sm:$0xff] %v9893_v34  ;;  %v7867_v62 = vpop.eup %7866  ;;  %v2757_v29 = vmul.f32 %v7865_v15, %v2753_v13  ;;  %11585 = vst [vmem:[#allocation63_spill] sm:$0xff] %v9953_v2  ;;  %v9965_v63 = vld [vmem:[%s10922_s6 + $0x20] sm:$0xff]  ;;  %v6214_v15 = vld [vmem:[%s10917_s1 + $0x8] sm:$0xff] }
 0x7b0   :  { %11567 = vst [vmem:[#allocation69_spill] sm:$0xff] %v9896_v20  ;;  %v2756_v56 = vmul.f32 %v7867_v62, %v2752_v28  ;;  %v9900_v57 = vpack.c.bf16 %v9893_v34, %v9896_v20  ;;  %11587 = vst [vmem:[#allocation9_spill] sm:$0xff] %v9965_v63  ;;  %v9979_v13 = vld [vmem:[%s10921_s5] sm:$0xff]  ;;  %v9991_v48 = vld [vmem:[%s10921_s5 + $0x8] sm:$0xff] }
 0x7b1   :  { %v9902_v22 = vadd.f32 %v7861_v8, %v2757_v29  ;;  %v9944_v8 = vld [vmem:[%s10922_s6 + $0x8] sm:$0xff]  ;;  %11589 = vst [vmem:[#allocation8_spill] sm:$0xff] %v9979_v13  ;;  %11590 = vst [vmem:[#allocation13_spill] sm:$0xff] %v9991_v48  ;;  %v9996_v28 = vld [vmem:[%s10921_s5 + $0x10] sm:$0xff] }
 0x7b2   :  { %11568 = vst [vmem:[#allocation53_spill] sm:$0xff] %v9900_v57  ;;  %v9904_v9 = vadd.f32 %v7863_v3, %v2756_v56  ;;  %7286 = vmatprep.subr.bf16.mxu1 %v9900_v57  ;;  %11584 = vst [vmem:[#allocation70_spill] sm:$0xff] %v9944_v8  ;;  %v9958_v3 = vld [vmem:[%s10922_s6 + $0x18] sm:$0xff]  ;;  %v10013_v56 = vld [vmem:[%s10921_s5 + $0x20] sm:$0xff] }
 0x7b3   :  { %11569 = vst [vmem:[#allocation30_spill] sm:$0xff] %v9902_v22  ;;  %7288 = vmatpush3.bf16.msra.mxu1 %v9900_v57  ;;  %11586 = vst [vmem:[#allocation72_spill] sm:$0xff] %v9958_v3  ;;  %v10005_v62 = vld [vmem:[%s10921_s5 + $0x18] sm:$0xff]  ;;  %v11619_v20 = vld [vmem:[#allocation28_spill] sm:$0xff] }
 0x7b4   :  { %11570 = vst [vmem:[#allocation27_spill] sm:$0xff] %v9904_v9  ;;  %v7289_v51 = vpack.c.bf16 %v9902_v22, %v9904_v9  ;;  %11591 = vst [vmem:[#allocation14_spill] sm:$0xff] %v9996_v28  ;;  %v6171_v29 = vld [vmem:[%s10916_s0 + $0x1c] sm:$0x7]  ;;  %v11612_v9 = vld [vmem:[#allocation21_spill] sm:$0xff] }
 0x7b5   :  { %11592 = vst [vmem:[#allocation15_spill] sm:$0xff] %v10005_v62  ;;  %11593 = vst [vmem:[#allocation16_spill] sm:$0xff] %v10013_v56  ;;  %v11621_v34 = vld [vmem:[#allocation43_spill] sm:$0xff] }
 0x7b6   :  { %7290 = vmatprep.subr.bf16.mxu1 %v7289_v51 }
 0x7b7   :  { %7292 = vmatpush3.bf16.msra.mxu1 %v7289_v51 }
 0x7b8   :  { %7306 = vmatprep.subr.bf16.mxu1 %v11571_v4 }
 0x7ba   :  { %6892 = vmatmul.mubr.msk.f32.vlgmr.msra.gmra.mrb[36].mxu1 %vm541_vm0, %v11572_v1  ;;  %v2767_v1 = vld [vmem:[%s10916_s0] sm:$0x7] }
 0x7bb   :  { %7308 = vmatpush3.bf16.msra.mxu1 %v11571_v4  ;;  %6894 = vmatprep.mubr.msk.f32.mxu1 %vm541_vm0, %v11573_v43  ;;  %v11595_v43 = vld [vmem:[#allocation39_spill] sm:$0xff] }
 0x7bc   :  { %7310 = vmatprep.subr.bf16.mxu1 %v7289_v51 }
 0x7be   :  { %6895 = vmatmul.mubr.msk.f32.gmra.mrb[38].mxu1 %vm541_vm0, %v11574_v59 }
 0x7bf   :  { %7312 = vmatpush3.bf16.msra.mxu1 %v7289_v51  ;;  %6897 = vmatprep.mubr.msk.f32.mxu1 %vm541_vm0, %v11575_v37  ;;  %v11594_v51 = vld [vmem:[#allocation54_spill] sm:$0xff]  ;;  %v11596_v37 = vld [vmem:[#allocation52_spill] sm:$0xff] }
 0x7c0   :  { %6967 = vmatprep.subr.mxu1 %v6214_v15  ;;  %v10018_v4 = vrot.slane %v6171_v29, %v11594_v51 }
 0x7c2   :  { %6898 = vmatmul.mubr.msk.f32.gmra.mrb[40].mxu1 %vm541_vm0, %v11576_v46  ;;  %v2773_v59 = vmul.f32 %v10018_v4, %v11595_v43  ;;  %v10028_v46 = vrot.slane %v6171_v29, %v11596_v37  ;;  %v11601_v43 = vld [vmem:[#allocation18_spill] sm:$0xff] }
 0x7c3   :  { %6900 = vmatprep.mubr.msk.f32.mxu1 %vm541_vm0, %v11577_v49  ;;  %v10033_v49 = vld [vmem:[%s10921_s5 + $0x28] sm:$0xff] }
 0x7c4   :  { %11597 = vst [vmem:[#allocation17_spill] sm:$0xff] %v10033_v49  ;;  %v2788_v57 = vmul.f32 %v10028_v46, %v11601_v43  ;;  %v11605_v43 = vld [vmem:[#allocation23_spill] sm:$0xff] }
 0x7c6   :  { %6901 = vmatmul.mubr.msk.f32.gmra.mrb[42].mxu1 %vm541_vm0, %v11578_v47  ;;  %v10038_v47 = vld [vmem:[%s10924_s8] sm:$0xff] }
 0x7c7   :  { %6903 = vmatprep.mubr.msk.f32.mxu1 %vm541_vm0, %v11579_v61  ;;  %11598 = vst [vmem:[#allocation6_spill] sm:$0xff] %v10038_v47  ;;  %v11599_v61 = vld [vmem:[#allocation19_spill] sm:$0xff] }
 0x7ca   :  { %6904 = vmatmul.mubr.msk.f32.gmra.mrb[44].mxu1 %vm541_vm0, %v11580_v41  ;;  %v2789_v41 = vmul.f32 %v10028_v46, %v11599_v61  ;;  %v11604_v61 = vld [vmem:[#allocation20_spill] sm:$0xff] }
 0x7cb   :  { %6906 = vmatprep.mubr.msk.f32.mxu1 %vm541_vm0, %v11581_v17  ;;  %v10045_v17 = vrot.slane %v2767_v1, %v11594_v51 }
 0x7cc   :  { %v2801_v29 = vadd.f32 %v2789_v41, %v2773_v59  ;;  %v354_v59 = vld [vmem:[%s10923_s7] sm:$0xff] }
 0x7cd   :  { %v2817_v51 = vmul.f32 %v10045_v17, %v11604_v61  ;;  %362 = vperm.xlu0 %7577, %v354_v59  }
 0x7ce   :  { %6907 = vmatmul.mubr.msk.f32.gmra.mrb[46].mxu1 %vm541_vm0, %v11582_v21  ;;  %v11600_v21 = vld [vmem:[#allocation37_spill] sm:$0xff] }
 0x7cf   :  { %6958 = vmatprep.mubr.msk.f32.mxu1 %vm541_vm0, %v9937_v24  ;;  %v11602_v24 = vld [vmem:[#allocation57_spill] sm:$0xff]  ;;  %v2829_v61 = vadd.f32 %v2817_v51, %v2801_v29  ;;  %v11613_v29 = vld [vmem:[#allocation34_spill] sm:$0xff] }
 0x7d0   :  { %v2776_v51 = vmul.f32 %v10018_v4, %v11613_v29 }
 0x7d2   :  { %6959 = vmatmul.mubr.msk.f32.vlgmr.msra.gmra.mrb[48].mxu1 %vm541_vm0, %v9944_v8 }
 0x7d3   :  { %6961 = vmatprep.mubr.msk.f32.mxu1 %vm541_vm0, %v9953_v2  ;;  %6968 = vmatpush3.msra.mxu1 %v6214_v15  ;;  %v2772_v15 = vmul.f32 %v10018_v4, %v11600_v21  ;;  %v355_v21 = vld [vmem:[%s10923_s7 + $0x8] sm:$0xff]  ;;  %v11611_v2 = vld [vmem:[#allocation22_spill] sm:$0xff] }
 0x7d4   :  { %367 = vperm.xlu1 %7578, %v355_v21  }
 0x7d5   :  { %v2800_v41 = vadd.f32 %v2788_v57, %v2772_v15  ;;  %v11610_v15 = vld [vmem:[#allocation29_spill] sm:$0xff] }
 0x7d6   :  { %6962 = vmatmul.mubr.msk.f32.gmra.mrb[50].mxu1 %vm541_vm0, %v9958_v3  ;;  %v11609_v3 = vld [vmem:[#allocation24_spill] sm:$0xff] }
 0x7d7   :  { %6964 = vmatprep.mubr.msk.f32.mxu1 %vm541_vm0, %v9965_v63 }
 0x7da   :  { %6965 = vmatmul.mubr.msk.f32.gmra.mrb[52].mxu1 %vm541_vm0, %v9974_v26  ;;  %v11608_v26 = vld [vmem:[#allocation35_spill] sm:$0xff] }
 0x7db   :  { %6969 = vmatprep.mubr.msk.f32.mxu1 %vm3215_vm1, %v9979_v13  ;;  %v2792_v63 = vmul.f32 %v10028_v46, %v11608_v26 }
 0x7de   :  { %6970 = vmatmul.mubr.msk.f32.vlgmr.msra.gmra.mrb[48].mxu1 %vm3215_vm1, %v9991_v48 }
 0x7df   :  { %6972 = vmatprep.mubr.msk.f32.mxu1 %vm3215_vm1, %v9996_v28  ;;  %v10060_v28 = vrot.slane %v2767_v1, %v11596_v37  ;;  %v11607_v37 = vld [vmem:[#allocation25_spill] sm:$0xff] }
 0x7e1   :  { %v2844_v48 = vmul.f32 %v10060_v28, %v11607_v37  ;;  %v2845_v57 = vmul.f32 %v10060_v28, %v11609_v3  ;;  %v2848_v12 = vmul.f32 %v10060_v28, %v11555_v42 }
 0x7e2   :  { %6973 = vmatmul.mubr.msk.f32.gmra.mrb[50].mxu1 %vm3215_vm1, %v10005_v62 }
 0x7e3   :  { %6975 = vmatprep.mubr.msk.f32.mxu1 %vm3215_vm1, %v10013_v56  ;;  %v2816_v56 = vmul.f32 %v10045_v17, %v11602_v24  ;;  %v2791_v24 = vmul.f32 %v10028_v46, %v11605_v43  ;;  %v2847_v43 = vmul.f32 %v10060_v28, %v11610_v15  ;;  %v2857_v26 = vadd.f32 %v2845_v57, %v2829_v61  ;;  %v11618_v15 = vld [vmem:[#allocation62_spill] sm:$0xff] }
 0x7e4   :  { %v2820_v29 = vmul.f32 %v10045_v17, %v11618_v15  ;;  %v2846_v61 = vmul.f32 %v10060_v28, %v11619_v20  ;;  %v11620_v57 = vld [vmem:[#allocation46_spill] sm:$0xff] }
 0x7e5   :  { %v2828_v1 = vadd.f32 %v2816_v56, %v2800_v41  ;;  %v2774_v56 = vmul.f32 %v10018_v4, %v11612_v9  ;;  %v11615_v41 = vld [vmem:[#allocation26_spill] sm:$0xff] }
 0x7e6   :  { %6976 = vmatmul.mubr.msk.f32.gmra.mrb[52].mxu1 %vm3215_vm1, %v10033_v49  ;;  %v11603_v49 = vld [vmem:[#allocation41_spill] sm:$0xff]  ;;  %v2818_v3 = vmul.f32 %v10045_v17, %v11615_v41  ;;  %v2779_v41 = vmul.f32 %v10018_v4, %v11620_v57 }
 0x7e7   :  { %6982 = vmatprep.mubr.msk.f32.mxu1 %vm3352_vm2, %v10038_v47  ;;  %v2775_v62 = vmul.f32 %v10018_v4, %v11603_v49  ;;  %v11606_v47 = vld [vmem:[#allocation60_spill] sm:$0xff] }
 0x7e8   :  { %v2819_v49 = vmul.f32 %v10045_v17, %v11606_v47  ;;  %v2790_v47 = vmul.f32 %v10028_v46, %v11611_v2  ;;  %v2856_v2 = vadd.f32 %v2844_v48, %v2828_v1  ;;  %v356_v48 = vld [vmem:[%s10923_s7 + $0x10] sm:$0xff] }
 0x7e9   :  { %v2803_v13 = vadd.f32 %v2791_v24, %v2775_v62  ;;  %v11614_v62 = vmov 1   ;;  %v11616_v24 = vld [vmem:[#allocation44_spill] sm:$0xff] }
 0x7ea   :  { %7579 = vset.pattern.permute.xlu1 %v11614_v62  ;;  %7580 = vset.pattern.permute.xlu0 %v11614_v62  ;;  %v2777_v37 = vmul.f32 %v10018_v4, %v11616_v24  ;;  %v2802_v22 = vadd.f32 %v2790_v47, %v2774_v56  ;;  %v2795_v24 = vmul.f32 %v10028_v46, %v11621_v34  ;;  %v11624_v56 = vld [vmem:[#allocation45_spill] sm:$0xff] }
 0x7eb   :  { %v2831_v8 = vadd.f32 %v2819_v49, %v2803_v13  ;;  %391 = vperm.xlu1 %7579, %v354_v59   ;;  %395 = vperm.xlu0 %7580, %v355_v21   ;;  %v11617_v13 = vld [vmem:[#allocation36_spill] sm:$0xff]  ;;  %v2804_v49 = vadd.f32 %v2792_v63, %v2776_v51  ;;  %v11622_v21 = vld [vmem:[#allocation31_spill] sm:$0xff]  ;;  %v11623_v51 = vld [vmem:[#allocation38_spill] sm:$0xff]  ;;  %v2849_v20 = vmul.f32 %v10060_v28, %v11624_v56 }
 0x7ec   :  { %v2793_v9 = vmul.f32 %v10028_v46, %v11617_v13  ;;  %v2869_v59 = vadd.f32 %v2857_v26, %v11622_v21  ;;  %v2830_v1 = vadd.f32 %v2818_v3, %v2802_v22  ;;  %v2821_v47 = vmul.f32 %v10045_v17, %v11623_v51  ;;  %v357_v21 = vld [vmem:[%s10923_s7 + $0x18] sm:$0xff] }
 0x7ed   :  { %v2859_v63 = vadd.f32 %v2847_v43, %v2831_v8  ;;  %v11625_v13 = vmov 0   ;;  %v2868_v34 = vadd.f32 %v2856_v2, %v11554_v7  ;;  %v2832_v55 = vadd.f32 %v2820_v29, %v2804_v49  ;;  %v10122_v7 = vld [vmem:[%s10923_s7 + $0x20] sm:$0xff]  ;;  %v11626_v49 = vld [vmem:[#allocation33_spill] sm:$0xff]  ;;  %v11629_v56 = vld [vmem:[#allocation47_spill] sm:$0xff] }
 0x7ee   :  { %v2805_v57 = vadd.f32 %v2793_v9, %v2777_v37  ;;  %v2858_v43 = vadd.f32 %v2846_v61, %v2830_v1  ;;  %v2807_v26 = vadd.f32 %v2795_v24, %v2779_v41  ;;  %v2823_v3 = vmul.f32 %v10045_v17, %v8589_v31  ;;  %v11627_v31 = vld [vmem:[#allocation50_spill] sm:$0xff]  ;;  %v11628_v1 = vld [vmem:[#allocation40_spill] sm:$0xff] }
 0x7ef   :  { %7581 = vset.pattern.permute.xlu1 %v11625_v13  ;;  %399 = vperm.xlu0 %7580, %v356_v48   ;;  %v2871_v42 = vadd.f32 %v2859_v63, %v11500_v5  ;;  %v2794_v2 = vmul.f32 %v10028_v46, %v11556_v23  ;;  %v2851_v41 = vmul.f32 %v10060_v28, %v11627_v31 }
 0x7f0   :  { %372 = vperm.xlu1 %7581, %v356_v48   ;;  %v2870_v29 = vadd.f32 %v2858_v43, %v11626_v49  ;;  %v2833_v61 = vadd.f32 %v2821_v47, %v2805_v57  ;;  %v2778_v51 = vmul.f32 %v10018_v4, %v11628_v1  ;;  %v2822_v5 = vmul.f32 %v10045_v17, %v11629_v56 }
 0x7f1   :  { %v2850_v57 = vmul.f32 %v10060_v28, %v8489_v25 }
 0x7f2   :  { %v2861_v47 = vadd.f32 %v2849_v20, %v2833_v61 }
 0x7f3   :  { %7583 = vset.pattern.permute.xlu0 %v11625_v13 }
 0x7f4   :  { %377 = vperm.xlu1 %7581, %v357_v21   ;;  %382 = vperm.xlu0 %7583, %v10122_v7  }
 0x7f8   :  { %7582 = vset.pattern.permute.xlu1 %v11614_v62 }
 0x7f9   :  { %403 = vperm.xlu1 %7582, %v357_v21  }
 0x7fd   :  { %7584 = vset.pattern.permute.xlu1 %v11625_v13 }
 0x88d   :  { %v6893_v15 = vpop.f32.mrb[36].mxu1 }
 0x88e   :  { %v3006_v8 = vadd.f32 %v6893_v15, %v2869_v59  ;;  %v2946_v22 = vpop.f32.mrb[37].mxu1  ;;  %v2860_v59 = vadd.f32 %v2848_v12, %v2832_v55  ;;  %v2835_v15 = vadd.f32 %v2823_v3, %v2807_v26  ;;  %v2806_v55 = vadd.f32 %v2794_v2, %v2778_v51 }
 0x88f   :  { %v3005_v37 = vadd.f32 %v2946_v22, %v2868_v34  ;;  %v415_v34 = vld [vmem:[%s10925_s9 + $0x8] sm:$0xff]  ;;  %v2873_v22 = vadd.f32 %v2861_v47, %v11286_v35  ;;  %v2781_v47 = vmul.f32 %v10018_v4, %v11289_v39 }
 0x890   :  { %v6185_v9 = vmul.f32 -1.442695, %v3006_v8  ;;  %v2863_v43 = vadd.f32 %v2851_v41, %v2835_v15  ;;  %v2834_v20 = vadd.f32 %v2822_v5, %v2806_v55  ;;  %423 = vperm.xlu0 %7583, %v415_v34   ;;  %v359_v35 = vld [vmem:[%s10923_s7 + $0x28] sm:$0xff]  ;;  %v2796_v5 = vmul.f32 %v10028_v46, %v11287_v40 }
 0x891   :  { %v6184_v24 = vmul.f32 -1.442695, %v3005_v37  ;;  %v6896_v48 = vpop.f32.mrb[38].mxu1  ;;  %387 = vperm.xlu1 %7584, %v359_v35   ;;  %v2825_v40 = vmul.f32 %v10045_v17, %v11290_v38  ;;  %v2824_v55 = vmul.f32 %v10045_v17, %v8604_v11  ;;  %v2782_v11 = vmul.f32 %v10018_v4, %v8587_v45 }
 0x892   :  { %7868 = vpow2.f32 %v6185_v9  ;;  %v3008_v23 = vadd.f32 %v6896_v48, %v2871_v42  ;;  %v2956_v63 = vpop.f32.mrb[39].mxu1  ;;  %v2872_v42 = vadd.f32 %v2860_v59, %v8442_v50  ;;  %v2862_v49 = vadd.f32 %v2850_v57, %v2834_v20  ;;  %v414_v59 = vld [vmem:[%s10925_s9] sm:$0xff] }
 0x893   :  { %7870 = vpow2.f32 %v6184_v24  ;;  %v3007_v12 = vadd.f32 %v2956_v63, %v2870_v29  ;;  %v2875_v25 = vadd.f32 %v2863_v43, %v8450_v53  ;;  %v2797_v53 = vmul.f32 %v10028_v46, %v11288_v58 }
 0x894   :  { %v6187_v8 = vmul.f32 -1.442695, %v3008_v23  ;;  %v2874_v50 = vadd.f32 %v2862_v49, %v8534_v14  ;;  %7586 = vset.pattern.permute.xlu0 %v11614_v62  ;;  %v2780_v58 = vmul.f32 %v10018_v4, %v8549_v19  ;;  %v2853_v19 = vmul.f32 %v10060_v28, %v11291_v36 }
 0x895   :  { %v6186_v37 = vmul.f32 -1.442695, %v3007_v12  ;;  %v6899_v9 = vpop.f32.mrb[40].mxu1  ;;  %411 = vperm.xlu0 %7586, %v359_v35   ;;  %418 = vperm.xlu1 %7584, %v414_v59   ;;  %v2809_v12 = vadd.f32 %v2797_v53, %v2781_v47  ;;  %v2827_v45 = vmul.f32 %v10045_v17, %v11451_v60 }
 0x896   :  { %7872 = vpow2.f32 %v6187_v8  ;;  %v3034_v26 = vadd.f32 %v6899_v9, %v2873_v22  ;;  %v2966_v3 = vpop.f32.mrb[41].mxu1  ;;  %v2808_v39 = vadd.f32 %v2796_v5, %v2780_v58  ;;  %v2826_v9 = vmul.f32 %v10045_v17, %v11396_v18 }
 0x897   :  { %7874 = vpow2.f32 %v6186_v37  ;;  %v3033_v2 = vadd.f32 %v2966_v3, %v2872_v42  ;;  %v2799_v37 = vmul.f32 %v10028_v46, %v8608_v27  ;;  %v2783_v42 = vmul.f32 %v10018_v4, %v11249_v44  ;;  %v11630_v4 = vld [vmem:[#allocation71_spill] sm:$0xff] }
 0x898   :  { %v6189_v29 = vmul.f32 -1.442695, %v3034_v26  ;;  %v2836_v36 = vadd.f32 %v2824_v55, %v2808_v39  ;;  %v2852_v27 = vmul.f32 %v10060_v28, %v11343_v10  ;;  %v11634_v55 = vld [vmem:[#allocation69_spill] sm:$0xff] }
 0x899   :  { %v6902_v61 = vpop.f32.mrb[42].mxu1  ;;  %v6188_v31 = vmul.f32 -1.442695, %v3033_v2  ;;  %7587 = vset.pattern.permute.xlu0 %v11625_v13  ;;  %v2798_v13 = vmul.f32 %v10028_v46, %v8598_v30  ;;  %7585 = vset.pattern.permute.xlu1 %v11614_v62  ;;  %v2837_v30 = vadd.f32 %v2825_v40, %v2809_v12  ;;  %v2811_v26 = vadd.f32 %v2799_v37, %v2783_v42 }
 0x89a   :  { %v3036_v41 = vadd.f32 %v6902_v61, %v2875_v25  ;;  %v2976_v24 = vpop.f32.mrb[43].mxu1  ;;  %7876 = vpow2.f32 %v6189_v29  ;;  %407 = vperm.xlu1 %7585, %v10122_v7   ;;  %v2854_v62 = vmul.f32 %v10060_v28, %v11504_v52  ;;  %v2855_v7 = vmul.f32 %v10060_v28, %v11630_v4 }
 0x89b   :  { %v3035_v21 = vadd.f32 %v2976_v24, %v2874_v50  ;;  %7878 = vpow2.f32 %v6188_v31  ;;  %v2810_v46 = vadd.f32 %v2798_v13, %v2782_v11  ;;  %v2865_v20 = vadd.f32 %v2853_v19, %v2837_v30  ;;  %v11635_v13 = vld [vmem:[#allocation30_spill] sm:$0xff] }
 0x89c   :  { %v7869_v48 = vpop.eup %7868  ;;  %v6191_v51 = vmul.f32 -1.442695, %v3036_v41  ;;  %v2864_v25 = vadd.f32 %v2852_v27, %v2836_v36  ;;  %v2839_v17 = vadd.f32 %v2827_v45, %v2811_v26 }
 0x89d   :  { %v7871_v1 = vpop.eup %7870  ;;  %v3022_v14 = vadd.f32 1.0, %v7869_v48  ;;  %v6905_v56 = vpop.f32.mrb[44].mxu1  ;;  %v6190_v63 = vmul.f32 -1.442695, %v3035_v21  ;;  %v2838_v3 = vadd.f32 %v2826_v9, %v2810_v46  ;;  %v2877_v61 = vadd.f32 %v2865_v20, %v11293_v32  ;;  %v11631_v32 = vld [vmem:[#allocation55_spill] sm:$0xff] }
 0x89e   :  { %v3021_v23 = vadd.f32 1.0, %v7871_v1  ;;  %v2986_v15 = vpop.f32.mrb[45].mxu1  ;;  %v3062_v44 = vadd.f32 %v6905_v56, %v11560_v33  ;;  %v2876_v31 = vadd.f32 %v2864_v25, %v8682_v54  ;;  %v2867_v21 = vadd.f32 %v2855_v7, %v2839_v17  ;;  %v11632_v56 = vld [vmem:[#allocation51_spill] sm:$0xff]  ;;  %v11640_v25 = vld [vmem:[#allocation9_spill] sm:$0xff] }
 0x89f   :  { %7880 = vrcp.f32 %v3022_v14  ;;  %v3061_v10 = vadd.f32 %v2986_v15, %v11292_v6  ;;  %v2866_v41 = vadd.f32 %v2854_v62, %v2838_v3  ;;  %v3097_v3 = vld [vmem:[%s10917_s1] sm:$0xff]  ;;  %v11638_v7 = vld [vmem:[#allocation63_spill] sm:$0xff] }
 0x8a0   :  { %v7873_v34 = vpop.eup %7872  ;;  %7882 = vrcp.f32 %v3021_v23  ;;  %v2879_v14 = vadd.f32 %v2867_v21, %v11631_v32  ;;  %v11646_v17 = vld [vmem:[#allocation15_spill] sm:$0xff] }
 0x8a1   :  { %v7875_v57 = vpop.eup %7874  ;;  %v3024_v8 = vadd.f32 1.0, %v7873_v34  ;;  %7884 = vpow2.f32 %v6191_v51  ;;  %v6908_v22 = vpop.f32.mrb[46].mxu1  ;;  %v2878_v54 = vadd.f32 %v2866_v41, %v11632_v56  ;;  %v11633_v34 = vld [vmem:[#allocation68_spill] sm:$0xff]  ;;  %v10238_v41 = vld [vmem:[%s10924_s8 + $0x8] sm:$0xff]  ;;  %v11650_v21 = vld [vmem:[#allocation67_spill] sm:$0xff] }
 0x8a2   :  { %v3023_v43 = vadd.f32 1.0, %v7875_v57  ;;  %7886 = vpow2.f32 %v6190_v63  ;;  %v2996_v38 = vpop.f32.mrb[47].mxu1  ;;  %v3064_v28 = vadd.f32 %v6908_v22, %v8702_v0  ;;  %v11652_v56 = vld [vmem:[#allocation49_spill] sm:$0xff] }
 0x8a3   :  { %7888 = vrcp.f32 %v3024_v8  ;;  %v3063_v6 = vadd.f32 %v2996_v38, %v8693_v16  ;;  %v11636_v38 = vld [vmem:[#allocation27_spill] sm:$0xff] }
 0x8a4   :  { %7890 = vrcp.f32 %v3023_v43  ;;  %v7877_v18 = vpop.eup %7876 }
 0x8a5   :  { %v7879_v2 = vpop.eup %7878  ;;  %v3050_v29 = vadd.f32 1.0, %v7877_v18 }
 0x8a6   :  { %v3049_v53 = vadd.f32 1.0, %v7879_v2 }
 0x8a7   :  { %7892 = vrcp.f32 %v3050_v29  ;;  %v11643_v29 = vld [vmem:[#allocation13_spill] sm:$0xff] }
 0x8a9   :  { %v7881_v49 = vpop.eup %7880 }
 0x8aa   :  { %v7883_v35 = vpop.eup %7882  ;;  %v3066_v60 = vmul.f32 %v7881_v49, %v3062_v44  ;;  %v11637_v44 = vld [vmem:[#allocation70_spill] sm:$0xff]  ;;  %v11639_v49 = vld [vmem:[#allocation72_spill] sm:$0xff] }
 0x8ab   :  { %v7885_v50 = vpop.eup %7884  ;;  %v3065_v52 = vmul.f32 %v7883_v35, %v3061_v10  ;;  %v11641_v10 = vld [vmem:[#allocation32_spill] sm:$0xff] }
 0x8ac   :  { %v7887_v24 = vpop.eup %7886  ;;  %v3070_v33 = vadd.f32 %v3066_v60, %v2877_v61  ;;  %v3052_v23 = vadd.f32 1.0, %v7885_v50  ;;  %v11642_v35 = vld [vmem:[#allocation8_spill] sm:$0xff]  ;;  %v11644_v61 = vld [vmem:[#allocation14_spill] sm:$0xff] }
 0x8ad   :  { %v7889_v48 = vpop.eup %7888  ;;  %v3069_v59 = vadd.f32 %v3065_v52, %v2876_v31  ;;  %v3051_v47 = vadd.f32 1.0, %v7887_v24  ;;  %v11645_v60 = vld [vmem:[#allocation64_spill] sm:$0xff]  ;;  %v11648_v31 = vld [vmem:[#allocation17_spill] sm:$0xff]  ;;  %v11649_v52 = vld [vmem:[#allocation6_spill] sm:$0xff] }
 0x8ae   :  { %v7891_v1 = vpop.eup %7890  ;;  %v3068_v51 = vmul.f32 %v7889_v48, %v3064_v28  ;;  %7894 = vtanh.f32 %v3070_v33  ;;  %v11647_v50 = vld [vmem:[#allocation16_spill] sm:$0xff]  ;;  %v10243_v24 = vld [vmem:[%s10924_s8 + $0x10] sm:$0xff]  ;;  %v10253_v33 = vld [vmem:[%s10924_s8 + $0x18] sm:$0xff] }
 0x8af   :  { %v3067_v5 = vmul.f32 %v7891_v1, %v3063_v6  ;;  %7896 = vtanh.f32 %v3069_v59  ;;  %v10259_v28 = vld [vmem:[%s10924_s8 + $0x20] sm:$0xff]  ;;  %v6238_v48 = vld [vmem:[%s10917_s1 + $0x10] sm:$0xff] }
 0x8b0   :  { %v3072_v63 = vadd.f32 %v3068_v51, %v2879_v14  ;;  %7898 = vrcp.f32 %v3049_v53  ;;  %v10272_v53 = vld [vmem:[%s10924_s8 + $0x28] sm:$0xff]  ;;  %v11651_v59 = vld [vmem:[#allocation42_spill] sm:$0xff]  ;;  %v10308_v14 = vpop.permute.xlu1 %367 }
 0x8b1   :  { %v3071_v0 = vadd.f32 %v3067_v5, %v2878_v54  ;;  %v7893_v16 = vpop.eup %7892  ;;  %v10313_v54 = vsub.s32 2, %v11652_v56  ;;  %v3329_v5 = vld [vmem:[%s10916_s0] sm:$0x7] }
 0x8b2   :  { %7900 = vtanh.f32 %v3072_v63 }
 0x8b3   :  { %7902 = vtanh.f32 %v3071_v0  ;;  %v3333_v63 = vrot.slane %v3329_v5, %v10313_v54 }
 0x8b4   :  { %7904 = vrcp.f32 %v3052_v23  ;;  %v10310_v51 = vpop.permute.xlu1 %391 }
 0x8b5   :  { %7906 = vrcp.f32 %v3051_v47  ;;  %v10321_v47 = vpop.permute.xlu0 %362  ;;  %v3335_v0 = vmul.f32 %v3333_v63, %v10308_v14 }
 0x8b8   :  { %v7895_v15 = vpop.eup %7894  ;;  %v10318_v23 = vpop.permute.xlu1 %372 }
 0x8b9   :  { %v7897_v58 = vpop.eup %7896  ;;  %v3078_v12 = vsub.f32 %v11633_v34, %v7895_v15  ;;  %v10304_v1 = vpop.f32.mrb[52].mxu1 }
 0x8ba   :  { %v7899_v40 = vpop.eup %7898  ;;  %v3077_v57 = vsub.f32 %v11634_v55, %v7897_v58  ;;  %v10306_v32 = vpop.f32.mrb[53].mxu1 }
 0x8bb   :  { %v3082_v39 = vmul.f32 %v7893_v16, %v3078_v12  ;;  %v10327_v12 = vpop.permute.xlu0 %395 }
 0x8bc   :  { %v7901_v8 = vpop.eup %7900  ;;  %v3081_v19 = vmul.f32 %v7899_v40, %v3077_v57  ;;  %v7389_v40 = vadd.f32 %v3335_v0, %v10327_v12 }
 0x8bd   :  { %v7903_v22 = vpop.eup %7902  ;;  %v3080_v43 = vsub.f32 %v11635_v13, %v7901_v8  ;;  %v3086_v9 = vadd.f32 %v7895_v15, %v3082_v39  ;;  %v3334_v15 = vmul.f32 %v3333_v63, %v10321_v47 }
 0x8be   :  { %v7905_v37 = vpop.eup %7904  ;;  %v3079_v11 = vsub.f32 %v11636_v38, %v7903_v22  ;;  %v3085_v36 = vadd.f32 %v7897_v58, %v3081_v19  ;;  %v10325_v58 = vpop.permute.xlu1 %377 }
 0x8bf   :  { %v7907_v30 = vpop.eup %7906  ;;  %v3084_v42 = vmul.f32 %v7905_v37, %v3080_v43  ;;  %v7391_v57 = vadd.f32 %v3334_v15, %v10310_v51  ;;  %v3336_v37 = vmul.f32 %v3333_v63, %v10318_v23 }
 0x8c0   :  { %v3083_v27 = vmul.f32 %v7907_v30, %v3079_v11  ;;  %v10296_v6 = vpack.c.bf16 %v3086_v9, %v3085_v36 }
 0x8c1   :  { %v3088_v46 = vadd.f32 %v7901_v8, %v3084_v42  ;;  %v3337_v8 = vmul.f32 %v3333_v63, %v10325_v58  ;;  %v10336_v42 = vpop.permute.xlu0 %399 }
 0x8c2   :  { %v3087_v20 = vadd.f32 %v7903_v22, %v3083_v27  ;;  %v10332_v43 = vpop.permute.xlu1 %403 }
 0x8c3   :  { %v3094_v26 = vadd.f32 %v3088_v46, %v3086_v9  ;;  %v7393_v9 = vadd.f32 %v3337_v8, %v10332_v43 }
 0x8c4   :  { %v7297_v45 = vpack.c.bf16 %v3088_v46, %v3087_v20  ;;  %v3093_v18 = vadd.f32 %v3087_v20, %v3085_v36  ;;  %v7395_v36 = vadd.f32 %v3336_v37, %v10336_v42 }
 0x8c5   :  { %v10206_v2 = vmul.f32 0.5, %v3094_v26 }
 0x8c6   :  { %7298 = vmatprep.subr.bf16.mxu0 %v7297_v45  ;;  %v10204_v62 = vmul.f32 0.5, %v3093_v18 }
 0x8c7   :  { %7300 = vmatpush3.bf16.msra.mxu0 %v7297_v45 }
 0x8c8   :  { %6926 = vmatprep.subr.mxu0 %v3097_v3  ;;  %v7301_v4 = vpack.c.bf16 %v10206_v2, %v10204_v62 }
 0x8ca   :  { %6918 = vmatmul.mubr.msk.f32.vlgmr.msra.gmra.mrb[48].mxu0 %vm541_vm0, %v11637_v44 }
 0x8cb   :  { %6927 = vmatpush3.msra.mxu0 %v3097_v3  ;;  %6920 = vmatprep.mubr.msk.f32.mxu0 %vm541_vm0, %v11638_v7  ;;  %v10339_v3 = vpop.permute.xlu0 %382 }
 0x8cc   :  { %7302 = vmatprep.subr.bf16.mxu0 %v7301_v4 }
 0x8ce   :  { %6921 = vmatmul.mubr.msk.f32.gmra.mrb[50].mxu0 %vm541_vm0, %v11639_v49 }
 0x8cf   :  { %6923 = vmatprep.mubr.msk.f32.mxu0 %vm541_vm0, %v11640_v25 }
 0x8d2   :  { %6924 = vmatmul.mubr.msk.f32.gmra.mrb[52].mxu0 %vm541_vm0, %v11641_v10 }
 0x8d3   :  { %6928 = vmatprep.mubr.msk.f32.mxu0 %vm3215_vm1, %v11642_v35 }
 0x8d6   :  { %6929 = vmatmul.mubr.msk.f32.vlgmr.msra.gmra.mrb[48].mxu0 %vm3215_vm1, %v11643_v29 }
 0x8d7   :  { %7304 = vmatpush3.bf16.msra.mxu0 %v7301_v4  ;;  %6931 = vmatprep.mubr.msk.f32.mxu0 %vm3215_vm1, %v11644_v61 }
 0x8d8   :  { %7318 = vmatprep.subr.bf16.mxu0 %v11645_v60 }
 0x8da   :  { %6932 = vmatmul.mubr.msk.f32.gmra.mrb[50].mxu0 %vm3215_vm1, %v11646_v17 }
 0x8db   :  { %6934 = vmatprep.mubr.msk.f32.mxu0 %vm3215_vm1, %v11647_v50 }
 0x8de   :  { %6935 = vmatmul.mubr.msk.f32.gmra.mrb[52].mxu0 %vm3215_vm1, %v11648_v31 }
 0x8df   :  { %6941 = vmatprep.mubr.msk.f32.mxu0 %vm3352_vm2, %v11649_v52 }
 0x8e2   :  { %6942 = vmatmul.mubr.msk.f32.vlgmr.msra.gmra.mrb[48].mxu0 %vm3352_vm2, %v10238_v41 }
 0x8e3   :  { %7320 = vmatpush3.bf16.msra.mxu0 %v11645_v60  ;;  %6944 = vmatprep.mubr.msk.f32.mxu0 %vm3352_vm2, %v10243_v24 }
 0x8e4   :  { %7322 = vmatprep.subr.bf16.mxu0 %v11650_v21 }
 0x8e6   :  { %6945 = vmatmul.mubr.msk.f32.gmra.mrb[50].mxu0 %vm3352_vm2, %v10253_v33 }
 0x8e7   :  { %7324 = vmatpush3.bf16.msra.mxu0 %v11650_v21  ;;  %6947 = vmatprep.mubr.msk.f32.mxu0 %vm3352_vm2, %v10259_v28 }
 0x8e8   :  { %7008 = vmatprep.subr.mxu0 %v6238_v48 }
 0x8ea   :  { %6948 = vmatmul.mubr.msk.f32.gmra.mrb[54].mxu0 %vm3352_vm2, %v10272_v53 }
 0x8eb   :  { %6999 = vmatprep.mubr.msk.f32.mxu0 %vm541_vm0, %v11651_v59 }
 0x8ee   :  { %7000 = vmatmul.mubr.msk.f32.vlgmr.msra.gmra.mrb[56].mxu0 %vm541_vm0, %v11637_v44 }
 0x8ef   :  { %7002 = vmatprep.mubr.msk.f32.mxu0 %vm541_vm0, %v11638_v7  ;;  %7009 = vmatpush3.msra.mxu0 %v6238_v48 }
 0x8f2   :  { %7003 = vmatmul.mubr.msk.f32.gmra.mrb[58].mxu0 %vm541_vm0, %v11639_v49 }
 0x8f3   :  { %7005 = vmatprep.mubr.msk.f32.mxu0 %vm541_vm0, %v11640_v25 }
 0x8f6   :  { %7006 = vmatmul.mubr.msk.f32.gmra.mrb[60].mxu0 %vm541_vm0, %v11641_v10 }
 0x8f7   :  { %7010 = vmatprep.mubr.msk.f32.mxu0 %vm3215_vm1, %v11642_v35 }
 0x8fa   :  { %7011 = vmatmul.mubr.msk.f32.vlgmr.msra.gmra.mrb[56].mxu0 %vm3215_vm1, %v11643_v29 }
 0x8fb   :  { %7013 = vmatprep.mubr.msk.f32.mxu0 %vm3215_vm1, %v11644_v61 }
 0x8fe   :  { %7014 = vmatmul.mubr.msk.f32.gmra.mrb[58].mxu0 %vm3215_vm1, %v11646_v17 }
 0x8ff   :  { %7016 = vmatprep.mubr.msk.f32.mxu0 %vm3215_vm1, %v11647_v50 }
 0x902   :  { %7017 = vmatmul.mubr.msk.f32.gmra.mrb[60].mxu0 %vm3215_vm1, %v11648_v31 }
 0x903   :  { %7023 = vmatprep.mubr.msk.f32.mxu0 %vm3352_vm2, %v11649_v52 }
 0x90f   :  { %v10343_v5 = vpop.permute.xlu0 %423 }
 0x910   :  { %v10341_v60 = vpop.permute.xlu1 %387 }
 0x911   :  { %v3339_v15 = vmul.f32 %v3333_v63, %v10341_v60 }
 0x914   :  { %v10345_v0 = vpop.permute.xlu1 %418 }
 0x9b1   :  { %v6936_v16 = vpop.f32.mrb[52].mxu0 }
 0x9b2   :  { %v3320_v34 = vpop.f32.mrb[53].mxu0 }
 0x9b5   :  { %v6943_v55 = vpop.f32.mrb[48].mxu0 }
 0x9b6   :  { %v7390_v39 = vadd.f32 %v7389_v40, %v6943_v55  ;;  %v3437_v22 = vpop.f32.mrb[49].mxu0  ;;  %v3338_v40 = vmul.f32 %v3333_v63, %v10339_v3  ;;  %v3345_v55 = vadd.f32 %v6936_v16, %v3339_v15 }
 0x9b7   :  { %v7392_v13 = vadd.f32 %v7391_v57, %v3437_v22 }
 0x9b8   :  { %v6211_v19 = vmul.f32 -1.442695, %v7390_v39  ;;  %v3344_v8 = vadd.f32 %v3338_v40, %v3320_v34  ;;  %v10349_v39 = vpop.permute.xlu0 %411 }
 0x9b9   :  { %v6210_v38 = vmul.f32 -1.442695, %v7392_v13  ;;  %v6946_v11 = vpop.f32.mrb[50].mxu0  ;;  %v10351_v13 = vpop.permute.xlu1 %407 }
 0x9ba   :  { %7908 = vpow2.f32 %v6211_v19  ;;  %v3447_v30 = vpop.f32.mrb[51].mxu0  ;;  %v7394_v27 = vadd.f32 %v7393_v9, %v6946_v11  ;;  %v3351_v9 = vadd.f32 %v3345_v55, %v10349_v39 }
 0x9bb   :  { %7910 = vpow2.f32 %v6210_v38  ;;  %v7396_v20 = vadd.f32 %v7395_v36, %v3447_v30  ;;  %v3350_v36 = vadd.f32 %v3344_v8, %v10351_v13 }
 0x9bc   :  { %v6213_v45 = vmul.f32 -1.442695, %v7394_v27 }
 0x9bd   :  { %v6949_v46 = vpop.f32.mrb[54].mxu0  ;;  %v6212_v18 = vmul.f32 -1.442695, %v7396_v20 }
 0x9be   :  { %v3457_v26 = vpop.f32.mrb[55].mxu0  ;;  %7912 = vpow2.f32 %v6213_v45  ;;  %v3495_v19 = vadd.f32 %v6949_v46, %v10343_v5 }
 0x9bf   :  { %7914 = vpow2.f32 %v6212_v18  ;;  %v3494_v38 = vadd.f32 %v3457_v26, %v10345_v0 }
 0x9c4   :  { %v7909_v4 = vpop.eup %7908 }
 0x9c5   :  { %v7911_v21 = vpop.eup %7910  ;;  %v3475_v48 = vadd.f32 1.0, %v7909_v4 }
 0x9c6   :  { %v3474_v56 = vadd.f32 1.0, %v7911_v21 }
 0x9c7   :  { %7916 = vrcp.f32 %v3475_v48 }
 0x9c8   :  { %7918 = vrcp.f32 %v3474_v56  ;;  %v7913_v57 = vpop.eup %7912 }
 0x9c9   :  { %v7915_v22 = vpop.eup %7914  ;;  %v3489_v16 = vadd.f32 1.0, %v7913_v57 }
 0x9ca   :  { %v3488_v34 = vadd.f32 1.0, %v7915_v22  ;;  %v11653_v22 = vld [vmem:[#allocation65_spill] sm:$0xff] }
 0x9d1   :  { %v7917_v37 = vpop.eup %7916 }
 0x9d2   :  { %v7919_v11 = vpop.eup %7918  ;;  %v3497_v30 = vmul.f32 %v7917_v37, %v3495_v19 }
 0x9d3   :  { %v3496_v63 = vmul.f32 %v7919_v11, %v3494_v38 }
 0x9d4   :  { %v3499_v27 = vadd.f32 %v3497_v30, %v3351_v9 }
 0x9d5   :  { %v3498_v20 = vadd.f32 %v3496_v63, %v3350_v36  ;;  %v10357_v45 = vpop.f32.mrb[60].mxu0 }
 0x9d6   :  { %7920 = vtanh.f32 %v3499_v27  ;;  %v10359_v18 = vpop.f32.mrb[61].mxu0 }
 0x9d7   :  { %7922 = vtanh.f32 %v3498_v20 }
 0x9d8   :  { %7924 = vrcp.f32 %v3489_v16 }
 0x9d9   :  { %7926 = vrcp.f32 %v3488_v34 }
 0x9e0   :  { %v7921_v46 = vpop.eup %7920 }
 0x9e1   :  { %v7923_v26 = vpop.eup %7922  ;;  %v3503_v4 = vsub.f32 %v10206_v2, %v7921_v46  ;;  %v6262_v2 = vld [vmem:[%s10917_s1 + $0x18] sm:$0xff] }
 0x9e2   :  { %v7925_v21 = vpop.eup %7924  ;;  %v3502_v48 = vsub.f32 %v10204_v62, %v7923_v26  ;;  %v11654_v62 = vld [vmem:[#allocation12_spill] sm:$0xff] }
 0x9e3   :  { %v7927_v56 = vpop.eup %7926  ;;  %v3505_v15 = vmul.f32 %v7925_v21, %v3503_v4 }
 0x9e4   :  { %v3504_v40 = vmul.f32 %v7927_v56, %v3502_v48 }
 0x9e5   :  { %v10363_v55 = vadd.f32 %v7921_v46, %v3505_v15 }
 0x9e6   :  { %v10365_v57 = vadd.f32 %v7923_v26, %v3504_v40 }
 0x9e8   :  { %v7313_v8 = vpack.c.bf16 %v10363_v55, %v10365_v57 }
 0x9ea   :  { %7314 = vmatprep.subr.bf16.mxu1 %v7313_v8 }
 0x9eb   :  { %7316 = vmatpush3.bf16.msra.mxu1 %v7313_v8 }
 0x9ec   :  { %7330 = vmatprep.subr.bf16.mxu1 %v11653_v22 }
 0x9ee   :  { %6983 = vmatmul.mubr.msk.f32.vlgmr.msra.gmra.mrb[48].mxu1 %vm3352_vm2, %v10238_v41 }
 0x9ef   :  { %7332 = vmatpush3.bf16.msra.mxu1 %v11653_v22  ;;  %6985 = vmatprep.mubr.msk.f32.mxu1 %vm3352_vm2, %v10243_v24 }
 0x9f0   :  { %7334 = vmatprep.subr.bf16.mxu1 %v11654_v62 }
 0x9f2   :  { %6986 = vmatmul.mubr.msk.f32.gmra.mrb[50].mxu1 %vm3352_vm2, %v10253_v33 }
 0x9f3   :  { %7336 = vmatpush3.bf16.msra.mxu1 %v11654_v62  ;;  %6988 = vmatprep.mubr.msk.f32.mxu1 %vm3352_vm2, %v10259_v28 }
 0x9f4   :  { %7049 = vmatprep.subr.mxu1 %v6262_v2 }
 0x9f6   :  { %6989 = vmatmul.mubr.msk.f32.gmra.mrb[54].mxu1 %vm3352_vm2, %v10272_v53 }
 0x9f7   :  { %7040 = vmatprep.mubr.msk.f32.mxu1 %vm541_vm0, %v11651_v59 }
 0x9fa   :  { %7041 = vmatmul.mubr.msk.f32.vlgmr.msra.gmra.mrb[56].mxu1 %vm541_vm0, %v11637_v44  ;;  %v6227_v44 = vld [vmem:[%s10916_s0 + $0x4] sm:$0x7] }
 0x9fb   :  { %7043 = vmatprep.mubr.msk.f32.mxu1 %vm541_vm0, %v11638_v7  ;;  %7050 = vmatpush3.msra.mxu1 %v6262_v2  ;;  %v3708_v7 = vrot.slane %v6227_v44, %v10313_v54 }
 0x9fd   :  { %v3712_v11 = vmul.f32 %v3708_v7, %v10325_v58  ;;  %v3711_v30 = vmul.f32 %v3708_v7, %v10318_v23  ;;  %v3714_v22 = vmul.f32 %v3708_v7, %v10341_v60  ;;  %v3713_v62 = vmul.f32 %v3708_v7, %v10339_v3 }
 0x9fe   :  { %7044 = vmatmul.mubr.msk.f32.gmra.mrb[58].mxu1 %vm541_vm0, %v11639_v49  ;;  %v3710_v49 = vmul.f32 %v3708_v7, %v10308_v14 }
 0x9ff   :  { %7046 = vmatprep.mubr.msk.f32.mxu1 %vm541_vm0, %v11640_v25  ;;  %v3709_v25 = vmul.f32 %v3708_v7, %v10321_v47  ;;  %v7401_v27 = vadd.f32 %v3712_v11, %v10332_v43  ;;  %v7403_v34 = vadd.f32 %v3711_v30, %v10336_v42  ;;  %v3720_v2 = vadd.f32 %v10304_v1, %v3714_v22  ;;  %v10471_v22 = vld [vmem:[%s10922_s6 + $0x8] sm:$0xff] }
 0xa01   :  { %v7399_v59 = vadd.f32 %v3709_v25, %v10310_v51 }
 0xa02   :  { %7047 = vmatmul.mubr.msk.f32.gmra.mrb[60].mxu1 %vm541_vm0, %v11641_v10  ;;  %v7397_v10 = vadd.f32 %v3710_v49, %v10327_v12  ;;  %v3719_v49 = vadd.f32 %v3713_v62, %v10306_v32  ;;  %v10478_v62 = vld [vmem:[%s10922_s6 + $0x10] sm:$0xff] }
 0xa03   :  { %7051 = vmatprep.mubr.msk.f32.mxu1 %vm3215_vm1, %v11642_v35 }
 0xa04   :  { %v3725_v11 = vadd.f32 %v3719_v49, %v10351_v13  ;;  %v10499_v49 = vld [vmem:[%s10922_s6 + $0x28] sm:$0xff] }
 0xa06   :  { %7052 = vmatmul.mubr.msk.f32.vlgmr.msra.gmra.mrb[56].mxu1 %vm3215_vm1, %v11643_v29 }
 0xa07   :  { %7054 = vmatprep.mubr.msk.f32.mxu1 %vm3215_vm1, %v11644_v61 }
 0xa0a   :  { %7055 = vmatmul.mubr.msk.f32.gmra.mrb[58].mxu1 %vm3215_vm1, %v11646_v17 }
 0xa0b   :  { %7057 = vmatprep.mubr.msk.f32.mxu1 %vm3215_vm1, %v11647_v50 }
 0xa0e   :  { %7058 = vmatmul.mubr.msk.f32.gmra.mrb[60].mxu1 %vm3215_vm1, %v11648_v31 }
 0xa0f   :  { %7064 = vmatprep.mubr.msk.f32.mxu1 %vm3352_vm2, %v11649_v52 }
 0xac1   :  { %v6984_v35 = vpop.f32.mrb[48].mxu1 }
 0xac2   :  { %v7398_v19 = vadd.f32 %v7397_v10, %v6984_v35  ;;  %v3793_v37 = vpop.f32.mrb[49].mxu1 }
 0xac3   :  { %v7400_v38 = vadd.f32 %v7399_v59, %v3793_v37  ;;  %v3726_v37 = vadd.f32 %v3720_v2, %v10349_v39  ;;  %v10485_v2 = vld [vmem:[%s10922_s6 + $0x18] sm:$0xff] }
 0xac4   :  { %v6235_v9 = vmul.f32 -1.442695, %v7398_v19 }
 0xac5   :  { %v6234_v36 = vmul.f32 -1.442695, %v7400_v38  ;;  %v6987_v63 = vpop.f32.mrb[50].mxu1 }
 0xac6   :  { %7928 = vpow2.f32 %v6235_v9  ;;  %v3803_v16 = vpop.f32.mrb[51].mxu1  ;;  %v7402_v20 = vadd.f32 %v7401_v27, %v6987_v63 }
 0xac7   :  { %7930 = vpow2.f32 %v6234_v36  ;;  %v7404_v26 = vadd.f32 %v7403_v34, %v3803_v16 }
 0xac8   :  { %v6237_v21 = vmul.f32 -1.442695, %v7402_v20 }
 0xac9   :  { %v6990_v46 = vpop.f32.mrb[54].mxu1  ;;  %v6236_v48 = vmul.f32 -1.442695, %v7404_v26 }
 0xaca   :  { %v3813_v4 = vpop.f32.mrb[55].mxu1  ;;  %7932 = vpow2.f32 %v6237_v21  ;;  %v3851_v10 = vadd.f32 %v6990_v46, %v10343_v5 }
 0xacb   :  { %7934 = vpow2.f32 %v6236_v48  ;;  %v3850_v59 = vadd.f32 %v3813_v4, %v10345_v0 }
 0xad0   :  { %v7929_v56 = vpop.eup %7928 }
 0xad1   :  { %v7931_v15 = vpop.eup %7930  ;;  %v3831_v40 = vadd.f32 1.0, %v7929_v56 }
 0xad2   :  { %v3830_v8 = vadd.f32 1.0, %v7931_v15 }
 0xad3   :  { %7936 = vrcp.f32 %v3831_v40  ;;  %v11655_v40 = vld [vmem:[#allocation66_spill] sm:$0xff] }
 0xad4   :  { %7938 = vrcp.f32 %v3830_v8  ;;  %v7933_v44 = vpop.eup %7932  ;;  %v10464_v8 = vld [vmem:[%s10922_s6] sm:$0xff] }
 0xad5   :  { %v7935_v25 = vpop.eup %7934  ;;  %v3845_v30 = vadd.f32 1.0, %v7933_v44  ;;  %v10492_v44 = vld [vmem:[%s10922_s6 + $0x20] sm:$0xff] }
 0xad6   :  { %v3844_v36 = vadd.f32 1.0, %v7935_v25  ;;  %v10506_v25 = vld [vmem:[%s10921_s5] sm:$0xff] }
 0xadd   :  { %v7937_v35 = vpop.eup %7936 }
 0xade   :  { %v7939_v19 = vpop.eup %7938  ;;  %v3853_v38 = vmul.f32 %v7937_v35, %v3851_v10  ;;  %v6251_v10 = vld [vmem:[%s10916_s0 + $0x8] sm:$0x7] }
 0xadf   :  { %v3852_v9 = vmul.f32 %v7939_v19, %v3850_v59 }
 0xae0   :  { %v3855_v7 = vadd.f32 %v3853_v38, %v3726_v37 }
 0xae1   :  { %v3854_v1 = vadd.f32 %v3852_v9, %v3725_v11  ;;  %v10432_v63 = vpop.f32.mrb[60].mxu1 }
 0xae2   :  { %7940 = vtanh.f32 %v3855_v7  ;;  %v10434_v32 = vpop.f32.mrb[61].mxu1 }
 0xae3   :  { %7942 = vtanh.f32 %v3854_v1 }
 0xae4   :  { %7944 = vrcp.f32 %v3845_v30 }
 0xae5   :  { %7946 = vrcp.f32 %v3844_v36 }
 0xaec   :  { %v7941_v16 = vpop.eup %7940 }
 0xaed   :  { %v7943_v27 = vpop.eup %7942  ;;  %v3859_v34 = vsub.f32 %v10363_v55, %v7941_v16  ;;  %v11656_v55 = vld [vmem:[#allocation10_spill] sm:$0xff] }
 0xaee   :  { %v7945_v20 = vpop.eup %7944  ;;  %v3858_v46 = vsub.f32 %v10365_v57, %v7943_v27  ;;  %v6286_v57 = vld [vmem:[%s10917_s1 + $0x20] sm:$0xff] }
 0xaef   :  { %v7947_v26 = vpop.eup %7946  ;;  %v3861_v4 = vmul.f32 %v7945_v20, %v3859_v34 }
 0xaf0   :  { %v3860_v21 = vmul.f32 %v7947_v26, %v3858_v46 }
 0xaf1   :  { %v10438_v48 = vadd.f32 %v7941_v16, %v3861_v4 }
 0xaf2   :  { %v10440_v56 = vadd.f32 %v7943_v27, %v3860_v21 }
 0xaf4   :  { %v7325_v15 = vpack.c.bf16 %v10438_v48, %v10440_v56 }
 0xaf6   :  { %7326 = vmatprep.subr.bf16.mxu0 %v7325_v15 }
 0xaf7   :  { %7328 = vmatpush3.bf16.msra.mxu0 %v7325_v15 }
 0xaf8   :  { %7342 = vmatprep.subr.bf16.mxu0 %v11655_v40 }
 0xafa   :  { %7024 = vmatmul.mubr.msk.f32.vlgmr.msra.gmra.mrb[56].mxu0 %vm3352_vm2, %v10238_v41 }
 0xafb   :  { %7344 = vmatpush3.bf16.msra.mxu0 %v11655_v40  ;;  %7026 = vmatprep.mubr.msk.f32.mxu0 %vm3352_vm2, %v10243_v24 }
 0xafc   :  { %7346 = vmatprep.subr.bf16.mxu0 %v11656_v55 }
 0xafe   :  { %7027 = vmatmul.mubr.msk.f32.gmra.mrb[58].mxu0 %vm3352_vm2, %v10253_v33 }
 0xaff   :  { %7348 = vmatpush3.bf16.msra.mxu0 %v11656_v55  ;;  %7029 = vmatprep.mubr.msk.f32.mxu0 %vm3352_vm2, %v10259_v28 }
 0xb00   :  { %7090 = vmatprep.subr.mxu0 %v6286_v57 }
 0xb02   :  { %7030 = vmatmul.mubr.msk.f32.gmra.mrb[62].mxu0 %vm3352_vm2, %v10272_v53 }
 0xb03   :  { %7081 = vmatprep.mubr.msk.f32.mxu0 %vm541_vm0, %v10464_v8 }
 0xb06   :  { %7082 = vmatmul.mubr.msk.f32.vlgmr.msra.gmra.mrb[64].mxu0 %vm541_vm0, %v10471_v22 }
 0xb07   :  { %7084 = vmatprep.mubr.msk.f32.mxu0 %vm541_vm0, %v10478_v62  ;;  %7091 = vmatpush3.msra.mxu0 %v6286_v57 }
 0xb0a   :  { %7085 = vmatmul.mubr.msk.f32.gmra.mrb[66].mxu0 %vm541_vm0, %v10485_v2 }
 0xb0b   :  { %7087 = vmatprep.mubr.msk.f32.mxu0 %vm541_vm0, %v10492_v44 }
 0xb0e   :  { %7088 = vmatmul.mubr.msk.f32.gmra.mrb[68].mxu0 %vm541_vm0, %v10499_v49 }
 0xb0f   :  { %7092 = vmatprep.mubr.msk.f32.mxu0 %vm3215_vm1, %v10506_v25 }
 0xb12   :  { %7093 = vmatmul.mubr.msk.f32.vlgmr.msra.gmra.mrb[64].mxu0 %vm3215_vm1, %v11643_v29  ;;  %v4064_v29 = vrot.slane %v6251_v10, %v10313_v54 }
 0xb13   :  { %7095 = vmatprep.mubr.msk.f32.mxu0 %vm3215_vm1, %v11644_v61 }
 0xb14   :  { %v4066_v61 = vmul.f32 %v4064_v29, %v10308_v14  ;;  %v4065_v35 = vmul.f32 %v4064_v29, %v10321_v47  ;;  %v4067_v11 = vmul.f32 %v4064_v29, %v10318_v23  ;;  %v4070_v55 = vmul.f32 %v4064_v29, %v10341_v60 }
 0xb15   :  { %v4069_v57 = vmul.f32 %v4064_v29, %v10339_v3 }
 0xb16   :  { %7096 = vmatmul.mubr.msk.f32.gmra.mrb[66].mxu0 %vm3215_vm1, %v11646_v17  ;;  %v7405_v17 = vadd.f32 %v4066_v61, %v10327_v12  ;;  %v7411_v1 = vadd.f32 %v4067_v11, %v10336_v42  ;;  %v4076_v10 = vadd.f32 %v10357_v45, %v4070_v55  ;;  %v10588_v55 = vld [vmem:[%s10921_s5 + $0x8] sm:$0xff] }
 0xb17   :  { %7098 = vmatprep.mubr.msk.f32.mxu0 %vm3215_vm1, %v11647_v50  ;;  %v7407_v50 = vadd.f32 %v4065_v35, %v10310_v51  ;;  %v4075_v35 = vadd.f32 %v4069_v57, %v10359_v18  ;;  %v10595_v57 = vld [vmem:[%s10921_s5 + $0x10] sm:$0xff] }
 0xb1a   :  { %7099 = vmatmul.mubr.msk.f32.gmra.mrb[68].mxu0 %vm3215_vm1, %v11648_v31 }
 0xb1b   :  { %7105 = vmatprep.mubr.msk.f32.mxu0 %vm3352_vm2, %v11649_v52  ;;  %v4068_v52 = vmul.f32 %v4064_v29, %v10325_v58 }
 0xb1d   :  { %v7409_v36 = vadd.f32 %v4068_v52, %v10332_v43 }
 0xbcd   :  { %v7025_v59 = vpop.f32.mrb[56].mxu0 }
 0xbce   :  { %v7406_v19 = vadd.f32 %v7405_v17, %v7025_v59  ;;  %v4149_v31 = vpop.f32.mrb[57].mxu0 }
 0xbcf   :  { %v7408_v37 = vadd.f32 %v7407_v50, %v4149_v31 }
 0xbd0   :  { %v6259_v38 = vmul.f32 -1.442695, %v7406_v19 }
 0xbd1   :  { %v6258_v9 = vmul.f32 -1.442695, %v7408_v37  ;;  %v7028_v30 = vpop.f32.mrb[58].mxu0  ;;  %v4082_v37 = vadd.f32 %v4076_v10, %v10349_v39  ;;  %v10602_v10 = vld [vmem:[%s10921_s5 + $0x18] sm:$0xff] }
 0xbd2   :  { %7948 = vpow2.f32 %v6259_v38  ;;  %v4159_v7 = vpop.f32.mrb[59].mxu0  ;;  %v7410_v16 = vadd.f32 %v7409_v36, %v7028_v30  ;;  %v4081_v38 = vadd.f32 %v4075_v35, %v10351_v13  ;;  %v10616_v35 = vld [vmem:[%s10921_s5 + $0x28] sm:$0xff] }
 0xbd3   :  { %7950 = vpow2.f32 %v6258_v9  ;;  %v7412_v34 = vadd.f32 %v7411_v1, %v4159_v7 }
 0xbd4   :  { %v6261_v46 = vmul.f32 -1.442695, %v7410_v16 }
 0xbd5   :  { %v7031_v27 = vpop.f32.mrb[62].mxu0  ;;  %v6260_v26 = vmul.f32 -1.442695, %v7412_v34 }
 0xbd6   :  { %v4169_v20 = vpop.f32.mrb[63].mxu0  ;;  %7952 = vpow2.f32 %v6261_v46  ;;  %v4207_v59 = vadd.f32 %v7031_v27, %v10343_v5 }
 0xbd7   :  { %7954 = vpow2.f32 %v6260_v26  ;;  %v4206_v19 = vadd.f32 %v4169_v20, %v10345_v0 }
 0xbdc   :  { %v7949_v4 = vpop.eup %7948 }
 0xbdd   :  { %v7951_v21 = vpop.eup %7950  ;;  %v4187_v15 = vadd.f32 1.0, %v7949_v4 }
 0xbde   :  { %v4186_v40 = vadd.f32 1.0, %v7951_v21 }
 0xbdf   :  { %7956 = vrcp.f32 %v4187_v15 }
 0xbe0   :  { %7958 = vrcp.f32 %v4186_v40  ;;  %v7953_v61 = vpop.eup %7952  ;;  %v11657_v40 = vld [vmem:[#allocation7_spill] sm:$0xff] }
 0xbe1   :  { %v7955_v17 = vpop.eup %7954  ;;  %v4201_v9 = vadd.f32 1.0, %v7953_v61  ;;  %v10609_v61 = vld [vmem:[%s10921_s5 + $0x20] sm:$0xff] }
 0xbe2   :  { %v4200_v30 = vadd.f32 1.0, %v7955_v17  ;;  %v10623_v17 = vld [vmem:[%s10924_s8] sm:$0xff] }
 0xbe9   :  { %v7957_v50 = vpop.eup %7956 }
 0xbea   :  { %v7959_v31 = vpop.eup %7958  ;;  %v4209_v52 = vmul.f32 %v7957_v50, %v4207_v59  ;;  %v6275_v59 = vld [vmem:[%s10916_s0 + $0xc] sm:$0x7] }
 0xbeb   :  { %v4208_v11 = vmul.f32 %v7959_v31, %v4206_v19  ;;  %v4420_v50 = vrot.slane %v6275_v59, %v10313_v54 }
 0xbec   :  { %v4211_v29 = vadd.f32 %v4209_v52, %v4082_v37 }
 0xbed   :  { %v4210_v45 = vadd.f32 %v4208_v11, %v4081_v38  ;;  %v10542_v7 = vpop.f32.mrb[68].mxu0  ;;  %v4422_v19 = vmul.f32 %v4420_v50, %v10308_v14  ;;  %v4421_v31 = vmul.f32 %v4420_v50, %v10321_v47 }
 0xbee   :  { %7960 = vtanh.f32 %v4211_v29  ;;  %v10544_v18 = vpop.f32.mrb[69].mxu0 }
 0xbef   :  { %7962 = vtanh.f32 %v4210_v45  ;;  %v7413_v37 = vadd.f32 %v4422_v19, %v10327_v12  ;;  %v7415_v38 = vadd.f32 %v4421_v31, %v10310_v51 }
 0xbf0   :  { %7964 = vrcp.f32 %v4201_v9 }
 0xbf1   :  { %7966 = vrcp.f32 %v4200_v30  ;;  %v4424_v30 = vmul.f32 %v4420_v50, %v10325_v58 }
 0xbf8   :  { %v7961_v36 = vpop.eup %7960 }
 0xbf9   :  { %v7963_v1 = vpop.eup %7962  ;;  %v4215_v16 = vsub.f32 %v10438_v48, %v7961_v36  ;;  %v11658_v48 = vld [vmem:[#allocation73_spill] sm:$0xff] }
 0xbfa   :  { %v7965_v27 = vpop.eup %7964  ;;  %v4214_v34 = vsub.f32 %v10440_v56, %v7963_v1  ;;  %v6310_v56 = vld [vmem:[%s10917_s1 + $0x28] sm:$0xff] }
 0xbfb   :  { %v7967_v20 = vpop.eup %7966  ;;  %v4217_v46 = vmul.f32 %v7965_v27, %v4215_v16 }
 0xbfc   :  { %v4216_v26 = vmul.f32 %v7967_v20, %v4214_v34  ;;  %v7417_v34 = vadd.f32 %v4424_v30, %v10332_v43 }
 0xbfd   :  { %v10548_v4 = vadd.f32 %v7961_v36, %v4217_v46  ;;  %v4423_v36 = vmul.f32 %v4420_v50, %v10318_v23 }
 0xbfe   :  { %v10550_v21 = vadd.f32 %v7963_v1, %v4216_v26 }
 0xbff   :  { %v7419_v20 = vadd.f32 %v4423_v36, %v10336_v42 }
 0xc00   :  { %v7337_v15 = vpack.c.bf16 %v10548_v4, %v10550_v21 }
 0xc02   :  { %7338 = vmatprep.subr.bf16.mxu1 %v7337_v15 }
 0xc03   :  { %7340 = vmatpush3.bf16.msra.mxu1 %v7337_v15 }
 0xc04   :  { %7354 = vmatprep.subr.bf16.mxu1 %v11657_v40 }
 0xc06   :  { %7065 = vmatmul.mubr.msk.f32.vlgmr.msra.gmra.mrb[56].mxu1 %vm3352_vm2, %v10238_v41 }
 0xc07   :  { %7356 = vmatpush3.bf16.msra.mxu1 %v11657_v40  ;;  %7067 = vmatprep.mubr.msk.f32.mxu1 %vm3352_vm2, %v10243_v24 }
 0xc08   :  { %7358 = vmatprep.subr.bf16.mxu1 %v11658_v48 }
 0xc0a   :  { %7068 = vmatmul.mubr.msk.f32.gmra.mrb[58].mxu1 %vm3352_vm2, %v10253_v33 }
 0xc0b   :  { %7360 = vmatpush3.bf16.msra.mxu1 %v11658_v48  ;;  %7070 = vmatprep.mubr.msk.f32.mxu1 %vm3352_vm2, %v10259_v28 }
 0xc0c   :  { %7131 = vmatprep.subr.mxu1 %v6310_v56 }
 0xc0e   :  { %7071 = vmatmul.mubr.msk.f32.gmra.mrb[62].mxu1 %vm3352_vm2, %v10272_v53 }
 0xc0f   :  { %7122 = vmatprep.mubr.msk.f32.mxu1 %vm541_vm0, %v10464_v8 }
 0xc12   :  { %7123 = vmatmul.mubr.msk.f32.vlgmr.msra.gmra.mrb[64].mxu1 %vm541_vm0, %v10471_v22 }
 0xc13   :  { %7125 = vmatprep.mubr.msk.f32.mxu1 %vm541_vm0, %v10478_v62  ;;  %7132 = vmatpush3.msra.mxu1 %v6310_v56 }
 0xc16   :  { %7126 = vmatmul.mubr.msk.f32.gmra.mrb[66].mxu1 %vm541_vm0, %v10485_v2 }
 0xc17   :  { %7128 = vmatprep.mubr.msk.f32.mxu1 %vm541_vm0, %v10492_v44 }
 0xc1a   :  { %7129 = vmatmul.mubr.msk.f32.gmra.mrb[68].mxu1 %vm541_vm0, %v10499_v49 }
 0xc1b   :  { %7133 = vmatprep.mubr.msk.f32.mxu1 %vm3215_vm1, %v10506_v25 }
 0xc1e   :  { %7134 = vmatmul.mubr.msk.f32.vlgmr.msra.gmra.mrb[64].mxu1 %vm3215_vm1, %v10588_v55 }
 0xc1f   :  { %7136 = vmatprep.mubr.msk.f32.mxu1 %vm3215_vm1, %v10595_v57 }
 0xc22   :  { %7137 = vmatmul.mubr.msk.f32.gmra.mrb[66].mxu1 %vm3215_vm1, %v10602_v10 }
 0xc23   :  { %7139 = vmatprep.mubr.msk.f32.mxu1 %vm3215_vm1, %v10609_v61 }
 0xc26   :  { %7140 = vmatmul.mubr.msk.f32.gmra.mrb[68].mxu1 %vm3215_vm1, %v10616_v35 }
 0xc27   :  { %7146 = vmatprep.mubr.msk.f32.mxu1 %vm3352_vm2, %v10623_v17 }
 0xcd9   :  { %v7066_v52 = vpop.f32.mrb[56].mxu1 }
 0xcda   :  { %v7414_v11 = vadd.f32 %v7413_v37, %v7066_v52  ;;  %v4505_v9 = vpop.f32.mrb[57].mxu1  ;;  %v4426_v52 = vmul.f32 %v4420_v50, %v10341_v60 }
 0xcdb   :  { %v7416_v29 = vadd.f32 %v7415_v38, %v4505_v9  ;;  %v4425_v38 = vmul.f32 %v4420_v50, %v10339_v3 }
 0xcdc   :  { %v6283_v45 = vmul.f32 -1.442695, %v7414_v11  ;;  %v4432_v11 = vadd.f32 %v10432_v63, %v4426_v52 }
 0xcdd   :  { %v6282_v1 = vmul.f32 -1.442695, %v7416_v29  ;;  %v7069_v16 = vpop.f32.mrb[58].mxu1  ;;  %v4431_v29 = vadd.f32 %v4425_v38, %v10434_v32 }
 0xcde   :  { %7968 = vpow2.f32 %v6283_v45  ;;  %v4515_v27 = vpop.f32.mrb[59].mxu1  ;;  %v7418_v46 = vadd.f32 %v7417_v34, %v7069_v16 }
 0xcdf   :  { %7970 = vpow2.f32 %v6282_v1  ;;  %v7420_v15 = vadd.f32 %v7419_v20, %v4515_v27  ;;  %v4438_v27 = vadd.f32 %v4432_v11, %v10349_v39  ;;  %v4437_v20 = vadd.f32 %v4431_v29, %v10351_v13 }
 0xce0   :  { %v6285_v48 = vmul.f32 -1.442695, %v7418_v46 }
 0xce1   :  { %v7072_v26 = vpop.f32.mrb[62].mxu1  ;;  %v6284_v56 = vmul.f32 -1.442695, %v7420_v15 }
 0xce2   :  { %v4525_v40 = vpop.f32.mrb[63].mxu1  ;;  %7972 = vpow2.f32 %v6285_v48  ;;  %v4563_v45 = vadd.f32 %v7072_v26, %v10343_v5 }
 0xce3   :  { %7974 = vpow2.f32 %v6284_v56  ;;  %v4562_v1 = vadd.f32 %v4525_v40, %v10345_v0 }
 0xce8   :  { %v7969_v59 = vpop.eup %7968 }
 0xce9   :  { %v7971_v19 = vpop.eup %7970  ;;  %v4543_v31 = vadd.f32 1.0, %v7969_v59 }
 0xcea   :  { %v4542_v37 = vadd.f32 1.0, %v7971_v19 }
 0xceb   :  { %7976 = vrcp.f32 %v4543_v31 }
 0xcec   :  { %7978 = vrcp.f32 %v4542_v37  ;;  %v7973_v9 = vpop.eup %7972 }
 0xced   :  { %v7975_v30 = vpop.eup %7974  ;;  %v4557_v15 = vadd.f32 1.0, %v7973_v9 }
 0xcee   :  { %v4556_v48 = vadd.f32 1.0, %v7975_v30  ;;  %v11659_v30 = vld [vmem:[#allocation53_spill] sm:$0xff] }
 0xcf5   :  { %v7977_v36 = vpop.eup %7976 }
 0xcf6   :  { %v7979_v16 = vpop.eup %7978  ;;  %v4565_v34 = vmul.f32 %v7977_v36, %v4563_v45  ;;  %v6299_v45 = vld [vmem:[%s10916_s0 + $0x10] sm:$0x7] }
 0xcf7   :  { %v4564_v46 = vmul.f32 %v7979_v16, %v4562_v1  ;;  %v4776_v36 = vrot.slane %v6299_v45, %v10313_v54 }
 0xcf8   :  { %v4567_v50 = vadd.f32 %v4565_v34, %v4438_v27 }
 0xcf9   :  { %v4566_v63 = vadd.f32 %v4564_v46, %v4437_v20  ;;  %v10647_v56 = vpop.f32.mrb[68].mxu1  ;;  %v4778_v1 = vmul.f32 %v4776_v36, %v10308_v14  ;;  %v4777_v16 = vmul.f32 %v4776_v36, %v10321_v47 }
 0xcfa   :  { %7980 = vtanh.f32 %v4567_v50  ;;  %v10649_v32 = vpop.f32.mrb[69].mxu1 }
 0xcfb   :  { %7982 = vtanh.f32 %v4566_v63  ;;  %v7421_v27 = vadd.f32 %v4778_v1, %v10327_v12  ;;  %v7423_v20 = vadd.f32 %v4777_v16, %v10310_v51 }
 0xcfc   :  { %7984 = vrcp.f32 %v4557_v15 }
 0xcfd   :  { %7986 = vrcp.f32 %v4556_v48  ;;  %v4780_v48 = vmul.f32 %v4776_v36, %v10325_v58 }
 0xd04   :  { %v7981_v26 = vpop.eup %7980 }
 0xd05   :  { %v7983_v40 = vpop.eup %7982  ;;  %v4571_v59 = vsub.f32 %v10548_v4, %v7981_v26  ;;  %v11660_v4 = vld [vmem:[#allocation11_spill] sm:$0xff] }
 0xd06   :  { %v7985_v19 = vpop.eup %7984  ;;  %v4570_v31 = vsub.f32 %v10550_v21, %v7983_v40  ;;  %v6334_v21 = vld [vmem:[%s10917_s1 + $0x30] sm:$0xff] }
 0xd07   :  { %v7987_v37 = vpop.eup %7986  ;;  %v4573_v52 = vmul.f32 %v7985_v19, %v4571_v59 }
 0xd08   :  { %v4572_v38 = vmul.f32 %v7987_v37, %v4570_v31  ;;  %v7425_v31 = vadd.f32 %v4780_v48, %v10332_v43 }
 0xd09   :  { %v10653_v11 = vadd.f32 %v7981_v26, %v4573_v52  ;;  %v4779_v26 = vmul.f32 %v4776_v36, %v10318_v23 }
 0xd0a   :  { %v10655_v9 = vadd.f32 %v7983_v40, %v4572_v38 }
 0xd0b   :  { %v7427_v37 = vadd.f32 %v4779_v26, %v10336_v42 }
 0xd0c   :  { %v7349_v29 = vpack.c.bf16 %v10653_v11, %v10655_v9 }
 0xd0e   :  { %7350 = vmatprep.subr.bf16.mxu0 %v7349_v29 }
 0xd0f   :  { %7352 = vmatpush3.bf16.msra.mxu0 %v7349_v29 }
 0xd10   :  { %7366 = vmatprep.subr.bf16.mxu0 %v11659_v30 }
 0xd12   :  { %7106 = vmatmul.mubr.msk.f32.vlgmr.msra.gmra.mrb[64].mxu0 %vm3352_vm2, %v10238_v41 }
 0xd13   :  { %7368 = vmatpush3.bf16.msra.mxu0 %v11659_v30  ;;  %7108 = vmatprep.mubr.msk.f32.mxu0 %vm3352_vm2, %v10243_v24 }
 0xd14   :  { %7370 = vmatprep.subr.bf16.mxu0 %v11660_v4 }
 0xd16   :  { %7109 = vmatmul.mubr.msk.f32.gmra.mrb[66].mxu0 %vm3352_vm2, %v10253_v33 }
 0xd17   :  { %7372 = vmatpush3.bf16.msra.mxu0 %v11660_v4  ;;  %7111 = vmatprep.mubr.msk.f32.mxu0 %vm3352_vm2, %v10259_v28 }
 0xd18   :  { %7172 = vmatprep.subr.mxu0 %v6334_v21 }
 0xd1a   :  { %7112 = vmatmul.mubr.msk.f32.gmra.mrb[70].mxu0 %vm3352_vm2, %v10272_v53 }
 0xd1b   :  { %7163 = vmatprep.mubr.msk.f32.mxu0 %vm541_vm0, %v10464_v8 }
 0xd1e   :  { %7164 = vmatmul.mubr.msk.f32.vlgmr.msra.gmra.mrb[72].mxu0 %vm541_vm0, %v10471_v22 }
 0xd1f   :  { %7166 = vmatprep.mubr.msk.f32.mxu0 %vm541_vm0, %v10478_v62  ;;  %7173 = vmatpush3.msra.mxu0 %v6334_v21 }
 0xd22   :  { %7167 = vmatmul.mubr.msk.f32.gmra.mrb[74].mxu0 %vm541_vm0, %v10485_v2 }
 0xd23   :  { %7169 = vmatprep.mubr.msk.f32.mxu0 %vm541_vm0, %v10492_v44 }
 0xd26   :  { %7170 = vmatmul.mubr.msk.f32.gmra.mrb[76].mxu0 %vm541_vm0, %v10499_v49 }
 0xd27   :  { %7174 = vmatprep.mubr.msk.f32.mxu0 %vm3215_vm1, %v10506_v25 }
 0xd2a   :  { %7175 = vmatmul.mubr.msk.f32.vlgmr.msra.gmra.mrb[72].mxu0 %vm3215_vm1, %v10588_v55 }
 0xd2b   :  { %7177 = vmatprep.mubr.msk.f32.mxu0 %vm3215_vm1, %v10595_v57 }
 0xd2e   :  { %7178 = vmatmul.mubr.msk.f32.gmra.mrb[74].mxu0 %vm3215_vm1, %v10602_v10 }
 0xd2f   :  { %7180 = vmatprep.mubr.msk.f32.mxu0 %vm3215_vm1, %v10609_v61 }
 0xd32   :  { %7181 = vmatmul.mubr.msk.f32.gmra.mrb[76].mxu0 %vm3215_vm1, %v10616_v35 }
 0xd33   :  { %7187 = vmatprep.mubr.msk.f32.mxu0 %vm3352_vm2, %v10623_v17 }
 0xde5   :  { %v7107_v34 = vpop.f32.mrb[64].mxu0 }
 0xde6   :  { %v7422_v46 = vadd.f32 %v7421_v27, %v7107_v34  ;;  %v4861_v15 = vpop.f32.mrb[65].mxu0  ;;  %v4782_v34 = vmul.f32 %v4776_v36, %v10341_v60 }
 0xde7   :  { %v7424_v50 = vadd.f32 %v7423_v20, %v4861_v15  ;;  %v4781_v20 = vmul.f32 %v4776_v36, %v10339_v3 }
 0xde8   :  { %v6307_v63 = vmul.f32 -1.442695, %v7422_v46  ;;  %v4788_v46 = vadd.f32 %v10542_v7, %v4782_v34 }
 0xde9   :  { %v6306_v40 = vmul.f32 -1.442695, %v7424_v50  ;;  %v7110_v59 = vpop.f32.mrb[66].mxu0  ;;  %v4787_v50 = vadd.f32 %v4781_v20, %v10544_v18 }
 0xdea   :  { %7988 = vpow2.f32 %v6307_v63  ;;  %v4871_v19 = vpop.f32.mrb[67].mxu0  ;;  %v7426_v52 = vadd.f32 %v7425_v31, %v7110_v59 }
 0xdeb   :  { %7990 = vpow2.f32 %v6306_v40  ;;  %v7428_v29 = vadd.f32 %v7427_v37, %v4871_v19  ;;  %v4794_v19 = vadd.f32 %v4788_v46, %v10349_v39  ;;  %v4793_v37 = vadd.f32 %v4787_v50, %v10351_v13 }
 0xdec   :  { %v6309_v4 = vmul.f32 -1.442695, %v7426_v52 }
 0xded   :  { %v7113_v38 = vpop.f32.mrb[70].mxu0  ;;  %v6308_v21 = vmul.f32 -1.442695, %v7428_v29 }
 0xdee   :  { %v4881_v30 = vpop.f32.mrb[71].mxu0  ;;  %7992 = vpow2.f32 %v6309_v4  ;;  %v4919_v63 = vadd.f32 %v7113_v38, %v10343_v5 }
 0xdef   :  { %7994 = vpow2.f32 %v6308_v21  ;;  %v4918_v40 = vadd.f32 %v4881_v30, %v10345_v0 }
 0xdf4   :  { %v7989_v45 = vpop.eup %7988 }
 0xdf5   :  { %v7991_v1 = vpop.eup %7990  ;;  %v4899_v16 = vadd.f32 1.0, %v7989_v45 }
 0xdf6   :  { %v4898_v27 = vadd.f32 1.0, %v7991_v1 }
 0xdf7   :  { %7996 = vrcp.f32 %v4899_v16 }
 0xdf8   :  { %7998 = vrcp.f32 %v4898_v27  ;;  %v7993_v15 = vpop.eup %7992 }
 0xdf9   :  { %v7995_v48 = vpop.eup %7994  ;;  %v4913_v29 = vadd.f32 1.0, %v7993_v15 }
 0xdfa   :  { %v4912_v4 = vadd.f32 1.0, %v7995_v48 }
 0xe01   :  { %v7997_v26 = vpop.eup %7996 }
 0xe02   :  { %v7999_v59 = vpop.eup %7998  ;;  %v4921_v31 = vmul.f32 %v7997_v26, %v4919_v63 }
 0xe03   :  { %v4920_v52 = vmul.f32 %v7999_v59, %v4918_v40 }
 0xe04   :  { %v4923_v36 = vadd.f32 %v4921_v31, %v4794_v19 }
 0xe05   :  { %v4922_v7 = vadd.f32 %v4920_v52, %v4793_v37  ;;  %v10722_v21 = vpop.f32.mrb[76].mxu0 }
 0xe06   :  { %8000 = vtanh.f32 %v4923_v36  ;;  %v10724_v18 = vpop.f32.mrb[77].mxu0 }
 0xe07   :  { %8002 = vtanh.f32 %v4922_v7 }
 0xe08   :  { %8004 = vrcp.f32 %v4913_v29 }
 0xe09   :  { %8006 = vrcp.f32 %v4912_v4 }
 0xe10   :  { %v8001_v38 = vpop.eup %8000 }
 0xe11   :  { %v8003_v30 = vpop.eup %8002  ;;  %v4927_v45 = vsub.f32 %v10653_v11, %v8001_v38  ;;  %v11661_v11 = vld [vmem:[#allocation74_spill] sm:$0xff] }
 0xe12   :  { %v8005_v1 = vpop.eup %8004  ;;  %v4926_v16 = vsub.f32 %v10655_v9, %v8003_v30  ;;  %v6358_v9 = vld [vmem:[%s10917_s1 + $0x38] sm:$0xff] }
 0xe13   :  { %v8007_v27 = vpop.eup %8006  ;;  %v4929_v34 = vmul.f32 %v8005_v1, %v4927_v45 }
 0xe14   :  { %v4928_v20 = vmul.f32 %v8007_v27, %v4926_v16 }
 0xe15   :  { %v10728_v46 = vadd.f32 %v8001_v38, %v4929_v34 }
 0xe16   :  { %v10730_v15 = vadd.f32 %v8003_v30, %v4928_v20 }
 0xe18   :  { %v7361_v50 = vpack.c.bf16 %v10728_v46, %v10730_v15 }
 0xe1a   :  { %7362 = vmatprep.subr.bf16.mxu1 %v7361_v50 }
 0xe1b   :  { %7364 = vmatpush3.bf16.msra.mxu1 %v7361_v50 }
 0xe1c   :  { %7378 = vmatprep.subr.bf16.mxu1 %v10296_v6 }
 0xe1e   :  { %7147 = vmatmul.mubr.msk.f32.vlgmr.msra.gmra.mrb[64].mxu1 %vm3352_vm2, %v10238_v41  ;;  %v6323_v41 = vld [vmem:[%s10916_s0 + $0x14] sm:$0x7] }
 0xe1f   :  { %7380 = vmatpush3.bf16.msra.mxu1 %v10296_v6  ;;  %7149 = vmatprep.mubr.msk.f32.mxu1 %vm3352_vm2, %v10243_v24  ;;  %v5132_v24 = vrot.slane %v6323_v41, %v10313_v54 }
 0xe20   :  { %7382 = vmatprep.subr.bf16.mxu1 %v11661_v11 }
 0xe21   :  { %v5138_v29 = vmul.f32 %v5132_v24, %v10341_v60  ;;  %v5137_v36 = vmul.f32 %v5132_v24, %v10339_v3 }
 0xe22   :  { %7150 = vmatmul.mubr.msk.f32.gmra.mrb[66].mxu1 %vm3352_vm2, %v10253_v33  ;;  %v5134_v33 = vmul.f32 %v5132_v24, %v10308_v14 }
 0xe23   :  { %7384 = vmatpush3.bf16.msra.mxu1 %v11661_v11  ;;  %7152 = vmatprep.mubr.msk.f32.mxu1 %vm3352_vm2, %v10259_v28  ;;  %v5133_v28 = vmul.f32 %v5132_v24, %v10321_v47  ;;  %v5144_v4 = vadd.f32 %v10647_v56, %v5138_v29  ;;  %v5143_v38 = vadd.f32 %v5137_v36, %v10649_v32 }
 0xe24   :  { %7213 = vmatprep.subr.mxu1 %v6358_v9 }
 0xe25   :  { %v5150_v34 = vadd.f32 %v5144_v4, %v10349_v39  ;;  %v5149_v50 = vadd.f32 %v5143_v38, %v10351_v13 }
 0xe26   :  { %7153 = vmatmul.mubr.msk.f32.gmra.mrb[70].mxu1 %vm3352_vm2, %v10272_v53  ;;  %v7429_v53 = vadd.f32 %v5134_v33, %v10327_v12 }
 0xe27   :  { %7204 = vmatprep.mubr.msk.f32.mxu1 %vm541_vm0, %v10464_v8  ;;  %v7431_v8 = vadd.f32 %v5133_v28, %v10310_v51 }
 0xe2a   :  { %7205 = vmatmul.mubr.msk.f32.vlgmr.msra.gmra.mrb[72].mxu1 %vm541_vm0, %v10471_v22 }
 0xe2b   :  { %7207 = vmatprep.mubr.msk.f32.mxu1 %vm541_vm0, %v10478_v62  ;;  %7214 = vmatpush3.msra.mxu1 %v6358_v9 }
 0xe2e   :  { %7208 = vmatmul.mubr.msk.f32.gmra.mrb[74].mxu1 %vm541_vm0, %v10485_v2 }
 0xe2f   :  { %7210 = vmatprep.mubr.msk.f32.mxu1 %vm541_vm0, %v10492_v44  ;;  %v5136_v44 = vmul.f32 %v5132_v24, %v10325_v58 }
 0xe32   :  { %7211 = vmatmul.mubr.msk.f32.gmra.mrb[76].mxu1 %vm541_vm0, %v10499_v49 }
 0xe33   :  { %7215 = vmatprep.mubr.msk.f32.mxu1 %vm3215_vm1, %v10506_v25  ;;  %v5135_v25 = vmul.f32 %v5132_v24, %v10318_v23 }
 0xe36   :  { %7216 = vmatmul.mubr.msk.f32.vlgmr.msra.gmra.mrb[72].mxu1 %vm3215_vm1, %v10588_v55 }
 0xe37   :  { %7218 = vmatprep.mubr.msk.f32.mxu1 %vm3215_vm1, %v10595_v57 }
 0xe3a   :  { %7219 = vmatmul.mubr.msk.f32.gmra.mrb[74].mxu1 %vm3215_vm1, %v10602_v10 }
 0xe3b   :  { %7221 = vmatprep.mubr.msk.f32.mxu1 %vm3215_vm1, %v10609_v61  ;;  %v7433_v61 = vadd.f32 %v5136_v44, %v10332_v43 }
 0xe3e   :  { %7222 = vmatmul.mubr.msk.f32.gmra.mrb[76].mxu1 %vm3215_vm1, %v10616_v35  ;;  %v7435_v35 = vadd.f32 %v5135_v25, %v10336_v42 }
 0xe3f   :  { %7228 = vmatprep.mubr.msk.f32.mxu1 %vm3352_vm2, %v10623_v17 }
 0xef1   :  { %v7148_v6 = vpop.f32.mrb[64].mxu1 }
 0xef2   :  { %v7430_v22 = vadd.f32 %v7429_v53, %v7148_v6  ;;  %v5217_v62 = vpop.f32.mrb[65].mxu1 }
 0xef3   :  { %v7432_v2 = vadd.f32 %v7431_v8, %v5217_v62 }
 0xef4   :  { %v6331_v49 = vmul.f32 -1.442695, %v7430_v22 }
 0xef5   :  { %v6330_v55 = vmul.f32 -1.442695, %v7432_v2  ;;  %v7151_v57 = vpop.f32.mrb[66].mxu1 }
 0xef6   :  { %8008 = vpow2.f32 %v6331_v49  ;;  %v5227_v10 = vpop.f32.mrb[67].mxu1  ;;  %v7434_v17 = vadd.f32 %v7433_v61, %v7151_v57  ;;  %v10812_v57 = vld [vmem:[%s10924_s8 + $0x8] sm:$0xff] }
 0xef7   :  { %8010 = vpow2.f32 %v6330_v55  ;;  %v7436_v63 = vadd.f32 %v7435_v35, %v5227_v10  ;;  %v10833_v10 = vld [vmem:[%s10924_s8 + $0x20] sm:$0xff]  ;;  %v10840_v61 = vld [vmem:[%s10924_s8 + $0x28] sm:$0xff]  ;;  %v6347_v35 = vld [vmem:[%s10916_s0 + $0x18] sm:$0x7] }
 0xef8   :  { %v6333_v40 = vmul.f32 -1.442695, %v7434_v17  ;;  %v5488_v17 = vrot.slane %v6347_v35, %v10313_v54 }
 0xef9   :  { %v7154_v48 = vpop.f32.mrb[70].mxu1  ;;  %v6332_v59 = vmul.f32 -1.442695, %v7436_v63 }
 0xefa   :  { %v5237_v26 = vpop.f32.mrb[71].mxu1  ;;  %8012 = vpow2.f32 %v6333_v40  ;;  %v5275_v45 = vadd.f32 %v7154_v48, %v10343_v5  ;;  %v5490_v48 = vmul.f32 %v5488_v17, %v10308_v14  ;;  %v5489_v63 = vmul.f32 %v5488_v17, %v10321_v47 }
 0xefb   :  { %8014 = vpow2.f32 %v6332_v59  ;;  %v5274_v16 = vadd.f32 %v5237_v26, %v10345_v0  ;;  %v5491_v36 = vmul.f32 %v5488_v17, %v10318_v23 }
 0xefc   :  { %v7437_v26 = vadd.f32 %v5490_v48, %v10327_v12  ;;  %v7439_v59 = vadd.f32 %v5489_v63, %v10310_v51 }
 0xf00   :  { %v8009_v19 = vpop.eup %8008 }
 0xf01   :  { %v8011_v31 = vpop.eup %8010  ;;  %v5255_v37 = vadd.f32 1.0, %v8009_v19 }
 0xf02   :  { %v5254_v52 = vadd.f32 1.0, %v8011_v31 }
 0xf03   :  { %8016 = vrcp.f32 %v5255_v37 }
 0xf04   :  { %8018 = vrcp.f32 %v5254_v52  ;;  %v8013_v7 = vpop.eup %8012  ;;  %v5492_v52 = vmul.f32 %v5488_v17, %v10325_v58 }
 0xf05   :  { %v8015_v30 = vpop.eup %8014  ;;  %v5269_v9 = vadd.f32 1.0, %v8013_v7 }
 0xf06   :  { %v5268_v24 = vadd.f32 1.0, %v8015_v30  ;;  %v7441_v30 = vadd.f32 %v5492_v52, %v10332_v43 }
 0xf0d   :  { %v8017_v1 = vpop.eup %8016 }
 0xf0e   :  { %v8019_v27 = vpop.eup %8018  ;;  %v5277_v20 = vmul.f32 %v8017_v1, %v5275_v45  ;;  %v7443_v45 = vadd.f32 %v5491_v36, %v10336_v42 }
 0xf0f   :  { %v5276_v11 = vmul.f32 %v8019_v27, %v5274_v16 }
 0xf10   :  { %v5279_v41 = vadd.f32 %v5277_v20, %v5150_v34 }
 0xf11   :  { %v5278_v56 = vadd.f32 %v5276_v11, %v5149_v50  ;;  %v10797_v33 = vpop.f32.mrb[76].mxu1 }
 0xf12   :  { %8020 = vtanh.f32 %v5279_v41  ;;  %v10799_v32 = vpop.f32.mrb[77].mxu1 }
 0xf13   :  { %8022 = vtanh.f32 %v5278_v56  ;;  %v5494_v56 = vmul.f32 %v5488_v17, %v10341_v60 }
 0xf14   :  { %8024 = vrcp.f32 %v5269_v9 }
 0xf15   :  { %8026 = vrcp.f32 %v5268_v24 }
 0xf1c   :  { %v8021_v28 = vpop.eup %8020 }
 0xf1d   :  { %v8023_v53 = vpop.eup %8022  ;;  %v5283_v6 = vsub.f32 %v10728_v46, %v8021_v28  ;;  %v10819_v46 = vld [vmem:[%s10924_s8 + $0x10] sm:$0xff] }
 0xf1e   :  { %v8025_v8 = vpop.eup %8024  ;;  %v5282_v22 = vsub.f32 %v10730_v15, %v8023_v53  ;;  %v10826_v15 = vld [vmem:[%s10924_s8 + $0x18] sm:$0xff] }
 0xf1f   :  { %v8027_v62 = vpop.eup %8026  ;;  %v5285_v2 = vmul.f32 %v8025_v8, %v5283_v6 }
 0xf20   :  { %v5284_v44 = vmul.f32 %v8027_v62, %v5282_v22 }
 0xf21   :  { %v10803_v49 = vadd.f32 %v8021_v28, %v5285_v2  ;;  %v5493_v28 = vmul.f32 %v5488_v17, %v10339_v3 }
 0xf22   :  { %v10805_v25 = vadd.f32 %v8023_v53, %v5284_v44  ;;  %v5500_v53 = vadd.f32 %v10722_v21, %v5494_v56 }
 0xf23   :  { %v5499_v8 = vadd.f32 %v5493_v28, %v10724_v18 }
 0xf24   :  { %v7373_v55 = vpack.c.bf16 %v10803_v49, %v10805_v25  ;;  %v5506_v35 = vadd.f32 %v5500_v53, %v10349_v39 }
 0xf25   :  { %v5505_v63 = vadd.f32 %v5499_v8, %v10351_v13 }
 0xf26   :  { %7374 = vmatprep.subr.bf16.mxu0 %v7373_v55 }
 0xf27   :  { %7376 = vmatpush3.bf16.msra.mxu0 %v7373_v55 }
 0xf2a   :  { %7188 = vmatmul.mubr.msk.f32.vlgmr.msra.gmra.mrb[72].mxu0 %vm3352_vm2, %v10812_v57 }
 0xf2b   :  { %7190 = vmatprep.mubr.msk.f32.mxu0 %vm3352_vm2, %v10819_v46 }
 0xf2e   :  { %7191 = vmatmul.mubr.msk.f32.gmra.mrb[74].mxu0 %vm3352_vm2, %v10826_v15 }
 0xf2f   :  { %7193 = vmatprep.mubr.msk.f32.mxu0 %vm3352_vm2, %v10833_v10 }
 0xf32   :  { %7194 = vmatmul.mubr.msk.f32.gmra.mrb[78].mxu0 %vm3352_vm2, %v10840_v61 }
 0xffd   :  { %v7189_v40 = vpop.f32.mrb[72].mxu0 }
 0xffe   :  { %v7438_v19 = vadd.f32 %v7437_v26, %v7189_v40  ;;  %v5573_v31 = vpop.f32.mrb[73].mxu0 }
 0xfff   :  { %v7440_v37 = vadd.f32 %v7439_v59, %v5573_v31 }
0x1000   :  { %v6355_v29 = vmul.f32 -1.442695, %v7438_v19 }
0x1001   :  { %v6354_v4 = vmul.f32 -1.442695, %v7440_v37  ;;  %v7192_v7 = vpop.f32.mrb[74].mxu0 }
0x1002   :  { %8028 = vpow2.f32 %v6355_v29  ;;  %v5583_v38 = vpop.f32.mrb[75].mxu0  ;;  %v7442_v1 = vadd.f32 %v7441_v30, %v7192_v7 }
0x1003   :  { %8030 = vpow2.f32 %v6354_v4  ;;  %v7444_v27 = vadd.f32 %v7443_v45, %v5583_v38 }
0x1004   :  { %v6357_v20 = vmul.f32 -1.442695, %v7442_v1 }
0x1005   :  { %v7195_v16 = vpop.f32.mrb[78].mxu0  ;;  %v6356_v50 = vmul.f32 -1.442695, %v7444_v27 }
0x1006   :  { %v5593_v34 = vpop.f32.mrb[79].mxu0  ;;  %8032 = vpow2.f32 %v6357_v20  ;;  %v5631_v62 = vadd.f32 %v7195_v16, %v10343_v5 }
0x1007   :  { %8034 = vpow2.f32 %v6356_v50  ;;  %v5630_v44 = vadd.f32 %v5593_v34, %v10345_v0 }
0x100c   :  { %v8029_v11 = vpop.eup %8028 }
0x100d   :  { %v8031_v9 = vpop.eup %8030  ;;  %v5611_v41 = vadd.f32 1.0, %v8029_v11 }
0x100e   :  { %v5610_v24 = vadd.f32 1.0, %v8031_v9 }
0x100f   :  { %8036 = vrcp.f32 %v5611_v41 }
0x1010   :  { %8038 = vrcp.f32 %v5610_v24  ;;  %v8033_v6 = vpop.eup %8032 }
0x1011   :  { %v8035_v22 = vpop.eup %8034  ;;  %v5625_v40 = vadd.f32 1.0, %v8033_v6 }
0x1012   :  { %v5624_v59 = vadd.f32 1.0, %v8035_v22 }
0x1019   :  { %v8037_v2 = vpop.eup %8036 }
0x101a   :  { %v8039_v55 = vpop.eup %8038  ;;  %v5633_v48 = vmul.f32 %v8037_v2, %v5631_v62 }
0x101b   :  { %v5632_v26 = vmul.f32 %v8039_v55, %v5630_v44 }
0x101c   :  { %v5635_v17 = vadd.f32 %v5633_v48, %v5506_v35 }
0x101d   :  { %v5634_v21 = vadd.f32 %v5632_v26, %v5505_v63 }
0x101e   :  { %8040 = vtanh.f32 %v5635_v17 }
0x101f   :  { %8042 = vtanh.f32 %v5634_v21 }
0x1020   :  { %8044 = vrcp.f32 %v5625_v40 }
0x1021   :  { %8046 = vrcp.f32 %v5624_v59 }
0x1028   :  { %v8041_v18 = vpop.eup %8040 }
0x1029   :  { %v8043_v19 = vpop.eup %8042  ;;  %v5639_v31 = vsub.f32 %v10803_v49, %v8041_v18  ;;  %v6371_v49 = vld [vmem:[%s10916_s0 + $0x1c] sm:$0x7]  ;;  %s8140_s0 = smov [#allocation3]  }
0x102a   :  { %v8045_v37 = vpop.eup %8044  ;;  %v5638_v52 = vsub.f32 %v10805_v25, %v8043_v19  ;;  %v5844_v25 = vrot.slane %v6371_v49, %v10313_v54  ;;  %s6007_s14 = sshll.u32 %s8140_s0, 4  ;;  %s6008_s14 = int_to_ptr.vmem [resolvable:$true] %s6007_s14 }
0x102b   :  { %v8047_v29 = vpop.eup %8046  ;;  %v5641_v36 = vmul.f32 %v8045_v37, %v5639_v31  ;;  %s8110_s15 = scalar_lea.vmem %s6008_s14, 256  ;;  %p8115_p1 = scmp.lt.s32.totalorder %s6008_s14, %s6008_s14 }
0x102c   :  { %v5640_v4 = vmul.f32 %v8047_v29, %v5638_v52  ;;  %v5845_v45 = vmul.f32 %v5844_v25, %v10321_v47  ;;  %v5847_v20 = vmul.f32 %v5844_v25, %v10318_v23  ;;  %v5850_v6 = vmul.f32 %v5844_v25, %v10341_v60  ;;  %p8111_p0 = scmp.ne.s32.totalorder %s6008_s14, %s8110_s15  ;;  %p8116_p2 = scmp.lt.s32.totalorder %s8110_s15, %s8110_s15 }
0x102d   :  { %v10866_v7 = vadd.f32 %v8041_v18, %v5641_v36 }
0x102e   :  { %v10868_v38 = vadd.f32 %v8043_v19, %v5640_v4  ;;  %v7451_v47 = vadd.f32 %v5847_v20, %v10336_v42  ;;  %v5856_v42 = vadd.f32 %v10797_v33, %v5850_v6  ;;  %p8117_p3 = por %p8116_p2, %p8115_p1 }
0x1030   :  { %v7385_v30 = vpack.c.bf16 %v10866_v7, %v10868_v38  ;;  %v5862_v48 = vadd.f32 %v5856_v42, %v10349_v39  ;;  %p8118_p4 = pnand %p8117_p3, %p8111_p0 }
0x1032   :  { %7386 = vmatprep.subr.bf16.mxu1 %v7385_v30 }
0x1033   :  { %7388 = vmatpush3.bf16.msra.mxu1 %v7385_v30 }
0x1036   :  { %7229 = vmatmul.mubr.msk.f32.vlgmr.msra.gmra.mrb[72].mxu1 %vm3352_vm2, %v10812_v57  ;;  %v5846_v57 = vmul.f32 %v5844_v25, %v10308_v14 }
0x1037   :  { %7231 = vmatprep.mubr.msk.f32.mxu1 %vm3352_vm2, %v10819_v46 }
0x1038   :  { %v7445_v46 = vadd.f32 %v5846_v57, %v10327_v12 }
0x103a   :  { %7232 = vmatmul.mubr.msk.f32.gmra.mrb[74].mxu1 %vm3352_vm2, %v10826_v15  ;;  %v7447_v15 = vadd.f32 %v5845_v45, %v10310_v51 }
0x103b   :  { %7234 = vmatprep.mubr.msk.f32.mxu1 %vm3352_vm2, %v10833_v10 }
0x103e   :  { %7235 = vmatmul.mubr.msk.f32.gmra.mrb[78].mxu1 %vm3352_vm2, %v10840_v61  ;;  %v5848_v61 = vmul.f32 %v5844_v25, %v10325_v58 }
0x1040   :  { %v7449_v14 = vadd.f32 %v5848_v61, %v10332_v43  ;;  %v5849_v43 = vmul.f32 %v5844_v25, %v10339_v3 }
0x1042   :  { %v5855_v22 = vadd.f32 %v5849_v43, %v10799_v32 }
0x1044   :  { %v5861_v26 = vadd.f32 %v5855_v22, %v10351_v13 }
0x1109   :  { %v7230_v1 = vpop.f32.mrb[72].mxu1 }
0x110a   :  { %v7446_v16 = vadd.f32 %v7445_v46, %v7230_v1  ;;  %v5929_v10 = vpop.f32.mrb[73].mxu1 }
0x110b   :  { %v7448_v27 = vadd.f32 %v7447_v15, %v5929_v10 }
0x110c   :  { %v6379_v34 = vmul.f32 -1.442695, %v7446_v16 }
0x110d   :  { %v6378_v50 = vmul.f32 -1.442695, %v7448_v27  ;;  %v7233_v11 = vpop.f32.mrb[74].mxu1 }
0x110e   :  { %8048 = vpow2.f32 %v6379_v34  ;;  %v5939_v54 = vpop.f32.mrb[75].mxu1  ;;  %v7450_v12 = vadd.f32 %v7449_v14, %v7233_v11 }
0x110f   :  { %8050 = vpow2.f32 %v6378_v50  ;;  %v7452_v51 = vadd.f32 %v7451_v47, %v5939_v54 }
0x1110   :  { %v6381_v24 = vmul.f32 -1.442695, %v7450_v12 }
0x1111   :  { %v7236_v9 = vpop.f32.mrb[78].mxu1  ;;  %v6380_v56 = vmul.f32 -1.442695, %v7452_v51 }
0x1112   :  { %v5949_v41 = vpop.f32.mrb[79].mxu1  ;;  %8052 = vpow2.f32 %v6381_v24  ;;  %v5987_v2 = vadd.f32 %v7236_v9, %v10343_v5 }
0x1113   :  { %8054 = vpow2.f32 %v6380_v56  ;;  %v5986_v55 = vadd.f32 %v5949_v41, %v10345_v0 }
0x1118   :  { %v8049_v28 = vpop.eup %8048 }
0x1119   :  { %v8051_v58 = vpop.eup %8050  ;;  %v5967_v53 = vadd.f32 1.0, %v8049_v28 }
0x111a   :  { %v5966_v23 = vadd.f32 1.0, %v8051_v58 }
0x111b   :  { %8056 = vrcp.f32 %v5967_v53 }
0x111c   :  { %8058 = vrcp.f32 %v5966_v23  ;;  %v8053_v8 = vpop.eup %8052 }
0x111d   :  { %v8055_v62 = vpop.eup %8054  ;;  %v5981_v40 = vadd.f32 1.0, %v8053_v8 }
0x111e   :  { %v5980_v17 = vadd.f32 1.0, %v8055_v62 }
0x1125   :  { %v8057_v44 = vpop.eup %8056 }
0x1126   :  { %v8059_v35 = vpop.eup %8058  ;;  %v5989_v63 = vmul.f32 %v8057_v44, %v5987_v2 }
0x1127   :  { %v5988_v60 = vmul.f32 %v8059_v35, %v5986_v55 }
0x1128   :  { %v5991_v3 = vadd.f32 %v5989_v63, %v5862_v48 }
0x1129   :  { %v5990_v33 = vadd.f32 %v5988_v60, %v5861_v26 }
0x112a   :  { %8060 = vtanh.f32 %v5991_v3 }
0x112b   :  { %8062 = vtanh.f32 %v5990_v33 }
0x112c   :  { %8064 = vrcp.f32 %v5981_v40 }
0x112d   :  { %8066 = vrcp.f32 %v5980_v17 }
0x1134   :  { %v8061_v32 = vpop.eup %8060 }
0x1135   :  { %v8063_v5 = vpop.eup %8062  ;;  %v5995_v59 = vsub.f32 %v10866_v7, %v8061_v32 }
0x1136   :  { %v8065_v0 = vpop.eup %8064  ;;  %v5994_v21 = vsub.f32 %v10868_v38, %v8063_v5 }
0x1137   :  { %v8067_v39 = vpop.eup %8066  ;;  %v5997_v18 = vmul.f32 %v8065_v0, %v5995_v59 }
0x1138   :  { %v5996_v13 = vmul.f32 %v8067_v39, %v5994_v21 }
0x1139   :  { %v5999_v19 = vadd.f32 %v8061_v32, %v5997_v18 }
0x113a   :  { %v5998_v31 = vadd.f32 %v8063_v5, %v5996_v13 }
0x113b   :  { %6001 = vst [vmem:[#allocation3 + $0x8] sm:$0xff] %v5999_v19 }
0x113c   :  { %6000 = vst [vmem:[#allocation3] sm:$0xff] %v5998_v31 }
0x113d   :  { %8121 = shalt.err (!%p8118_p4)
}
0x113e   :  { %s8122_s9 = scalar_lea.hbm %s10926_s10, 256 }
0x113f   :  { %p8123_p5 = scmp.ne.s32.totalorder %s10926_s10, %s8122_s9  ;;  %p8126_p6 = scmp.lt.u32.totalorder %s8122_s9, %s10926_s10 }
0x1141   :  { %p8128_p7 = pnand %p8126_p6, %p8123_p5 }
0x1143   :  { %8131 = shalt.err (!%p8128_p7)
}
0x1144   :  { %s8141_s20 = smov 128   ;;  %s8142_s2 = smov 8  }
0x1145   :  { %6013 = dma.vmem_to_hbm [thread:$0]  %s6008_s14, 256, %s10926_s10, [#allocation4], %s8141_s20, %s8141_s20, %s8142_s2  }
0x1146   :  { %8132 = dma.done.wait [#allocation4], 256  }
0x1147   :  { %8133 = vsyncadd [#allocation4], 4294967040 }
0x1148   :  { %6017 = vsyncpa [#allocation4], 1 }

</bundles_post_ra>
